<compile_context>
chip_gen: v5e
topology: v5e:2x2
jax: 0.10.0
libtpu: 0.0.40
codegen_flags: <defaults>
</compile_context>

<pallas_src>
import numpy as np
import jax
import jax.numpy as jnp
from jax.experimental import pallas as pl
from jax.experimental.pallas import tpu as pltpu

COMPUTE_DTYPE = jnp.bfloat16  # storage / matmul-input dtype; accumulation is f32


# ------------------------------ tiling helper --------------------------------

def _lane_tile(m, small=2048, target=8192):
    """Lane tile (multiple of 128 or full dim) and block count.

    Small stages -> 1 block (no pointless split on single-TC chips); larger
    stages -> even block count so v7x megacore shards evenly."""
    if m <= small:
        return m, 1
    nblk = 2 * pl.cdiv(m, 2 * target)              # even block count
    tile = pl.cdiv(pl.cdiv(m, nblk), 128) * 128
    return tile, pl.cdiv(m, tile)


# ------------------------------ Pallas kernels --------------------------------

def _conv_pool_kernel(w_ref, p_ref, b_ref, o_ref):
    # o = relu(max_t(W @ patches[t]) + b)   (conv + folded BN + ReLU + 2x2 maxpool)
    # w: (Cout, 9*Cin) bf16, p: (4, 9*Cin, T) bf16, b: (Cout, 1) f32
    w = w_ref[...]
    acc = jnp.dot(w, p_ref[0], preferred_element_type=jnp.float32)
    for t in range(1, 4):
        acc = jnp.maximum(acc, jnp.dot(w, p_ref[t],
                                       preferred_element_type=jnp.float32))
    o_ref[...] = jnp.maximum(acc + b_ref[...], 0.0).astype(o_ref.dtype)


def _tail_kernel(p_ref, w3_ref, b3_ref, w1_ref, b1_ref, w2_ref, b2_ref, o_ref):
    # conv3 + BN + ReLU + maxpool + flatten + fc1 + ReLU + fc2 + ReLU + log_softmax
    # p: (9, 4, N, 9*Cin) bf16   [pooled spatial pos s, pool tap t, batch, patch]
    # w3: (9*Cin, 64) bf16, b3: (1, 64) f32
    # w1: (9, 64, 64) f32  (fc1 weight regrouped per spatial position s)
    w3 = w3_ref[...]
    b3 = b3_ref[...]
    nb = o_ref.shape[0]
    d1 = w1_ref.shape[2]
    h1 = jnp.zeros((nb, d1), jnp.float32)
    for s in range(p_ref.shape[0]):                 # 9 pooled spatial positions
        a = jnp.dot(p_ref[s, 0], w3, preferred_element_type=jnp.float32)
        for t in range(1, 4):                       # fused 2x2 max-pool
            a = jnp.maximum(a, jnp.dot(p_ref[s, t], w3,
                                       preferred_element_type=jnp.float32))
        y3s = jnp.maximum(a + b3, 0.0)              # (N, 64) conv3+BN+ReLU+pool at s
        # flatten + fc1: accumulate this spatial position's contribution
        h1 = h1 + jnp.dot(y3s, w1_ref[s], preferred_element_type=jnp.float32)
    h1 = jnp.maximum(h1 + b1_ref[...], 0.0)                            # relu(fc1)
    h2 = jnp.dot(h1, w2_ref[...], preferred_element_type=jnp.float32)
    h2 = jnp.maximum(h2 + b2_ref[...], 0.0)                            # relu(fc2)
    m = jnp.max(h2, axis=-1, keepdims=True)
    lse = jnp.log(jnp.sum(jnp.exp(h2 - m), axis=-1, keepdims=True)) + m
    o_ref[...] = h2 - lse                                              # log_softmax


# ----------------------------- XLA glue helpers --------------------------------

def _fold_bn(p, eps=1e-5):
    """Fold eval-mode BatchNorm into conv weight/bias.

    Returns w_t (Cout, 9*Cin) bf16 with column order (kh, kw, c), b (Cout,1) f32."""
    scale = p["gamma"] / jnp.sqrt(p["var"] + eps)
    w_f = p["w"] * scale[:, None, None, None]                 # (Cout, Cin, 3, 3)
    b_f = (p["b"] - p["mean"]) * scale + p["beta"]
    w_t = jnp.transpose(w_f, (0, 2, 3, 1)).reshape(p["w"].shape[0], -1)
    return w_t.astype(COMPUTE_DTYPE), b_f.reshape(-1, 1).astype(jnp.float32)


def _pooled_patches(x, Hp, Wp):
    """Pool-fused im2col of a CNHW tensor for conv(3x3, s=2) + maxpool(2).

    Returns (4, 9*C, N*Hp*Wp) bf16: leading dim = 2x2 pool tap (i, j),
    rows ordered (kh, kw, c), columns ordered (n, hp, wp).  Only pool-covered
    conv outputs are gathered (matches floor-mode MaxPool2d(2))."""
    C, N, H, W = x.shape
    pool_taps = []
    for i in range(2):
        for j in range(2):
            ktaps = []
            for kh in range(3):
                for kw in range(3):
                    h0, w0 = 2 * i + kh, 2 * j + kw
                    ktaps.append(x[:, :, h0:h0 + 4 * Hp - 3:4, w0:w0 + 4 * Wp - 3:4])
            t = jnp.stack(ktaps, axis=0)                       # (9, C, N, Hp, Wp)
            pool_taps.append(t.reshape(9 * C, N * Hp * Wp))
    return jnp.stack(pool_taps, axis=0).astype(COMPUTE_DTYPE)


def _pooled_patches_tail(x, Hp, Wp):
    """(C,N,H,W) -> (Hp*Wp, 4, N, 9*C) pool-fused im2col for the fused tail.

    dims: [pooled spatial pos s=(hp,wp), pool tap, batch, (kh,kw,c)]."""
    C, N, H, W = x.shape
    pool_taps = []
    for i in range(2):
        for j in range(2):
            ktaps = []
            for kh in range(3):
                for kw in range(3):
                    h0, w0 = 2 * i + kh, 2 * j + kw
                    ktaps.append(x[:, :, h0:h0 + 4 * Hp - 3:4, w0:w0 + 4 * Wp - 3:4])
            t = jnp.stack(ktaps, axis=0)                       # (9, C, N, Hp, Wp)
            t = jnp.transpose(t, (3, 4, 2, 0, 1))              # (Hp, Wp, N, 9, C)
            pool_taps.append(t.reshape(Hp * Wp, N, 9 * C))
    return jnp.stack(pool_taps, axis=1).astype(COMPUTE_DTYPE)  # (Hp*Wp, 4, N, 9C)


# -------------------------------- stage wrappers --------------------------------

def conv_bn_relu_pool_stage(x_cnhw, p):
    """Conv(3x3, s2) + BN(eval) + ReLU + MaxPool(2) as one Pallas call (CNHW)."""
    w_t, b_f = _fold_bn(p)
    cout, K = w_t.shape
    C, N, H, W = x_cnhw.shape
    Ho, Wo = (H - 3) // 2 + 1, (W - 3) // 2 + 1
    Hp, Wp = Ho // 2, Wo // 2
    M = N * Hp * Wp
    patches = _pooled_patches(x_cnhw, Hp, Wp)                  # (4, K, M) bf16
    tile, nblk = _lane_tile(M)
    y = pl.pallas_call(
        _conv_pool_kernel,
        out_shape=jax.ShapeDtypeStruct((cout, M), COMPUTE_DTYPE),
        grid=(nblk,),
        in_specs=[pl.BlockSpec((cout, K), lambda i: (0, 0)),
                  pl.BlockSpec((4, K, tile), lambda i: (0, 0, i)),
                  pl.BlockSpec((cout, 1), lambda i: (0, 0))],
        out_specs=pl.BlockSpec((cout, tile), lambda i: (0, i)),
        compiler_params=pltpu.CompilerParams(
            dimension_semantics=("parallel",)),
    )(w_t, patches, b_f)
    return y.reshape(cout, N, Hp, Wp)                          # CNHW for next stage


def tail_conv_fc(x_cnhw, p3, fc1, fc2):
    """conv3+BN+ReLU+pool + flatten + fc1+ReLU + fc2+ReLU + log_softmax, one call."""
    w3_t, b3 = _fold_bn(p3)                                    # (64, 9*Cin), (64, 1)
    cout3 = w3_t.shape[0]
    C, N, H, W = x_cnhw.shape
    Ho, Wo = (H - 3) // 2 + 1, (W - 3) // 2 + 1
    Hp, Wp = Ho // 2, Wo // 2
    S, K3 = Hp * Wp, 9 * C
    patches = _pooled_patches_tail(x_cnhw, Hp, Wp)             # (S, 4, N, K3) bf16
    w3T = jnp.transpose(w3_t)                                  # (K3, 64) bf16
    b3r = b3.reshape(1, cout3)
    # fc1 weight (S*cout3, d1), PyTorch NCHW flatten order (c, hp, wp):
    # row index = c*S + s  ->  regroup to (S, cout3, d1) indexed [s, c, :]
    d1 = fc1["w"].shape[1]
    w1s = jnp.transpose(fc1["w"].reshape(cout3, S, d1), (1, 0, 2))
    b1 = fc1["b"].reshape(1, d1)
    w2 = fc2["w"]
    d2 = w2.shape[1]
    b2 = fc2["b"].reshape(1, d2)

    def full(shape):
        return pl.BlockSpec(shape, lambda *_: (0,) * len(shape))

    return pl.pallas_call(
        _tail_kernel,
        out_shape=jax.ShapeDtypeStruct((N, d2), jnp.float32),
        grid=(1,),
        in_specs=[full((S, 4, N, K3)), full((K3, cout3)), full((1, cout3)),
                  full((S, cout3, d1)), full((1, d1)),
                  full((d1, d2)), full((1, d2))],
        out_specs=full((N, d2)),
    )(patches, w3T, b3r, w1s, b1, w2, b2)


# -------------------------------- full forward ---------------------------------

def cnn_forward(x_nchw, params):
    # bf16 cast before layout change; CNHW keeps the big fused N*H*W axis on lanes.
    x = jnp.transpose(x_nchw.astype(COMPUTE_DTYPE), (1, 0, 2, 3))     # NCHW -> CNHW
    x = conv_bn_relu_pool_stage(x, params["conv1"])                   # (16, B, 55, 55)
    x = conv_bn_relu_pool_stage(x, params["conv2"])                   # (32, B, 13, 13)
    return tail_conv_fc(x, params["conv3"],
                        params["fc1"], params["fc2"])                 # (B, 32)


# -------------------------------- parameters -----------------------------------

def init_params(key):
    def uinit(k, shape, fan_in):
        bound = 1.0 / np.sqrt(fan_in)
        return jax.random.uniform(k, shape, jnp.float32, -bound, bound)

    keys = jax.random.split(key, 10)
    params = {}
    ki = 0
    for name, cin, cout in [("conv1", 3, 16), ("conv2", 16, 32), ("conv3", 32, 64)]:
        fan = cin * 9
        params[name] = dict(
            w=uinit(keys[ki], (cout, cin, 3, 3), fan),
            b=uinit(keys[ki + 1], (cout,), fan),
            gamma=jnp.ones((cout,), jnp.float32),
            beta=jnp.zeros((cout,), jnp.float32),
            mean=jnp.zeros((cout,), jnp.float32),
            var=jnp.ones((cout,), jnp.float32),
        )
        ki += 2
    for name, din, dout in [("fc1", 576, 64), ("fc2", 64, 32)]:
        params[name] = dict(
            w=uinit(keys[ki], (din, dout), din),    # stored as (in, out)
            b=uinit(keys[ki + 1], (dout,), din),
        )
        ki += 2
    return params


# ----------------------------------- main ---------------------------------------

if __name__ == "__main__":
    key = jax.random.PRNGKey(0)
    kx, kp = jax.random.split(key)
    # spatial 224 is forced by fc1 expecting 3*3*64 features after 3 conv/pool stages
    x = jax.random.normal(kx, (2, 3, 224, 224), jnp.float32)
    params = init_params(kp)

    out = jax.jit(cnn_forward)(x, params)
    out = jax.block_until_ready(out)

    assert out.shape == (2, 32), out.shape
    # log_softmax rows must exponentiate to probabilities summing to 1
    assert np.allclose(np.exp(np.asarray(out)).sum(axis=1), 1.0, atol=1e-4)
    print("KERNEL_OK")
</pallas_src>

<mosaic_0001>
module attributes {stable_mosaic.version = 11 : i64} {
  func.func @_conv_pool_kernel(%arg0: i32, %arg1: memref<16x27xbf16, #tpu.memory_space<vmem>>, %arg2: memref<4x27x3072xbf16, #tpu.memory_space<vmem>>, %arg3: memref<16x1xf32, #tpu.memory_space<vmem>>, %arg4: memref<16x3072xbf16, #tpu.memory_space<vmem>>) attributes {dimension_semantics = [#tpu.dimension_semantics<parallel>], iteration_bounds = array<i64: 2>, scalar_prefetch = 0 : i64, scratch_operands = 0 : i64, tpu.core_type = #tpu.core_type<tc>, window_params = [{pipeline_mode = #tpu.pipeline_mode<synchronous>, transform_indices = @transform_0, window_bounds = array<i64: 16, 27>}, {transform_indices = @transform_1, window_bounds = array<i64: 4, 27, 3072>}, {pipeline_mode = #tpu.pipeline_mode<synchronous>, transform_indices = @transform_2, window_bounds = array<i64: 16, 1>}, {transform_indices = @transform_3, window_bounds = array<i64: 16, 3072>}]} {
    %c0 = arith.constant 0 : index
    %c0_0 = arith.constant 0 : index
    %0 = vector.load %arg1[%c0, %c0_0] : memref<16x27xbf16, #tpu.memory_space<vmem>>, vector<16x27xbf16>
    %c0_1 = arith.constant 0 : index
    %c0_2 = arith.constant 0 : index
    %c0_3 = arith.constant 0 : index
    %1 = vector.load %arg2[%c0_1, %c0_2, %c0_3] : memref<4x27x3072xbf16, #tpu.memory_space<vmem>>, vector<1x27x3072xbf16>
    %2 = vector.shape_cast %1 : vector<1x27x3072xbf16> to vector<27x3072xbf16>
    %cst = arith.constant dense<0.000000e+00> : vector<16x3072xf32>
    %3 = tpu.matmul %0, %2, %cst {dimension_numbers = #tpu.dot_dimension_numbers<[1], [0], [0], [1], [0, 0, 1, 1], [], []>} : vector<16x27xbf16>, vector<27x3072xbf16>, vector<16x3072xf32> -> vector<16x3072xf32>
    %c1 = arith.constant 1 : index
    %c0_4 = arith.constant 0 : index
    %c0_5 = arith.constant 0 : index
    %4 = vector.load %arg2[%c1, %c0_4, %c0_5] : memref<4x27x3072xbf16, #tpu.memory_space<vmem>>, vector<1x27x3072xbf16>
    %5 = vector.shape_cast %4 : vector<1x27x3072xbf16> to vector<27x3072xbf16>
    %cst_6 = arith.constant dense<0.000000e+00> : vector<16x3072xf32>
    %6 = tpu.matmul %0, %5, %cst_6 {dimension_numbers = #tpu.dot_dimension_numbers<[1], [0], [0], [1], [0, 0, 1, 1], [], []>} : vector<16x27xbf16>, vector<27x3072xbf16>, vector<16x3072xf32> -> vector<16x3072xf32>
    %7 = arith.maximumf %3, %6 : vector<16x3072xf32>
    %c2 = arith.constant 2 : index
    %c0_7 = arith.constant 0 : index
    %c0_8 = arith.constant 0 : index
    %8 = vector.load %arg2[%c2, %c0_7, %c0_8] : memref<4x27x3072xbf16, #tpu.memory_space<vmem>>, vector<1x27x3072xbf16>
    %9 = vector.shape_cast %8 : vector<1x27x3072xbf16> to vector<27x3072xbf16>
    %cst_9 = arith.constant dense<0.000000e+00> : vector<16x3072xf32>
    %10 = tpu.matmul %0, %9, %cst_9 {dimension_numbers = #tpu.dot_dimension_numbers<[1], [0], [0], [1], [0, 0, 1, 1], [], []>} : vector<16x27xbf16>, vector<27x3072xbf16>, vector<16x3072xf32> -> vector<16x3072xf32>
    %11 = arith.maximumf %7, %10 : vector<16x3072xf32>
    %c3 = arith.constant 3 : index
    %c0_10 = arith.constant 0 : index
    %c0_11 = arith.constant 0 : index
    %12 = vector.load %arg2[%c3, %c0_10, %c0_11] : memref<4x27x3072xbf16, #tpu.memory_space<vmem>>, vector<1x27x3072xbf16>
    %13 = vector.shape_cast %12 : vector<1x27x3072xbf16> to vector<27x3072xbf16>
    %cst_12 = arith.constant dense<0.000000e+00> : vector<16x3072xf32>
    %14 = tpu.matmul %0, %13, %cst_12 {dimension_numbers = #tpu.dot_dimension_numbers<[1], [0], [0], [1], [0, 0, 1, 1], [], []>} : vector<16x27xbf16>, vector<27x3072xbf16>, vector<16x3072xf32> -> vector<16x3072xf32>
    %15 = arith.maximumf %11, %14 : vector<16x3072xf32>
    %c0_13 = arith.constant 0 : index
    %c0_14 = arith.constant 0 : index
    %16 = vector.load %arg3[%c0_13, %c0_14] : memref<16x1xf32, #tpu.memory_space<vmem>>, vector<16x1xf32>
    %17 = vector.broadcast %16 : vector<16x1xf32> to vector<16x3072xf32>
    %18 = arith.addf %15, %17 : vector<16x3072xf32>
    %cst_15 = arith.constant 0.000000e+00 : f32
    %19 = vector.broadcast %cst_15 : f32 to vector<16x3072xf32>
    %20 = arith.maximumf %18, %19 : vector<16x3072xf32>
    %21 = arith.truncf %20 : vector<16x3072xf32> to vector<16x3072xbf16>
    %c0_16 = arith.constant 0 : index
    %c0_17 = arith.constant 0 : index
    %22 = vector.load %arg4[%c0_16, %c0_17] : memref<16x3072xbf16, #tpu.memory_space<vmem>>, vector<16x3072xbf16>
    tpu.vector_store %arg4[%c0_16, %c0_17], %21 {strides = array<i32>} : memref<16x3072xbf16, #tpu.memory_space<vmem>>, vector<16x3072xbf16>,
    return
  }
  func.func @transform_0(%arg0: i32) -> (i32, i32) {
    %c0_i32 = arith.constant 0 : i32
    %c0_i32_0 = arith.constant 0 : i32
    %c0_i32_1 = arith.constant 0 : i32
    return %c0_i32, %c0_i32_0 : i32, i32
  }
  func.func @transform_1(%arg0: i32) -> (i32, i32, i32) {
    %c0_i32 = arith.constant 0 : i32
    %c0_i32_0 = arith.constant 0 : i32
    %c0_i32_1 = arith.constant 0 : i32
    return %c0_i32, %c0_i32_0, %arg0 : i32, i32, i32
  }
  func.func @transform_2(%arg0: i32) -> (i32, i32) {
    %c0_i32 = arith.constant 0 : i32
    %c0_i32_0 = arith.constant 0 : i32
    %c0_i32_1 = arith.constant 0 : i32
    return %c0_i32, %c0_i32_0 : i32, i32
  }
  func.func @transform_3(%arg0: i32) -> (i32, i32) {
    %c0_i32 = arith.constant 0 : i32
    %c0_i32_0 = arith.constant 0 : i32
    return %c0_i32, %arg0 : i32, i32
  }
}

module attributes {stable_mosaic.version = 11 : i64} {
  func.func @_conv_pool_kernel(%arg0: i32, %arg1: memref<32x144xbf16, #tpu.memory_space<vmem>>, %arg2: memref<4x144x338xbf16, #tpu.memory_space<vmem>>, %arg3: memref<32x1xf32, #tpu.memory_space<vmem>>, %arg4: memref<32x338xbf16, #tpu.memory_space<vmem>>) attributes {dimension_semantics = [#tpu.dimension_semantics<parallel>], iteration_bounds = array<i64: 1>, scalar_prefetch = 0 : i64, scratch_operands = 0 : i64, tpu.core_type = #tpu.core_type<tc>, window_params = [{pipeline_mode = #tpu.pipeline_mode<synchronous>, transform_indices = @transform_0, window_bounds = array<i64: 32, 144>}, {transform_indices = @transform_1, window_bounds = array<i64: 4, 144, 338>}, {pipeline_mode = #tpu.pipeline_mode<synchronous>, transform_indices = @transform_2, window_bounds = array<i64: 32, 1>}, {transform_indices = @transform_3, window_bounds = array<i64: 32, 338>}]} {
    %c0 = arith.constant 0 : index
    %c0_0 = arith.constant 0 : index
    %0 = vector.load %arg1[%c0, %c0_0] : memref<32x144xbf16, #tpu.memory_space<vmem>>, vector<32x144xbf16>
    %c0_1 = arith.constant 0 : index
    %c0_2 = arith.constant 0 : index
    %c0_3 = arith.constant 0 : index
    %1 = vector.load %arg2[%c0_1, %c0_2, %c0_3] : memref<4x144x338xbf16, #tpu.memory_space<vmem>>, vector<1x144x338xbf16>
    %2 = vector.shape_cast %1 : vector<1x144x338xbf16> to vector<144x338xbf16>
    %cst = arith.constant dense<0.000000e+00> : vector<32x338xf32>
    %3 = tpu.matmul %0, %2, %cst {dimension_numbers = #tpu.dot_dimension_numbers<[1], [0], [0], [1], [0, 0, 1, 1], [], []>} : vector<32x144xbf16>, vector<144x338xbf16>, vector<32x338xf32> -> vector<32x338xf32>
    %c1 = arith.constant 1 : index
    %c0_4 = arith.constant 0 : index
    %c0_5 = arith.constant 0 : index
    %4 = vector.load %arg2[%c1, %c0_4, %c0_5] : memref<4x144x338xbf16, #tpu.memory_space<vmem>>, vector<1x144x338xbf16>
    %5 = vector.shape_cast %4 : vector<1x144x338xbf16> to vector<144x338xbf16>
    %cst_6 = arith.constant dense<0.000000e+00> : vector<32x338xf32>
    %6 = tpu.matmul %0, %5, %cst_6 {dimension_numbers = #tpu.dot_dimension_numbers<[1], [0], [0], [1], [0, 0, 1, 1], [], []>} : vector<32x144xbf16>, vector<144x338xbf16>, vector<32x338xf32> -> vector<32x338xf32>
    %7 = arith.maximumf %3, %6 : vector<32x338xf32>
    %c2 = arith.constant 2 : index
    %c0_7 = arith.constant 0 : index
    %c0_8 = arith.constant 0 : index
    %8 = vector.load %arg2[%c2, %c0_7, %c0_8] : memref<4x144x338xbf16, #tpu.memory_space<vmem>>, vector<1x144x338xbf16>
    %9 = vector.shape_cast %8 : vector<1x144x338xbf16> to vector<144x338xbf16>
    %cst_9 = arith.constant dense<0.000000e+00> : vector<32x338xf32>
    %10 = tpu.matmul %0, %9, %cst_9 {dimension_numbers = #tpu.dot_dimension_numbers<[1], [0], [0], [1], [0, 0, 1, 1], [], []>} : vector<32x144xbf16>, vector<144x338xbf16>, vector<32x338xf32> -> vector<32x338xf32>
    %11 = arith.maximumf %7, %10 : vector<32x338xf32>
    %c3 = arith.constant 3 : index
    %c0_10 = arith.constant 0 : index
    %c0_11 = arith.constant 0 : index
    %12 = vector.load %arg2[%c3, %c0_10, %c0_11] : memref<4x144x338xbf16, #tpu.memory_space<vmem>>, vector<1x144x338xbf16>
    %13 = vector.shape_cast %12 : vector<1x144x338xbf16> to vector<144x338xbf16>
    %cst_12 = arith.constant dense<0.000000e+00> : vector<32x338xf32>
    %14 = tpu.matmul %0, %13, %cst_12 {dimension_numbers = #tpu.dot_dimension_numbers<[1], [0], [0], [1], [0, 0, 1, 1], [], []>} : vector<32x144xbf16>, vector<144x338xbf16>, vector<32x338xf32> -> vector<32x338xf32>
    %15 = arith.maximumf %11, %14 : vector<32x338xf32>
    %c0_13 = arith.constant 0 : index
    %c0_14 = arith.constant 0 : index
    %16 = vector.load %arg3[%c0_13, %c0_14] : memref<32x1xf32, #tpu.memory_space<vmem>>, vector<32x1xf32>
    %17 = vector.broadcast %16 : vector<32x1xf32> to vector<32x338xf32>
    %18 = arith.addf %15, %17 : vector<32x338xf32>
    %cst_15 = arith.constant 0.000000e+00 : f32
    %19 = vector.broadcast %cst_15 : f32 to vector<32x338xf32>
    %20 = arith.maximumf %18, %19 : vector<32x338xf32>
    %21 = arith.truncf %20 : vector<32x338xf32> to vector<32x338xbf16>
    %c0_16 = arith.constant 0 : index
    %c0_17 = arith.constant 0 : index
    %22 = vector.load %arg4[%c0_16, %c0_17] : memref<32x338xbf16, #tpu.memory_space<vmem>>, vector<32x338xbf16>
    tpu.vector_store %arg4[%c0_16, %c0_17], %21 {strides = array<i32>} : memref<32x338xbf16, #tpu.memory_space<vmem>>, vector<32x338xbf16>,
    return
  }
  func.func @transform_0(%arg0: i32) -> (i32, i32) {
    %c0_i32 = arith.constant 0 : i32
    %c0_i32_0 = arith.constant 0 : i32
    %c0_i32_1 = arith.constant 0 : i32
    return %c0_i32, %c0_i32_0 : i32, i32
  }
  func.func @transform_1(%arg0: i32) -> (i32, i32, i32) {
    %c0_i32 = arith.constant 0 : i32
    %c0_i32_0 = arith.constant 0 : i32
    %c0_i32_1 = arith.constant 0 : i32
    return %c0_i32, %c0_i32_0, %arg0 : i32, i32, i32
  }
  func.func @transform_2(%arg0: i32) -> (i32, i32) {
    %c0_i32 = arith.constant 0 : i32
    %c0_i32_0 = arith.constant 0 : i32
    %c0_i32_1 = arith.constant 0 : i32
    return %c0_i32, %c0_i32_0 : i32, i32
  }
  func.func @transform_3(%arg0: i32) -> (i32, i32) {
    %c0_i32 = arith.constant 0 : i32
    %c0_i32_0 = arith.constant 0 : i32
    return %c0_i32, %arg0 : i32, i32
  }
}

module attributes {stable_mosaic.version = 11 : i64} {
  func.func @_tail_kernel(%arg0: i32, %arg1: memref<9x4x2x288xbf16, #tpu.memory_space<vmem>>, %arg2: memref<288x64xbf16, #tpu.memory_space<vmem>>, %arg3: memref<1x64xf32, #tpu.memory_space<vmem>>, %arg4: memref<9x64x64xf32, #tpu.memory_space<vmem>>, %arg5: memref<1x64xf32, #tpu.memory_space<vmem>>, %arg6: memref<64x32xf32, #tpu.memory_space<vmem>>, %arg7: memref<1x32xf32, #tpu.memory_space<vmem>>, %arg8: memref<2x32xf32, #tpu.memory_space<vmem>>) attributes {dimension_semantics = [#tpu.dimension_semantics<arbitrary>], iteration_bounds = array<i64: 1>, scalar_prefetch = 0 : i64, scratch_operands = 0 : i64, tpu.core_type = #tpu.core_type<tc>, window_params = [{pipeline_mode = #tpu.pipeline_mode<synchronous>, transform_indices = @transform_0, window_bounds = array<i64: 9, 4, 2, 288>}, {pipeline_mode = #tpu.pipeline_mode<synchronous>, transform_indices = @transform_1, window_bounds = array<i64: 288, 64>}, {pipeline_mode = #tpu.pipeline_mode<synchronous>, transform_indices = @transform_2, window_bounds = array<i64: 1, 64>}, {pipeline_mode = #tpu.pipeline_mode<synchronous>, transform_indices = @transform_3, window_bounds = array<i64: 9, 64, 64>}, {pipeline_mode = #tpu.pipeline_mode<synchronous>, transform_indices = @transform_4, window_bounds = array<i64: 1, 64>}, {pipeline_mode = #tpu.pipeline_mode<synchronous>, transform_indices = @transform_5, window_bounds = array<i64: 64, 32>}, {pipeline_mode = #tpu.pipeline_mode<synchronous>, transform_indices = @transform_6, window_bounds = array<i64: 1, 32>}, {pipeline_mode = #tpu.pipeline_mode<synchronous>, transform_indices = @transform_7, window_bounds = array<i64: 2, 32>}]} {
    %c0 = arith.constant 0 : index
    %c0_0 = arith.constant 0 : index
    %0 = vector.load %arg2[%c0, %c0_0] : memref<288x64xbf16, #tpu.memory_space<vmem>>, vector<288x64xbf16>
    %c0_1 = arith.constant 0 : index
    %c0_2 = arith.constant 0 : index
    %1 = vector.load %arg3[%c0_1, %c0_2] : memref<1x64xf32, #tpu.memory_space<vmem>>, vector<1x64xf32>
    %cst = arith.constant 0.000000e+00 : f32
    %2 = vector.broadcast %cst : f32 to vector<2x64xf32>
    %c0_3 = arith.constant 0 : index
    %c0_4 = arith.constant 0 : index
    %c0_5 = arith.constant 0 : index
    %c0_6 = arith.constant 0 : index
    %3 = vector.load %arg1[%c0_3, %c0_4, %c0_5, %c0_6] : memref<9x4x2x288xbf16, #tpu.memory_space<vmem>>, vector<1x1x2x288xbf16>
    %4 = vector.shape_cast %3 : vector<1x1x2x288xbf16> to vector<2x288xbf16>
    %cst_7 = arith.constant dense<0.000000e+00> : vector<2x64xf32>
    %5 = tpu.matmul %4, %0, %cst_7 {dimension_numbers = #tpu.dot_dimension_numbers<[1], [0], [0], [1], [0, 0, 1, 1], [], []>} : vector<2x288xbf16>, vector<288x64xbf16>, vector<2x64xf32> -> vector<2x64xf32>
    %c0_8 = arith.constant 0 : index
    %c1 = arith.constant 1 : index
    %c0_9 = arith.constant 0 : index
    %c0_10 = arith.constant 0 : index
    %6 = vector.load %arg1[%c0_8, %c1, %c0_9, %c0_10] : memref<9x4x2x288xbf16, #tpu.memory_space<vmem>>, vector<1x1x2x288xbf16>
    %7 = vector.shape_cast %6 : vector<1x1x2x288xbf16> to vector<2x288xbf16>
    %cst_11 = arith.constant dense<0.000000e+00> : vector<2x64xf32>
    %8 = tpu.matmul %7, %0, %cst_11 {dimension_numbers = #tpu.dot_dimension_numbers<[1], [0], [0], [1], [0, 0, 1, 1], [], []>} : vector<2x288xbf16>, vector<288x64xbf16>, vector<2x64xf32> -> vector<2x64xf32>
    %9 = arith.maximumf %5, %8 : vector<2x64xf32>
    %c0_12 = arith.constant 0 : index
    %c2 = arith.constant 2 : index
    %c0_13 = arith.constant 0 : index
    %c0_14 = arith.constant 0 : index
    %10 = vector.load %arg1[%c0_12, %c2, %c0_13, %c0_14] : memref<9x4x2x288xbf16, #tpu.memory_space<vmem>>, vector<1x1x2x288xbf16>
    %11 = vector.shape_cast %10 : vector<1x1x2x288xbf16> to vector<2x288xbf16>
    %cst_15 = arith.constant dense<0.000000e+00> : vector<2x64xf32>
    %12 = tpu.matmul %11, %0, %cst_15 {dimension_numbers = #tpu.dot_dimension_numbers<[1], [0], [0], [1], [0, 0, 1, 1], [], []>} : vector<2x288xbf16>, vector<288x64xbf16>, vector<2x64xf32> -> vector<2x64xf32>
    %13 = arith.maximumf %9, %12 : vector<2x64xf32>
    %c0_16 = arith.constant 0 : index
    %c3 = arith.constant 3 : index
    %c0_17 = arith.constant 0 : index
    %c0_18 = arith.constant 0 : index
    %14 = vector.load %arg1[%c0_16, %c3, %c0_17, %c0_18] : memref<9x4x2x288xbf16, #tpu.memory_space<vmem>>, vector<1x1x2x288xbf16>
    %15 = vector.shape_cast %14 : vector<1x1x2x288xbf16> to vector<2x288xbf16>
    %cst_19 = arith.constant dense<0.000000e+00> : vector<2x64xf32>
    %16 = tpu.matmul %15, %0, %cst_19 {dimension_numbers = #tpu.dot_dimension_numbers<[1], [0], [0], [1], [0, 0, 1, 1], [], []>} : vector<2x288xbf16>, vector<288x64xbf16>, vector<2x64xf32> -> vector<2x64xf32>
    %17 = arith.maximumf %13, %16 : vector<2x64xf32>
    %18 = vector.broadcast %1 : vector<1x64xf32> to vector<2x64xf32>
    %19 = arith.addf %17, %18 : vector<2x64xf32>
    %cst_20 = arith.constant 0.000000e+00 : f32
    %20 = vector.broadcast %cst_20 : f32 to vector<2x64xf32>
    %21 = arith.maximumf %19, %20 : vector<2x64xf32>
    %c0_21 = arith.constant 0 : index
    %c0_22 = arith.constant 0 : index
    %c0_23 = arith.constant 0 : index
    %22 = vector.load %arg4[%c0_21, %c0_22, %c0_23] : memref<9x64x64xf32, #tpu.memory_space<vmem>>, vector<1x64x64xf32>
    %23 = vector.shape_cast %22 : vector<1x64x64xf32> to vector<64x64xf32>
    %cst_24 = arith.constant dense<0.000000e+00> : vector<2x64xf32>
    %24 = tpu.matmul %21, %23, %cst_24 {dimension_numbers = #tpu.dot_dimension_numbers<[1], [0], [0], [1], [0, 0, 1, 1], [], []>} : vector<2x64xf32>, vector<64x64xf32>, vector<2x64xf32> -> vector<2x64xf32>
    %25 = arith.addf %2, %24 : vector<2x64xf32>
    %c1_25 = arith.constant 1 : index
    %c0_26 = arith.constant 0 : index
    %c0_27 = arith.constant 0 : index
    %c0_28 = arith.constant 0 : index
    %26 = vector.load %arg1[%c1_25, %c0_26, %c0_27, %c0_28] : memref<9x4x2x288xbf16, #tpu.memory_space<vmem>>, vector<1x1x2x288xbf16>
    %27 = vector.shape_cast %26 : vector<1x1x2x288xbf16> to vector<2x288xbf16>
    %cst_29 = arith.constant dense<0.000000e+00> : vector<2x64xf32>
    %28 = tpu.matmul %27, %0, %cst_29 {dimension_numbers = #tpu.dot_dimension_numbers<[1], [0], [0], [1], [0, 0, 1, 1], [], []>} : vector<2x288xbf16>, vector<288x64xbf16>, vector<2x64xf32> -> vector<2x64xf32>
    %c1_30 = arith.constant 1 : index
    %c1_31 = arith.constant 1 : index
    %c0_32 = arith.constant 0 : index
    %c0_33 = arith.constant 0 : index
    %29 = vector.load %arg1[%c1_30, %c1_31, %c0_32, %c0_33] : memref<9x4x2x288xbf16, #tpu.memory_space<vmem>>, vector<1x1x2x288xbf16>
    %30 = vector.shape_cast %29 : vector<1x1x2x288xbf16> to vector<2x288xbf16>
    %cst_34 = arith.constant dense<0.000000e+00> : vector<2x64xf32>
    %31 = tpu.matmul %30, %0, %cst_34 {dimension_numbers = #tpu.dot_dimension_numbers<[1], [0], [0], [1], [0, 0, 1, 1], [], []>} : vector<2x288xbf16>, vector<288x64xbf16>, vector<2x64xf32> -> vector<2x64xf32>
    %32 = arith.maximumf %28, %31 : vector<2x64xf32>
    %c1_35 = arith.constant 1 : index
    %c2_36 = arith.constant 2 : index
    %c0_37 = arith.constant 0 : index
    %c0_38 = arith.constant 0 : index
    %33 = vector.load %arg1[%c1_35, %c2_36, %c0_37, %c0_38] : memref<9x4x2x288xbf16, #tpu.memory_space<vmem>>, vector<1x1x2x288xbf16>
    %34 = vector.shape_cast %33 : vector<1x1x2x288xbf16> to vector<2x288xbf16>
    %cst_39 = arith.constant dense<0.000000e+00> : vector<2x64xf32>
    %35 = tpu.matmul %34, %0, %cst_39 {dimension_numbers = #tpu.dot_dimension_numbers<[1], [0], [0], [1], [0, 0, 1, 1], [], []>} : vector<2x288xbf16>, vector<288x64xbf16>, vector<2x64xf32> -> vector<2x64xf32>
    %36 = arith.maximumf %32, %35 : vector<2x64xf32>
    %c1_40 = arith.constant 1 : index
    %c3_41 = arith.constant 3 : index
    %c0_42 = arith.constant 0 : index
    %c0_43 = arith.constant 0 : index
    %37 = vector.load %arg1[%c1_40, %c3_41, %c0_42, %c0_43] : memref<9x4x2x288xbf16, #tpu.memory_space<vmem>>, vector<1x1x2x288xbf16>
    %38 = vector.shape_cast %37 : vector<1x1x2x288xbf16> to vector<2x288xbf16>
    %cst_44 = arith.constant dense<0.000000e+00> : vector<2x64xf32>
    %39 = tpu.matmul %38, %0, %cst_44 {dimension_numbers = #tpu.dot_dimension_numbers<[1], [0], [0], [1], [0, 0, 1, 1], [], []>} : vector<2x288xbf16>, vector<288x64xbf16>, vector<2x64xf32> -> vector<2x64xf32>
    %40 = arith.maximumf %36, %39 : vector<2x64xf32>
    %41 = vector.broadcast %1 : vector<1x64xf32> to vector<2x64xf32>
    %42 = arith.addf %40, %41 : vector<2x64xf32>
    %cst_45 = arith.constant 0.000000e+00 : f32
    %43 = vector.broadcast %cst_45 : f32 to vector<2x64xf32>
    %44 = arith.maximumf %42, %43 : vector<2x64xf32>
    %c1_46 = arith.constant 1 : index
    %c0_47 = arith.constant 0 : index
    %c0_48 = arith.constant 0 : index
    %45 = vector.load %arg4[%c1_46, %c0_47, %c0_48] : memref<9x64x64xf32, #tpu.memory_space<vmem>>, vector<1x64x64xf32>
    %46 = vector.shape_cast %45 : vector<1x64x64xf32> to vector<64x64xf32>
    %cst_49 = arith.constant dense<0.000000e+00> : vector<2x64xf32>
    %47 = tpu.matmul %44, %46, %cst_49 {dimension_numbers = #tpu.dot_dimension_numbers<[1], [0], [0], [1], [0, 0, 1, 1], [], []>} : vector<2x64xf32>, vector<64x64xf32>, vector<2x64xf32> -> vector<2x64xf32>
    %48 = arith.addf %25, %47 : vector<2x64xf32>
    %c2_50 = arith.constant 2 : index
    %c0_51 = arith.constant 0 : index
    %c0_52 = arith.constant 0 : index
    %c0_53 = arith.constant 0 : index
    %49 = vector.load %arg1[%c2_50, %c0_51, %c0_52, %c0_53] : memref<9x4x2x288xbf16, #tpu.memory_space<vmem>>, vector<1x1x2x288xbf16>
    %50 = vector.shape_cast %49 : vector<1x1x2x288xbf16> to vector<2x288xbf16>
    %cst_54 = arith.constant dense<0.000000e+00> : vector<2x64xf32>
    %51 = tpu.matmul %50, %0, %cst_54 {dimension_numbers = #tpu.dot_dimension_numbers<[1], [0], [0], [1], [0, 0, 1, 1], [], []>} : vector<2x288xbf16>, vector<288x64xbf16>, vector<2x64xf32> -> vector<2x64xf32>
    %c2_55 = arith.constant 2 : index
    %c1_56 = arith.constant 1 : index
    %c0_57 = arith.constant 0 : index
    %c0_58 = arith.constant 0 : index
    %52 = vector.load %arg1[%c2_55, %c1_56, %c0_57, %c0_58] : memref<9x4x2x288xbf16, #tpu.memory_space<vmem>>, vector<1x1x2x288xbf16>
    %53 = vector.shape_cast %52 : vector<1x1x2x288xbf16> to vector<2x288xbf16>
    %cst_59 = arith.constant dense<0.000000e+00> : vector<2x64xf32>
    %54 = tpu.matmul %53, %0, %cst_59 {dimension_numbers = #tpu.dot_dimension_numbers<[1], [0], [0], [1], [0, 0, 1, 1], [], []>} : vector<2x288xbf16>, vector<288x64xbf16>, vector<2x64xf32> -> vector<2x64xf32>
    %55 = arith.maximumf %51, %54 : vector<2x64xf32>
    %c2_60 = arith.constant 2 : index
    %c2_61 = arith.constant 2 : index
    %c0_62 = arith.constant 0 : index
    %c0_63 = arith.constant 0 : index
    %56 = vector.load %arg1[%c2_60, %c2_61, %c0_62, %c0_63] : memref<9x4x2x288xbf16, #tpu.memory_space<vmem>>, vector<1x1x2x288xbf16>
    %57 = vector.shape_cast %56 : vector<1x1x2x288xbf16> to vector<2x288xbf16>
    %cst_64 = arith.constant dense<0.000000e+00> : vector<2x64xf32>
    %58 = tpu.matmul %57, %0, %cst_64 {dimension_numbers = #tpu.dot_dimension_numbers<[1], [0], [0], [1], [0, 0, 1, 1], [], []>} : vector<2x288xbf16>, vector<288x64xbf16>, vector<2x64xf32> -> vector<2x64xf32>
    %59 = arith.maximumf %55, %58 : vector<2x64xf32>
    %c2_65 = arith.constant 2 : index
    %c3_66 = arith.constant 3 : index
    %c0_67 = arith.constant 0 : index
    %c0_68 = arith.constant 0 : index
    %60 = vector.load %arg1[%c2_65, %c3_66, %c0_67, %c0_68] : memref<9x4x2x288xbf16, #tpu.memory_space<vmem>>, vector<1x1x2x288xbf16>
    %61 = vector.shape_cast %60 : vector<1x1x2x288xbf16> to vector<2x288xbf16>
    %cst_69 = arith.constant dense<0.000000e+00> : vector<2x64xf32>
    %62 = tpu.matmul %61, %0, %cst_69 {dimension_numbers = #tpu.dot_dimension_numbers<[1], [0], [0], [1], [0, 0, 1, 1], [], []>} : vector<2x288xbf16>, vector<288x64xbf16>, vector<2x64xf32> -> vector<2x64xf32>
    %63 = arith.maximumf %59, %62 : vector<2x64xf32>
    %64 = vector.broadcast %1 : vector<1x64xf32> to vector<2x64xf32>
    %65 = arith.addf %63, %64 : vector<2x64xf32>
    %cst_70 = arith.constant 0.000000e+00 : f32
    %66 = vector.broadcast %cst_70 : f32 to vector<2x64xf32>
    %67 = arith.maximumf %65, %66 : vector<2x64xf32>
    %c2_71 = arith.constant 2 : index
    %c0_72 = arith.constant 0 : index
    %c0_73 = arith.constant 0 : index
    %68 = vector.load %arg4[%c2_71, %c0_72, %c0_73] : memref<9x64x64xf32, #tpu.memory_space<vmem>>, vector<1x64x64xf32>
    %69 = vector.shape_cast %68 : vector<1x64x64xf32> to vector<64x64xf32>
    %cst_74 = arith.constant dense<0.000000e+00> : vector<2x64xf32>
    %70 = tpu.matmul %67, %69, %cst_74 {dimension_numbers = #tpu.dot_dimension_numbers<[1], [0], [0], [1], [0, 0, 1, 1], [], []>} : vector<2x64xf32>, vector<64x64xf32>, vector<2x64xf32> -> vector<2x64xf32>
    %71 = arith.addf %48, %70 : vector<2x64xf32>
    %c3_75 = arith.constant 3 : index
    %c0_76 = arith.constant 0 : index
    %c0_77 = arith.constant 0 : index
    %c0_78 = arith.constant 0 : index
    %72 = vector.load %arg1[%c3_75, %c0_76, %c0_77, %c0_78] : memref<9x4x2x288xbf16, #tpu.memory_space<vmem>>, vector<1x1x2x288xbf16>
    %73 = vector.shape_cast %72 : vector<1x1x2x288xbf16> to vector<2x288xbf16>
    %cst_79 = arith.constant dense<0.000000e+00> : vector<2x64xf32>
    %74 = tpu.matmul %73, %0, %cst_79 {dimension_numbers = #tpu.dot_dimension_numbers<[1], [0], [0], [1], [0, 0, 1, 1], [], []>} : vector<2x288xbf16>, vector<288x64xbf16>, vector<2x64xf32> -> vector<2x64xf32>
    %c3_80 = arith.constant 3 : index
    %c1_81 = arith.constant 1 : index
    %c0_82 = arith.constant 0 : index
    %c0_83 = arith.constant 0 : index
    %75 = vector.load %arg1[%c3_80, %c1_81, %c0_82, %c0_83] : memref<9x4x2x288xbf16, #tpu.memory_space<vmem>>, vector<1x1x2x288xbf16>
    %76 = vector.shape_cast %75 : vector<1x1x2x288xbf16> to vector<2x288xbf16>
    %cst_84 = arith.constant dense<0.000000e+00> : vector<2x64xf32>
    %77 = tpu.matmul %76, %0, %cst_84 {dimension_numbers = #tpu.dot_dimension_numbers<[1], [0], [0], [1], [0, 0, 1, 1], [], []>} : vector<2x288xbf16>, vector<288x64xbf16>, vector<2x64xf32> -> vector<2x64xf32>
    %78 = arith.maximumf %74, %77 : vector<2x64xf32>
    %c3_85 = arith.constant 3 : index
    %c2_86 = arith.constant 2 : index
    %c0_87 = arith.constant 0 : index
    %c0_88 = arith.constant 0 : index
    %79 = vector.load %arg1[%c3_85, %c2_86, %c0_87, %c0_88] : memref<9x4x2x288xbf16, #tpu.memory_space<vmem>>, vector<1x1x2x288xbf16>
    %80 = vector.shape_cast %79 : vector<1x1x2x288xbf16> to vector<2x288xbf16>
    %cst_89 = arith.constant dense<0.000000e+00> : vector<2x64xf32>
    %81 = tpu.matmul %80, %0, %cst_89 {dimension_numbers = #tpu.dot_dimension_numbers<[1], [0], [0], [1], [0, 0, 1, 1], [], []>} : vector<2x288xbf16>, vector<288x64xbf16>, vector<2x64xf32> -> vector<2x64xf32>
    %82 = arith.maximumf %78, %81 : vector<2x64xf32>
    %c3_90 = arith.constant 3 : index
    %c3_91 = arith.constant 3 : index
    %c0_92 = arith.constant 0 : index
    %c0_93 = arith.constant 0 : index
    %83 = vector.load %arg1[%c3_90, %c3_91, %c0_92, %c0_93] : memref<9x4x2x288xbf16, #tpu.memory_space<vmem>>, vector<1x1x2x288xbf16>
    %84 = vector.shape_cast %83 : vector<1x1x2x288xbf16> to vector<2x288xbf16>
    %cst_94 = arith.constant dense<0.000000e+00> : vector<2x64xf32>
    %85 = tpu.matmul %84, %0, %cst_94 {dimension_numbers = #tpu.dot_dimension_numbers<[1], [0], [0], [1], [0, 0, 1, 1], [], []>} : vector<2x288xbf16>, vector<288x64xbf16>, vector<2x64xf32> -> vector<2x64xf32>
    %86 = arith.maximumf %82, %85 : vector<2x64xf32>
    %87 = vector.broadcast %1 : vector<1x64xf32> to vector<2x64xf32>
    %88 = arith.addf %86, %87 : vector<2x64xf32>
    %cst_95 = arith.constant 0.000000e+00 : f32
    %89 = vector.broadcast %cst_95 : f32 to vector<2x64xf32>
    %90 = arith.maximumf %88, %89 : vector<2x64xf32>
    %c3_96 = arith.constant 3 : index
    %c0_97 = arith.constant 0 : index
    %c0_98 = arith.constant 0 : index
    %91 = vector.load %arg4[%c3_96, %c0_97, %c0_98] : memref<9x64x64xf32, #tpu.memory_space<vmem>>, vector<1x64x64xf32>
    %92 = vector.shape_cast %91 : vector<1x64x64xf32> to vector<64x64xf32>
    %cst_99 = arith.constant dense<0.000000e+00> : vector<2x64xf32>
    %93 = tpu.matmul %90, %92, %cst_99 {dimension_numbers = #tpu.dot_dimension_numbers<[1], [0], [0], [1], [0, 0, 1, 1], [], []>} : vector<2x64xf32>, vector<64x64xf32>, vector<2x64xf32> -> vector<2x64xf32>
    %94 = arith.addf %71, %93 : vector<2x64xf32>
    %c4 = arith.constant 4 : index
    %c0_100 = arith.constant 0 : index
    %c0_101 = arith.constant 0 : index
    %c0_102 = arith.constant 0 : index
    %95 = vector.load %arg1[%c4, %c0_100, %c0_101, %c0_102] : memref<9x4x2x288xbf16, #tpu.memory_space<vmem>>, vector<1x1x2x288xbf16>
    %96 = vector.shape_cast %95 : vector<1x1x2x288xbf16> to vector<2x288xbf16>
    %cst_103 = arith.constant dense<0.000000e+00> : vector<2x64xf32>
    %97 = tpu.matmul %96, %0, %cst_103 {dimension_numbers = #tpu.dot_dimension_numbers<[1], [0], [0], [1], [0, 0, 1, 1], [], []>} : vector<2x288xbf16>, vector<288x64xbf16>, vector<2x64xf32> -> vector<2x64xf32>
    %c4_104 = arith.constant 4 : index
    %c1_105 = arith.constant 1 : index
    %c0_106 = arith.constant 0 : index
    %c0_107 = arith.constant 0 : index
    %98 = vector.load %arg1[%c4_104, %c1_105, %c0_106, %c0_107] : memref<9x4x2x288xbf16, #tpu.memory_space<vmem>>, vector<1x1x2x288xbf16>
    %99 = vector.shape_cast %98 : vector<1x1x2x288xbf16> to vector<2x288xbf16>
    %cst_108 = arith.constant dense<0.000000e+00> : vector<2x64xf32>
    %100 = tpu.matmul %99, %0, %cst_108 {dimension_numbers = #tpu.dot_dimension_numbers<[1], [0], [0], [1], [0, 0, 1, 1], [], []>} : vector<2x288xbf16>, vector<288x64xbf16>, vector<2x64xf32> -> vector<2x64xf32>
    %101 = arith.maximumf %97, %100 : vector<2x64xf32>
    %c4_109 = arith.constant 4 : index
    %c2_110 = arith.constant 2 : index
    %c0_111 = arith.constant 0 : index
    %c0_112 = arith.constant 0 : index
    %102 = vector.load %arg1[%c4_109, %c2_110, %c0_111, %c0_112] : memref<9x4x2x288xbf16, #tpu.memory_space<vmem>>, vector<1x1x2x288xbf16>
    %103 = vector.shape_cast %102 : vector<1x1x2x288xbf16> to vector<2x288xbf16>
    %cst_113 = arith.constant dense<0.000000e+00> : vector<2x64xf32>
    %104 = tpu.matmul %103, %0, %cst_113 {dimension_numbers = #tpu.dot_dimension_numbers<[1], [0], [0], [1], [0, 0, 1, 1], [], []>} : vector<2x288xbf16>, vector<288x64xbf16>, vector<2x64xf32> -> vector<2x64xf32>
    %105 = arith.maximumf %101, %104 : vector<2x64xf32>
    %c4_114 = arith.constant 4 : index
    %c3_115 = arith.constant 3 : index
    %c0_116 = arith.constant 0 : index
    %c0_117 = arith.constant 0 : index
    %106 = vector.load %arg1[%c4_114, %c3_115, %c0_116, %c0_117] : memref<9x4x2x288xbf16, #tpu.memory_space<vmem>>, vector<1x1x2x288xbf16>
    %107 = vector.shape_cast %106 : vector<1x1x2x288xbf16> to vector<2x288xbf16>
    %cst_118 = arith.constant dense<0.000000e+00> : vector<2x64xf32>
    %108 = tpu.matmul %107, %0, %cst_118 {dimension_numbers = #tpu.dot_dimension_numbers<[1], [0], [0], [1], [0, 0, 1, 1], [], []>} : vector<2x288xbf16>, vector<288x64xbf16>, vector<2x64xf32> -> vector<2x64xf32>
    %109 = arith.maximumf %105, %108 : vector<2x64xf32>
    %110 = vector.broadcast %1 : vector<1x64xf32> to vector<2x64xf32>
    %111 = arith.addf %109, %110 : vector<2x64xf32>
    %cst_119 = arith.constant 0.000000e+00 : f32
    %112 = vector.broadcast %cst_119 : f32 to vector<2x64xf32>
    %113 = arith.maximumf %111, %112 : vector<2x64xf32>
    %c4_120 = arith.constant 4 : index
    %c0_121 = arith.constant 0 : index
    %c0_122 = arith.constant 0 : index
    %114 = vector.load %arg4[%c4_120, %c0_121, %c0_122] : memref<9x64x64xf32, #tpu.memory_space<vmem>>, vector<1x64x64xf32>
    %115 = vector.shape_cast %114 : vector<1x64x64xf32> to vector<64x64xf32>
    %cst_123 = arith.constant dense<0.000000e+00> : vector<2x64xf32>
    %116 = tpu.matmul %113, %115, %cst_123 {dimension_numbers = #tpu.dot_dimension_numbers<[1], [0], [0], [1], [0, 0, 1, 1], [], []>} : vector<2x64xf32>, vector<64x64xf32>, vector<2x64xf32> -> vector<2x64xf32>
    %117 = arith.addf %94, %116 : vector<2x64xf32>
    %c5 = arith.constant 5 : index
    %c0_124 = arith.constant 0 : index
    %c0_125 = arith.constant 0 : index
    %c0_126 = arith.constant 0 : index
    %118 = vector.load %arg1[%c5, %c0_124, %c0_125, %c0_126] : memref<9x4x2x288xbf16, #tpu.memory_space<vmem>>, vector<1x1x2x288xbf16>
    %119 = vector.shape_cast %118 : vector<1x1x2x288xbf16> to vector<2x288xbf16>
    %cst_127 = arith.constant dense<0.000000e+00> : vector<2x64xf32>
    %120 = tpu.matmul %119, %0, %cst_127 {dimension_numbers = #tpu.dot_dimension_numbers<[1], [0], [0], [1], [0, 0, 1, 1], [], []>} : vector<2x288xbf16>, vector<288x64xbf16>, vector<2x64xf32> -> vector<2x64xf32>
    %c5_128 = arith.constant 5 : index
    %c1_129 = arith.constant 1 : index
    %c0_130 = arith.constant 0 : index
    %c0_131 = arith.constant 0 : index
    %121 = vector.load %arg1[%c5_128, %c1_129, %c0_130, %c0_131] : memref<9x4x2x288xbf16, #tpu.memory_space<vmem>>, vector<1x1x2x288xbf16>
    %122 = vector.shape_cast %121 : vector<1x1x2x288xbf16> to vector<2x288xbf16>
    %cst_132 = arith.constant dense<0.000000e+00> : vector<2x64xf32>
    %123 = tpu.matmul %122, %0, %cst_132 {dimension_numbers = #tpu.dot_dimension_numbers<[1], [0], [0], [1], [0, 0, 1, 1], [], []>} : vector<2x288xbf16>, vector<288x64xbf16>, vector<2x64xf32> -> vector<2x64xf32>
    %124 = arith.maximumf %120, %123 : vector<2x64xf32>
    %c5_133 = arith.constant 5 : index
    %c2_134 = arith.constant 2 : index
    %c0_135 = arith.constant 0 : index
    %c0_136 = arith.constant 0 : index
    %125 = vector.load %arg1[%c5_133, %c2_134, %c0_135, %c0_136] : memref<9x4x2x288xbf16, #tpu.memory_space<vmem>>, vector<1x1x2x288xbf16>
    %126 = vector.shape_cast %125 : vector<1x1x2x288xbf16> to vector<2x288xbf16>
    %cst_137 = arith.constant dense<0.000000e+00> : vector<2x64xf32>
    %127 = tpu.matmul %126, %0, %cst_137 {dimension_numbers = #tpu.dot_dimension_numbers<[1], [0], [0], [1], [0, 0, 1, 1], [], []>} : vector<2x288xbf16>, vector<288x64xbf16>, vector<2x64xf32> -> vector<2x64xf32>
    %128 = arith.maximumf %124, %127 : vector<2x64xf32>
    %c5_138 = arith.constant 5 : index
    %c3_139 = arith.constant 3 : index
    %c0_140 = arith.constant 0 : index
    %c0_141 = arith.constant 0 : index
    %129 = vector.load %arg1[%c5_138, %c3_139, %c0_140, %c0_141] : memref<9x4x2x288xbf16, #tpu.memory_space<vmem>>, vector<1x1x2x288xbf16>
    %130 = vector.shape_cast %129 : vector<1x1x2x288xbf16> to vector<2x288xbf16>
    %cst_142 = arith.constant dense<0.000000e+00> : vector<2x64xf32>
    %131 = tpu.matmul %130, %0, %cst_142 {dimension_numbers = #tpu.dot_dimension_numbers<[1], [0], [0], [1], [0, 0, 1, 1], [], []>} : vector<2x288xbf16>, vector<288x64xbf16>, vector<2x64xf32> -> vector<2x64xf32>
    %132 = arith.maximumf %128, %131 : vector<2x64xf32>
    %133 = vector.broadcast %1 : vector<1x64xf32> to vector<2x64xf32>
    %134 = arith.addf %132, %133 : vector<2x64xf32>
    %cst_143 = arith.constant 0.000000e+00 : f32
    %135 = vector.broadcast %cst_143 : f32 to vector<2x64xf32>
    %136 = arith.maximumf %134, %135 : vector<2x64xf32>
    %c5_144 = arith.constant 5 : index
    %c0_145 = arith.constant 0 : index
    %c0_146 = arith.constant 0 : index
    %137 = vector.load %arg4[%c5_144, %c0_145, %c0_146] : memref<9x64x64xf32, #tpu.memory_space<vmem>>, vector<1x64x64xf32>
    %138 = vector.shape_cast %137 : vector<1x64x64xf32> to vector<64x64xf32>
    %cst_147 = arith.constant dense<0.000000e+00> : vector<2x64xf32>
    %139 = tpu.matmul %136, %138, %cst_147 {dimension_numbers = #tpu.dot_dimension_numbers<[1], [0], [0], [1], [0, 0, 1, 1], [], []>} : vector<2x64xf32>, vector<64x64xf32>, vector<2x64xf32> -> vector<2x64xf32>
    %140 = arith.addf %117, %139 : vector<2x64xf32>
    %c6 = arith.constant 6 : index
    %c0_148 = arith.constant 0 : index
    %c0_149 = arith.constant 0 : index
    %c0_150 = arith.constant 0 : index
    %141 = vector.load %arg1[%c6, %c0_148, %c0_149, %c0_150] : memref<9x4x2x288xbf16, #tpu.memory_space<vmem>>, vector<1x1x2x288xbf16>
    %142 = vector.shape_cast %141 : vector<1x1x2x288xbf16> to vector<2x288xbf16>
    %cst_151 = arith.constant dense<0.000000e+00> : vector<2x64xf32>
    %143 = tpu.matmul %142, %0, %cst_151 {dimension_numbers = #tpu.dot_dimension_numbers<[1], [0], [0], [1], [0, 0, 1, 1], [], []>} : vector<2x288xbf16>, vector<288x64xbf16>, vector<2x64xf32> -> vector<2x64xf32>
    %c6_152 = arith.constant 6 : index
    %c1_153 = arith.constant 1 : index
    %c0_154 = arith.constant 0 : index
    %c0_155 = arith.constant 0 : index
    %144 = vector.load %arg1[%c6_152, %c1_153, %c0_154, %c0_155] : memref<9x4x2x288xbf16, #tpu.memory_space<vmem>>, vector<1x1x2x288xbf16>
    %145 = vector.shape_cast %144 : vector<1x1x2x288xbf16> to vector<2x288xbf16>
    %cst_156 = arith.constant dense<0.000000e+00> : vector<2x64xf32>
    %146 = tpu.matmul %145, %0, %cst_156 {dimension_numbers = #tpu.dot_dimension_numbers<[1], [0], [0], [1], [0, 0, 1, 1], [], []>} : vector<2x288xbf16>, vector<288x64xbf16>, vector<2x64xf32> -> vector<2x64xf32>
    %147 = arith.maximumf %143, %146 : vector<2x64xf32>
    %c6_157 = arith.constant 6 : index
    %c2_158 = arith.constant 2 : index
    %c0_159 = arith.constant 0 : index
    %c0_160 = arith.constant 0 : index
    %148 = vector.load %arg1[%c6_157, %c2_158, %c0_159, %c0_160] : memref<9x4x2x288xbf16, #tpu.memory_space<vmem>>, vector<1x1x2x288xbf16>
    %149 = vector.shape_cast %148 : vector<1x1x2x288xbf16> to vector<2x288xbf16>
    %cst_161 = arith.constant dense<0.000000e+00> : vector<2x64xf32>
    %150 = tpu.matmul %149, %0, %cst_161 {dimension_numbers = #tpu.dot_dimension_numbers<[1], [0], [0], [1], [0, 0, 1, 1], [], []>} : vector<2x288xbf16>, vector<288x64xbf16>, vector<2x64xf32> -> vector<2x64xf32>
    %151 = arith.maximumf %147, %150 : vector<2x64xf32>
    %c6_162 = arith.constant 6 : index
    %c3_163 = arith.constant 3 : index
    %c0_164 = arith.constant 0 : index
    %c0_165 = arith.constant 0 : index
    %152 = vector.load %arg1[%c6_162, %c3_163, %c0_164, %c0_165] : memref<9x4x2x288xbf16, #tpu.memory_space<vmem>>, vector<1x1x2x288xbf16>
    %153 = vector.shape_cast %152 : vector<1x1x2x288xbf16> to vector<2x288xbf16>
    %cst_166 = arith.constant dense<0.000000e+00> : vector<2x64xf32>
    %154 = tpu.matmul %153, %0, %cst_166 {dimension_numbers = #tpu.dot_dimension_numbers<[1], [0], [0], [1], [0, 0, 1, 1], [], []>} : vector<2x288xbf16>, vector<288x64xbf16>, vector<2x64xf32> -> vector<2x64xf32>
    %155 = arith.maximumf %151, %154 : vector<2x64xf32>
    %156 = vector.broadcast %1 : vector<1x64xf32> to vector<2x64xf32>
    %157 = arith.addf %155, %156 : vector<2x64xf32>
    %cst_167 = arith.constant 0.000000e+00 : f32
    %158 = vector.broadcast %cst_167 : f32 to vector<2x64xf32>
    %159 = arith.maximumf %157, %158 : vector<2x64xf32>
    %c6_168 = arith.constant 6 : index
    %c0_169 = arith.constant 0 : index
    %c0_170 = arith.constant 0 : index
    %160 = vector.load %arg4[%c6_168, %c0_169, %c0_170] : memref<9x64x64xf32, #tpu.memory_space<vmem>>, vector<1x64x64xf32>
    %161 = vector.shape_cast %160 : vector<1x64x64xf32> to vector<64x64xf32>
    %cst_171 = arith.constant dense<0.000000e+00> : vector<2x64xf32>
    %162 = tpu.matmul %159, %161, %cst_171 {dimension_numbers = #tpu.dot_dimension_numbers<[1], [0], [0], [1], [0, 0, 1, 1], [], []>} : vector<2x64xf32>, vector<64x64xf32>, vector<2x64xf32> -> vector<2x64xf32>
    %163 = arith.addf %140, %162 : vector<2x64xf32>
    %c7 = arith.constant 7 : index
    %c0_172 = arith.constant 0 : index
    %c0_173 = arith.constant 0 : index
    %c0_174 = arith.constant 0 : index
    %164 = vector.load %arg1[%c7, %c0_172, %c0_173, %c0_174] : memref<9x4x2x288xbf16, #tpu.memory_space<vmem>>, vector<1x1x2x288xbf16>
    %165 = vector.shape_cast %164 : vector<1x1x2x288xbf16> to vector<2x288xbf16>
    %cst_175 = arith.constant dense<0.000000e+00> : vector<2x64xf32>
    %166 = tpu.matmul %165, %0, %cst_175 {dimension_numbers = #tpu.dot_dimension_numbers<[1], [0], [0], [1], [0, 0, 1, 1], [], []>} : vector<2x288xbf16>, vector<288x64xbf16>, vector<2x64xf32> -> vector<2x64xf32>
    %c7_176 = arith.constant 7 : index
    %c1_177 = arith.constant 1 : index
    %c0_178 = arith.constant 0 : index
    %c0_179 = arith.constant 0 : index
    %167 = vector.load %arg1[%c7_176, %c1_177, %c0_178, %c0_179] : memref<9x4x2x288xbf16, #tpu.memory_space<vmem>>, vector<1x1x2x288xbf16>
    %168 = vector.shape_cast %167 : vector<1x1x2x288xbf16> to vector<2x288xbf16>
    %cst_180 = arith.constant dense<0.000000e+00> : vector<2x64xf32>
    %169 = tpu.matmul %168, %0, %cst_180 {dimension_numbers = #tpu.dot_dimension_numbers<[1], [0], [0], [1], [0, 0, 1, 1], [], []>} : vector<2x288xbf16>, vector<288x64xbf16>, vector<2x64xf32> -> vector<2x64xf32>
    %170 = arith.maximumf %166, %169 : vector<2x64xf32>
    %c7_181 = arith.constant 7 : index
    %c2_182 = arith.constant 2 : index
    %c0_183 = arith.constant 0 : index
    %c0_184 = arith.constant 0 : index
    %171 = vector.load %arg1[%c7_181, %c2_182, %c0_183, %c0_184] : memref<9x4x2x288xbf16, #tpu.memory_space<vmem>>, vector<1x1x2x288xbf16>
    %172 = vector.shape_cast %171 : vector<1x1x2x288xbf16> to vector<2x288xbf16>
    %cst_185 = arith.constant dense<0.000000e+00> : vector<2x64xf32>
    %173 = tpu.matmul %172, %0, %cst_185 {dimension_numbers = #tpu.dot_dimension_numbers<[1], [0], [0], [1], [0, 0, 1, 1], [], []>} : vector<2x288xbf16>, vector<288x64xbf16>, vector<2x64xf32> -> vector<2x64xf32>
    %174 = arith.maximumf %170, %173 : vector<2x64xf32>
    %c7_186 = arith.constant 7 : index
    %c3_187 = arith.constant 3 : index
    %c0_188 = arith.constant 0 : index
    %c0_189 = arith.constant 0 : index
    %175 = vector.load %arg1[%c7_186, %c3_187, %c0_188, %c0_189] : memref<9x4x2x288xbf16, #tpu.memory_space<vmem>>, vector<1x1x2x288xbf16>
    %176 = vector.shape_cast %175 : vector<1x1x2x288xbf16> to vector<2x288xbf16>
    %cst_190 = arith.constant dense<0.000000e+00> : vector<2x64xf32>
    %177 = tpu.matmul %176, %0, %cst_190 {dimension_numbers = #tpu.dot_dimension_numbers<[1], [0], [0], [1], [0, 0, 1, 1], [], []>} : vector<2x288xbf16>, vector<288x64xbf16>, vector<2x64xf32> -> vector<2x64xf32>
    %178 = arith.maximumf %174, %177 : vector<2x64xf32>
    %179 = vector.broadcast %1 : vector<1x64xf32> to vector<2x64xf32>
    %180 = arith.addf %178, %179 : vector<2x64xf32>
    %cst_191 = arith.constant 0.000000e+00 : f32
    %181 = vector.broadcast %cst_191 : f32 to vector<2x64xf32>
    %182 = arith.maximumf %180, %181 : vector<2x64xf32>
    %c7_192 = arith.constant 7 : index
    %c0_193 = arith.constant 0 : index
    %c0_194 = arith.constant 0 : index
    %183 = vector.load %arg4[%c7_192, %c0_193, %c0_194] : memref<9x64x64xf32, #tpu.memory_space<vmem>>, vector<1x64x64xf32>
    %184 = vector.shape_cast %183 : vector<1x64x64xf32> to vector<64x64xf32>
    %cst_195 = arith.constant dense<0.000000e+00> : vector<2x64xf32>
    %185 = tpu.matmul %182, %184, %cst_195 {dimension_numbers = #tpu.dot_dimension_numbers<[1], [0], [0], [1], [0, 0, 1, 1], [], []>} : vector<2x64xf32>, vector<64x64xf32>, vector<2x64xf32> -> vector<2x64xf32>
    %186 = arith.addf %163, %185 : vector<2x64xf32>
    %c8 = arith.constant 8 : index
    %c0_196 = arith.constant 0 : index
    %c0_197 = arith.constant 0 : index
    %c0_198 = arith.constant 0 : index
    %187 = vector.load %arg1[%c8, %c0_196, %c0_197, %c0_198] : memref<9x4x2x288xbf16, #tpu.memory_space<vmem>>, vector<1x1x2x288xbf16>
    %188 = vector.shape_cast %187 : vector<1x1x2x288xbf16> to vector<2x288xbf16>
    %cst_199 = arith.constant dense<0.000000e+00> : vector<2x64xf32>
    %189 = tpu.matmul %188, %0, %cst_199 {dimension_numbers = #tpu.dot_dimension_numbers<[1], [0], [0], [1], [0, 0, 1, 1], [], []>} : vector<2x288xbf16>, vector<288x64xbf16>, vector<2x64xf32> -> vector<2x64xf32>
    %c8_200 = arith.constant 8 : index
    %c1_201 = arith.constant 1 : index
    %c0_202 = arith.constant 0 : index
    %c0_203 = arith.constant 0 : index
    %190 = vector.load %arg1[%c8_200, %c1_201, %c0_202, %c0_203] : memref<9x4x2x288xbf16, #tpu.memory_space<vmem>>, vector<1x1x2x288xbf16>
    %191 = vector.shape_cast %190 : vector<1x1x2x288xbf16> to vector<2x288xbf16>
    %cst_204 = arith.constant dense<0.000000e+00> : vector<2x64xf32>
    %192 = tpu.matmul %191, %0, %cst_204 {dimension_numbers = #tpu.dot_dimension_numbers<[1], [0], [0], [1], [0, 0, 1, 1], [], []>} : vector<2x288xbf16>, vector<288x64xbf16>, vector<2x64xf32> -> vector<2x64xf32>
    %193 = arith.maximumf %189, %192 : vector<2x64xf32>
    %c8_205 = arith.constant 8 : index
    %c2_206 = arith.constant 2 : index
    %c0_207 = arith.constant 0 : index
    %c0_208 = arith.constant 0 : index
    %194 = vector.load %arg1[%c8_205, %c2_206, %c0_207, %c0_208] : memref<9x4x2x288xbf16, #tpu.memory_space<vmem>>, vector<1x1x2x288xbf16>
    %195 = vector.shape_cast %194 : vector<1x1x2x288xbf16> to vector<2x288xbf16>
    %cst_209 = arith.constant dense<0.000000e+00> : vector<2x64xf32>
    %196 = tpu.matmul %195, %0, %cst_209 {dimension_numbers = #tpu.dot_dimension_numbers<[1], [0], [0], [1], [0, 0, 1, 1], [], []>} : vector<2x288xbf16>, vector<288x64xbf16>, vector<2x64xf32> -> vector<2x64xf32>
    %197 = arith.maximumf %193, %196 : vector<2x64xf32>
    %c8_210 = arith.constant 8 : index
    %c3_211 = arith.constant 3 : index
    %c0_212 = arith.constant 0 : index
    %c0_213 = arith.constant 0 : index
    %198 = vector.load %arg1[%c8_210, %c3_211, %c0_212, %c0_213] : memref<9x4x2x288xbf16, #tpu.memory_space<vmem>>, vector<1x1x2x288xbf16>
    %199 = vector.shape_cast %198 : vector<1x1x2x288xbf16> to vector<2x288xbf16>
    %cst_214 = arith.constant dense<0.000000e+00> : vector<2x64xf32>
    %200 = tpu.matmul %199, %0, %cst_214 {dimension_numbers = #tpu.dot_dimension_numbers<[1], [0], [0], [1], [0, 0, 1, 1], [], []>} : vector<2x288xbf16>, vector<288x64xbf16>, vector<2x64xf32> -> vector<2x64xf32>
    %201 = arith.maximumf %197, %200 : vector<2x64xf32>
    %202 = vector.broadcast %1 : vector<1x64xf32> to vector<2x64xf32>
    %203 = arith.addf %201, %202 : vector<2x64xf32>
    %cst_215 = arith.constant 0.000000e+00 : f32
    %204 = vector.broadcast %cst_215 : f32 to vector<2x64xf32>
    %205 = arith.maximumf %203, %204 : vector<2x64xf32>
    %c8_216 = arith.constant 8 : index
    %c0_217 = arith.constant 0 : index
    %c0_218 = arith.constant 0 : index
    %206 = vector.load %arg4[%c8_216, %c0_217, %c0_218] : memref<9x64x64xf32, #tpu.memory_space<vmem>>, vector<1x64x64xf32>
    %207 = vector.shape_cast %206 : vector<1x64x64xf32> to vector<64x64xf32>
    %cst_219 = arith.constant dense<0.000000e+00> : vector<2x64xf32>
    %208 = tpu.matmul %205, %207, %cst_219 {dimension_numbers = #tpu.dot_dimension_numbers<[1], [0], [0], [1], [0, 0, 1, 1], [], []>} : vector<2x64xf32>, vector<64x64xf32>, vector<2x64xf32> -> vector<2x64xf32>
    %209 = arith.addf %186, %208 : vector<2x64xf32>
    %c0_220 = arith.constant 0 : index
    %c0_221 = arith.constant 0 : index
    %210 = vector.load %arg5[%c0_220, %c0_221] : memref<1x64xf32, #tpu.memory_space<vmem>>, vector<1x64xf32>
    %211 = vector.broadcast %210 : vector<1x64xf32> to vector<2x64xf32>
    %212 = arith.addf %209, %211 : vector<2x64xf32>
    %cst_222 = arith.constant 0.000000e+00 : f32
    %213 = vector.broadcast %cst_222 : f32 to vector<2x64xf32>
    %214 = arith.maximumf %212, %213 : vector<2x64xf32>
    %c0_223 = arith.constant 0 : index
    %c0_224 = arith.constant 0 : index
    %215 = vector.load %arg6[%c0_223, %c0_224] : memref<64x32xf32, #tpu.memory_space<vmem>>, vector<64x32xf32>
    %cst_225 = arith.constant dense<0.000000e+00> : vector<2x32xf32>
    %216 = tpu.matmul %214, %215, %cst_225 {dimension_numbers = #tpu.dot_dimension_numbers<[1], [0], [0], [1], [0, 0, 1, 1], [], []>} : vector<2x64xf32>, vector<64x32xf32>, vector<2x32xf32> -> vector<2x32xf32>
    %c0_226 = arith.constant 0 : index
    %c0_227 = arith.constant 0 : index
    %217 = vector.load %arg7[%c0_226, %c0_227] : memref<1x32xf32, #tpu.memory_space<vmem>>, vector<1x32xf32>
    %218 = vector.broadcast %217 : vector<1x32xf32> to vector<2x32xf32>
    %219 = arith.addf %216, %218 : vector<2x32xf32>
    %cst_228 = arith.constant 0.000000e+00 : f32
    %220 = vector.broadcast %cst_228 : f32 to vector<2x32xf32>
    %221 = arith.maximumf %219, %220 : vector<2x32xf32>
    %cst_229 = arith.constant dense<0xFF800000> : vector<2xf32>
    %222 = vector.multi_reduction <maximumf>, %221, %cst_229 [1] : vector<2x32xf32> to vector<2xf32>
    %223 = vector.shape_cast %222 : vector<2xf32> to vector<2x1xf32>
    %224 = vector.broadcast %223 : vector<2x1xf32> to vector<2x32xf32>
    %225 = arith.subf %221, %224 : vector<2x32xf32>
    %226 = math.exp %225 : vector<2x32xf32>
    %cst_230 = arith.constant dense<0.000000e+00> : vector<2xf32>
    %227 = vector.multi_reduction <add>, %226, %cst_230 [1] : vector<2x32xf32> to vector<2xf32>
    %228 = vector.shape_cast %227 : vector<2xf32> to vector<2x1xf32>
    %229 = math.log %228 : vector<2x1xf32>
    %230 = arith.addf %229, %223 : vector<2x1xf32>
    %231 = vector.broadcast %230 : vector<2x1xf32> to vector<2x32xf32>
    %232 = arith.subf %221, %231 : vector<2x32xf32>
    %c0_231 = arith.constant 0 : index
    %c0_232 = arith.constant 0 : index
    %233 = vector.load %arg8[%c0_231, %c0_232] : memref<2x32xf32, #tpu.memory_space<vmem>>, vector<2x32xf32>
    tpu.vector_store %arg8[%c0_231, %c0_232], %232 {strides = array<i32>} : memref<2x32xf32, #tpu.memory_space<vmem>>, vector<2x32xf32>,
    return
  }
  func.func @transform_0(%arg0: i32) -> (i32, i32, i32, i32) {
    %c0_i32 = arith.constant 0 : i32
    %c0_i32_0 = arith.constant 0 : i32
    %c0_i32_1 = arith.constant 0 : i32
    %c0_i32_2 = arith.constant 0 : i32
    %c0_i32_3 = arith.constant 0 : i32
    return %c0_i32, %c0_i32_0, %c0_i32_1, %c0_i32_2 : i32, i32, i32, i32
  }
  func.func @transform_1(%arg0: i32) -> (i32, i32) {
    %c0_i32 = arith.constant 0 : i32
    %c0_i32_0 = arith.constant 0 : i32
    %c0_i32_1 = arith.constant 0 : i32
    return %c0_i32, %c0_i32_0 : i32, i32
  }
  func.func @transform_2(%arg0: i32) -> (i32, i32) {
    %c0_i32 = arith.constant 0 : i32
    %c0_i32_0 = arith.constant 0 : i32
    %c0_i32_1 = arith.constant 0 : i32
    return %c0_i32, %c0_i32_0 : i32, i32
  }
  func.func @transform_3(%arg0: i32) -> (i32, i32, i32) {
    %c0_i32 = arith.constant 0 : i32
    %c0_i32_0 = arith.constant 0 : i32
    %c0_i32_1 = arith.constant 0 : i32
    %c0_i32_2 = arith.constant 0 : i32
    return %c0_i32, %c0_i32_0, %c0_i32_1 : i32, i32, i32
  }
  func.func @transform_4(%arg0: i32) -> (i32, i32) {
    %c0_i32 = arith.constant 0 : i32
    %c0_i32_0 = arith.constant 0 : i32
    %c0_i32_1 = arith.constant 0 : i32
    return %c0_i32, %c0_i32_0 : i32, i32
  }
  func.func @transform_5(%arg0: i32) -> (i32, i32) {
    %c0_i32 = arith.constant 0 : i32
    %c0_i32_0 = arith.constant 0 : i32
    %c0_i32_1 = arith.constant 0 : i32
    return %c0_i32, %c0_i32_0 : i32, i32
  }
  func.func @transform_6(%arg0: i32) -> (i32, i32) {
    %c0_i32 = arith.constant 0 : i32
    %c0_i32_0 = arith.constant 0 : i32
    %c0_i32_1 = arith.constant 0 : i32
    return %c0_i32, %c0_i32_0 : i32, i32
  }
  func.func @transform_7(%arg0: i32) -> (i32, i32) {
    %c0_i32 = arith.constant 0 : i32
    %c0_i32_0 = arith.constant 0 : i32
    %c0_i32_1 = arith.constant 0 : i32
    return %c0_i32, %c0_i32_0 : i32, i32
  }
}

</mosaic_0001>

<bundles_post_ra>
// kernel: cnn_forward.3
= control target key start
LH: loop header
LB: loop body
LE: loop exit
PB: predicated region body
PF: predicated region fallthrough
CT: control target
= control target key end

     0   :  { %s4999_s12 = smov 0   ;;  %s5001_s13 = smov 0   ;;  %s6708_s0 = inlined_call_operand.vmem [shape: bf16[16,27], index: 0, kind: input, shape index: {}]   ;;  %s6709_s1 = inlined_call_operand.vmem [shape: bf16[4,27,6050], index: 1, kind: input, shape index: {}]   ;;  %s6710_s2 = inlined_call_operand.vmem [shape: f32[16,1], index: 2, kind: input, shape index: {}]   ;;  %s6711_s3 = inlined_call_operand.vmem [shape: bf16[16,6050], index: 3, kind: output, shape index: {}]  }
   0x1   :  { %s5003_s14 = smov 0  }
   0x2 LB: > { %s3705_s15 = sadd.s32 4294967295, %s4975_s14   ;;  %s5016_s16 = sadd.s32 1, %s4975_s14   ;;  %s4975_s14 = sphi %s5003_s14, %s6817_s14   ;;  %s4971_s13 = sphi %s5001_s13, %s6816_s13   ;;  %s4967_s12 = sphi %s4999_s12, %s6815_s12  }
   0x3   : > { %s38_s17 = ssub.s32 %s4975_s14, %s5016_s16  ;;  %s41_s18 = sadd.s32 1, %s4971_s13 }
   0x4   : > { %p39_p0 = scmp.eq.s32.totalorder %s38_s17, 0  ;;  %p48_p1 = scmp.ne.s32.totalorder %s4971_s13, %s4967_s12 }
   0x5   : > { %p49_p2 = scmp.eq.s32.totalorder %s4975_s14, 0  ;;  %p99_p3 = scmp.eq.s32.totalorder %s3705_s15, 1 }
   0x6   : > { %s5027_s19 = scalar_select %p39_p0, %s4971_s13, %s41_s18  }
   0x7   : > { %p50_p4 = por %p49_p2, %p48_p1  ;;  %p5029_p5 = por %p99_p3, %p48_p1 }
   0x8   : > { %p3708_p6 = scmp.ge.s32.totalorder %s4975_s14, 2 }
   0xa   : > { %127 = sbr.rel (%p3708_p6) target bundleno = 212 (0xd4), region = 24 }
   0xf   : > { %130 = sbr.rel (!%p50_p4) target bundleno = 212 (0xd4), region = 28  ;;  %s132_s21 = sand.u32 (%p50_p4), 1, %s4971_s13  }
  0x10   : > { %s4726_s22 = smul.u32 (%p50_p4), 96, %s4975_s14 }
  0x11   : > { %s4921_s23 = smul.u32 (%p50_p4), 1536, %s132_s21 }
  0x12   : > { %s5039_s26 = scalar_lea.vmem (%p50_p4), %s6709_s1, %s4726_s22 }
  0x13   : > { %v150_v0 = vld [vmem:[%s5039_s26] sm:$0xff] (%p50_p4)  ;;  %v152_v1 = vld [vmem:[%s5039_s26 + $0x8] sm:$0xff] (%p50_p4)  ;;  %v154_v2 = vld [vmem:[%s5039_s26 + $0x10] sm:$0xff] (%p50_p4)  ;;  %s5044_s27 = scalar_lea.vmem (%p50_p4), [#allocation2], %s4921_s23 }
  0x14   : > { %151 = vst [vmem:[%s5044_s27] sm:$0xff] %v150_v0  ;;  %v156_v3 = vld [vmem:[%s5039_s26 + $0x18] sm:$0xff]  ;;  %v158_v4 = vld [vmem:[%s5039_s26 + $0x20] sm:$0xff]  ;;  %v160_v5 = vld [vmem:[%s5039_s26 + $0x28] sm:$0xff] }
  0x15   : > { %153 = vst [vmem:[%s5044_s27 + $0x8] sm:$0xff] %v152_v1  ;;  %v162_v6 = vld [vmem:[%s5039_s26 + $0x30] sm:$0xff]  ;;  %v164_v7 = vld [vmem:[%s5039_s26 + $0x38] sm:$0xff]  ;;  %v166_v8 = vld [vmem:[%s5039_s26 + $0x40] sm:$0xff] }
  0x16   : > { %155 = vst [vmem:[%s5044_s27 + $0x10] sm:$0xff] %v154_v2  ;;  %v168_v9 = vld [vmem:[%s5039_s26 + $0x48] sm:$0xff]  ;;  %v170_v10 = vld [vmem:[%s5039_s26 + $0x50] sm:$0xff]  ;;  %v172_v11 = vld [vmem:[%s5039_s26 + $0x58] sm:$0xff] }
  0x17   : > { %157 = vst [vmem:[%s5044_s27 + $0x18] sm:$0xff] %v156_v3  ;;  %v174_v12 = vld [vmem:[%s5039_s26 + $0xc0] sm:$0xff]  ;;  %v176_v13 = vld [vmem:[%s5039_s26 + $0xc8] sm:$0xff]  ;;  %v178_v14 = vld [vmem:[%s5039_s26 + $0xd0] sm:$0xff] }
  0x18   : > { %159 = vst [vmem:[%s5044_s27 + $0x20] sm:$0xff] %v158_v4  ;;  %v180_v15 = vld [vmem:[%s5039_s26 + $0xd8] sm:$0xff]  ;;  %v182_v16 = vld [vmem:[%s5039_s26 + $0xe0] sm:$0xff]  ;;  %v184_v17 = vld [vmem:[%s5039_s26 + $0xe8] sm:$0xff] }
  0x19   : > { %161 = vst [vmem:[%s5044_s27 + $0x28] sm:$0xff] %v160_v5  ;;  %v186_v18 = vld [vmem:[%s5039_s26 + $0xf0] sm:$0xff]  ;;  %v188_v19 = vld [vmem:[%s5039_s26 + $0xf8] sm:$0xff]  ;;  %v190_v20 = vld [vmem:[%s5039_s26 + $0x100] sm:$0xff] }
  0x1a   : > { %163 = vst [vmem:[%s5044_s27 + $0x30] sm:$0xff] %v162_v6  ;;  %v192_v21 = vld [vmem:[%s5039_s26 + $0x108] sm:$0xff]  ;;  %v194_v22 = vld [vmem:[%s5039_s26 + $0x110] sm:$0xff]  ;;  %v196_v23 = vld [vmem:[%s5039_s26 + $0x118] sm:$0xff] }
  0x1b   : > { %165 = vst [vmem:[%s5044_s27 + $0x38] sm:$0xff] %v164_v7  ;;  %v198_v24 = vld [vmem:[%s5039_s26 + $0x180] sm:$0xff]  ;;  %v200_v25 = vld [vmem:[%s5039_s26 + $0x188] sm:$0xff]  ;;  %v202_v26 = vld [vmem:[%s5039_s26 + $0x190] sm:$0xff] }
  0x1c   : > { %167 = vst [vmem:[%s5044_s27 + $0x40] sm:$0xff] %v166_v8  ;;  %v204_v27 = vld [vmem:[%s5039_s26 + $0x198] sm:$0xff]  ;;  %v206_v28 = vld [vmem:[%s5039_s26 + $0x1a0] sm:$0xff]  ;;  %v208_v29 = vld [vmem:[%s5039_s26 + $0x1a8] sm:$0xff] }
  0x1d   : > { %169 = vst [vmem:[%s5044_s27 + $0x48] sm:$0xff] %v168_v9  ;;  %v210_v30 = vld [vmem:[%s5039_s26 + $0x1b0] sm:$0xff]  ;;  %v212_v31 = vld [vmem:[%s5039_s26 + $0x1b8] sm:$0xff]  ;;  %v214_v32 = vld [vmem:[%s5039_s26 + $0x1c0] sm:$0xff] }
  0x1e   : > { %171 = vst [vmem:[%s5044_s27 + $0x50] sm:$0xff] %v170_v10  ;;  %v216_v33 = vld [vmem:[%s5039_s26 + $0x1c8] sm:$0xff]  ;;  %v218_v34 = vld [vmem:[%s5039_s26 + $0x1d0] sm:$0xff]  ;;  %v220_v35 = vld [vmem:[%s5039_s26 + $0x1d8] sm:$0xff] }
  0x1f   : > { %173 = vst [vmem:[%s5044_s27 + $0x58] sm:$0xff] %v172_v11  ;;  %v222_v36 = vld [vmem:[%s5039_s26 + $0x240] sm:$0xff]  ;;  %v224_v37 = vld [vmem:[%s5039_s26 + $0x248] sm:$0xff]  ;;  %v226_v38 = vld [vmem:[%s5039_s26 + $0x250] sm:$0xff] }
  0x20   : > { %175 = vst [vmem:[%s5044_s27 + $0x60] sm:$0xff] %v174_v12  ;;  %v228_v39 = vld [vmem:[%s5039_s26 + $0x258] sm:$0xff]  ;;  %v230_v40 = vld [vmem:[%s5039_s26 + $0x260] sm:$0xff]  ;;  %v232_v41 = vld [vmem:[%s5039_s26 + $0x268] sm:$0xff] }
  0x21   : > { %177 = vst [vmem:[%s5044_s27 + $0x68] sm:$0xff] %v176_v13  ;;  %v234_v42 = vld [vmem:[%s5039_s26 + $0x270] sm:$0xff]  ;;  %v236_v43 = vld [vmem:[%s5039_s26 + $0x278] sm:$0xff]  ;;  %v238_v44 = vld [vmem:[%s5039_s26 + $0x280] sm:$0xff] }
  0x22   : > { %179 = vst [vmem:[%s5044_s27 + $0x70] sm:$0xff] %v178_v14  ;;  %v240_v45 = vld [vmem:[%s5039_s26 + $0x288] sm:$0xff]  ;;  %v242_v46 = vld [vmem:[%s5039_s26 + $0x290] sm:$0xff]  ;;  %v244_v47 = vld [vmem:[%s5039_s26 + $0x298] sm:$0xff] }
  0x23   : > { %181 = vst [vmem:[%s5044_s27 + $0x78] sm:$0xff] %v180_v15  ;;  %v246_v48 = vld [vmem:[%s5039_s26 + $0x300] sm:$0xff]  ;;  %v248_v49 = vld [vmem:[%s5039_s26 + $0x308] sm:$0xff]  ;;  %v250_v50 = vld [vmem:[%s5039_s26 + $0x310] sm:$0xff] }
  0x24   : > { %183 = vst [vmem:[%s5044_s27 + $0x80] sm:$0xff] %v182_v16  ;;  %v252_v51 = vld [vmem:[%s5039_s26 + $0x318] sm:$0xff]  ;;  %v254_v52 = vld [vmem:[%s5039_s26 + $0x320] sm:$0xff]  ;;  %v256_v53 = vld [vmem:[%s5039_s26 + $0x328] sm:$0xff] }
  0x25   : > { %185 = vst [vmem:[%s5044_s27 + $0x88] sm:$0xff] %v184_v17  ;;  %v258_v54 = vld [vmem:[%s5039_s26 + $0x330] sm:$0xff]  ;;  %v260_v55 = vld [vmem:[%s5039_s26 + $0x338] sm:$0xff]  ;;  %v262_v56 = vld [vmem:[%s5039_s26 + $0x340] sm:$0xff] }
  0x26   : > { %187 = vst [vmem:[%s5044_s27 + $0x90] sm:$0xff] %v186_v18  ;;  %v264_v57 = vld [vmem:[%s5039_s26 + $0x348] sm:$0xff]  ;;  %v266_v58 = vld [vmem:[%s5039_s26 + $0x350] sm:$0xff]  ;;  %v268_v59 = vld [vmem:[%s5039_s26 + $0x358] sm:$0xff] }
  0x27   : > { %189 = vst [vmem:[%s5044_s27 + $0x98] sm:$0xff] %v188_v19  ;;  %v270_v60 = vld [vmem:[%s5039_s26 + $0x3c0] sm:$0xff]  ;;  %v272_v61 = vld [vmem:[%s5039_s26 + $0x3c8] sm:$0xff]  ;;  %v274_v62 = vld [vmem:[%s5039_s26 + $0x3d0] sm:$0xff] }
  0x28   : > { %191 = vst [vmem:[%s5044_s27 + $0xa0] sm:$0xff] %v190_v20  ;;  %v276_v63 = vld [vmem:[%s5039_s26 + $0x3d8] sm:$0xff]  ;;  %v278_v0 = vld [vmem:[%s5039_s26 + $0x3e0] sm:$0xff]  ;;  %v280_v1 = vld [vmem:[%s5039_s26 + $0x3e8] sm:$0xff] }
  0x29   : > { %193 = vst [vmem:[%s5044_s27 + $0xa8] sm:$0xff] %v192_v21  ;;  %v282_v2 = vld [vmem:[%s5039_s26 + $0x3f0] sm:$0xff]  ;;  %v284_v3 = vld [vmem:[%s5039_s26 + $0x3f8] sm:$0xff]  ;;  %v286_v4 = vld [vmem:[%s5039_s26 + $0x400] sm:$0xff] }
  0x2a   : > { %195 = vst [vmem:[%s5044_s27 + $0xb0] sm:$0xff] %v194_v22  ;;  %v288_v5 = vld [vmem:[%s5039_s26 + $0x408] sm:$0xff]  ;;  %v290_v6 = vld [vmem:[%s5039_s26 + $0x410] sm:$0xff]  ;;  %v292_v7 = vld [vmem:[%s5039_s26 + $0x418] sm:$0xff] }
  0x2b   : > { %197 = vst [vmem:[%s5044_s27 + $0xb8] sm:$0xff] %v196_v23  ;;  %v294_v8 = vld [vmem:[%s5039_s26 + $0x480] sm:$0xff]  ;;  %v296_v9 = vld [vmem:[%s5039_s26 + $0x488] sm:$0xff]  ;;  %v298_v10 = vld [vmem:[%s5039_s26 + $0x490] sm:$0xff] }
  0x2c   : > { %199 = vst [vmem:[%s5044_s27 + $0xc0] sm:$0xff] %v198_v24  ;;  %v300_v11 = vld [vmem:[%s5039_s26 + $0x498] sm:$0xff]  ;;  %v302_v12 = vld [vmem:[%s5039_s26 + $0x4a0] sm:$0xff]  ;;  %v304_v13 = vld [vmem:[%s5039_s26 + $0x4a8] sm:$0xff] }
  0x2d   : > { %201 = vst [vmem:[%s5044_s27 + $0xc8] sm:$0xff] %v200_v25  ;;  %v306_v14 = vld [vmem:[%s5039_s26 + $0x4b0] sm:$0xff]  ;;  %v308_v15 = vld [vmem:[%s5039_s26 + $0x4b8] sm:$0xff]  ;;  %v310_v16 = vld [vmem:[%s5039_s26 + $0x4c0] sm:$0xff] }
  0x2e   : > { %203 = vst [vmem:[%s5044_s27 + $0xd0] sm:$0xff] %v202_v26  ;;  %v312_v17 = vld [vmem:[%s5039_s26 + $0x4c8] sm:$0xff]  ;;  %v314_v18 = vld [vmem:[%s5039_s26 + $0x4d0] sm:$0xff]  ;;  %v316_v19 = vld [vmem:[%s5039_s26 + $0x4d8] sm:$0xff] }
  0x2f   : > { %205 = vst [vmem:[%s5044_s27 + $0xd8] sm:$0xff] %v204_v27  ;;  %v318_v20 = vld [vmem:[%s5039_s26 + $0x540] sm:$0xff]  ;;  %v320_v21 = vld [vmem:[%s5039_s26 + $0x548] sm:$0xff]  ;;  %v322_v22 = vld [vmem:[%s5039_s26 + $0x550] sm:$0xff] }
  0x30   : > { %207 = vst [vmem:[%s5044_s27 + $0xe0] sm:$0xff] %v206_v28  ;;  %v324_v23 = vld [vmem:[%s5039_s26 + $0x558] sm:$0xff]  ;;  %v326_v24 = vld [vmem:[%s5039_s26 + $0x560] sm:$0xff]  ;;  %v328_v25 = vld [vmem:[%s5039_s26 + $0x568] sm:$0xff] }
  0x31   : > { %209 = vst [vmem:[%s5044_s27 + $0xe8] sm:$0xff] %v208_v29  ;;  %v330_v26 = vld [vmem:[%s5039_s26 + $0x570] sm:$0xff]  ;;  %v332_v27 = vld [vmem:[%s5039_s26 + $0x578] sm:$0xff]  ;;  %v334_v28 = vld [vmem:[%s5039_s26 + $0x580] sm:$0xff] }
  0x32   : > { %211 = vst [vmem:[%s5044_s27 + $0xf0] sm:$0xff] %v210_v30  ;;  %v336_v29 = vld [vmem:[%s5039_s26 + $0x588] sm:$0xff]  ;;  %v338_v30 = vld [vmem:[%s5039_s26 + $0x590] sm:$0xff] }
  0x33   : > { %213 = vst [vmem:[%s5044_s27 + $0xf8] sm:$0xff] %v212_v31  ;;  %v340_v31 = vld [vmem:[%s5039_s26 + $0x598] sm:$0xff] }
  0x34   : > { %215 = vst [vmem:[%s5044_s27 + $0x100] sm:$0xff] %v214_v32  ;;  %v342_v32 = vld [vmem:[%s5039_s26 + $0x600] sm:$0xff] }
  0x35   : > { %217 = vst [vmem:[%s5044_s27 + $0x108] sm:$0xff] %v216_v33  ;;  %v344_v33 = vld [vmem:[%s5039_s26 + $0x608] sm:$0xff] }
  0x36   : > { %219 = vst [vmem:[%s5044_s27 + $0x110] sm:$0xff] %v218_v34  ;;  %v346_v34 = vld [vmem:[%s5039_s26 + $0x610] sm:$0xff] }
  0x37   : > { %221 = vst [vmem:[%s5044_s27 + $0x118] sm:$0xff] %v220_v35  ;;  %v348_v35 = vld [vmem:[%s5039_s26 + $0x618] sm:$0xff] }
  0x38   : > { %223 = vst [vmem:[%s5044_s27 + $0x120] sm:$0xff] %v222_v36  ;;  %v350_v36 = vld [vmem:[%s5039_s26 + $0x620] sm:$0xff] }
  0x39   : > { %225 = vst [vmem:[%s5044_s27 + $0x128] sm:$0xff] %v224_v37  ;;  %v352_v37 = vld [vmem:[%s5039_s26 + $0x628] sm:$0xff] }
  0x3a   : > { %227 = vst [vmem:[%s5044_s27 + $0x130] sm:$0xff] %v226_v38  ;;  %v354_v38 = vld [vmem:[%s5039_s26 + $0x630] sm:$0xff] }
  0x3b   : > { %229 = vst [vmem:[%s5044_s27 + $0x138] sm:$0xff] %v228_v39  ;;  %v356_v39 = vld [vmem:[%s5039_s26 + $0x638] sm:$0xff] }
  0x3c   : > { %231 = vst [vmem:[%s5044_s27 + $0x140] sm:$0xff] %v230_v40  ;;  %v358_v40 = vld [vmem:[%s5039_s26 + $0x640] sm:$0xff] }
  0x3d   : > { %233 = vst [vmem:[%s5044_s27 + $0x148] sm:$0xff] %v232_v41  ;;  %v360_v41 = vld [vmem:[%s5039_s26 + $0x648] sm:$0xff] }
  0x3e   : > { %235 = vst [vmem:[%s5044_s27 + $0x150] sm:$0xff] %v234_v42  ;;  %v362_v42 = vld [vmem:[%s5039_s26 + $0x650] sm:$0xff] }
  0x3f   : > { %237 = vst [vmem:[%s5044_s27 + $0x158] sm:$0xff] %v236_v43  ;;  %v364_v43 = vld [vmem:[%s5039_s26 + $0x658] sm:$0xff] }
  0x40   : > { %239 = vst [vmem:[%s5044_s27 + $0x160] sm:$0xff] %v238_v44  ;;  %v366_v44 = vld [vmem:[%s5039_s26 + $0x6c0] sm:$0xff] }
  0x41   : > { %241 = vst [vmem:[%s5044_s27 + $0x168] sm:$0xff] %v240_v45  ;;  %v368_v45 = vld [vmem:[%s5039_s26 + $0x6c8] sm:$0xff] }
  0x42   : > { %243 = vst [vmem:[%s5044_s27 + $0x170] sm:$0xff] %v242_v46  ;;  %v370_v46 = vld [vmem:[%s5039_s26 + $0x6d0] sm:$0xff] }
  0x43   : > { %245 = vst [vmem:[%s5044_s27 + $0x178] sm:$0xff] %v244_v47  ;;  %v372_v47 = vld [vmem:[%s5039_s26 + $0x6d8] sm:$0xff] }
  0x44   : > { %247 = vst [vmem:[%s5044_s27 + $0x180] sm:$0xff] %v246_v48  ;;  %v374_v48 = vld [vmem:[%s5039_s26 + $0x6e0] sm:$0xff] }
  0x45   : > { %249 = vst [vmem:[%s5044_s27 + $0x188] sm:$0xff] %v248_v49  ;;  %v376_v49 = vld [vmem:[%s5039_s26 + $0x6e8] sm:$0xff] }
  0x46   : > { %251 = vst [vmem:[%s5044_s27 + $0x190] sm:$0xff] %v250_v50  ;;  %v378_v50 = vld [vmem:[%s5039_s26 + $0x6f0] sm:$0xff] }
  0x47   : > { %253 = vst [vmem:[%s5044_s27 + $0x198] sm:$0xff] %v252_v51  ;;  %v380_v51 = vld [vmem:[%s5039_s26 + $0x6f8] sm:$0xff] }
  0x48   : > { %255 = vst [vmem:[%s5044_s27 + $0x1a0] sm:$0xff] %v254_v52  ;;  %v382_v52 = vld [vmem:[%s5039_s26 + $0x700] sm:$0xff] }
  0x49   : > { %257 = vst [vmem:[%s5044_s27 + $0x1a8] sm:$0xff] %v256_v53  ;;  %v384_v53 = vld [vmem:[%s5039_s26 + $0x708] sm:$0xff] }
  0x4a   : > { %259 = vst [vmem:[%s5044_s27 + $0x1b0] sm:$0xff] %v258_v54  ;;  %v386_v54 = vld [vmem:[%s5039_s26 + $0x710] sm:$0xff] }
  0x4b   : > { %261 = vst [vmem:[%s5044_s27 + $0x1b8] sm:$0xff] %v260_v55  ;;  %v388_v55 = vld [vmem:[%s5039_s26 + $0x718] sm:$0xff] }
  0x4c   : > { %263 = vst [vmem:[%s5044_s27 + $0x1c0] sm:$0xff] %v262_v56  ;;  %v390_v56 = vld [vmem:[%s5039_s26 + $0x780] sm:$0xff] }
  0x4d   : > { %265 = vst [vmem:[%s5044_s27 + $0x1c8] sm:$0xff] %v264_v57  ;;  %v392_v57 = vld [vmem:[%s5039_s26 + $0x788] sm:$0xff] }
  0x4e   : > { %267 = vst [vmem:[%s5044_s27 + $0x1d0] sm:$0xff] %v266_v58  ;;  %v394_v58 = vld [vmem:[%s5039_s26 + $0x790] sm:$0xff] }
  0x4f   : > { %269 = vst [vmem:[%s5044_s27 + $0x1d8] sm:$0xff] %v268_v59  ;;  %v396_v59 = vld [vmem:[%s5039_s26 + $0x798] sm:$0xff] }
  0x50   : > { %271 = vst [vmem:[%s5044_s27 + $0x1e0] sm:$0xff] %v270_v60  ;;  %v398_v60 = vld [vmem:[%s5039_s26 + $0x7a0] sm:$0xff] }
  0x51   : > { %273 = vst [vmem:[%s5044_s27 + $0x1e8] sm:$0xff] %v272_v61  ;;  %v400_v61 = vld [vmem:[%s5039_s26 + $0x7a8] sm:$0xff] }
  0x52   : > { %275 = vst [vmem:[%s5044_s27 + $0x1f0] sm:$0xff] %v274_v62  ;;  %v402_v62 = vld [vmem:[%s5039_s26 + $0x7b0] sm:$0xff] }
  0x53   : > { %277 = vst [vmem:[%s5044_s27 + $0x1f8] sm:$0xff] %v276_v63  ;;  %v404_v63 = vld [vmem:[%s5039_s26 + $0x7b8] sm:$0xff] }
  0x54   : > { %279 = vst [vmem:[%s5044_s27 + $0x200] sm:$0xff] %v278_v0  ;;  %v406_v0 = vld [vmem:[%s5039_s26 + $0x7c0] sm:$0xff] }
  0x55   : > { %281 = vst [vmem:[%s5044_s27 + $0x208] sm:$0xff] %v280_v1  ;;  %v408_v1 = vld [vmem:[%s5039_s26 + $0x7c8] sm:$0xff] }
  0x56   : > { %283 = vst [vmem:[%s5044_s27 + $0x210] sm:$0xff] %v282_v2  ;;  %v410_v2 = vld [vmem:[%s5039_s26 + $0x7d0] sm:$0xff] }
  0x57   : > { %285 = vst [vmem:[%s5044_s27 + $0x218] sm:$0xff] %v284_v3  ;;  %v412_v3 = vld [vmem:[%s5039_s26 + $0x7d8] sm:$0xff] }
  0x58   : > { %287 = vst [vmem:[%s5044_s27 + $0x220] sm:$0xff] %v286_v4  ;;  %v414_v4 = vld [vmem:[%s5039_s26 + $0x840] sm:$0xff] }
  0x59   : > { %289 = vst [vmem:[%s5044_s27 + $0x228] sm:$0xff] %v288_v5  ;;  %v416_v5 = vld [vmem:[%s5039_s26 + $0x848] sm:$0xff] }
  0x5a   : > { %291 = vst [vmem:[%s5044_s27 + $0x230] sm:$0xff] %v290_v6  ;;  %v418_v6 = vld [vmem:[%s5039_s26 + $0x850] sm:$0xff] }
  0x5b   : > { %293 = vst [vmem:[%s5044_s27 + $0x238] sm:$0xff] %v292_v7  ;;  %v420_v7 = vld [vmem:[%s5039_s26 + $0x858] sm:$0xff] }
  0x5c   : > { %295 = vst [vmem:[%s5044_s27 + $0x240] sm:$0xff] %v294_v8  ;;  %v422_v8 = vld [vmem:[%s5039_s26 + $0x860] sm:$0xff] }
  0x5d   : > { %297 = vst [vmem:[%s5044_s27 + $0x248] sm:$0xff] %v296_v9  ;;  %v424_v9 = vld [vmem:[%s5039_s26 + $0x868] sm:$0xff] }
  0x5e   : > { %299 = vst [vmem:[%s5044_s27 + $0x250] sm:$0xff] %v298_v10  ;;  %v426_v10 = vld [vmem:[%s5039_s26 + $0x870] sm:$0xff] }
  0x5f   : > { %301 = vst [vmem:[%s5044_s27 + $0x258] sm:$0xff] %v300_v11  ;;  %v428_v11 = vld [vmem:[%s5039_s26 + $0x878] sm:$0xff] }
  0x60   : > { %303 = vst [vmem:[%s5044_s27 + $0x260] sm:$0xff] %v302_v12  ;;  %v430_v12 = vld [vmem:[%s5039_s26 + $0x880] sm:$0xff] }
  0x61   : > { %305 = vst [vmem:[%s5044_s27 + $0x268] sm:$0xff] %v304_v13  ;;  %v432_v13 = vld [vmem:[%s5039_s26 + $0x888] sm:$0xff] }
  0x62   : > { %307 = vst [vmem:[%s5044_s27 + $0x270] sm:$0xff] %v306_v14  ;;  %v434_v14 = vld [vmem:[%s5039_s26 + $0x890] sm:$0xff] }
  0x63   : > { %309 = vst [vmem:[%s5044_s27 + $0x278] sm:$0xff] %v308_v15  ;;  %v436_v15 = vld [vmem:[%s5039_s26 + $0x898] sm:$0xff] }
  0x64   : > { %311 = vst [vmem:[%s5044_s27 + $0x280] sm:$0xff] %v310_v16  ;;  %v438_v16 = vld [vmem:[%s5039_s26 + $0x900] sm:$0xff] }
  0x65   : > { %313 = vst [vmem:[%s5044_s27 + $0x288] sm:$0xff] %v312_v17  ;;  %v440_v17 = vld [vmem:[%s5039_s26 + $0x908] sm:$0xff] }
  0x66   : > { %315 = vst [vmem:[%s5044_s27 + $0x290] sm:$0xff] %v314_v18  ;;  %v442_v18 = vld [vmem:[%s5039_s26 + $0x910] sm:$0xff] }
  0x67   : > { %317 = vst [vmem:[%s5044_s27 + $0x298] sm:$0xff] %v316_v19  ;;  %v444_v19 = vld [vmem:[%s5039_s26 + $0x918] sm:$0xff] }
  0x68   : > { %319 = vst [vmem:[%s5044_s27 + $0x2a0] sm:$0xff] %v318_v20  ;;  %v446_v20 = vld [vmem:[%s5039_s26 + $0x920] sm:$0xff] }
  0x69   : > { %321 = vst [vmem:[%s5044_s27 + $0x2a8] sm:$0xff] %v320_v21  ;;  %v448_v21 = vld [vmem:[%s5039_s26 + $0x928] sm:$0xff] }
  0x6a   : > { %323 = vst [vmem:[%s5044_s27 + $0x2b0] sm:$0xff] %v322_v22  ;;  %v450_v22 = vld [vmem:[%s5039_s26 + $0x930] sm:$0xff] }
  0x6b   : > { %325 = vst [vmem:[%s5044_s27 + $0x2b8] sm:$0xff] %v324_v23  ;;  %v452_v23 = vld [vmem:[%s5039_s26 + $0x938] sm:$0xff] }
  0x6c   : > { %327 = vst [vmem:[%s5044_s27 + $0x2c0] sm:$0xff] %v326_v24  ;;  %v454_v24 = vld [vmem:[%s5039_s26 + $0x940] sm:$0xff] }
  0x6d   : > { %329 = vst [vmem:[%s5044_s27 + $0x2c8] sm:$0xff] %v328_v25  ;;  %v456_v25 = vld [vmem:[%s5039_s26 + $0x948] sm:$0xff] }
  0x6e   : > { %331 = vst [vmem:[%s5044_s27 + $0x2d0] sm:$0xff] %v330_v26  ;;  %v458_v26 = vld [vmem:[%s5039_s26 + $0x950] sm:$0xff] }
  0x6f   : > { %333 = vst [vmem:[%s5044_s27 + $0x2d8] sm:$0xff] %v332_v27  ;;  %v460_v27 = vld [vmem:[%s5039_s26 + $0x958] sm:$0xff] }
  0x70   : > { %335 = vst [vmem:[%s5044_s27 + $0x2e0] sm:$0xff] %v334_v28  ;;  %v462_v28 = vld [vmem:[%s5039_s26 + $0x9c0] sm:$0xff] }
  0x71   : > { %337 = vst [vmem:[%s5044_s27 + $0x2e8] sm:$0xff] %v336_v29  ;;  %v464_v29 = vld [vmem:[%s5039_s26 + $0x9c8] sm:$0xff] }
  0x72   : > { %339 = vst [vmem:[%s5044_s27 + $0x2f0] sm:$0xff] %v338_v30  ;;  %v466_v30 = vld [vmem:[%s5039_s26 + $0x9d0] sm:$0xff] }
  0x73   : > { %341 = vst [vmem:[%s5044_s27 + $0x2f8] sm:$0xff] %v340_v31  ;;  %v468_v31 = vld [vmem:[%s5039_s26 + $0x9d8] sm:$0xff] }
  0x74   : > { %343 = vst [vmem:[%s5044_s27 + $0x300] sm:$0xff] %v342_v32  ;;  %v470_v32 = vld [vmem:[%s5039_s26 + $0x9e0] sm:$0xff] }
  0x75   : > { %345 = vst [vmem:[%s5044_s27 + $0x308] sm:$0xff] %v344_v33  ;;  %v472_v33 = vld [vmem:[%s5039_s26 + $0x9e8] sm:$0xff] }
  0x76   : > { %347 = vst [vmem:[%s5044_s27 + $0x310] sm:$0xff] %v346_v34  ;;  %v474_v34 = vld [vmem:[%s5039_s26 + $0x9f0] sm:$0xff] }
  0x77   : > { %349 = vst [vmem:[%s5044_s27 + $0x318] sm:$0xff] %v348_v35  ;;  %v476_v35 = vld [vmem:[%s5039_s26 + $0x9f8] sm:$0xff] }
  0x78   : > { %351 = vst [vmem:[%s5044_s27 + $0x320] sm:$0xff] %v350_v36  ;;  %v478_v36 = vld [vmem:[%s5039_s26 + $0xa00] sm:$0xff] }
  0x79   : > { %353 = vst [vmem:[%s5044_s27 + $0x328] sm:$0xff] %v352_v37  ;;  %v480_v37 = vld [vmem:[%s5039_s26 + $0xa08] sm:$0xff] }
  0x7a   : > { %355 = vst [vmem:[%s5044_s27 + $0x330] sm:$0xff] %v354_v38  ;;  %v482_v38 = vld [vmem:[%s5039_s26 + $0xa10] sm:$0xff] }
  0x7b   : > { %357 = vst [vmem:[%s5044_s27 + $0x338] sm:$0xff] %v356_v39  ;;  %v484_v39 = vld [vmem:[%s5039_s26 + $0xa18] sm:$0xff] }
  0x7c   : > { %359 = vst [vmem:[%s5044_s27 + $0x340] sm:$0xff] %v358_v40  ;;  %v486_v40 = vld [vmem:[%s5039_s26 + $0xa80] sm:$0xff] }
  0x7d   : > { %361 = vst [vmem:[%s5044_s27 + $0x348] sm:$0xff] %v360_v41  ;;  %v488_v41 = vld [vmem:[%s5039_s26 + $0xa88] sm:$0xff] }
  0x7e   : > { %363 = vst [vmem:[%s5044_s27 + $0x350] sm:$0xff] %v362_v42  ;;  %v490_v42 = vld [vmem:[%s5039_s26 + $0xa90] sm:$0xff] }
  0x7f   : > { %365 = vst [vmem:[%s5044_s27 + $0x358] sm:$0xff] %v364_v43  ;;  %v492_v43 = vld [vmem:[%s5039_s26 + $0xa98] sm:$0xff] }
  0x80   : > { %367 = vst [vmem:[%s5044_s27 + $0x360] sm:$0xff] %v366_v44  ;;  %v494_v44 = vld [vmem:[%s5039_s26 + $0xaa0] sm:$0xff] }
  0x81   : > { %369 = vst [vmem:[%s5044_s27 + $0x368] sm:$0xff] %v368_v45  ;;  %v496_v45 = vld [vmem:[%s5039_s26 + $0xaa8] sm:$0xff] }
  0x82   : > { %371 = vst [vmem:[%s5044_s27 + $0x370] sm:$0xff] %v370_v46  ;;  %v498_v46 = vld [vmem:[%s5039_s26 + $0xab0] sm:$0xff] }
  0x83   : > { %373 = vst [vmem:[%s5044_s27 + $0x378] sm:$0xff] %v372_v47  ;;  %v500_v47 = vld [vmem:[%s5039_s26 + $0xab8] sm:$0xff] }
  0x84   : > { %375 = vst [vmem:[%s5044_s27 + $0x380] sm:$0xff] %v374_v48  ;;  %v502_v48 = vld [vmem:[%s5039_s26 + $0xac0] sm:$0xff] }
  0x85   : > { %377 = vst [vmem:[%s5044_s27 + $0x388] sm:$0xff] %v376_v49  ;;  %v504_v49 = vld [vmem:[%s5039_s26 + $0xac8] sm:$0xff] }
  0x86   : > { %379 = vst [vmem:[%s5044_s27 + $0x390] sm:$0xff] %v378_v50  ;;  %v506_v50 = vld [vmem:[%s5039_s26 + $0xad0] sm:$0xff] }
  0x87   : > { %381 = vst [vmem:[%s5044_s27 + $0x398] sm:$0xff] %v380_v51  ;;  %v508_v51 = vld [vmem:[%s5039_s26 + $0xad8] sm:$0xff] }
  0x88   : > { %383 = vst [vmem:[%s5044_s27 + $0x3a0] sm:$0xff] %v382_v52  ;;  %v510_v52 = vld [vmem:[%s5039_s26 + $0xb40] sm:$0xff] }
  0x89   : > { %385 = vst [vmem:[%s5044_s27 + $0x3a8] sm:$0xff] %v384_v53  ;;  %v512_v53 = vld [vmem:[%s5039_s26 + $0xb48] sm:$0xff] }
  0x8a   : > { %387 = vst [vmem:[%s5044_s27 + $0x3b0] sm:$0xff] %v386_v54  ;;  %v514_v54 = vld [vmem:[%s5039_s26 + $0xb50] sm:$0xff] }
  0x8b   : > { %389 = vst [vmem:[%s5044_s27 + $0x3b8] sm:$0xff] %v388_v55  ;;  %v516_v55 = vld [vmem:[%s5039_s26 + $0xb58] sm:$0xff] }
  0x8c   : > { %391 = vst [vmem:[%s5044_s27 + $0x3c0] sm:$0xff] %v390_v56  ;;  %v518_v56 = vld [vmem:[%s5039_s26 + $0xb60] sm:$0xff] }
  0x8d   : > { %393 = vst [vmem:[%s5044_s27 + $0x3c8] sm:$0xff] %v392_v57  ;;  %v520_v57 = vld [vmem:[%s5039_s26 + $0xb68] sm:$0xff] }
  0x8e   : > { %395 = vst [vmem:[%s5044_s27 + $0x3d0] sm:$0xff] %v394_v58  ;;  %v522_v58 = vld [vmem:[%s5039_s26 + $0xb70] sm:$0xff] }
  0x8f   : > { %397 = vst [vmem:[%s5044_s27 + $0x3d8] sm:$0xff] %v396_v59  ;;  %v524_v59 = vld [vmem:[%s5039_s26 + $0xb78] sm:$0xff] }
  0x90   : > { %399 = vst [vmem:[%s5044_s27 + $0x3e0] sm:$0xff] %v398_v60  ;;  %v526_v60 = vld [vmem:[%s5039_s26 + $0xb80] sm:$0xff] }
  0x91   : > { %401 = vst [vmem:[%s5044_s27 + $0x3e8] sm:$0xff] %v400_v61  ;;  %v528_v61 = vld [vmem:[%s5039_s26 + $0xb88] sm:$0xff] }
  0x92   : > { %403 = vst [vmem:[%s5044_s27 + $0x3f0] sm:$0xff] %v402_v62  ;;  %v530_v62 = vld [vmem:[%s5039_s26 + $0xb90] sm:$0xff] }
  0x93   : > { %405 = vst [vmem:[%s5044_s27 + $0x3f8] sm:$0xff] %v404_v63  ;;  %v532_v63 = vld [vmem:[%s5039_s26 + $0xb98] sm:$0xff] }
  0x94   : > { %407 = vst [vmem:[%s5044_s27 + $0x400] sm:$0xff] %v406_v0 }
  0x95   : > { %409 = vst [vmem:[%s5044_s27 + $0x408] sm:$0xff] %v408_v1 }
  0x96   : > { %411 = vst [vmem:[%s5044_s27 + $0x410] sm:$0xff] %v410_v2 }
  0x97   : > { %413 = vst [vmem:[%s5044_s27 + $0x418] sm:$0xff] %v412_v3 }
  0x98   : > { %415 = vst [vmem:[%s5044_s27 + $0x420] sm:$0xff] %v414_v4 }
  0x99   : > { %417 = vst [vmem:[%s5044_s27 + $0x428] sm:$0xff] %v416_v5 }
  0x9a   : > { %419 = vst [vmem:[%s5044_s27 + $0x430] sm:$0xff] %v418_v6 }
  0x9b   : > { %421 = vst [vmem:[%s5044_s27 + $0x438] sm:$0xff] %v420_v7 }
  0x9c   : > { %423 = vst [vmem:[%s5044_s27 + $0x440] sm:$0xff] %v422_v8 }
  0x9d   : > { %425 = vst [vmem:[%s5044_s27 + $0x448] sm:$0xff] %v424_v9 }
  0x9e   : > { %427 = vst [vmem:[%s5044_s27 + $0x450] sm:$0xff] %v426_v10 }
  0x9f   : > { %429 = vst [vmem:[%s5044_s27 + $0x458] sm:$0xff] %v428_v11 }
  0xa0   : > { %431 = vst [vmem:[%s5044_s27 + $0x460] sm:$0xff] %v430_v12 }
  0xa1   : > { %433 = vst [vmem:[%s5044_s27 + $0x468] sm:$0xff] %v432_v13 }
  0xa2   : > { %435 = vst [vmem:[%s5044_s27 + $0x470] sm:$0xff] %v434_v14 }
  0xa3   : > { %437 = vst [vmem:[%s5044_s27 + $0x478] sm:$0xff] %v436_v15 }
  0xa4   : > { %439 = vst [vmem:[%s5044_s27 + $0x480] sm:$0xff] %v438_v16 }
  0xa5   : > { %441 = vst [vmem:[%s5044_s27 + $0x488] sm:$0xff] %v440_v17 }
  0xa6   : > { %443 = vst [vmem:[%s5044_s27 + $0x490] sm:$0xff] %v442_v18 }
  0xa7   : > { %445 = vst [vmem:[%s5044_s27 + $0x498] sm:$0xff] %v444_v19 }
  0xa8   : > { %447 = vst [vmem:[%s5044_s27 + $0x4a0] sm:$0xff] %v446_v20 }
  0xa9   : > { %449 = vst [vmem:[%s5044_s27 + $0x4a8] sm:$0xff] %v448_v21 }
  0xaa   : > { %451 = vst [vmem:[%s5044_s27 + $0x4b0] sm:$0xff] %v450_v22 }
  0xab   : > { %453 = vst [vmem:[%s5044_s27 + $0x4b8] sm:$0xff] %v452_v23 }
  0xac   : > { %455 = vst [vmem:[%s5044_s27 + $0x4c0] sm:$0xff] %v454_v24 }
  0xad   : > { %457 = vst [vmem:[%s5044_s27 + $0x4c8] sm:$0xff] %v456_v25 }
  0xae   : > { %459 = vst [vmem:[%s5044_s27 + $0x4d0] sm:$0xff] %v458_v26 }
  0xaf   : > { %461 = vst [vmem:[%s5044_s27 + $0x4d8] sm:$0xff] %v460_v27 }
  0xb0   : > { %463 = vst [vmem:[%s5044_s27 + $0x4e0] sm:$0xff] %v462_v28 }
  0xb1   : > { %465 = vst [vmem:[%s5044_s27 + $0x4e8] sm:$0xff] %v464_v29 }
  0xb2   : > { %467 = vst [vmem:[%s5044_s27 + $0x4f0] sm:$0xff] %v466_v30 }
  0xb3   : > { %469 = vst [vmem:[%s5044_s27 + $0x4f8] sm:$0xff] %v468_v31 }
  0xb4   : > { %471 = vst [vmem:[%s5044_s27 + $0x500] sm:$0xff] %v470_v32 }
  0xb5   : > { %473 = vst [vmem:[%s5044_s27 + $0x508] sm:$0xff] %v472_v33 }
  0xb6   : > { %475 = vst [vmem:[%s5044_s27 + $0x510] sm:$0xff] %v474_v34 }
  0xb7   : > { %477 = vst [vmem:[%s5044_s27 + $0x518] sm:$0xff] %v476_v35 }
  0xb8   : > { %479 = vst [vmem:[%s5044_s27 + $0x520] sm:$0xff] %v478_v36 }
  0xb9   : > { %481 = vst [vmem:[%s5044_s27 + $0x528] sm:$0xff] %v480_v37 }
  0xba   : > { %483 = vst [vmem:[%s5044_s27 + $0x530] sm:$0xff] %v482_v38 }
  0xbb   : > { %485 = vst [vmem:[%s5044_s27 + $0x538] sm:$0xff] %v484_v39 }
  0xbc   : > { %487 = vst [vmem:[%s5044_s27 + $0x540] sm:$0xff] %v486_v40 }
  0xbd   : > { %489 = vst [vmem:[%s5044_s27 + $0x548] sm:$0xff] %v488_v41 }
  0xbe   : > { %491 = vst [vmem:[%s5044_s27 + $0x550] sm:$0xff] %v490_v42 }
  0xbf   : > { %493 = vst [vmem:[%s5044_s27 + $0x558] sm:$0xff] %v492_v43 }
  0xc0   : > { %495 = vst [vmem:[%s5044_s27 + $0x560] sm:$0xff] %v494_v44 }
  0xc1   : > { %497 = vst [vmem:[%s5044_s27 + $0x568] sm:$0xff] %v496_v45 }
  0xc2   : > { %499 = vst [vmem:[%s5044_s27 + $0x570] sm:$0xff] %v498_v46 }
  0xc3   : > { %501 = vst [vmem:[%s5044_s27 + $0x578] sm:$0xff] %v500_v47 }
  0xc4   : > { %503 = vst [vmem:[%s5044_s27 + $0x580] sm:$0xff] %v502_v48 }
  0xc5   : > { %505 = vst [vmem:[%s5044_s27 + $0x588] sm:$0xff] %v504_v49 }
  0xc6   : > { %507 = vst [vmem:[%s5044_s27 + $0x590] sm:$0xff] %v506_v50 }
  0xc7   : > { %509 = vst [vmem:[%s5044_s27 + $0x598] sm:$0xff] %v508_v51 }
  0xc8   : > { %511 = vst [vmem:[%s5044_s27 + $0x5a0] sm:$0xff] %v510_v52 }
  0xc9   : > { %513 = vst [vmem:[%s5044_s27 + $0x5a8] sm:$0xff] %v512_v53 }
  0xca   : > { %515 = vst [vmem:[%s5044_s27 + $0x5b0] sm:$0xff] %v514_v54 }
  0xcb   : > { %517 = vst [vmem:[%s5044_s27 + $0x5b8] sm:$0xff] %v516_v55 }
  0xcc   : > { %519 = vst [vmem:[%s5044_s27 + $0x5c0] sm:$0xff] %v518_v56 }
  0xcd   : > { %521 = vst [vmem:[%s5044_s27 + $0x5c8] sm:$0xff] %v520_v57 }
  0xce   : > { %523 = vst [vmem:[%s5044_s27 + $0x5d0] sm:$0xff] %v522_v58 }
  0xcf   : > { %525 = vst [vmem:[%s5044_s27 + $0x5d8] sm:$0xff] %v524_v59 }
  0xd0   : > { %527 = vst [vmem:[%s5044_s27 + $0x5e0] sm:$0xff] %v526_v60 }
  0xd1   : > { %529 = vst [vmem:[%s5044_s27 + $0x5e8] sm:$0xff] %v528_v61 }
  0xd2   : > { %531 = vst [vmem:[%s5044_s27 + $0x5f0] sm:$0xff] %v530_v62 }
  0xd3   : > { %533 = vst [vmem:[%s5044_s27 + $0x5f8] sm:$0xff] %v532_v63 }
  0xd4 PF: > { %p3710_p7 = scmp.ge.s32.totalorder %s4975_s14, 1  ;;  %p538_p8 = scmp.lt.s32.totalorder %s4975_s14, 3 }
  0xd6   : > { %p539_p9 = pnand %p3710_p7, %p538_p8 }
  0xd8   : > { %542 = sbr.rel (%p539_p9) target bundleno = 765 (0x2fd), region = 51 }
  0xdd   : > { %s545_s28 = sand.u32 1, %s4967_s12   ;;  %vm845_vm0 = vcmask 1044480   ;;  %vm846_vm1 = vcmask 1045504   ;;  %v4977_v0 = vmov 65535   ;;  %vm841_vm2 = vcmask 220160   ;;  %v5461_v32 = vld [vmem:[%s6708_s0] sm:$0xff] }
  0xde   : > { %s4922_s29 = smul.u32 1536, %s545_s28  ;;  %v847_v1 = vsel %vm845_vm0, 4294967295, %v4977_v0 }
  0xdf   : > { %v5432_v2 = vsel %vm846_vm1, %v847_v1, 0  ;;  %s4923_s21 = smul.u32 192, %s545_s28 }
  0xe0   : > { %s5434_s30 = scalar_lea.vmem [#allocation2], %s4922_s29  ;;  %s4920_s22 = smul.u32 (%p5029_p5), 96, %s3705_s15 }
  0xe1   : > { %v3813_v3 = vld [vmem:[%s5434_s30 + $0xc0] sm:$0xf]  ;;  %v4752_v5 = vld [vmem:[%s5434_s30 + $0xc4] sm:$0xf]  ;;  %v3821_v8 = vld [vmem:[%s5434_s30 + $0xc8] sm:$0xf] }
  0xe2   : > { %v4764_v4 = vld [vmem:[%s5434_s30 + $0x11c] sm:$0x30]  ;;  %v3815_v7 = vld [vmem:[%s5434_s30 + $0x120] sm:$0x30]  ;;  %v4765_v9 = vld [vmem:[%s5434_s30 + $0x124] sm:$0x30]  ;;  %s6650_s20 = scalar_lea.vmem (%p5029_p5), %s6711_s3, %s4920_s22 }
  0xe3   : > { %v3814_v6 = vor.u32 %v4764_v4, %v3813_v3  ;;  %v3818_v10 = vor.u32 %v4752_v5, %v3815_v7  ;;  %v3822_v11 = vor.u32 %v4765_v9, %v3821_v8  ;;  %v4753_v12 = vld [vmem:[%s5434_s30 + $0xcc] sm:$0xf]  ;;  %v3717_v14 = vld [vmem:[%s5434_s30] sm:$0xf]  ;;  %v4728_v18 = vld [vmem:[%s5434_s30 + $0x4] sm:$0xf] }
  0xe4   : > { %v3823_v13 = vld [vmem:[%s5434_s30 + $0x128] sm:$0x30]  ;;  %v4740_v17 = vld [vmem:[%s5434_s30 + $0x5c] sm:$0xf0]  ;;  %v3719_v19 = vld [vmem:[%s5434_s30 + $0x60] sm:$0xf0] }
  0xe5   : > { %v850_v15 = vand.u32 %v3814_v6, %v5432_v2  ;;  %v3826_v16 = vor.u32 %v4753_v12, %v3823_v13  ;;  %v853_v20 = vand.u32 %v3818_v10, %v5432_v2  ;;  %v856_v21 = vand.u32 %v3822_v11, %v5432_v2  ;;  %v3725_v22 = vld [vmem:[%s5434_s30 + $0x8] sm:$0xf]  ;;  %v4729_v24 = vld [vmem:[%s5434_s30 + $0xc] sm:$0xf]  ;;  %v3837_v28 = vld [vmem:[%s5434_s30 + $0xd8] sm:$0xf] }
  0xe6   : > { %v4741_v23 = vld [vmem:[%s5434_s30 + $0x64] sm:$0xf0]  ;;  %v3718_v26 = vor.u32 %v4740_v17, %v3717_v14  ;;  %v3727_v27 = vld [vmem:[%s5434_s30 + $0x68] sm:$0xf0]  ;;  %v4767_v29 = vld [vmem:[%s5434_s30 + $0x134] sm:$0x30]  ;;  %v3722_v30 = vor.u32 %v4728_v18, %v3719_v19 }
  0xe7   : > { %927 = vmatpush.bf16.msra.mxu0 %v850_v15  ;;  %v859_v25 = vand.u32 %v3826_v16, %v5432_v2  ;;  %941 = vmatpush.bf16.msra.mxu1 %v853_v20  ;;  %v3726_v31 = vor.u32 %v4741_v23, %v3725_v22  ;;  %v3838_v33 = vor.u32 %v4767_v29, %v3837_v28  ;;  %v4755_v34 = vld [vmem:[%s5434_s30 + $0xdc] sm:$0xf]  ;;  %v3829_v36 = vld [vmem:[%s5434_s30 + $0xd0] sm:$0xf]  ;;  %v4754_v40 = vld [vmem:[%s5434_s30 + $0xd4] sm:$0xf] }
  0xe8   : > { %955 = vmatpush.bf16.msra.mxu2 %v856_v21  ;;  %v3839_v35 = vld [vmem:[%s5434_s30 + $0x138] sm:$0x30]  ;;  %v3730_v37 = vor.u32 %v4729_v24, %v3727_v27  ;;  %v4766_v39 = vld [vmem:[%s5434_s30 + $0x12c] sm:$0x30]  ;;  %v3831_v41 = vld [vmem:[%s5434_s30 + $0x130] sm:$0x30] }
  0xe9   : > { %969 = vmatpush.bf16.msra.mxu3 %v859_v25  ;;  %v3842_v38 = vor.u32 %v4755_v34, %v3839_v35  ;;  %v868_v42 = vand.u32 %v3838_v33, %v5432_v2  ;;  %v3830_v43 = vor.u32 %v4766_v39, %v3829_v36  ;;  %v3834_v44 = vor.u32 %v4754_v40, %v3831_v41  ;;  %v3741_v45 = vld [vmem:[%s5434_s30 + $0x18] sm:$0xf]  ;;  %v4731_v47 = vld [vmem:[%s5434_s30 + $0x1c] sm:$0xf]  ;;  %v3733_v50 = vld [vmem:[%s5434_s30 + $0x10] sm:$0xf] }
  0xea   : > { %v4743_v46 = vld [vmem:[%s5434_s30 + $0x74] sm:$0xf0]  ;;  %v3743_v49 = vld [vmem:[%s5434_s30 + $0x78] sm:$0xf0]  ;;  %v4742_v51 = vld [vmem:[%s5434_s30 + $0x6c] sm:$0xf0] }
  0xeb   : > { %928 = vmatpush.bf16.msra.mxu0 %v3718_v26  ;;  %v871_v48 = vand.u32 %v3842_v38, %v5432_v2  ;;  %942 = vmatpush.bf16.msra.mxu1 %v3722_v30  ;;  %v862_v52 = vand.u32 %v3830_v43, %v5432_v2  ;;  %v4730_v53 = vld [vmem:[%s5434_s30 + $0x14] sm:$0xf]  ;;  %v3853_v55 = vld [vmem:[%s5434_s30 + $0xe8] sm:$0xf]  ;;  %v865_v56 = vand.u32 %v3834_v44, %v5432_v2  ;;  %v4757_v59 = vld [vmem:[%s5434_s30 + $0xec] sm:$0xf] }
  0xec   : > { %956 = vmatpush.bf16.msra.mxu2 %v3726_v31  ;;  %v3735_v54 = vld [vmem:[%s5434_s30 + $0x70] sm:$0xf0]  ;;  %v3742_v57 = vor.u32 %v4743_v46, %v3741_v45  ;;  %v4769_v58 = vld [vmem:[%s5434_s30 + $0x144] sm:$0x30]  ;;  %v3855_v60 = vld [vmem:[%s5434_s30 + $0x148] sm:$0x30]  ;;  %v3746_v61 = vor.u32 %v4731_v47, %v3743_v49  ;;  %v3734_v4 = vor.u32 %v4742_v51, %v3733_v50 }
  0xed   : > { %970 = vmatpush.bf16.msra.mxu3 %v3730_v37  ;;  %v3854_v62 = vor.u32 %v4769_v58, %v3853_v55  ;;  %v3858_v63 = vor.u32 %v4757_v59, %v3855_v60  ;;  %v3845_v0 = vld [vmem:[%s5434_s30 + $0xe0] sm:$0xf]  ;;  %v4756_v3 = vld [vmem:[%s5434_s30 + $0xe4] sm:$0xf]  ;;  %v3757_v7 = vld [vmem:[%s5434_s30 + $0x28] sm:$0xf]  ;;  %v3738_v14 = vor.u32 %v4730_v53, %v3735_v54 }
  0xee   : > { %3907 = vmatmul.msk.bf16.vlgmr.msra.gmra.mxu0 %vm841_vm2, %v5461_v32  ;;  %v4768_v1 = vld [vmem:[%s5434_s30 + $0x13c] sm:$0x30]  ;;  %3908 = vmatmul.msk.bf16.vlgmr.msra.gmra.mxu1 %vm841_vm2, %v5461_v32  ;;  %v3847_v6 = vld [vmem:[%s5434_s30 + $0x140] sm:$0x30]  ;;  %v4745_v8 = vld [vmem:[%s5434_s30 + $0x84] sm:$0xf0] }
  0xef   : > { %3909 = vmatmul.msk.bf16.vlgmr.msra.gmra.mxu2 %vm841_vm2, %v5461_v32  ;;  %v3846_v5 = vor.u32 %v4768_v1, %v3845_v0  ;;  %983 = vmatpush.bf16.msrb.mxu0 %v862_v52  ;;  %v880_v9 = vand.u32 %v3854_v62, %v5432_v2  ;;  %v883_v10 = vand.u32 %v3858_v63, %v5432_v2  ;;  %v4733_v12 = vld [vmem:[%s5434_s30 + $0x2c] sm:$0xf]  ;;  %v3749_v18 = vld [vmem:[%s5434_s30 + $0x20] sm:$0xf]  ;;  %v4732_v21 = vld [vmem:[%s5434_s30 + $0x24] sm:$0xf] }
  0xf0   : > { %1011 = vmatpush.bf16.msrb.mxu2 %v868_v42  ;;  %3910 = vmatmul.msk.bf16.vlgmr.msra.gmra.mxu3 %vm841_vm2, %v5461_v32  ;;  %v3850_v11 = vor.u32 %v4756_v3, %v3847_v6  ;;  %v3759_v13 = vld [vmem:[%s5434_s30 + $0x88] sm:$0xf0]  ;;  %v3758_v17 = vor.u32 %v4745_v8, %v3757_v7  ;;  %v4744_v19 = vld [vmem:[%s5434_s30 + $0x7c] sm:$0xf0]  ;;  %v3751_v22 = vld [vmem:[%s5434_s30 + $0x80] sm:$0xf0] }
  0xf1   : > { %1025 = vmatpush.bf16.msrb.mxu3 %v871_v48  ;;  %997 = vmatpush.bf16.msrb.mxu1 %v865_v56  ;;  %v874_v15 = vand.u32 %v3846_v5, %v5432_v2  ;;  %v3762_v20 = vor.u32 %v4733_v12, %v3759_v13  ;;  %v3750_v23 = vor.u32 %v4744_v19, %v3749_v18  ;;  %v3869_v24 = vld [vmem:[%s5434_s30 + $0xf8] sm:$0xf]  ;;  %v4759_v26 = vld [vmem:[%s5434_s30 + $0xfc] sm:$0xf]  ;;  %v3861_v29 = vld [vmem:[%s5434_s30 + $0xf0] sm:$0xf] }
  0xf2   : > { %v877_v16 = vand.u32 %v3850_v11, %v5432_v2  ;;  %v4771_v25 = vld [vmem:[%s5434_s30 + $0x154] sm:$0x30]  ;;  %v3754_v27 = vor.u32 %v4732_v21, %v3751_v22  ;;  %v3871_v28 = vld [vmem:[%s5434_s30 + $0x158] sm:$0x30]  ;;  %v4770_v30 = vld [vmem:[%s5434_s30 + $0x14c] sm:$0x30] }
  0xf3   : > { %984 = vmatpush.bf16.msrb.mxu0 %v3734_v4  ;;  %v4758_v31 = vld [vmem:[%s5434_s30 + $0xf4] sm:$0xf]  ;;  %v3870_v34 = vor.u32 %v4771_v25, %v3869_v24  ;;  %v3874_v35 = vor.u32 %v4759_v26, %v3871_v28  ;;  %v3862_v36 = vor.u32 %v4770_v30, %v3861_v29  ;;  %v3773_v41 = vld [vmem:[%s5434_s30 + $0x38] sm:$0xf]  ;;  %v4735_v43 = vld [vmem:[%s5434_s30 + $0x3c] sm:$0xf] }
  0xf4   : > { %1012 = vmatpush.bf16.msrb.mxu2 %v3742_v57  ;;  %v3863_v33 = vld [vmem:[%s5434_s30 + $0x150] sm:$0x30]  ;;  %v4747_v42 = vld [vmem:[%s5434_s30 + $0x94] sm:$0xf0]  ;;  %v3775_v45 = vld [vmem:[%s5434_s30 + $0x98] sm:$0xf0] }
  0xf5   : > { %1026 = vmatpush.bf16.msrb.mxu3 %v3746_v61  ;;  %998 = vmatpush.bf16.msrb.mxu1 %v3738_v14  ;;  %v3866_v37 = vor.u32 %v4758_v31, %v3863_v33  ;;  %v892_v38 = vand.u32 %v3870_v34, %v5432_v2  ;;  %v895_v39 = vand.u32 %v3874_v35, %v5432_v2  ;;  %v3765_v46 = vld [vmem:[%s5434_s30 + $0x30] sm:$0xf]  ;;  %v4734_v48 = vld [vmem:[%s5434_s30 + $0x34] sm:$0xf]  ;;  %v3885_v54 = vld [vmem:[%s5434_s30 + $0x108] sm:$0xf] }
  0xf6   : > { %v886_v40 = vand.u32 %v3862_v36, %v5432_v2  ;;  %v4746_v47 = vld [vmem:[%s5434_s30 + $0x8c] sm:$0xf0]  ;;  %v3767_v49 = vld [vmem:[%s5434_s30 + $0x90] sm:$0xf0]  ;;  %v3774_v50 = vor.u32 %v4747_v42, %v3773_v41  ;;  %v3778_v51 = vor.u32 %v4735_v43, %v3775_v45  ;;  %v4773_v55 = vld [vmem:[%s5434_s30 + $0x164] sm:$0x30] }
  0xf7   : > { %1039 = vmatpush.bf16.msra.mxu0 %v874_v15  ;;  %v889_v44 = vand.u32 %v3866_v37, %v5432_v2  ;;  %v3766_v52 = vor.u32 %v4746_v47, %v3765_v46  ;;  %v3770_v53 = vor.u32 %v4734_v48, %v3767_v49  ;;  %v4761_v56 = vld [vmem:[%s5434_s30 + $0x10c] sm:$0xf]  ;;  %v3877_v58 = vld [vmem:[%s5434_s30 + $0x100] sm:$0xf]  ;;  %v4760_v60 = vld [vmem:[%s5434_s30 + $0x104] sm:$0xf]  ;;  %v3886_v62 = vor.u32 %v4773_v55, %v3885_v54 }
  0xf8   : > { %1067 = vmatpush.bf16.msra.mxu2 %v880_v9  ;;  %v3887_v57 = vld [vmem:[%s5434_s30 + $0x168] sm:$0x30]  ;;  %v4772_v59 = vld [vmem:[%s5434_s30 + $0x15c] sm:$0x30]  ;;  %v3879_v61 = vld [vmem:[%s5434_s30 + $0x160] sm:$0x30] }
  0xf9   : > { %1081 = vmatpush.bf16.msra.mxu3 %v883_v10  ;;  %1053 = vmatpush.bf16.msra.mxu1 %v877_v16  ;;  %v3890_v63 = vor.u32 %v4761_v56, %v3887_v57  ;;  %v3878_v0 = vor.u32 %v4772_v59, %v3877_v58  ;;  %v3882_v1 = vor.u32 %v4760_v60, %v3879_v61  ;;  %v3789_v6 = vld [vmem:[%s5434_s30 + $0x48] sm:$0xf]  ;;  %v4737_v8 = vld [vmem:[%s5434_s30 + $0x4c] sm:$0xf]  ;;  %v3781_v11 = vld [vmem:[%s5434_s30 + $0x40] sm:$0xf] }
  0xfa   : > { %v904_v3 = vand.u32 %v3886_v62, %v5432_v2  ;;  %v4749_v7 = vld [vmem:[%s5434_s30 + $0xa4] sm:$0xf0]  ;;  %v3791_v10 = vld [vmem:[%s5434_s30 + $0xa8] sm:$0xf0]  ;;  %v4748_v12 = vld [vmem:[%s5434_s30 + $0x9c] sm:$0xf0] }
  0xfb   : > { %1040 = vmatpush.bf16.msra.mxu0 %v3750_v23  ;;  %v907_v4 = vand.u32 %v3890_v63, %v5432_v2  ;;  %v898_v5 = vand.u32 %v3878_v0, %v5432_v2  ;;  %v901_v9 = vand.u32 %v3882_v1, %v5432_v2  ;;  %v4736_v13 = vld [vmem:[%s5434_s30 + $0x44] sm:$0xf]  ;;  %v3790_v15 = vor.u32 %v4749_v7, %v3789_v6  ;;  %v3901_v19 = vld [vmem:[%s5434_s30 + $0x118] sm:$0xf]  ;;  %v4763_v21 = vld [vmem:[%s5434_s30 + $0x11c] sm:$0xf] }
  0xfc   : > { %1068 = vmatpush.bf16.msra.mxu2 %v3758_v17  ;;  %v3783_v14 = vld [vmem:[%s5434_s30 + $0xa0] sm:$0xf0]  ;;  %v3794_v16 = vor.u32 %v4737_v8, %v3791_v10  ;;  %v3782_v17 = vor.u32 %v4748_v12, %v3781_v11  ;;  %v3903_v22 = vld [vmem:[%s5434_s30 + $0x178] sm:$0x30]  ;;  %v3893_v23 = vld [vmem:[%s5434_s30 + $0x110] sm:$0xf] }
  0xfd   : > { %1082 = vmatpush.bf16.msra.mxu3 %v3762_v20  ;;  %1054 = vmatpush.bf16.msra.mxu1 %v3754_v27  ;;  %v3786_v18 = vor.u32 %v4736_v13, %v3783_v14  ;;  %v4775_v20 = vld [vmem:[%s5434_s30 + $0x174] sm:$0x30]  ;;  %v4774_v24 = vld [vmem:[%s5434_s30 + $0x16c] sm:$0x30]  ;;  %v4762_v25 = vld [vmem:[%s5434_s30 + $0x114] sm:$0xf]  ;;  %v3906_v28 = vor.u32 %v4763_v21, %v3903_v22 }
  0xfe   : > { %3911 = vmatmul.msk.bf16.vlgmr.msrb.gmra.mxu0 %vm841_vm2, %v5461_v32  ;;  %3912 = vmatmul.msk.bf16.vlgmr.msrb.gmra.mxu1 %vm841_vm2, %v5461_v32  ;;  %v3895_v26 = vld [vmem:[%s5434_s30 + $0x170] sm:$0x30]  ;;  %v3902_v27 = vor.u32 %v4775_v20, %v3901_v19  ;;  %v3894_v29 = vor.u32 %v4774_v24, %v3893_v23  ;;  %v3805_v35 = vld [vmem:[%s5434_s30 + $0x58] sm:$0xf]  ;;  %v4739_v37 = vld [vmem:[%s5434_s30 + $0x5c] sm:$0xf] }
  0xff   : > { %3913 = vmatmul.msk.bf16.vlgmr.msrb.gmra.mxu2 %vm841_vm2, %v5461_v32  ;;  %1095 = vmatpush.bf16.msrb.mxu0 %v886_v40  ;;  %v3898_v30 = vor.u32 %v4762_v25, %v3895_v26  ;;  %v919_v33 = vand.u32 %v3906_v28, %v5432_v2  ;;  %v4751_v36 = vld [vmem:[%s5434_s30 + $0xb4] sm:$0xf0]  ;;  %v3797_v40 = vld [vmem:[%s5434_s30 + $0x50] sm:$0xf]  ;;  %v4738_v42 = vld [vmem:[%s5434_s30 + $0x54] sm:$0xf] }
 0x100   : > { %3914 = vmatmul.msk.bf16.vlgmr.msrb.gmra.mxu3 %vm841_vm2, %v5461_v32  ;;  %1123 = vmatpush.bf16.msrb.mxu2 %v892_v38  ;;  %v916_v31 = vand.u32 %v3902_v27, %v5432_v2  ;;  %v910_v34 = vand.u32 %v3894_v29, %v5432_v2  ;;  %v4750_v41 = vld [vmem:[%s5434_s30 + $0xac] sm:$0xf0]  ;;  %v3799_v43 = vld [vmem:[%s5434_s30 + $0xb0] sm:$0xf0]  ;;  %v4085_v48 = vld [vmem:[%s5434_s30 + $0x248] sm:$0xf] }
 0x101   : > { %1137 = vmatpush.bf16.msrb.mxu3 %v895_v39  ;;  %1109 = vmatpush.bf16.msrb.mxu1 %v889_v44  ;;  %v913_v38 = vand.u32 %v3898_v30, %v5432_v2  ;;  %v3807_v39 = vld [vmem:[%s5434_s30 + $0xb8] sm:$0xf0]  ;;  %v3806_v44 = vor.u32 %v4751_v36, %v3805_v35  ;;  %v3798_v46 = vor.u32 %v4750_v41, %v3797_v40  ;;  %v4813_v49 = vld [vmem:[%s5434_s30 + $0x2a4] sm:$0x30]  ;;  %v4800_v54 = vld [vmem:[%s5434_s30 + $0x244] sm:$0xf] }
 0x102   : > { %v3810_v45 = vor.u32 %v4739_v37, %v3807_v39  ;;  %v3802_v47 = vor.u32 %v4738_v42, %v3799_v43  ;;  %v4079_v55 = vld [vmem:[%s5434_s30 + $0x2a0] sm:$0x30]  ;;  %v4086_v56 = vor.u32 %v4813_v49, %v4085_v48  ;;  %v3989_v63 = vld [vmem:[%s5434_s30 + $0x188] sm:$0xf]  ;;  %v4777_v1 = vld [vmem:[%s5434_s30 + $0x18c] sm:$0xf] }
 0x103   : > { %1096 = vmatpush.bf16.msrb.mxu0 %v3766_v52  ;;  %v4077_v52 = vld [vmem:[%s5434_s30 + $0x240] sm:$0xf]  ;;  %v4082_v59 = vor.u32 %v4800_v54, %v4079_v55  ;;  %v4789_v0 = vld [vmem:[%s5434_s30 + $0x1e4] sm:$0xf0]  ;;  %v4776_v7 = vld [vmem:[%s5434_s30 + $0x184] sm:$0xf] }
 0x104   : > { %1124 = vmatpush.bf16.msrb.mxu2 %v3774_v50  ;;  %v4801_v50 = vld [vmem:[%s5434_s30 + $0x24c] sm:$0xf]  ;;  %v1529_v60 = vand.u32 %v4086_v56, %v5432_v2  ;;  %v4788_v6 = vld [vmem:[%s5434_s30 + $0x1dc] sm:$0xf0]  ;;  %v3983_v8 = vld [vmem:[%s5434_s30 + $0x1e0] sm:$0xf0] }
 0x105   : > { %1138 = vmatpush.bf16.msrb.mxu3 %v3778_v51  ;;  %1110 = vmatpush.bf16.msrb.mxu1 %v3770_v53  ;;  %v4087_v51 = vld [vmem:[%s5434_s30 + $0x2a8] sm:$0x30]  ;;  %v4812_v53 = vld [vmem:[%s5434_s30 + $0x29c] sm:$0x30]  ;;  %v3986_v12 = vor.u32 %v4776_v7, %v3983_v8  ;;  %v4101_v13 = vld [vmem:[%s5434_s30 + $0x258] sm:$0xf] }
 0x106   : > { %v4090_v57 = vor.u32 %v4801_v50, %v4087_v51  ;;  %v4078_v58 = vor.u32 %v4812_v53, %v4077_v52  ;;  %v4815_v14 = vld [vmem:[%s5434_s30 + $0x2b4] sm:$0x30]  ;;  %v4802_v19 = vld [vmem:[%s5434_s30 + $0x254] sm:$0xf]  ;;  %v4779_v30 = vld [vmem:[%s5434_s30 + $0x19c] sm:$0xf] }
 0x107   : > { %v4095_v20 = vld [vmem:[%s5434_s30 + $0x2b0] sm:$0x30]  ;;  %v4102_v21 = vor.u32 %v4815_v14, %v4101_v13  ;;  %v4005_v28 = vld [vmem:[%s5434_s30 + $0x198] sm:$0xf]  ;;  %v4790_v35 = vld [vmem:[%s5434_s30 + $0x1ec] sm:$0xf0] }
 0x108   : > { %v1532_v61 = vand.u32 %v4090_v57, %v5432_v2  ;;  %v1523_v62 = vand.u32 %v4078_v58, %v5432_v2  ;;  %v4098_v24 = vor.u32 %v4802_v19, %v4095_v20  ;;  %v4791_v29 = vld [vmem:[%s5434_s30 + $0x1f4] sm:$0xf0]  ;;  %v4778_v36 = vld [vmem:[%s5434_s30 + $0x194] sm:$0xf]  ;;  %v4117_v42 = vld [vmem:[%s5434_s30 + $0x268] sm:$0xf] }
 0x109   : > { %v1541_v25 = vand.u32 %v4102_v21, %v5432_v2  ;;  %v3999_v37 = vld [vmem:[%s5434_s30 + $0x1f0] sm:$0xf0]  ;;  %v4817_v43 = vld [vmem:[%s5434_s30 + $0x2c4] sm:$0x30]  ;;  %v4804_v48 = vld [vmem:[%s5434_s30 + $0x264] sm:$0xf] }
 0x10a   : > { %v4002_v41 = vor.u32 %v4778_v36, %v3999_v37  ;;  %v4111_v49 = vld [vmem:[%s5434_s30 + $0x2c0] sm:$0x30]  ;;  %v4118_v50 = vor.u32 %v4817_v43, %v4117_v42  ;;  %v4021_v57 = vld [vmem:[%s5434_s30 + $0x1a8] sm:$0xf]  ;;  %v4133_v7 = vld [vmem:[%s5434_s30 + $0x278] sm:$0xf] }
 0x10b   : > { %v4114_v53 = vor.u32 %v4804_v48, %v4111_v49  ;;  %v4793_v58 = vld [vmem:[%s5434_s30 + $0x204] sm:$0xf0]  ;;  %v4819_v8 = vld [vmem:[%s5434_s30 + $0x2d4] sm:$0x30]  ;;  %v4806_v13 = vld [vmem:[%s5434_s30 + $0x274] sm:$0xf] }
 0x10c   : > { %v1553_v54 = vand.u32 %v4118_v50, %v5432_v2  ;;  %v4127_v14 = vld [vmem:[%s5434_s30 + $0x2d0] sm:$0x30]  ;;  %v4149_v36 = vld [vmem:[%s5434_s30 + $0x288] sm:$0xf]  ;;  %v4808_v42 = vld [vmem:[%s5434_s30 + $0x284] sm:$0xf] }
 0x10d   : > { %v4821_v37 = vld [vmem:[%s5434_s30 + $0x2e4] sm:$0x30]  ;;  %v4143_v43 = vld [vmem:[%s5434_s30 + $0x2e0] sm:$0x30]  ;;  %s6527_s12 = scalar_lea.vmem [#allocation3], %s4923_s21 }
 0x10e   : > { %3915 = vmatmul.msk.bf16.vlgmr.msra.gmra.mxu0 %vm841_vm2, %v5461_v32  ;;  %3916 = vmatmul.msk.bf16.vlgmr.msra.gmra.mxu1 %vm841_vm2, %v5461_v32 }
 0x10f   : > { %3917 = vmatmul.msk.bf16.vlgmr.msra.gmra.mxu2 %vm841_vm2, %v5461_v32  ;;  %1151 = vmatpush.bf16.msra.mxu0 %v898_v5  ;;  %v3981_v5 = vld [vmem:[%s5434_s30 + $0x180] sm:$0xf] }
 0x110   : > { %3918 = vmatmul.msk.bf16.vlgmr.msra.gmra.mxu3 %vm841_vm2, %v5461_v32  ;;  %1179 = vmatpush.bf16.msra.mxu2 %v904_v3  ;;  %v1526_v3 = vand.u32 %v4082_v59, %v5432_v2  ;;  %v3982_v11 = vor.u32 %v4788_v6, %v3981_v5  ;;  %v4781_v59 = vld [vmem:[%s5434_s30 + $0x1ac] sm:$0xf] }
 0x111   : > { %1193 = vmatpush.bf16.msra.mxu3 %v907_v4  ;;  %1165 = vmatpush.bf16.msra.mxu1 %v901_v9  ;;  %v3991_v4 = vld [vmem:[%s5434_s30 + $0x1e8] sm:$0xf0]  ;;  %v3990_v9 = vor.u32 %v4789_v0, %v3989_v63  ;;  %v4792_v63 = vld [vmem:[%s5434_s30 + $0x1fc] sm:$0xf0]  ;;  %v4780_v0 = vld [vmem:[%s5434_s30 + $0x1a4] sm:$0xf] }
 0x112   : > { %v3994_v10 = vor.u32 %v4777_v1, %v3991_v4  ;;  %v4015_v1 = vld [vmem:[%s5434_s30 + $0x200] sm:$0xf0] }
 0x113   : > { %1152 = vmatpush.bf16.msra.mxu0 %v3782_v17  ;;  %v4093_v17 = vld [vmem:[%s5434_s30 + $0x250] sm:$0xf]  ;;  %v4018_v6 = vor.u32 %v4780_v0, %v4015_v1 }
 0x114   : > { %1180 = vmatpush.bf16.msra.mxu2 %v3790_v15  ;;  %v4803_v15 = vld [vmem:[%s5434_s30 + $0x25c] sm:$0xf] }
 0x115   : > { %1194 = vmatpush.bf16.msra.mxu3 %v3794_v16  ;;  %1166 = vmatpush.bf16.msra.mxu1 %v3786_v18  ;;  %v4103_v16 = vld [vmem:[%s5434_s30 + $0x2b8] sm:$0x30]  ;;  %v4814_v18 = vld [vmem:[%s5434_s30 + $0x2ac] sm:$0x30] }
 0x116   : > { %v4106_v22 = vor.u32 %v4803_v15, %v4103_v16  ;;  %v4094_v23 = vor.u32 %v4814_v18, %v4093_v17  ;;  %v4134_v15 = vor.u32 %v4819_v8, %v4133_v7  ;;  %v4130_v18 = vor.u32 %v4806_v13, %v4127_v14  ;;  %v4165_v7 = vld [vmem:[%s5434_s30 + $0x298] sm:$0xf]  ;;  %v4810_v13 = vld [vmem:[%s5434_s30 + $0x294] sm:$0xf] }
 0x117   : > { %v4823_v8 = vld [vmem:[%s5434_s30 + $0x2f4] sm:$0x30]  ;;  %v4159_v14 = vld [vmem:[%s5434_s30 + $0x2f0] sm:$0x30] }
 0x118   : > { %v1544_v26 = vand.u32 %v4106_v22, %v5432_v2  ;;  %v1535_v27 = vand.u32 %v4094_v23, %v5432_v2  ;;  %v1565_v19 = vand.u32 %v4134_v15, %v5432_v2  ;;  %v4037_v22 = vld [vmem:[%s5434_s30 + $0x1b8] sm:$0xf]  ;;  %v4166_v15 = vor.u32 %v4823_v8, %v4165_v7  ;;  %v4837_v7 = vld [vmem:[%s5434_s30 + $0x364] sm:$0xf0]  ;;  %v4825_v8 = vld [vmem:[%s5434_s30 + $0x30c] sm:$0xf] }
 0x119   : > { %v4795_v23 = vld [vmem:[%s5434_s30 + $0x214] sm:$0xf0] }
 0x11e   : > { %3919 = vmatmul.msk.bf16.vlgmr.msrb.gmra.mxu0 %vm841_vm2, %v5461_v32  ;;  %3920 = vmatmul.msk.bf16.vlgmr.msrb.gmra.mxu1 %vm841_vm2, %v5461_v32 }
 0x11f   : > { %3921 = vmatmul.msk.bf16.vlgmr.msrb.gmra.mxu2 %vm841_vm2, %v5461_v32  ;;  %1207 = vmatpush.bf16.msrb.mxu0 %v910_v34  ;;  %v3997_v34 = vld [vmem:[%s5434_s30 + $0x190] sm:$0xf] }
 0x120   : > { %3922 = vmatmul.msk.bf16.vlgmr.msrb.gmra.mxu3 %vm841_vm2, %v5461_v32  ;;  %1235 = vmatpush.bf16.msrb.mxu2 %v916_v31  ;;  %v1538_v31 = vand.u32 %v4098_v24, %v5432_v2  ;;  %v3998_v40 = vor.u32 %v4790_v35, %v3997_v34  ;;  %v4783_v24 = vld [vmem:[%s5434_s30 + $0x1bc] sm:$0xf] }
 0x121   : > { %1249 = vmatpush.bf16.msrb.mxu3 %v919_v33  ;;  %1221 = vmatpush.bf16.msrb.mxu1 %v913_v38  ;;  %v4007_v33 = vld [vmem:[%s5434_s30 + $0x1f8] sm:$0xf0]  ;;  %v4006_v38 = vor.u32 %v4791_v29, %v4005_v28  ;;  %v4794_v28 = vld [vmem:[%s5434_s30 + $0x20c] sm:$0xf0]  ;;  %v4782_v29 = vld [vmem:[%s5434_s30 + $0x1b4] sm:$0xf] }
 0x122   : > { %v4010_v39 = vor.u32 %v4779_v30, %v4007_v33  ;;  %v4031_v30 = vld [vmem:[%s5434_s30 + $0x210] sm:$0xf0] }
 0x123   : > { %1208 = vmatpush.bf16.msrb.mxu0 %v3798_v46  ;;  %v4109_v46 = vld [vmem:[%s5434_s30 + $0x260] sm:$0xf]  ;;  %v4034_v35 = vor.u32 %v4782_v29, %v4031_v30  ;;  %v4071_v30 = vld [vmem:[%s5434_s30 + $0x238] sm:$0xf0] }
 0x124   : > { %1236 = vmatpush.bf16.msrb.mxu2 %v3806_v44  ;;  %v4805_v44 = vld [vmem:[%s5434_s30 + $0x26c] sm:$0xf] }
 0x125   : > { %1250 = vmatpush.bf16.msrb.mxu3 %v3810_v45  ;;  %1222 = vmatpush.bf16.msrb.mxu1 %v3802_v47  ;;  %v4119_v45 = vld [vmem:[%s5434_s30 + $0x2c8] sm:$0x30]  ;;  %v4816_v47 = vld [vmem:[%s5434_s30 + $0x2bc] sm:$0x30] }
 0x126   : > { %v4122_v51 = vor.u32 %v4805_v44, %v4119_v45  ;;  %v4110_v52 = vor.u32 %v4816_v47, %v4109_v46  ;;  %v4150_v44 = vor.u32 %v4821_v37, %v4149_v36  ;;  %v4146_v47 = vor.u32 %v4808_v42, %v4143_v43 }
 0x128   : > { %v1556_v55 = vand.u32 %v4122_v51, %v5432_v2  ;;  %v1547_v56 = vand.u32 %v4110_v52, %v5432_v2  ;;  %v1577_v50 = vand.u32 %v4150_v44, %v5432_v2  ;;  %v4349_v44 = vld [vmem:[%s5434_s30 + $0x3c8] sm:$0xf] }
 0x12e   : > { %3923 = vmatmul.msk.bf16.vlgmr.msra.gmra.mxu0 %vm841_vm2, %v5461_v32  ;;  %3924 = vmatmul.msk.bf16.vlgmr.msra.gmra.mxu1 %vm841_vm2, %v5461_v32 }
 0x12f   : > { %3925 = vmatmul.msk.bf16.vlgmr.msra.gmra.mxu2 %vm841_vm2, %v5461_v32  ;;  %1600 = vmatpush.bf16.msra.mxu0 %v1523_v62  ;;  %v4013_v62 = vld [vmem:[%s5434_s30 + $0x1a0] sm:$0xf] }
 0x130   : > { %3926 = vmatmul.msk.bf16.vlgmr.msra.gmra.mxu3 %vm841_vm2, %v5461_v32  ;;  %1628 = vmatpush.bf16.msra.mxu2 %v1529_v60  ;;  %v1550_v60 = vand.u32 %v4114_v53, %v5432_v2  ;;  %v4014_v5 = vor.u32 %v4792_v63, %v4013_v62  ;;  %v4053_v53 = vld [vmem:[%s5434_s30 + $0x1c8] sm:$0xf] }
 0x131   : > { %1642 = vmatpush.bf16.msra.mxu3 %v1532_v61  ;;  %1614 = vmatpush.bf16.msra.mxu1 %v1526_v3  ;;  %v4023_v61 = vld [vmem:[%s5434_s30 + $0x208] sm:$0xf0]  ;;  %v4022_v3 = vor.u32 %v4793_v58, %v4021_v57  ;;  %v4045_v58 = vld [vmem:[%s5434_s30 + $0x1c0] sm:$0xf] }
 0x132   : > { %v4026_v4 = vor.u32 %v4781_v59, %v4023_v61  ;;  %v4055_v57 = vld [vmem:[%s5434_s30 + $0x228] sm:$0xf0]  ;;  %v4796_v59 = vld [vmem:[%s5434_s30 + $0x21c] sm:$0xf0]  ;;  %v4047_v61 = vld [vmem:[%s5434_s30 + $0x220] sm:$0xf0] }
 0x133   : > { %1601 = vmatpush.bf16.msra.mxu0 %v3982_v11  ;;  %v4125_v11 = vld [vmem:[%s5434_s30 + $0x270] sm:$0xf]  ;;  %v4046_v0 = vor.u32 %v4796_v59, %v4045_v58 }
 0x134   : > { %1629 = vmatpush.bf16.msra.mxu2 %v3990_v9  ;;  %v4807_v9 = vld [vmem:[%s5434_s30 + $0x27c] sm:$0xf] }
 0x135   : > { %1643 = vmatpush.bf16.msra.mxu3 %v3994_v10  ;;  %1615 = vmatpush.bf16.msra.mxu1 %v3986_v12  ;;  %v4135_v10 = vld [vmem:[%s5434_s30 + $0x2d8] sm:$0x30]  ;;  %v4818_v12 = vld [vmem:[%s5434_s30 + $0x2cc] sm:$0x30] }
 0x136   : > { %v4138_v16 = vor.u32 %v4807_v9, %v4135_v10  ;;  %v4126_v17 = vor.u32 %v4818_v12, %v4125_v11  ;;  %v4811_v9 = vld [vmem:[%s5434_s30 + $0x29c] sm:$0xf]  ;;  %v4157_v11 = vld [vmem:[%s5434_s30 + $0x290] sm:$0xf] }
 0x137   : > { %v4167_v10 = vld [vmem:[%s5434_s30 + $0x2f8] sm:$0x30]  ;;  %v4822_v12 = vld [vmem:[%s5434_s30 + $0x2ec] sm:$0x30] }
 0x138   : > { %v1568_v20 = vand.u32 %v4138_v16, %v5432_v2  ;;  %v1559_v21 = vand.u32 %v4126_v17, %v5432_v2  ;;  %v4170_v16 = vor.u32 %v4811_v9, %v4167_v10  ;;  %v4158_v17 = vor.u32 %v4822_v12, %v4157_v11  ;;  %v4255_v10 = vld [vmem:[%s5434_s30 + $0x368] sm:$0xf0]  ;;  %v4245_v11 = vld [vmem:[%s5434_s30 + $0x300] sm:$0xf] }
 0x139   : > { %v4836_v12 = vld [vmem:[%s5434_s30 + $0x35c] sm:$0xf0] }
 0x13e   : > { %3927 = vmatmul.msk.bf16.vlgmr.msrb.gmra.mxu0 %vm841_vm2, %v5461_v32  ;;  %3928 = vmatmul.msk.bf16.vlgmr.msrb.gmra.mxu1 %vm841_vm2, %v5461_v32 }
 0x13f   : > { %3929 = vmatmul.msk.bf16.vlgmr.msrb.gmra.mxu2 %vm841_vm2, %v5461_v32  ;;  %1656 = vmatpush.bf16.msrb.mxu0 %v1535_v27  ;;  %v4029_v27 = vld [vmem:[%s5434_s30 + $0x1b0] sm:$0xf] }
 0x140   : > { %3930 = vmatmul.msk.bf16.vlgmr.msrb.gmra.mxu3 %vm841_vm2, %v5461_v32  ;;  %1684 = vmatpush.bf16.msrb.mxu2 %v1541_v25  ;;  %v1562_v25 = vand.u32 %v4130_v18, %v5432_v2  ;;  %v4030_v34 = vor.u32 %v4794_v28, %v4029_v27  ;;  %v4799_v27 = vld [vmem:[%s5434_s30 + $0x234] sm:$0xf0]  ;;  %v4787_v28 = vld [vmem:[%s5434_s30 + $0x1dc] sm:$0xf] }
 0x141   : > { %1698 = vmatpush.bf16.msrb.mxu3 %v1544_v26  ;;  %1670 = vmatpush.bf16.msrb.mxu1 %v1538_v31  ;;  %v4039_v26 = vld [vmem:[%s5434_s30 + $0x218] sm:$0xf0]  ;;  %v4038_v31 = vor.u32 %v4795_v23, %v4037_v22  ;;  %v1589_v23 = vand.u32 %v4166_v15, %v5432_v2  ;;  %v4074_v37 = vor.u32 %v4787_v28, %v4071_v30  ;;  %v4357_v30 = vld [vmem:[%s5434_s30 + $0x3d0] sm:$0xf] }
 0x142   : > { %v4042_v33 = vor.u32 %v4783_v24, %v4039_v26  ;;  %v1592_v24 = vand.u32 %v4170_v16, %v5432_v2  ;;  %v4069_v26 = vld [vmem:[%s5434_s30 + $0x1d8] sm:$0xf]  ;;  %v4258_v16 = vor.u32 %v4825_v8, %v4255_v10  ;;  %v4851_v28 = vld [vmem:[%s5434_s30 + $0x3dc] sm:$0xf] }
 0x143   : > { %1657 = vmatpush.bf16.msrb.mxu0 %v3998_v40  ;;  %v4141_v40 = vld [vmem:[%s5434_s30 + $0x280] sm:$0xf]  ;;  %v4070_v36 = vor.u32 %v4799_v27, %v4069_v26  ;;  %v4365_v26 = vld [vmem:[%s5434_s30 + $0x3d8] sm:$0xf] }
 0x144   : > { %1685 = vmatpush.bf16.msrb.mxu2 %v4006_v38  ;;  %v4809_v38 = vld [vmem:[%s5434_s30 + $0x28c] sm:$0xf]  ;;  %v4863_v27 = vld [vmem:[%s5434_s30 + $0x434] sm:$0x30] }
 0x145   : > { %1699 = vmatpush.bf16.msrb.mxu3 %v4010_v39  ;;  %1671 = vmatpush.bf16.msrb.mxu1 %v4002_v41  ;;  %v4151_v39 = vld [vmem:[%s5434_s30 + $0x2e8] sm:$0x30]  ;;  %v4820_v41 = vld [vmem:[%s5434_s30 + $0x2dc] sm:$0x30] }
 0x146   : > { %v4154_v45 = vor.u32 %v4809_v38, %v4151_v39  ;;  %v4142_v46 = vor.u32 %v4820_v41, %v4141_v40 }
 0x148   : > { %v1580_v51 = vand.u32 %v4154_v45, %v5432_v2  ;;  %v1571_v52 = vand.u32 %v4142_v46, %v5432_v2  ;;  %v4861_v45 = vld [vmem:[%s5434_s30 + $0x424] sm:$0x30]  ;;  %v4849_v46 = vld [vmem:[%s5434_s30 + $0x3cc] sm:$0xf] }
 0x14e   : > { %4171 = vmatmul.msk.bf16.vlgmr.msra.gmra.mxu0 %vm841_vm2, %v5461_v32  ;;  %4172 = vmatmul.msk.bf16.vlgmr.msra.gmra.mxu1 %vm841_vm2, %v5461_v32 }
 0x14f   : > { %4173 = vmatmul.msk.bf16.vlgmr.msra.gmra.mxu2 %vm841_vm2, %v5461_v32  ;;  %1712 = vmatpush.bf16.msra.mxu0 %v1547_v56  ;;  %v1574_v56 = vand.u32 %v4146_v47, %v5432_v2  ;;  %v4351_v47 = vld [vmem:[%s5434_s30 + $0x428] sm:$0x30] }
 0x150   : > { %4174 = vmatmul.msk.bf16.vlgmr.msra.gmra.mxu3 %vm841_vm2, %v5461_v32  ;;  %1740 = vmatpush.bf16.msra.mxu2 %v1553_v54  ;;  %v4797_v54 = vld [vmem:[%s5434_s30 + $0x224] sm:$0xf0] }
 0x151   : > { %1754 = vmatpush.bf16.msra.mxu3 %v1556_v55  ;;  %1726 = vmatpush.bf16.msra.mxu1 %v1550_v60  ;;  %v4785_v55 = vld [vmem:[%s5434_s30 + $0x1cc] sm:$0xf]  ;;  %v4784_v60 = vld [vmem:[%s5434_s30 + $0x1c4] sm:$0xf]  ;;  %v4054_v62 = vor.u32 %v4797_v54, %v4053_v53  ;;  %v4350_v54 = vor.u32 %v4861_v45, %v4349_v44 }
 0x152   : > { %v4058_v63 = vor.u32 %v4785_v55, %v4055_v57  ;;  %v4343_v53 = vld [vmem:[%s5434_s30 + $0x420] sm:$0x30]  ;;  %v4354_v55 = vor.u32 %v4849_v46, %v4351_v47 }
 0x153   : > { %1713 = vmatpush.bf16.msra.mxu0 %v4014_v5 }
 0x154   : > { %1741 = vmatpush.bf16.msra.mxu2 %v4022_v3  ;;  %v4050_v3 = vor.u32 %v4784_v60, %v4047_v61 }
 0x155   : > { %1755 = vmatpush.bf16.msra.mxu3 %v4026_v4  ;;  %1727 = vmatpush.bf16.msra.mxu1 %v4018_v6 }
 0x15e   : > { %4175 = vmatmul.msk.bf16.vlgmr.msrb.gmra.mxu0 %vm841_vm2, %v5461_v32  ;;  %4176 = vmatmul.msk.bf16.vlgmr.msrb.gmra.mxu1 %vm841_vm2, %v5461_v32 }
 0x15f   : > { %4177 = vmatmul.msk.bf16.vlgmr.msrb.gmra.mxu2 %vm841_vm2, %v5461_v32  ;;  %1768 = vmatpush.bf16.msrb.mxu0 %v1559_v21 }
 0x160   : > { %4178 = vmatmul.msk.bf16.vlgmr.msrb.gmra.mxu3 %vm841_vm2, %v5461_v32  ;;  %1796 = vmatpush.bf16.msrb.mxu2 %v1565_v19  ;;  %v4162_v19 = vor.u32 %v4810_v13, %v4159_v14  ;;  %v4824_v13 = vld [vmem:[%s5434_s30 + $0x304] sm:$0xf] }
 0x161   : > { %1810 = vmatpush.bf16.msrb.mxu3 %v1568_v20  ;;  %1782 = vmatpush.bf16.msrb.mxu1 %v1562_v25  ;;  %v1583_v25 = vand.u32 %v4158_v17, %v5432_v2  ;;  %v4247_v14 = vld [vmem:[%s5434_s30 + $0x360] sm:$0xf0]  ;;  %v4246_v17 = vor.u32 %v4836_v12, %v4245_v11 }
 0x162   : > { %v1586_v29 = vand.u32 %v4162_v19, %v5432_v2 }
 0x163   : > { %1769 = vmatpush.bf16.msrb.mxu0 %v4030_v34  ;;  %v4786_v34 = vld [vmem:[%s5434_s30 + $0x1d4] sm:$0xf] }
 0x164   : > { %1797 = vmatpush.bf16.msrb.mxu2 %v4038_v31  ;;  %v4061_v31 = vld [vmem:[%s5434_s30 + $0x1d0] sm:$0xf] }
 0x165   : > { %1811 = vmatpush.bf16.msrb.mxu3 %v4042_v33  ;;  %1783 = vmatpush.bf16.msrb.mxu1 %v4034_v35  ;;  %v4798_v33 = vld [vmem:[%s5434_s30 + $0x22c] sm:$0xf0]  ;;  %v4063_v35 = vld [vmem:[%s5434_s30 + $0x230] sm:$0xf0] }
 0x166   : > { %v4062_v38 = vor.u32 %v4798_v33, %v4061_v31  ;;  %v4066_v40 = vor.u32 %v4786_v34, %v4063_v35  ;;  %v4862_v31 = vld [vmem:[%s5434_s30 + $0x42c] sm:$0x30]  ;;  %v4850_v33 = vld [vmem:[%s5434_s30 + $0x3d4] sm:$0xf]  ;;  %v4366_v35 = vor.u32 %v4863_v27, %v4365_v26  ;;  %v4373_v26 = vld [vmem:[%s5434_s30 + $0x3e0] sm:$0xf] }
 0x167   : > { %v4359_v34 = vld [vmem:[%s5434_s30 + $0x430] sm:$0x30]  ;;  %v4864_v27 = vld [vmem:[%s5434_s30 + $0x43c] sm:$0x30] }
 0x168   : > { %v2262_v47 = vand.u32 %v4366_v35, %v5432_v2 }
 0x16b   : > { %v5713_v48 = vpop.f32.mrf.mxu0  ;;  %v5715_v49 = vpop.f32.mrf.mxu1 }
 0x16e   : > { %4179 = vmatmul.msk.bf16.vlgmr.msra.gmra.mxu0 %vm841_vm2, %v5461_v32  ;;  %4180 = vmatmul.msk.bf16.vlgmr.msra.gmra.mxu1 %vm841_vm2, %v5461_v32 }
 0x16f   : > { %4181 = vmatmul.msk.bf16.vlgmr.msra.gmra.mxu2 %vm841_vm2, %v5461_v32  ;;  %1824 = vmatpush.bf16.msra.mxu0 %v1571_v52  ;;  %v4848_v52 = vld [vmem:[%s5434_s30 + $0x3c4] sm:$0xf] }
 0x170   : > { %4182 = vmatmul.msk.bf16.vlgmr.msra.gmra.mxu3 %vm841_vm2, %v5461_v32  ;;  %1852 = vmatpush.bf16.msra.mxu2 %v1577_v50  ;;  %v4341_v50 = vld [vmem:[%s5434_s30 + $0x3c0] sm:$0xf]  ;;  %v4346_v58 = vor.u32 %v4848_v52, %v4343_v53  ;;  %v4269_v52 = vld [vmem:[%s5434_s30 + $0x318] sm:$0xf] }
 0x171   : > { %1866 = vmatpush.bf16.msra.mxu3 %v1580_v51  ;;  %1838 = vmatpush.bf16.msra.mxu1 %v1574_v56  ;;  %v4860_v51 = vld [vmem:[%s5434_s30 + $0x41c] sm:$0x30]  ;;  %v4839_v53 = vld [vmem:[%s5434_s30 + $0x374] sm:$0xf0] }
 0x172   : > { %v5737_v1 = vpop.f32.mrf.mxu2  ;;  %v4342_v56 = vor.u32 %v4860_v51, %v4341_v50  ;;  %v2247_v9 = vand.u32 %v4346_v58, %v5432_v2  ;;  %v4271_v58 = vld [vmem:[%s5434_s30 + $0x378] sm:$0xf0] }
 0x173   : > { %v5739_v4 = vpop.f32.mrf.mxu3  ;;  %v5741_v5 = vpop.f32.mrf.mxu0  ;;  %1825 = vmatpush.bf16.msra.mxu0 %v4046_v0 }
 0x174   : > { %v5743_v6 = vpop.f32.mrf.mxu1  ;;  %1853 = vmatpush.bf16.msra.mxu2 %v4054_v62  ;;  %v2250_v62 = vand.u32 %v4350_v54, %v5432_v2  ;;  %v2244_v0 = vand.u32 %v4342_v56, %v5432_v2  ;;  %v4827_v54 = vld [vmem:[%s5434_s30 + $0x31c] sm:$0xf] }
 0x175   : > { %1867 = vmatpush.bf16.msra.mxu3 %v4058_v63  ;;  %1839 = vmatpush.bf16.msra.mxu1 %v4050_v3  ;;  %v2253_v63 = vand.u32 %v4354_v55, %v5432_v2  ;;  %v4253_v3 = vld [vmem:[%s5434_s30 + $0x308] sm:$0xf]  ;;  %v5858_v55 = vld [vmem:[%s6708_s0] sm:$0xff]  ;;  %v4274_v8 = vor.u32 %v4827_v54, %v4271_v58  ;;  %v4829_v54 = vld [vmem:[%s5434_s30 + $0x32c] sm:$0xf] }
 0x176   : > { %v4254_v15 = vor.u32 %v4837_v7, %v4253_v3  ;;  %v4263_v3 = vld [vmem:[%s5434_s30 + $0x370] sm:$0xf0]  ;;  %v4270_v7 = vor.u32 %v4839_v53, %v4269_v52  ;;  %v4285_v52 = vld [vmem:[%s5434_s30 + $0x328] sm:$0xf]  ;;  %v4287_v58 = vld [vmem:[%s5434_s30 + $0x388] sm:$0xf0] }
 0x177   : > { %v4841_v53 = vld [vmem:[%s5434_s30 + $0x384] sm:$0xf0] }
 0x17a   : > { %v5753_v18 = vpop.f32.mrf.mxu2 }
 0x17b   : > { %v5755_v20 = vpop.f32.mrf.mxu3  ;;  %v5757_v21 = vpop.f32.mrf.mxu0 }
 0x17c   : > { %v5759_v22 = vpop.f32.mrf.mxu1 }
 0x17e   : > { %4183 = vmatmul.msk.bf16.vlgmr.msrb.gmra.mxu0 %vm841_vm2, %v5461_v32  ;;  %4184 = vmatmul.msk.bf16.vlgmr.msrb.gmra.mxu1 %vm841_vm2, %v5461_v32 }
 0x17f   : > { %4185 = vmatmul.msk.bf16.vlgmr.msrb.gmra.mxu2 %vm841_vm2, %v5461_v32  ;;  %1880 = vmatpush.bf16.msrb.mxu0 %v1583_v25 }
 0x180   : > { %4186 = vmatmul.msk.bf16.vlgmr.msrb.gmra.mxu3 %vm841_vm2, %v5461_v32  ;;  %1908 = vmatpush.bf16.msrb.mxu2 %v1589_v23  ;;  %v4250_v23 = vor.u32 %v4824_v13, %v4247_v14 }
 0x181   : > { %1922 = vmatpush.bf16.msrb.mxu3 %v1592_v24  ;;  %1894 = vmatpush.bf16.msrb.mxu1 %v1586_v29  ;;  %v4367_v29 = vld [vmem:[%s5434_s30 + $0x438] sm:$0x30] }
 0x182   : > { %v5781_v39 = vpop.f32.mrf.mxu2 }
 0x183   : > { %v5783_v41 = vpop.f32.mrf.mxu3  ;;  %v5785_v42 = vpop.f32.mrf.mxu0  ;;  %1881 = vmatpush.bf16.msrb.mxu0 %v4062_v38 }
 0x184   : > { %v5787_v43 = vpop.f32.mrf.mxu1  ;;  %1909 = vmatpush.bf16.msrb.mxu2 %v4070_v36  ;;  %v4370_v36 = vor.u32 %v4851_v28, %v4367_v29  ;;  %v4852_v28 = vld [vmem:[%s5434_s30 + $0x3e4] sm:$0xf] }
 0x185   : > { %1923 = vmatpush.bf16.msrb.mxu3 %v4074_v37  ;;  %1895 = vmatpush.bf16.msrb.mxu1 %v4066_v40  ;;  %v4358_v37 = vor.u32 %v4862_v31, %v4357_v30  ;;  %v4362_v40 = vor.u32 %v4850_v33, %v4359_v34  ;;  %v4375_v29 = vld [vmem:[%s5434_s30 + $0x440] sm:$0x30]  ;;  %v4374_v33 = vor.u32 %v4864_v27, %v4373_v26  ;;  %v4397_v26 = vld [vmem:[%s5434_s30 + $0x3f8] sm:$0xf] }
 0x186   : > { %v2265_v50 = vand.u32 %v4370_v36, %v5432_v2  ;;  %v4378_v35 = vor.u32 %v4852_v28, %v4375_v29  ;;  %v4867_v27 = vld [vmem:[%s5434_s30 + $0x454] sm:$0x30]  ;;  %v4855_v28 = vld [vmem:[%s5434_s30 + $0x3fc] sm:$0xf] }
 0x187   : > { %v2256_v51 = vand.u32 %v4358_v37, %v5432_v2  ;;  %v2259_v56 = vand.u32 %v4362_v40, %v5432_v2  ;;  %v4399_v29 = vld [vmem:[%s5434_s30 + $0x458] sm:$0x30] }
 0x18a   : > { %v5797_v57 = vpop.f32.mrf.mxu2 }
 0x18b   : > { %v5799_v59 = vpop.f32.mrf.mxu3  ;;  %v5801_v60 = vpop.f32.mrf.mxu0 }
 0x18c   : > { %v5803_v61 = vpop.f32.mrf.mxu1 }
 0x18e   : > { %4187 = vmatmul.msk.bf16.vlgmr.msra.gmra.mxu0 %vm841_vm2, %v5461_v32  ;;  %4188 = vmatmul.msk.bf16.vlgmr.msra.gmra.mxu1 %vm841_vm2, %v5461_v32 }
 0x18f   : > { %4189 = vmatmul.msk.bf16.vlgmr.msra.gmra.mxu2 %vm841_vm2, %v5461_v32  ;;  %2321 = vmatpush.bf16.msra.mxu0 %v2244_v0  ;;  %v4826_v0 = vld [vmem:[%s5434_s30 + $0x314] sm:$0xf] }
 0x190   : > { %4190 = vmatmul.msk.bf16.vlgmr.msra.gmra.mxu3 %vm841_vm2, %v5461_v32  ;;  %2349 = vmatpush.bf16.msra.mxu2 %v2250_v62  ;;  %v4261_v62 = vld [vmem:[%s5434_s30 + $0x310] sm:$0xf]  ;;  %v4266_v11 = vor.u32 %v4826_v0, %v4263_v3  ;;  %v4828_v0 = vld [vmem:[%s5434_s30 + $0x324] sm:$0xf] }
 0x191   : > { %2363 = vmatpush.bf16.msra.mxu3 %v2253_v63  ;;  %2335 = vmatpush.bf16.msra.mxu1 %v2247_v9  ;;  %v4838_v63 = vld [vmem:[%s5434_s30 + $0x36c] sm:$0xf0]  ;;  %v4279_v3 = vld [vmem:[%s5434_s30 + $0x380] sm:$0xf0] }
 0x192   : > { %v5825_v19 = vpop.f32.mrf.mxu2  ;;  %v4262_v9 = vor.u32 %v4838_v63, %v4261_v62  ;;  %v4277_v62 = vld [vmem:[%s5434_s30 + $0x320] sm:$0xf] }
 0x193   : > { %v5827_v24 = vpop.f32.mrf.mxu3  ;;  %v5829_v32 = vpop.f32.mrf.mxu0  ;;  %2322 = vmatpush.bf16.msra.mxu0 %v4246_v17  ;;  %v4853_v17 = vld [vmem:[%s5434_s30 + $0x3ec] sm:$0xf]  ;;  %v4840_v63 = vld [vmem:[%s5434_s30 + $0x37c] sm:$0xf0] }
 0x194   : > { %v5831_v25 = vpop.f32.mrf.mxu1  ;;  %2350 = vmatpush.bf16.msra.mxu2 %v4254_v15  ;;  %v4381_v15 = vld [vmem:[%s5434_s30 + $0x3e8] sm:$0xf] }
 0x195   : > { %6713 = vst [vmem:[#allocation4_spill] sm:$0xff] %v5831_v25  ;;  %2364 = vmatpush.bf16.msra.mxu3 %v4258_v16  ;;  %2336 = vmatpush.bf16.msra.mxu1 %v4250_v23  ;;  %v4865_v16 = vld [vmem:[%s5434_s30 + $0x444] sm:$0x30]  ;;  %v4383_v23 = vld [vmem:[%s5434_s30 + $0x448] sm:$0x30] }
 0x196   : > { %v4382_v30 = vor.u32 %v4865_v16, %v4381_v15  ;;  %v4386_v31 = vor.u32 %v4853_v17, %v4383_v23  ;;  %v4282_v15 = vor.u32 %v4828_v0, %v4279_v3  ;;  %v4301_v3 = vld [vmem:[%s5434_s30 + $0x338] sm:$0xf] }
 0x19a   : > { %v5841_v38 = vpop.f32.mrf.mxu2 }
 0x19b   : > { %6714 = vst [vmem:[#allocation5_spill] sm:$0xff] %v5841_v38  ;;  %v5843_v44 = vpop.f32.mrf.mxu3  ;;  %v5845_v45 = vpop.f32.mrf.mxu0  ;;  %v4978_v38 = vmov 0  }
 0x19c   : > { %6715 = vst [vmem:[#allocation6_spill] sm:$0xff] %v5843_v44  ;;  %v5847_v46 = vpop.f32.mrf.mxu1  ;;  %4950 = vset.pattern.permute.xlu0 %v4978_v38  ;;  %v4525_v38 = vld [vmem:[%s5434_s30 + $0x490] sm:$0xf] }
 0x19d   : > { %6716 = vst [vmem:[#allocation7_spill] sm:$0xff] %v5845_v45 }
 0x19e   : > { %6717 = vst [vmem:[#allocation8_spill] sm:$0xff] %v5847_v46  ;;  %4191 = vmatmul.msk.bf16.vlgmr.msrb.gmra.mxu0 %vm841_vm2, %v5858_v55  ;;  %4192 = vmatmul.msk.bf16.vlgmr.msrb.gmra.mxu1 %vm841_vm2, %v5858_v55 }
 0x19f   : > { %4193 = vmatmul.msk.bf16.vlgmr.msrb.gmra.mxu2 %vm841_vm2, %v5858_v55  ;;  %2377 = vmatpush.bf16.msrb.mxu0 %v2256_v51  ;;  %v2268_v51 = vand.u32 %v4374_v33, %v5432_v2  ;;  %v4854_v33 = vld [vmem:[%s5434_s30 + $0x3f4] sm:$0xf] }
 0x1a0   : > { %4194 = vmatmul.msk.bf16.vlgmr.msrb.gmra.mxu3 %vm841_vm2, %v5858_v55  ;;  %2405 = vmatpush.bf16.msrb.mxu2 %v2262_v47  ;;  %v2274_v47 = vand.u32 %v4382_v30, %v5432_v2  ;;  %v4389_v30 = vld [vmem:[%s5434_s30 + $0x3f0] sm:$0xf] }
 0x1a1   : > { %2419 = vmatpush.bf16.msrb.mxu3 %v2265_v50  ;;  %2391 = vmatpush.bf16.msrb.mxu1 %v2259_v56  ;;  %v2277_v50 = vand.u32 %v4386_v31, %v5432_v2  ;;  %v2271_v56 = vand.u32 %v4378_v35, %v5432_v2  ;;  %v4866_v31 = vld [vmem:[%s5434_s30 + $0x44c] sm:$0x30]  ;;  %v4391_v35 = vld [vmem:[%s5434_s30 + $0x450] sm:$0x30] }
 0x1a2   : > { %v5874_v10 = vpop.f32.mrf.mxu2 }
 0x1a3   : > { %6718 = vst [vmem:[#allocation9_spill] sm:$0xff] %v5874_v10  ;;  %v5876_v12 = vpop.f32.mrf.mxu3  ;;  %v5878_v13 = vpop.f32.mrf.mxu0  ;;  %2378 = vmatpush.bf16.msrb.mxu0 %v4262_v9  ;;  %v4278_v9 = vor.u32 %v4840_v63, %v4277_v62 }
 0x1a4   : > { %6719 = vst [vmem:[#allocation10_spill] sm:$0xff] %v5876_v12  ;;  %v5880_v14 = vpop.f32.mrf.mxu1  ;;  %2406 = vmatpush.bf16.msrb.mxu2 %v4270_v7  ;;  %v4286_v7 = vor.u32 %v4841_v53, %v4285_v52  ;;  %v4394_v53 = vor.u32 %v4854_v33, %v4391_v35 }
 0x1a5   : > { %6720 = vst [vmem:[#allocation11_spill] sm:$0xff] %v5878_v13  ;;  %2420 = vmatpush.bf16.msrb.mxu3 %v4274_v8  ;;  %2392 = vmatpush.bf16.msrb.mxu1 %v4266_v11  ;;  %v4290_v8 = vor.u32 %v4829_v54, %v4287_v58 }
 0x1a6   : > { %6721 = vst [vmem:[#allocation12_spill] sm:$0xff] %v5880_v14 }
 0x1aa   : > { %v5890_v34 = vpop.f32.mrf.mxu2 }
 0x1ab   : > { %6722 = vst [vmem:[#allocation13_spill] sm:$0xff] %v5890_v34  ;;  %v5892_v36 = vpop.f32.mrf.mxu3  ;;  %v5894_v37 = vpop.f32.mrf.mxu0  ;;  %v4884_v34 = vld [vmem:[%s5434_s30 + $0x4dc] sm:$0xf0] }
 0x1ac   : > { %6723 = vst [vmem:[#allocation14_spill] sm:$0xff] %v5892_v36  ;;  %v5896_v40 = vpop.f32.mrf.mxu1 }
 0x1ad   : > { %6724 = vst [vmem:[#allocation15_spill] sm:$0xff] %v5894_v37 }
 0x1ae   : > { %6725 = vst [vmem:[#allocation16_spill] sm:$0xff] %v5896_v40  ;;  %4435 = vmatmul.msk.bf16.vlgmr.msra.gmra.mxu0 %vm841_vm2, %v5858_v55  ;;  %4436 = vmatmul.msk.bf16.vlgmr.msra.gmra.mxu1 %vm841_vm2, %v5858_v55 }
 0x1af   : > { %4437 = vmatmul.msk.bf16.vlgmr.msra.gmra.mxu2 %vm841_vm2, %v5858_v55  ;;  %2433 = vmatpush.bf16.msra.mxu0 %v2268_v51  ;;  %v4390_v51 = vor.u32 %v4866_v31, %v4389_v30 }
 0x1b0   : > { %4438 = vmatmul.msk.bf16.vlgmr.msra.gmra.mxu3 %vm841_vm2, %v5858_v55  ;;  %2461 = vmatpush.bf16.msra.mxu2 %v2274_v47  ;;  %v4398_v47 = vor.u32 %v4867_v27, %v4397_v26  ;;  %v4293_v26 = vld [vmem:[%s5434_s30 + $0x330] sm:$0xf] }
 0x1b1   : > { %2475 = vmatpush.bf16.msra.mxu3 %v2277_v50  ;;  %2447 = vmatpush.bf16.msra.mxu1 %v2271_v56  ;;  %v4402_v50 = vor.u32 %v4855_v28, %v4399_v29  ;;  %v2280_v0 = vand.u32 %v4390_v51, %v5432_v2  ;;  %v4842_v27 = vld [vmem:[%s5434_s30 + $0x38c] sm:$0xf0]  ;;  %v4830_v28 = vld [vmem:[%s5434_s30 + $0x334] sm:$0xf] }
 0x1b2   : > { %v5918_v11 = vpop.f32.mrf.mxu2  ;;  %v2286_v62 = vand.u32 %v4398_v47, %v5432_v2  ;;  %v4295_v29 = vld [vmem:[%s5434_s30 + $0x390] sm:$0xf0]  ;;  %v4294_v33 = vor.u32 %v4842_v27, %v4293_v26 }
 0x1b3   : > { %6726 = vst [vmem:[#allocation17_spill] sm:$0xff] %v5918_v11  ;;  %v5920_v16 = vpop.f32.mrf.mxu3  ;;  %v5922_v17 = vpop.f32.mrf.mxu0  ;;  %2434 = vmatpush.bf16.msra.mxu0 %v4278_v9  ;;  %v2289_v63 = vand.u32 %v4402_v50, %v5432_v2  ;;  %v2283_v9 = vand.u32 %v4394_v53, %v5432_v2  ;;  %v4298_v47 = vor.u32 %v4830_v28, %v4295_v29 }
 0x1b4   : > { %6727 = vst [vmem:[#allocation18_spill] sm:$0xff] %v5920_v16  ;;  %v5924_v23 = vpop.f32.mrf.mxu1  ;;  %2462 = vmatpush.bf16.msra.mxu2 %v4286_v7  ;;  %v4843_v7 = vld [vmem:[%s5434_s30 + $0x394] sm:$0xf0] }
 0x1b5   : > { %6728 = vst [vmem:[#allocation19_spill] sm:$0xff] %v5922_v17  ;;  %2476 = vmatpush.bf16.msra.mxu3 %v4290_v8  ;;  %2448 = vmatpush.bf16.msra.mxu1 %v4282_v15  ;;  %v4831_v8 = vld [vmem:[%s5434_s30 + $0x33c] sm:$0xf]  ;;  %v4302_v30 = vor.u32 %v4843_v7, %v4301_v3  ;;  %v4415_v3 = vld [vmem:[%s5434_s30 + $0x468] sm:$0x30] }
 0x1b6   : > { %6729 = vst [vmem:[#allocation20_spill] sm:$0xff] %v5924_v23  ;;  %v4303_v15 = vld [vmem:[%s5434_s30 + $0x398] sm:$0xf0]  ;;  %v4405_v7 = vld [vmem:[%s5434_s30 + $0x400] sm:$0xf] }
 0x1b7   : > { %v4306_v31 = vor.u32 %v4831_v8, %v4303_v15  ;;  %v4868_v8 = vld [vmem:[%s5434_s30 + $0x45c] sm:$0x30]  ;;  %v4407_v15 = vld [vmem:[%s5434_s30 + $0x460] sm:$0x30] }
 0x1b8   : > { %v4406_v28 = vor.u32 %v4868_v8, %v4405_v7  ;;  %v4833_v7 = vld [vmem:[%s5434_s30 + $0x34c] sm:$0xf] }
 0x1ba   : > { %v5934_v52 = vpop.f32.mrf.mxu2 }
 0x1bb   : > { %6730 = vst [vmem:[#allocation21_spill] sm:$0xff] %v5934_v52  ;;  %v5936_v54 = vpop.f32.mrf.mxu3  ;;  %v5938_v56 = vpop.f32.mrf.mxu0  ;;  %v4846_v52 = vld [vmem:[%s5434_s30 + $0x3ac] sm:$0xf0] }
 0x1bc   : > { %6731 = vst [vmem:[#allocation22_spill] sm:$0xff] %v5936_v54  ;;  %v5940_v58 = vpop.f32.mrf.mxu1 }
 0x1bd   : > { %6732 = vst [vmem:[#allocation23_spill] sm:$0xff] %v5938_v56 }
 0x1be   : > { %6733 = vst [vmem:[#allocation24_spill] sm:$0xff] %v5940_v58  ;;  %4439 = vmatmul.msk.bf16.vlgmr.msrb.gmra.mxu0 %vm841_vm2, %v5858_v55  ;;  %4440 = vmatmul.msk.bf16.vlgmr.msrb.gmra.mxu1 %vm841_vm2, %v5858_v55 }
 0x1bf   : > { %4441 = vmatmul.msk.bf16.vlgmr.msrb.gmra.mxu2 %vm841_vm2, %v5858_v55  ;;  %2489 = vmatpush.bf16.msrb.mxu0 %v2280_v0  ;;  %v4857_v0 = vld [vmem:[%s5434_s30 + $0x40c] sm:$0xf] }
 0x1c0   : > { %4442 = vmatmul.msk.bf16.vlgmr.msrb.gmra.mxu3 %vm841_vm2, %v5858_v55  ;;  %2517 = vmatpush.bf16.msrb.mxu2 %v2286_v62  ;;  %v4413_v62 = vld [vmem:[%s5434_s30 + $0x408] sm:$0xf]  ;;  %v4418_v27 = vor.u32 %v4857_v0, %v4415_v3 }
 0x1c1   : > { %2531 = vmatpush.bf16.msrb.mxu3 %v2289_v63  ;;  %2503 = vmatpush.bf16.msrb.mxu1 %v2283_v9  ;;  %v4869_v63 = vld [vmem:[%s5434_s30 + $0x464] sm:$0x30]  ;;  %v4856_v9 = vld [vmem:[%s5434_s30 + $0x404] sm:$0xf] }
 0x1c2   : > { %v5962_v35 = vpop.f32.mrf.mxu2  ;;  %v4414_v26 = vor.u32 %v4869_v63, %v4413_v62  ;;  %v2301_v62 = vand.u32 %v4418_v27, %v5432_v2  ;;  %v2292_v63 = vand.u32 %v4406_v28, %v5432_v2  ;;  %v4317_v0 = vld [vmem:[%s5434_s30 + $0x348] sm:$0xf]  ;;  %v4311_v27 = vld [vmem:[%s5434_s30 + $0x3a0] sm:$0xf0] }
 0x1c3   : > { %6734 = vst [vmem:[#allocation25_spill] sm:$0xff] %v5962_v35  ;;  %v5964_v50 = vpop.f32.mrf.mxu3  ;;  %v5966_v51 = vpop.f32.mrf.mxu0  ;;  %2490 = vmatpush.bf16.msrb.mxu0 %v4294_v33  ;;  %v4845_v3 = vld [vmem:[%s5434_s30 + $0x3a4] sm:$0xf0] }
 0x1c4   : > { %6735 = vst [vmem:[#allocation26_spill] sm:$0xff] %v5964_v50  ;;  %v5968_v53 = vpop.f32.mrf.mxu1  ;;  %2518 = vmatpush.bf16.msrb.mxu2 %v4302_v30  ;;  %v4410_v30 = vor.u32 %v4856_v9, %v4407_v15  ;;  %v4319_v9 = vld [vmem:[%s5434_s30 + $0x3a8] sm:$0xf0]  ;;  %v4309_v15 = vld [vmem:[%s5434_s30 + $0x340] sm:$0xf]  ;;  %v4318_v28 = vor.u32 %v4845_v3, %v4317_v0 }
 0x1c5   : > { %6736 = vst [vmem:[#allocation27_spill] sm:$0xff] %v5966_v51  ;;  %2532 = vmatpush.bf16.msrb.mxu3 %v4306_v31  ;;  %2504 = vmatpush.bf16.msrb.mxu1 %v4298_v47  ;;  %v4859_v0 = vld [vmem:[%s5434_s30 + $0x41c] sm:$0xf]  ;;  %v4421_v3 = vld [vmem:[%s5434_s30 + $0x410] sm:$0xf] }
 0x1c6   : > { %6737 = vst [vmem:[#allocation28_spill] sm:$0xff] %v5968_v53  ;;  %v2298_v53 = vand.u32 %v4414_v26, %v5432_v2  ;;  %v2295_v8 = vand.u32 %v4410_v30, %v5432_v2  ;;  %v4832_v26 = vld [vmem:[%s5434_s30 + $0x344] sm:$0xf]  ;;  %v4322_v30 = vor.u32 %v4833_v7, %v4319_v9  ;;  %v4870_v7 = vld [vmem:[%s5434_s30 + $0x46c] sm:$0x30] }
 0x1c7   : > { %v4314_v50 = vor.u32 %v4832_v26, %v4311_v27  ;;  %v4423_v9 = vld [vmem:[%s5434_s30 + $0x470] sm:$0x30]  ;;  %v4422_v27 = vor.u32 %v4870_v7, %v4421_v3  ;;  %v4835_v3 = vld [vmem:[%s5434_s30 + $0x35c] sm:$0xf] }
 0x1ca   : > { %v5978_v29 = vpop.f32.mrf.mxu2 }
 0x1cb   : > { %6738 = vst [vmem:[#allocation29_spill] sm:$0xff] %v5978_v29  ;;  %v5980_v31 = vpop.f32.mrf.mxu3  ;;  %v5982_v33 = vpop.f32.mrf.mxu0 }
 0x1cc   : > { %6739 = vst [vmem:[#allocation30_spill] sm:$0xff] %v5980_v31  ;;  %v5984_v47 = vpop.f32.mrf.mxu1  ;;  %v4844_v31 = vld [vmem:[%s5434_s30 + $0x39c] sm:$0xf0] }
 0x1cd   : > { %v4310_v29 = vor.u32 %v4844_v31, %v4309_v15  ;;  %v4431_v31 = vld [vmem:[%s5434_s30 + $0x478] sm:$0x30] }
 0x1ce   : > { %4443 = vmatmul.msk.bf16.vlgmr.msra.gmra.mxu0 %vm841_vm2, %v5858_v55  ;;  %4444 = vmatmul.msk.bf16.vlgmr.msra.gmra.mxu1 %vm841_vm2, %v5858_v55  ;;  %v4434_v26 = vor.u32 %v4859_v0, %v4431_v31  ;;  %v4333_v0 = vld [vmem:[%s5434_s30 + $0x358] sm:$0xf] }
 0x1cf   : > { %4445 = vmatmul.msk.bf16.vlgmr.msra.gmra.mxu2 %vm841_vm2, %v5858_v55  ;;  %2545 = vmatpush.bf16.msra.mxu0 %v2292_v63  ;;  %v4871_v63 = vld [vmem:[%s5434_s30 + $0x474] sm:$0x30] }
 0x1d0   : > { %4446 = vmatmul.msk.bf16.vlgmr.msra.gmra.mxu3 %vm841_vm2, %v5858_v55  ;;  %2573 = vmatpush.bf16.msra.mxu2 %v2298_v53  ;;  %v4847_v31 = vld [vmem:[%s5434_s30 + $0x3b4] sm:$0xf0] }
 0x1d1   : > { %2587 = vmatpush.bf16.msra.mxu3 %v2301_v62  ;;  %2559 = vmatpush.bf16.msra.mxu1 %v2295_v8  ;;  %v4429_v62 = vld [vmem:[%s5434_s30 + $0x418] sm:$0xf]  ;;  %v4858_v8 = vld [vmem:[%s5434_s30 + $0x414] sm:$0xf] }
 0x1d2   : > { %v6006_v51 = vpop.f32.mrf.mxu2  ;;  %v4430_v15 = vor.u32 %v4871_v63, %v4429_v62  ;;  %v2313_v62 = vand.u32 %v4434_v26, %v5432_v2  ;;  %v2304_v63 = vand.u32 %v4422_v27, %v5432_v2  ;;  %v4327_v26 = vld [vmem:[%s5434_s30 + $0x3b0] sm:$0xf0]  ;;  %v4334_v27 = vor.u32 %v4847_v31, %v4333_v0  ;;  %v4897_v0 = vld [vmem:[%s5434_s30 + $0x54c] sm:$0xf]  ;;  %v4605_v31 = vld [vmem:[%s5434_s30 + $0x540] sm:$0xf] }
 0x1d3   : > { %v6008_v35 = vpop.f32.mrf.mxu3  ;;  %v6010_v58 = vpop.f32.mrf.mxu0  ;;  %2546 = vmatpush.bf16.msra.mxu0 %v4310_v29  ;;  %v4426_v29 = vor.u32 %v4858_v8, %v4423_v9  ;;  %v4335_v8 = vld [vmem:[%s5434_s30 + $0x3b8] sm:$0xf0]  ;;  %v4325_v9 = vld [vmem:[%s5434_s30 + $0x350] sm:$0xf] }
 0x1d4   : > { %v6012_v53 = vpop.f32.mrf.mxu1  ;;  %2574 = vmatpush.bf16.msra.mxu2 %v4318_v28  ;;  %v2310_v54 = vand.u32 %v4430_v15, %v5432_v2  ;;  %v4834_v15 = vld [vmem:[%s5434_s30 + $0x354] sm:$0xf]  ;;  %v4326_v23 = vor.u32 %v4846_v52, %v4325_v9  ;;  %v4615_v52 = vld [vmem:[%s5434_s30 + $0x5a8] sm:$0x30] }
 0x1d5   : > { %2588 = vmatpush.bf16.msra.mxu3 %v4322_v30  ;;  %2560 = vmatpush.bf16.msra.mxu1 %v4314_v50  ;;  %v2307_v7 = vand.u32 %v4426_v29, %v5432_v2  ;;  %v4338_v29 = vor.u32 %v4835_v3, %v4335_v8  ;;  %v4330_v16 = vor.u32 %v4834_v15, %v4327_v26  ;;  %v4908_v3 = vld [vmem:[%s5434_s30 + $0x59c] sm:$0x30]  ;;  %v4607_v8 = vld [vmem:[%s5434_s30 + $0x5a0] sm:$0x30] }
 0x1d6   : > { %v4618_v15 = vor.u32 %v4897_v0, %v4615_v52  ;;  %v4606_v26 = vor.u32 %v4908_v3, %v4605_v31  ;;  %v4517_v0 = vld [vmem:[%s5434_s30 + $0x488] sm:$0xf]  ;;  %v4873_v31 = vld [vmem:[%s5434_s30 + $0x48c] sm:$0xf] }
 0x1d7   : > { %v4885_v52 = vld [vmem:[%s5434_s30 + $0x4e4] sm:$0xf0] }
 0x1da   : > { %v6022_v28 = vpop.f32.mrf.mxu2 }
 0x1db   : > { %v6024_v30 = vpop.f32.mrf.mxu3  ;;  %v6026_v50 = vpop.f32.mrf.mxu0 }
 0x1dc   : > { %v6028_v56 = vpop.f32.mrf.mxu1 }
 0x1de   : > { %4447 = vmatmul.msk.bf16.vlgmr.msrb.gmra.mxu0 %vm841_vm2, %v5858_v55  ;;  %4448 = vmatmul.msk.bf16.vlgmr.msrb.gmra.mxu1 %vm841_vm2, %v5858_v55 }
 0x1df   : > { %4449 = vmatmul.msk.bf16.vlgmr.msrb.gmra.mxu2 %vm841_vm2, %v5858_v55  ;;  %2601 = vmatpush.bf16.msrb.mxu0 %v2304_v63  ;;  %v4909_v63 = vld [vmem:[%s5434_s30 + $0x5a4] sm:$0x30] }
 0x1e0   : > { %4450 = vmatmul.msk.bf16.vlgmr.msrb.gmra.mxu3 %vm841_vm2, %v5858_v55  ;;  %2629 = vmatpush.bf16.msrb.mxu2 %v2310_v54 }
 0x1e1   : > { %2643 = vmatpush.bf16.msrb.mxu3 %v2313_v62  ;;  %2615 = vmatpush.bf16.msrb.mxu1 %v2307_v7  ;;  %v4613_v62 = vld [vmem:[%s5434_s30 + $0x548] sm:$0xf]  ;;  %v4896_v7 = vld [vmem:[%s5434_s30 + $0x544] sm:$0xf] }
 0x1e2   : > { %v6050_v17 = vpop.f32.mrf.mxu2  ;;  %v4614_v9 = vor.u32 %v4909_v63, %v4613_v62  ;;  %v2974_v62 = vand.u32 %v4618_v15, %v5432_v2  ;;  %v2965_v63 = vand.u32 %v4606_v26, %v5432_v2  ;;  %v4511_v15 = vld [vmem:[%s5434_s30 + $0x4e0] sm:$0xf0]  ;;  %v4518_v26 = vor.u32 %v4885_v52, %v4517_v0  ;;  %v4899_v0 = vld [vmem:[%s5434_s30 + $0x55c] sm:$0xf]  ;;  %v4621_v52 = vld [vmem:[%s5434_s30 + $0x550] sm:$0xf] }
 0x1e3   : > { %v6052_v11 = vpop.f32.mrf.mxu3  ;;  %v6054_v40 = vpop.f32.mrf.mxu0  ;;  %2602 = vmatpush.bf16.msrb.mxu0 %v4326_v23  ;;  %v4610_v23 = vor.u32 %v4896_v7, %v4607_v8  ;;  %v4519_v7 = vld [vmem:[%s5434_s30 + $0x4e8] sm:$0xf0]  ;;  %v4509_v8 = vld [vmem:[%s5434_s30 + $0x480] sm:$0xf] }
 0x1e4   : > { %v6056_v54 = vpop.f32.mrf.mxu1  ;;  %2630 = vmatpush.bf16.msrb.mxu2 %v4334_v27  ;;  %v2971_v36 = vand.u32 %v4614_v9, %v5432_v2  ;;  %v4872_v9 = vld [vmem:[%s5434_s30 + $0x484] sm:$0xf]  ;;  %v4510_v14 = vor.u32 %v4884_v34, %v4509_v8  ;;  %v4631_v34 = vld [vmem:[%s5434_s30 + $0x5b8] sm:$0x30] }
 0x1e5   : > { %2644 = vmatpush.bf16.msrb.mxu3 %v4338_v29  ;;  %2616 = vmatpush.bf16.msrb.mxu1 %v4330_v16  ;;  %v2968_v3 = vand.u32 %v4610_v23, %v5432_v2  ;;  %v4522_v23 = vor.u32 %v4873_v31, %v4519_v7  ;;  %v4514_v12 = vor.u32 %v4872_v9, %v4511_v15  ;;  %v4910_v31 = vld [vmem:[%s5434_s30 + $0x5ac] sm:$0x30]  ;;  %v4898_v7 = vld [vmem:[%s5434_s30 + $0x554] sm:$0xf] }
 0x1e6   : > { %v4634_v9 = vor.u32 %v4899_v0, %v4631_v34  ;;  %v4622_v15 = vor.u32 %v4910_v31, %v4621_v52  ;;  %v4533_v34 = vld [vmem:[%s5434_s30 + $0x498] sm:$0xf]  ;;  %v4875_v31 = vld [vmem:[%s5434_s30 + $0x49c] sm:$0xf] }
 0x1e7   : > { %v4887_v52 = vld [vmem:[%s5434_s30 + $0x4f4] sm:$0xf0] }
 0x1e8   : > { %v2977_v0 = vand.u32 %v4622_v15, %v5432_v2  ;;  %v4527_v15 = vld [vmem:[%s5434_s30 + $0x4f0] sm:$0xf0] }
 0x1ea   : > { %v6066_v27 = vpop.f32.mrf.mxu2 }
 0x1eb   : > { %v6068_v29 = vpop.f32.mrf.mxu3  ;;  %v6070_v16 = vpop.f32.mrf.mxu0 }
 0x1ec   : > { %v6072_v37 = vpop.f32.mrf.mxu1 }
 0x1ee   : > { %4451 = vmatmul.msk.bf16.vlgmr.msra.gmra.mxu0 %vm841_vm2, %v5858_v55  ;;  %4452 = vmatmul.msk.bf16.vlgmr.msra.gmra.mxu1 %vm841_vm2, %v5858_v55 }
 0x1ef   : > { %4453 = vmatmul.msk.bf16.vlgmr.msra.gmra.mxu2 %vm841_vm2, %v5858_v55  ;;  %3042 = vmatpush.bf16.msra.mxu0 %v2965_v63  ;;  %v4911_v63 = vld [vmem:[%s5434_s30 + $0x5b4] sm:$0x30] }
 0x1f0   : > { %4454 = vmatmul.msk.bf16.vlgmr.msra.gmra.mxu3 %vm841_vm2, %v5858_v55  ;;  %3070 = vmatpush.bf16.msra.mxu2 %v2971_v36 }
 0x1f1   : > { %3084 = vmatpush.bf16.msra.mxu3 %v2974_v62  ;;  %3056 = vmatpush.bf16.msra.mxu1 %v2968_v3  ;;  %v4629_v62 = vld [vmem:[%s5434_s30 + $0x558] sm:$0xf]  ;;  %v4623_v3 = vld [vmem:[%s5434_s30 + $0x5b0] sm:$0x30] }
 0x1f2   : > { %v6094_v13 = vpop.f32.mrf.mxu2  ;;  %v4630_v8 = vor.u32 %v4911_v63, %v4629_v62  ;;  %v3420_v62 = vld [vmem:[%s6710_s2] sm:$0xff]  ;;  %v2986_v63 = vand.u32 %v4634_v9, %v5432_v2  ;;  %v4874_v9 = vld [vmem:[%s5434_s30 + $0x494] sm:$0xf] }
 0x1f3   : > { %v6096_v10 = vpop.f32.mrf.mxu3  ;;  %v6098_v46 = vpop.f32.mrf.mxu0  ;;  %3043 = vmatpush.bf16.msra.mxu0 %v4510_v14  ;;  %3424 = vperm.xlu0 %4950, %v3420_v62   ;;  %v4534_v62 = vor.u32 %v4887_v52, %v4533_v34  ;;  %v4913_v52 = vld [vmem:[%s5434_s30 + $0x5c4] sm:$0x30] }
 0x1f4   : > { %v6100_v36 = vpop.f32.mrf.mxu1  ;;  %3071 = vmatpush.bf16.msra.mxu2 %v4518_v26  ;;  %v4626_v26 = vor.u32 %v4898_v7, %v4623_v3  ;;  %v2983_v44 = vand.u32 %v4630_v8, %v5432_v2  ;;  %v4535_v3 = vld [vmem:[%s5434_s30 + $0x4f8] sm:$0xf0]  ;;  %v4886_v8 = vld [vmem:[%s5434_s30 + $0x4ec] sm:$0xf0] }
 0x1f5   : > { %3085 = vmatpush.bf16.msra.mxu3 %v4522_v23  ;;  %3057 = vmatpush.bf16.msra.mxu1 %v4514_v12 }
 0x1f6   : > { %v2980_v7 = vand.u32 %v4626_v26, %v5432_v2  ;;  %v4538_v26 = vor.u32 %v4875_v31, %v4535_v3  ;;  %v4901_v31 = vld [vmem:[%s5434_s30 + $0x56c] sm:$0xf]  ;;  %v4637_v3 = vld [vmem:[%s5434_s30 + $0x560] sm:$0xf] }
 0x1fa   : > { %v6110_v45 = vpop.f32.mrf.mxu2 }
 0x1fb   : > { %6740 = vst [vmem:[#allocation31_spill] sm:$0xff] %v6110_v45  ;;  %v6112_v14 = vpop.f32.mrf.mxu3  ;;  %v6114_v23 = vpop.f32.mrf.mxu0 }
 0x1fc   : > { %6741 = vst [vmem:[#allocation32_spill] sm:$0xff] %v6112_v14  ;;  %v6116_v12 = vpop.f32.mrf.mxu1  ;;  %v4530_v14 = vor.u32 %v4874_v9, %v4527_v15  ;;  %v4639_v9 = vld [vmem:[%s5434_s30 + $0x5c0] sm:$0x30] }
 0x1fd   : > { %6742 = vst [vmem:[#allocation33_spill] sm:$0xff] %v6114_v23 }
 0x1fe   : > { %6743 = vst [vmem:[#allocation34_spill] sm:$0xff] %v6116_v12  ;;  %4455 = vmatmul.msk.bf16.vlgmr.msrb.gmra.mxu0 %vm841_vm2, %v5858_v55  ;;  %4456 = vmatmul.msk.bf16.vlgmr.msrb.gmra.mxu1 %vm841_vm2, %v5858_v55  ;;  %v4526_v12 = vor.u32 %v4886_v8, %v4525_v38  ;;  %v4912_v38 = vld [vmem:[%s5434_s30 + $0x5bc] sm:$0x30]  ;;  %v4900_v8 = vld [vmem:[%s5434_s30 + $0x564] sm:$0xf] }
 0x1ff   : > { %4457 = vmatmul.msk.bf16.vlgmr.msrb.gmra.mxu2 %vm841_vm2, %v5858_v55  ;;  %3098 = vmatpush.bf16.msrb.mxu0 %v2977_v0  ;;  %v4645_v0 = vld [vmem:[%s5434_s30 + $0x568] sm:$0xf] }
 0x200   : > { %4458 = vmatmul.msk.bf16.vlgmr.msrb.gmra.mxu3 %vm841_vm2, %v5858_v55  ;;  %3126 = vmatpush.bf16.msrb.mxu2 %v2983_v44  ;;  %v4646_v15 = vor.u32 %v4913_v52, %v4645_v0 }
 0x201   : > { %3140 = vmatpush.bf16.msrb.mxu3 %v2986_v63  ;;  %3112 = vmatpush.bf16.msrb.mxu1 %v2980_v7  ;;  %v3421_v63 = vld [vmem:[%s6710_s2 + $0x8] sm:$0xff] }
 0x202   : > { %v6141_v23 = vpop.f32.mrf.mxu2  ;;  %v4647_v7 = vld [vmem:[%s5434_s30 + $0x5c8] sm:$0x30]  ;;  %3429 = vperm.xlu0 %4950, %v3421_v63  }
 0x203   : > { %6744 = vst [vmem:[#allocation35_spill] sm:$0xff] %v6141_v23  ;;  %v6143_v45 = vpop.f32.mrf.mxu3  ;;  %v6145_v44 = vpop.f32.mrf.mxu0  ;;  %3099 = vmatpush.bf16.msrb.mxu0 %v4526_v12 }
 0x204   : > { %6745 = vst [vmem:[#allocation36_spill] sm:$0xff] %v6143_v45  ;;  %v6147_v34 = vpop.f32.mrf.mxu1  ;;  %3127 = vmatpush.bf16.msrb.mxu2 %v4534_v62  ;;  %v4650_v62 = vor.u32 %v4901_v31, %v4647_v7  ;;  %v2995_v45 = vand.u32 %v4646_v15, %v5432_v2  ;;  %v4549_v31 = vld [vmem:[%s5434_s30 + $0x4a8] sm:$0xf]  ;;  %v4876_v15 = vld [vmem:[%s5434_s30 + $0x4a4] sm:$0xf] }
 0x205   : > { %6746 = vst [vmem:[#allocation37_spill] sm:$0xff] %v6145_v44  ;;  %3141 = vmatpush.bf16.msrb.mxu3 %v4538_v26  ;;  %3113 = vmatpush.bf16.msrb.mxu1 %v4530_v14  ;;  %v4642_v26 = vor.u32 %v4900_v8, %v4639_v9  ;;  %v4889_v7 = vld [vmem:[%s5434_s30 + $0x504] sm:$0xf0]  ;;  %v4551_v8 = vld [vmem:[%s5434_s30 + $0x508] sm:$0xf0] }
 0x206   : > { %6747 = vst [vmem:[#allocation38_spill] sm:$0xff] %v6147_v34  ;;  %v4638_v34 = vor.u32 %v4912_v38, %v4637_v3  ;;  %v2998_v0 = vand.u32 %v4650_v62, %v5432_v2  ;;  %v4877_v3 = vld [vmem:[%s5434_s30 + $0x4ac] sm:$0xf]  ;;  %v4541_v9 = vld [vmem:[%s5434_s30 + $0x4a0] sm:$0xf] }
 0x207   : > { %v2992_v38 = vand.u32 %v4642_v26, %v5432_v2  ;;  %v4543_v62 = vld [vmem:[%s5434_s30 + $0x500] sm:$0xf0]  ;;  %v4554_v26 = vor.u32 %v4877_v3, %v4551_v8  ;;  %v4914_v3 = vld [vmem:[%s5434_s30 + $0x5cc] sm:$0x30]  ;;  %v4655_v8 = vld [vmem:[%s5434_s30 + $0x5d0] sm:$0x30] }
 0x208   : > { %v2989_v52 = vand.u32 %v4638_v34, %v5432_v2  ;;  %v4550_v34 = vor.u32 %v4889_v7, %v4549_v31  ;;  %v4903_v31 = vld [vmem:[%s5434_s30 + $0x57c] sm:$0xf]  ;;  %v4653_v7 = vld [vmem:[%s5434_s30 + $0x570] sm:$0xf] }
 0x20a   : > { %v6160_v12 = vpop.f32.mrf.mxu2 }
 0x20b   : > { %6748 = vst [vmem:[#allocation39_spill] sm:$0xff] %v6160_v12  ;;  %v6162_v44 = vpop.f32.mrf.mxu3  ;;  %v6164_v14 = vpop.f32.mrf.mxu0  ;;  %v4546_v12 = vor.u32 %v4876_v15, %v4543_v62  ;;  %v4654_v62 = vor.u32 %v4914_v3, %v4653_v7  ;;  %v4879_v7 = vld [vmem:[%s5434_s30 + $0x4bc] sm:$0xf] }
 0x20c   : > { %6749 = vst [vmem:[#allocation40_spill] sm:$0xff] %v6162_v44  ;;  %v6166_v63 = vpop.f32.mrf.mxu1 }
 0x20d   : > { %6750 = vst [vmem:[#allocation41_spill] sm:$0xff] %v6164_v14  ;;  %v4888_v14 = vld [vmem:[%s5434_s30 + $0x4fc] sm:$0xf0] }
 0x20e   : > { %6751 = vst [vmem:[#allocation42_spill] sm:$0xff] %v6166_v63  ;;  %4699 = vmatmul.msk.bf16.vlgmr.msra.gmra.mxu0 %vm841_vm2, %v5858_v55  ;;  %4700 = vmatmul.msk.bf16.vlgmr.msra.gmra.mxu1 %vm841_vm2, %v5858_v55  ;;  %v4542_v63 = vor.u32 %v4888_v14, %v4541_v9  ;;  %v4663_v14 = vld [vmem:[%s5434_s30 + $0x5d8] sm:$0x30] }
 0x20f   : > { %4701 = vmatmul.msk.bf16.vlgmr.msra.gmra.mxu2 %vm841_vm2, %v5858_v55  ;;  %3154 = vmatpush.bf16.msra.mxu0 %v2989_v52  ;;  %v4915_v52 = vld [vmem:[%s5434_s30 + $0x5d4] sm:$0x30]  ;;  %v4666_v15 = vor.u32 %v4903_v31, %v4663_v14 }
 0x210   : > { %4702 = vmatmul.msk.bf16.vlgmr.msra.gmra.mxu3 %vm841_vm2, %v5858_v55  ;;  %3182 = vmatpush.bf16.msra.mxu2 %v2995_v45  ;;  %v4565_v31 = vld [vmem:[%s5434_s30 + $0x4b8] sm:$0xf] }
 0x211   : > { %3196 = vmatpush.bf16.msra.mxu3 %v2998_v0  ;;  %3168 = vmatpush.bf16.msra.mxu1 %v2992_v38  ;;  %v4661_v0 = vld [vmem:[%s5434_s30 + $0x578] sm:$0xf]  ;;  %v4902_v38 = vld [vmem:[%s5434_s30 + $0x574] sm:$0xf] }
 0x212   : > { %v6188_v44 = vpop.f32.mrf.mxu2  ;;  %v4662_v9 = vor.u32 %v4915_v52, %v4661_v0  ;;  %v3010_v0 = vand.u32 %v4666_v15, %v5432_v2  ;;  %v3001_v52 = vand.u32 %v4654_v62, %v5432_v2  ;;  %v4891_v14 = vld [vmem:[%s5434_s30 + $0x514] sm:$0xf0]  ;;  %v4559_v15 = vld [vmem:[%s5434_s30 + $0x510] sm:$0xf0] }
 0x213   : > { %6752 = vst [vmem:[#allocation43_spill] sm:$0xff] %v6188_v44  ;;  %v6190_v23 = vpop.f32.mrf.mxu3  ;;  %v6192_v25 = vpop.f32.mrf.mxu0  ;;  %3155 = vmatpush.bf16.msra.mxu0 %v4542_v63  ;;  %v4658_v63 = vor.u32 %v4902_v38, %v4655_v8  ;;  %v4567_v38 = vld [vmem:[%s5434_s30 + $0x518] sm:$0xf0]  ;;  %v4557_v8 = vld [vmem:[%s5434_s30 + $0x4b0] sm:$0xf]  ;;  %v4566_v62 = vor.u32 %v4891_v14, %v4565_v31 }
 0x214   : > { %6753 = vst [vmem:[#allocation44_spill] sm:$0xff] %v6190_v23  ;;  %v6194_v45 = vpop.f32.mrf.mxu1  ;;  %3183 = vmatpush.bf16.msra.mxu2 %v4550_v34  ;;  %v4905_v31 = vld [vmem:[%s5434_s30 + $0x58c] sm:$0xf]  ;;  %v4669_v14 = vld [vmem:[%s5434_s30 + $0x580] sm:$0xf] }
 0x215   : > { %6754 = vst [vmem:[#allocation45_spill] sm:$0xff] %v6192_v25  ;;  %3197 = vmatpush.bf16.msra.mxu3 %v4554_v26  ;;  %3169 = vmatpush.bf16.msra.mxu1 %v4546_v12  ;;  %v3007_v25 = vand.u32 %v4662_v9, %v5432_v2  ;;  %v3004_v3 = vand.u32 %v4658_v63, %v5432_v2  ;;  %v4878_v9 = vld [vmem:[%s5434_s30 + $0x4b4] sm:$0xf] }
 0x216   : > { %6755 = vst [vmem:[#allocation46_spill] sm:$0xff] %v6194_v45  ;;  %v4570_v63 = vor.u32 %v4879_v7, %v4567_v38  ;;  %v4916_v7 = vld [vmem:[%s5434_s30 + $0x5dc] sm:$0x30]  ;;  %v4904_v38 = vld [vmem:[%s5434_s30 + $0x584] sm:$0xf] }
 0x21a   : > { %v6204_v34 = vpop.f32.mrf.mxu2 }
 0x21b   : > { %6756 = vst [vmem:[#allocation47_spill] sm:$0xff] %v6204_v34  ;;  %v6206_v26 = vpop.f32.mrf.mxu3  ;;  %v6208_v12 = vpop.f32.mrf.mxu0  ;;  %v4562_v34 = vor.u32 %v4878_v9, %v4559_v15  ;;  %v4670_v15 = vor.u32 %v4916_v7, %v4669_v14  ;;  %v4581_v14 = vld [vmem:[%s5434_s30 + $0x4c8] sm:$0xf] }
 0x21c   : > { %6757 = vst [vmem:[#allocation48_spill] sm:$0xff] %v6206_v26  ;;  %v6210_v45 = vpop.f32.mrf.mxu1  ;;  %v4893_v7 = vld [vmem:[%s5434_s30 + $0x524] sm:$0xf0] }
 0x21d   : > { %6758 = vst [vmem:[#allocation49_spill] sm:$0xff] %v6208_v12  ;;  %v4890_v12 = vld [vmem:[%s5434_s30 + $0x50c] sm:$0xf0] }
 0x21e   : > { %6759 = vst [vmem:[#allocation50_spill] sm:$0xff] %v6210_v45  ;;  %4703 = vmatmul.msk.bf16.vlgmr.msrb.gmra.mxu0 %vm841_vm2, %v5858_v55  ;;  %4704 = vmatmul.msk.bf16.vlgmr.msrb.gmra.mxu1 %vm841_vm2, %v5858_v55  ;;  %v4558_v45 = vor.u32 %v4890_v12, %v4557_v8  ;;  %v4679_v12 = vld [vmem:[%s5434_s30 + $0x5e8] sm:$0x30] }
 0x21f   : > { %4705 = vmatmul.msk.bf16.vlgmr.msrb.gmra.mxu2 %vm841_vm2, %v5858_v55  ;;  %3210 = vmatpush.bf16.msrb.mxu0 %v3001_v52  ;;  %v4917_v52 = vld [vmem:[%s5434_s30 + $0x5e4] sm:$0x30]  ;;  %v4682_v9 = vor.u32 %v4905_v31, %v4679_v12  ;;  %v3013_v12 = vand.u32 %v4670_v15, %v5432_v2  ;;  %v4582_v15 = vor.u32 %v4893_v7, %v4581_v14  ;;  %v4693_v14 = vld [vmem:[%s5434_s30 + $0x598] sm:$0xf]  ;;  %v4685_v7 = vld [vmem:[%s5434_s30 + $0x590] sm:$0xf] }
 0x220   : > { %4706 = vmatmul.msk.bf16.vlgmr.msrb.gmra.mxu3 %vm841_vm2, %v5858_v55  ;;  %3238 = vmatpush.bf16.msrb.mxu2 %v3007_v25 }
 0x221   : > { %3252 = vmatpush.bf16.msrb.mxu3 %v3010_v0  ;;  %3224 = vmatpush.bf16.msrb.mxu1 %v3004_v3  ;;  %v4677_v0 = vld [vmem:[%s5434_s30 + $0x588] sm:$0xf]  ;;  %v4671_v3 = vld [vmem:[%s5434_s30 + $0x5e0] sm:$0x30] }
 0x222   : > { %v6232_v26 = vpop.f32.mrf.mxu2  ;;  %v4678_v8 = vor.u32 %v4917_v52, %v4677_v0 }
 0x223   : > { %v6234_v23 = vpop.f32.mrf.mxu3  ;;  %v6236_v44 = vpop.f32.mrf.mxu0  ;;  %3211 = vmatpush.bf16.msrb.mxu0 %v4558_v45  ;;  %v4674_v45 = vor.u32 %v4904_v38, %v4671_v3  ;;  %v4573_v38 = vld [vmem:[%s5434_s30 + $0x4c0] sm:$0xf] }
 0x224   : > { %6760 = vst [vmem:[#allocation51_spill] sm:$0xff] %v6236_v44  ;;  %v6238_v25 = vpop.f32.mrf.mxu1  ;;  %3239 = vmatpush.bf16.msrb.mxu2 %v4566_v62  ;;  %v1930_v62 = vmax.f32 %v5713_v48, %v5982_v33  ;;  %v3019_v31 = vand.u32 %v4678_v8, %v5432_v2  ;;  %v3022_v33 = vand.u32 %v4682_v9, %v5432_v2  ;;  %v4892_v3 = vld [vmem:[%s5434_s30 + $0x51c] sm:$0xf0]  ;;  %v4880_v8 = vld [vmem:[%s5434_s30 + $0x4c4] sm:$0xf] }
 0x225   : > { %6761 = vst [vmem:[#allocation52_spill] sm:$0xff] %v6238_v25  ;;  %3253 = vmatpush.bf16.msrb.mxu3 %v4570_v63  ;;  %3225 = vmatpush.bf16.msrb.mxu1 %v4562_v34  ;;  %v1931_v34 = vmax.f32 %v5715_v49, %v5984_v47  ;;  %v4881_v49 = vld [vmem:[%s5434_s30 + $0x4cc] sm:$0xf]  ;;  %v3016_v47 = vand.u32 %v4674_v45, %v5432_v2  ;;  %v4575_v9 = vld [vmem:[%s5434_s30 + $0x520] sm:$0xf0] }
 0x22a   : > { %v6250_v63 = vpop.f32.mrf.mxu2 }
 0x22b   : > { %v6254_v25 = vpop.f32.mrf.mxu3  ;;  %v2324_v44 = vpop.f32.mrf.mxu0 }
 0x22c   : > { %v6256_v0 = vmax.f32 %v1930_v62, %v2324_v44  ;;  %v2338_v52 = vpop.f32.mrf.mxu1  ;;  %v4583_v44 = vld [vmem:[%s5434_s30 + $0x528] sm:$0xf0]  ;;  %v1932_v62 = vmax.f32 %v5737_v1, %v6006_v51  ;;  %v1955_v1 = vmax.f32 %v5743_v6, %v6012_v53  ;;  %v4919_v6 = vld [vmem:[%s5434_s30 + $0x5f4] sm:$0x30]  ;;  %v4907_v53 = vld [vmem:[%s5434_s30 + $0x59c] sm:$0xf] }
 0x22d   : > { %v6259_v48 = vmax.f32 %v1931_v34, %v2338_v52  ;;  %v4586_v45 = vor.u32 %v4881_v49, %v4583_v44  ;;  %v4574_v34 = vor.u32 %v4892_v3, %v4573_v38  ;;  %v1933_v52 = vmax.f32 %v5739_v4, %v6008_v35  ;;  %v4918_v49 = vld [vmem:[%s5434_s30 + $0x5ec] sm:$0x30]  ;;  %v4687_v44 = vld [vmem:[%s5434_s30 + $0x5f0] sm:$0x30] }
 0x22e   : > { %6762 = vst [vmem:[#allocation53_spill] sm:$0xff] %v6256_v0  ;;  %4707 = vmatmul.msk.bf16.vlgmr.msra.gmra.mxu0 %vm841_vm2, %v5858_v55  ;;  %4708 = vmatmul.msk.bf16.vlgmr.msra.gmra.mxu1 %vm841_vm2, %v5858_v55  ;;  %v4694_v38 = vor.u32 %v4919_v6, %v4693_v14  ;;  %v4599_v14 = vld [vmem:[%s5434_s30 + $0x538] sm:$0xf0]  ;;  %v4589_v6 = vld [vmem:[%s5434_s30 + $0x4d0] sm:$0xf] }
 0x22f   : > { %6763 = vst [vmem:[#allocation54_spill] sm:$0xff] %v6259_v48  ;;  %4709 = vmatmul.msk.bf16.vlgmr.msra.gmra.mxu2 %vm841_vm2, %v5858_v55  ;;  %3266 = vmatpush.bf16.msra.mxu0 %v3013_v12  ;;  %v1954_v48 = vmax.f32 %v5741_v5, %v6010_v58 }
 0x230   : > { %4710 = vmatmul.msk.bf16.vlgmr.msra.gmra.mxu3 %vm841_vm2, %v5858_v55  ;;  %3294 = vmatpush.bf16.msra.mxu2 %v3019_v31  ;;  %v4578_v31 = vor.u32 %v4880_v8, %v4575_v9  ;;  %v4686_v8 = vor.u32 %v4918_v49, %v4685_v7  ;;  %v1957_v9 = vmax.f32 %v5755_v20, %v6024_v30  ;;  %v4882_v7 = vld [vmem:[%s5434_s30 + $0x4d4] sm:$0xf] }
 0x231   : > { %3308 = vmatpush.bf16.msra.mxu3 %v3022_v33  ;;  %3280 = vmatpush.bf16.msra.mxu1 %v3016_v47  ;;  %v4906_v47 = vld [vmem:[%s5434_s30 + $0x594] sm:$0xf] }
 0x232   : > { %v2352_v0 = vpop.f32.mrf.mxu2  ;;  %v4591_v49 = vld [vmem:[%s5434_s30 + $0x530] sm:$0xf0] }
 0x233   : > { %v6288_v51 = vmax.f32 %v1932_v62, %v2352_v0  ;;  %v2366_v33 = vpop.f32.mrf.mxu3  ;;  %v2326_v4 = vpop.f32.mrf.mxu0  ;;  %3267 = vmatpush.bf16.msra.mxu0 %v4574_v34  ;;  %v4695_v0 = vld [vmem:[%s5434_s30 + $0x5f8] sm:$0x30]  ;;  %v1935_v34 = vmax.f32 %v5759_v22, %v6028_v56  ;;  %v3025_v56 = vand.u32 %v4686_v8, %v5432_v2  ;;  %v4594_v8 = vor.u32 %v4882_v7, %v4591_v49 }
 0x234   : > { %v6290_v35 = vmax.f32 %v1933_v52, %v2366_v33  ;;  %v6292_v5 = vmax.f32 %v1954_v48, %v2326_v4  ;;  %v2340_v58 = vpop.f32.mrf.mxu1  ;;  %3295 = vmatpush.bf16.msra.mxu2 %v4582_v15  ;;  %v1956_v48 = vmax.f32 %v5753_v18, %v6022_v28  ;;  %v4698_v3 = vor.u32 %v4907_v53, %v4695_v0  ;;  %v4895_v33 = vld [vmem:[%s5434_s30 + $0x534] sm:$0xf0]  ;;  %v4883_v4 = vld [vmem:[%s5434_s30 + $0x4dc] sm:$0xf]  ;;  %v4894_v53 = vld [vmem:[%s5434_s30 + $0x52c] sm:$0xf0] }
 0x235   : > { %v6294_v12 = vmax.f32 %v1955_v1, %v2340_v58  ;;  %3309 = vmatpush.bf16.msra.mxu3 %v4586_v45  ;;  %3281 = vmatpush.bf16.msra.mxu1 %v4578_v31  ;;  %v1934_v15 = vmax.f32 %v5757_v21, %v6026_v50  ;;  %v4690_v45 = vor.u32 %v4906_v47, %v4687_v44  ;;  %v4597_v1 = vld [vmem:[%s5434_s30 + $0x4d8] sm:$0xf]  ;;  %v6337_v0 = vld [vmem:[%s6708_s0] sm:$0xff] }
 0x236   : > { %v3031_v21 = vand.u32 %v4694_v38, %v5432_v2  ;;  %v3034_v22 = vand.u32 %v4698_v3, %v5432_v2  ;;  %v1936_v47 = vmax.f32 %v5781_v39, %v6050_v17  ;;  %v4590_v44 = vor.u32 %v4894_v53, %v4589_v6  ;;  %v6767_v6 = vld [vmem:[#allocation32_spill] sm:$0xff]  ;;  %v6769_v53 = vld [vmem:[#allocation33_spill] sm:$0xff]  ;;  %v6770_v7 = vld [vmem:[#allocation7_spill] sm:$0xff] }
 0x237   : > { %v3028_v58 = vand.u32 %v4690_v45, %v5432_v2  ;;  %v4598_v2 = vor.u32 %v4895_v33, %v4597_v1  ;;  %v1937_v38 = vmax.f32 %v5783_v41, %v6052_v11 }
 0x23a   : > { %v2354_v62 = vpop.f32.mrf.mxu2 }
 0x23b   : > { %v6312_v52 = vmax.f32 %v1956_v48, %v2354_v62  ;;  %v2368_v18 = vpop.f32.mrf.mxu3  ;;  %v2380_v28 = vpop.f32.mrf.mxu0  ;;  %v1958_v48 = vmax.f32 %v5785_v42, %v6054_v40  ;;  %v1960_v42 = vmax.f32 %v5797_v57, %v6066_v27  ;;  %v1938_v40 = vmax.f32 %v5801_v60, %v6070_v16  ;;  %v6764_v27 = vld [vmem:[#allocation4_spill] sm:$0xff] }
 0x23c   : > { %v6314_v31 = vmax.f32 %v1957_v9, %v2368_v18  ;;  %v6316_v20 = vmax.f32 %v1934_v15, %v2380_v28  ;;  %v2394_v30 = vpop.f32.mrf.mxu1  ;;  %v1959_v9 = vmax.f32 %v5787_v43, %v6056_v54  ;;  %v1961_v43 = vmax.f32 %v5799_v59, %v6068_v29 }
 0x23d   : > { %v6319_v50 = vmax.f32 %v1935_v34, %v2394_v30  ;;  %v1939_v54 = vmax.f32 %v5803_v61, %v6072_v37  ;;  %v1940_v59 = vmax.f32 %v5825_v19, %v6094_v13  ;;  %v1941_v60 = vmax.f32 %v5827_v24, %v6096_v10  ;;  %v6765_v13 = vld [vmem:[#allocation31_spill] sm:$0xff]  ;;  %v6766_v24 = vld [vmem:[#allocation5_spill] sm:$0xff] }
 0x23e   : > { %4711 = vmatmul.msk.bf16.vlgmr.msrb.gmra.mxu0 %vm841_vm2, %v5858_v55  ;;  %4712 = vmatmul.msk.bf16.vlgmr.msrb.gmra.mxu1 %vm841_vm2, %v5858_v55  ;;  %v4602_v55 = vor.u32 %v4883_v4, %v4599_v14  ;;  %v1962_v61 = vmax.f32 %v5829_v32, %v6098_v46  ;;  %v1963_v29 = vmax.f32 %v6764_v27, %v6100_v36  ;;  %v6768_v32 = vld [vmem:[#allocation6_spill] sm:$0xff] }
 0x23f   : > { %4713 = vmatmul.msk.bf16.vlgmr.msrb.gmra.mxu2 %vm841_vm2, %v6337_v0  ;;  %3322 = vmatpush.bf16.msrb.mxu0 %v3025_v56  ;;  %v1964_v10 = vmax.f32 %v6766_v24, %v6765_v13  ;;  %v1965_v46 = vmax.f32 %v6768_v32, %v6767_v6  ;;  %v1942_v36 = vmax.f32 %v6770_v7, %v6769_v53  ;;  %v6781_v13 = vld [vmem:[#allocation39_spill] sm:$0xff]  ;;  %v6782_v24 = vld [vmem:[#allocation13_spill] sm:$0xff]  ;;  %v6783_v6 = vld [vmem:[#allocation40_spill] sm:$0xff] }
 0x240   : > { %4714 = vmatmul.msk.bf16.vlgmr.msrb.gmra.mxu3 %vm841_vm2, %v6337_v0  ;;  %3350 = vmatpush.bf16.msrb.mxu2 %v3031_v21  ;;  %v6784_v32 = vld [vmem:[#allocation14_spill] sm:$0xff]  ;;  %v6785_v53 = vld [vmem:[#allocation41_spill] sm:$0xff]  ;;  %v6786_v7 = vld [vmem:[#allocation15_spill] sm:$0xff] }
 0x241   : > { %3364 = vmatpush.bf16.msrb.mxu3 %v3034_v22  ;;  %3336 = vmatpush.bf16.msrb.mxu1 %v3028_v58 }
 0x242   : > { %v2408_v3 = vpop.f32.mrf.mxu2 }
 0x243   : > { %v6353_v15 = vmax.f32 %v1936_v47, %v2408_v3  ;;  %v2422_v62 = vpop.f32.mrf.mxu3  ;;  %v2382_v39 = vpop.f32.mrf.mxu0  ;;  %3323 = vmatpush.bf16.msrb.mxu0 %v4590_v44  ;;  %v6772_v47 = vld [vmem:[#allocation8_spill] sm:$0xff] }
 0x244   : > { %v6355_v17 = vmax.f32 %v1937_v38, %v2422_v62  ;;  %v6357_v45 = vmax.f32 %v1958_v48, %v2382_v39  ;;  %v2396_v34 = vpop.f32.mrf.mxu1  ;;  %3351 = vmatpush.bf16.msrb.mxu2 %v4598_v2  ;;  %v6771_v2 = vld [vmem:[#allocation34_spill] sm:$0xff]  ;;  %v6773_v39 = vld [vmem:[#allocation35_spill] sm:$0xff] }
 0x245   : > { %v6359_v41 = vmax.f32 %v1959_v9, %v2396_v34  ;;  %3365 = vmatpush.bf16.msrb.mxu3 %v4602_v55  ;;  %3337 = vmatpush.bf16.msrb.mxu1 %v4594_v8  ;;  %v1943_v55 = vmax.f32 %v6772_v47, %v6771_v2  ;;  %v6774_v34 = vld [vmem:[#allocation9_spill] sm:$0xff]  ;;  %v6787_v2 = vld [vmem:[#allocation42_spill] sm:$0xff]  ;;  %v6788_v47 = vld [vmem:[#allocation16_spill] sm:$0xff] }
 0x24a   : > { %v2410_v11 = vpop.f32.mrf.mxu2 }
 0x24b   : > { %v6369_v18 = vmax.f32 %v1960_v42, %v2410_v11  ;;  %v2424_v28 = vpop.f32.mrf.mxu3  ;;  %v2436_v30 = vpop.f32.mrf.mxu0  ;;  %v1944_v42 = vmax.f32 %v6774_v34, %v6773_v39 }
 0x24c   : > { %v6371_v21 = vmax.f32 %v1961_v43, %v2424_v28  ;;  %v6373_v22 = vmax.f32 %v1938_v40, %v2436_v30  ;;  %v2450_v56 = vpop.f32.mrf.mxu1  ;;  %v6775_v43 = vld [vmem:[#allocation36_spill] sm:$0xff]  ;;  %v6776_v40 = vld [vmem:[#allocation10_spill] sm:$0xff]  ;;  %v6778_v28 = vld [vmem:[#allocation11_spill] sm:$0xff] }
 0x24d   : > { %v6375_v57 = vmax.f32 %v1939_v54, %v2450_v56  ;;  %v1945_v11 = vmax.f32 %v6776_v40, %v6775_v43  ;;  %v6777_v54 = vld [vmem:[#allocation37_spill] sm:$0xff]  ;;  %v6789_v40 = vld [vmem:[#allocation43_spill] sm:$0xff] }
 0x24e   : > { %4715 = vmatmul.msk.bf16.vlgmr.msra.gmra.mxu0 %vm841_vm2, %v6337_v0  ;;  %4716 = vmatmul.msk.bf16.vlgmr.msra.gmra.mxu1 %vm841_vm2, %v6337_v0  ;;  %v1966_v30 = vmax.f32 %v6778_v28, %v6777_v54  ;;  %v6791_v28 = vld [vmem:[#allocation44_spill] sm:$0xff] }
 0x24f   : > { %4717 = vmatmul.msk.bf16.vlgmr.msra.gmra.mxu2 %vm841_vm2, %v6337_v0 }
 0x250   : > { %4718 = vmatmul.msk.bf16.vlgmr.msra.gmra.mxu3 %vm841_vm2, %v6337_v0 }
 0x252   : > { %v2464_v37 = vpop.f32.mrf.mxu2 }
 0x253   : > { %v6393_v16 = vmax.f32 %v1940_v59, %v2464_v37  ;;  %v2478_v1 = vpop.f32.mrf.mxu3  ;;  %v2438_v33 = vpop.f32.mrf.mxu0  ;;  %v6779_v59 = vld [vmem:[#allocation38_spill] sm:$0xff] }
 0x254   : > { %v6395_v4 = vmax.f32 %v1941_v60, %v2478_v1  ;;  %v6397_v58 = vmax.f32 %v1962_v61, %v2438_v33  ;;  %v2452_v14 = vpop.f32.mrf.mxu1  ;;  %v6780_v60 = vld [vmem:[#allocation12_spill] sm:$0xff] }
 0x255   : > { %v6399_v19 = vmax.f32 %v1963_v29, %v2452_v14  ;;  %v1967_v61 = vmax.f32 %v6780_v60, %v6779_v59  ;;  %v6793_v59 = vld [vmem:[#allocation45_spill] sm:$0xff]  ;;  %v6794_v60 = vld [vmem:[#allocation19_spill] sm:$0xff] }
 0x25a   : > { %v2466_v49 = vpop.f32.mrf.mxu2 }
 0x25b   : > { %v6409_v44 = vmax.f32 %v1964_v10, %v2466_v49  ;;  %v2480_v38 = vpop.f32.mrf.mxu3  ;;  %v2492_v48 = vpop.f32.mrf.mxu0  ;;  %v1968_v10 = vmax.f32 %v6782_v24, %v6781_v13 }
 0x25c   : > { %v6411_v3 = vmax.f32 %v1965_v46, %v2480_v38  ;;  %v6413_v8 = vmax.f32 %v1942_v36, %v2492_v48  ;;  %v2506_v9 = vpop.f32.mrf.mxu1  ;;  %v1969_v46 = vmax.f32 %v6784_v32, %v6783_v6  ;;  %v1946_v36 = vmax.f32 %v6786_v7, %v6785_v53 }
 0x25d   : > { %v6415_v62 = vmax.f32 %v1943_v55, %v2506_v9  ;;  %v1947_v55 = vmax.f32 %v6788_v47, %v6787_v2  ;;  %v6799_v47 = vld [vmem:[#allocation48_spill] sm:$0xff] }
 0x25e   : > { %4719 = vmatmul.msk.bf16.vlgmr.msrb.gmra.mxu0 %vm841_vm2, %v6337_v0  ;;  %4720 = vmatmul.msk.bf16.vlgmr.msrb.gmra.mxu1 %vm841_vm2, %v6337_v0 }
 0x25f   : > { %4721 = vmatmul.msk.bf16.vlgmr.msrb.gmra.mxu2 %vm841_vm2, %v6337_v0 }
 0x260   : > { %4722 = vmatmul.msk.bf16.vlgmr.msrb.gmra.mxu3 %vm841_vm2, %v6337_v0 }
 0x262   : > { %v2520_v56 = vpop.f32.mrf.mxu2 }
 0x263   : > { %v6433_v37 = vmax.f32 %v1944_v42, %v2520_v56  ;;  %v2534_v27 = vpop.f32.mrf.mxu3  ;;  %v2494_v29 = vpop.f32.mrf.mxu0 }
 0x264   : > { %v6435_v1 = vmax.f32 %v1945_v11, %v2534_v27  ;;  %v6437_v0 = vmax.f32 %v1966_v30, %v2494_v29  ;;  %v2508_v33 = vpop.f32.mrf.mxu1  ;;  %v6790_v11 = vld [vmem:[#allocation17_spill] sm:$0xff]  ;;  %v6792_v30 = vld [vmem:[#allocation18_spill] sm:$0xff] }
 0x265   : > { %v6439_v14 = vmax.f32 %v1967_v61, %v2508_v33  ;;  %v1948_v54 = vmax.f32 %v6790_v11, %v6789_v40  ;;  %v1949_v56 = vmax.f32 %v6792_v30, %v6791_v28  ;;  %v1970_v61 = vmax.f32 %v6794_v60, %v6793_v59  ;;  %v6795_v29 = vld [vmem:[#allocation46_spill] sm:$0xff]  ;;  %v6796_v33 = vld [vmem:[#allocation20_spill] sm:$0xff] }
 0x266   : > { %v1971_v13 = vmax.f32 %v6796_v33, %v6795_v29  ;;  %v6804_v28 = vld [vmem:[#allocation24_spill] sm:$0xff] }
 0x26a   : > { %v2522_v49 = vpop.f32.mrf.mxu2 }
 0x26b   : > { %v6449_v38 = vmax.f32 %v1968_v10, %v2522_v49  ;;  %v2536_v48 = vpop.f32.mrf.mxu3  ;;  %v2548_v9 = vpop.f32.mrf.mxu0  ;;  %v6798_v49 = vld [vmem:[#allocation21_spill] sm:$0xff] }
 0x26c   : > { %v6451_v39 = vmax.f32 %v1969_v46, %v2536_v48  ;;  %v6453_v34 = vmax.f32 %v1946_v36, %v2548_v9  ;;  %v2562_v42 = vpop.f32.mrf.mxu1  ;;  %v6797_v36 = vld [vmem:[#allocation47_spill] sm:$0xff]  ;;  %v6801_v9 = vld [vmem:[#allocation49_spill] sm:$0xff] }
 0x26d   : > { %v6455_v43 = vmax.f32 %v1947_v55, %v2562_v42  ;;  %v1972_v2 = vmax.f32 %v6798_v49, %v6797_v36  ;;  %v6800_v55 = vld [vmem:[#allocation22_spill] sm:$0xff]  ;;  %v6802_v42 = vld [vmem:[#allocation23_spill] sm:$0xff] }
 0x26e   : > { %v1973_v48 = vmax.f32 %v6800_v55, %v6799_v47  ;;  %v1950_v40 = vmax.f32 %v6802_v42, %v6801_v9  ;;  %v6807_v36 = vld [vmem:[#allocation51_spill] sm:$0xff]  ;;  %v6809_v55 = vld [vmem:[#allocation52_spill] sm:$0xff] }
 0x26f   : > { %v6808_v49 = vld [vmem:[#allocation27_spill] sm:$0xff]  ;;  %v6810_v9 = vld [vmem:[#allocation28_spill] sm:$0xff] }
 0x270   : > { %v1974_v47 = vmax.f32 %v6808_v49, %v6807_v36  ;;  %v1975_v42 = vmax.f32 %v6810_v9, %v6809_v55  ;;  %v6814_v9 = vld [vmem:[#allocation54_spill] sm:$0xff] }
 0x272   : > { %v2576_v27 = vpop.f32.mrf.mxu2 }
 0x273   : > { %v6465_v24 = vmax.f32 %v1948_v54, %v2576_v27  ;;  %v2590_v10 = vpop.f32.mrf.mxu3  ;;  %v2550_v6 = vpop.f32.mrf.mxu0  ;;  %v6803_v54 = vld [vmem:[#allocation50_spill] sm:$0xff] }
 0x274   : > { %v6467_v32 = vmax.f32 %v1949_v56, %v2590_v10  ;;  %v6469_v46 = vmax.f32 %v1970_v61, %v2550_v6  ;;  %v2564_v53 = vpop.f32.mrf.mxu1  ;;  %v1951_v30 = vmax.f32 %v6804_v28, %v6803_v54  ;;  %v6806_v6 = vld [vmem:[#allocation26_spill] sm:$0xff] }
 0x275   : > { %v6471_v7 = vmax.f32 %v1971_v13, %v2564_v53  ;;  %v6805_v13 = vld [vmem:[#allocation25_spill] sm:$0xff]  ;;  %v1953_v53 = vmax.f32 %v6806_v6, %v6234_v23  ;;  %v6505_v23 = vpop.permute.xlu0 %3424 }
 0x276   : > { %v1952_v10 = vmax.f32 %v6805_v13, %v6232_v26 }
 0x27a   : > { %v2578_v11 = vpop.f32.mrf.mxu2 }
 0x27b   : > { %v6481_v56 = vmax.f32 %v1972_v2, %v2578_v11  ;;  %v2592_v59 = vpop.f32.mrf.mxu3  ;;  %v2604_v60 = vpop.f32.mrf.mxu0 }
 0x27c   : > { %v6483_v61 = vmax.f32 %v1973_v48, %v2592_v59  ;;  %v6485_v27 = vmax.f32 %v1950_v40, %v2604_v60  ;;  %v2618_v29 = vpop.f32.mrf.mxu1  ;;  %v6811_v59 = vld [vmem:[#allocation29_spill] sm:$0xff] }
 0x27d   : > { %v6487_v33 = vmax.f32 %v1951_v30, %v2618_v29  ;;  %v1976_v60 = vmax.f32 %v6811_v59, %v6250_v63  ;;  %v6812_v29 = vld [vmem:[#allocation30_spill] sm:$0xff]  ;;  %v6521_v59 = vpop.permute.xlu0 %3429 }
 0x27e   : > { %v1977_v13 = vmax.f32 %v6812_v29, %v6254_v25 }
 0x282   : > { %v2632_v2 = vpop.f32.mrf.mxu2 }
 0x283   : > { %v6497_v48 = vmax.f32 %v1952_v10, %v2632_v2  ;;  %v2646_v40 = vpop.f32.mrf.mxu3  ;;  %v2606_v11 = vpop.f32.mrf.mxu0 }
 0x284   : > { %v6499_v54 = vmax.f32 %v1953_v53, %v2646_v40  ;;  %v6501_v28 = vmax.f32 %v1974_v47, %v2606_v11  ;;  %v2620_v26 = vpop.f32.mrf.mxu1  ;;  %v6813_v47 = vld [vmem:[#allocation53_spill] sm:$0xff] }
 0x285   : > { %v6503_v30 = vmax.f32 %v1975_v42, %v2620_v26 }
 0x28a   : > { %v2634_v10 = vpop.f32.mrf.mxu2 }
 0x28b   : > { %v6511_v6 = vmax.f32 %v1976_v60, %v2634_v10  ;;  %v2648_v36 = vpop.f32.mrf.mxu3  ;;  %v3045_v53 = vpop.f32.mrf.mxu0 }
 0x28c   : > { %v6513_v49 = vmax.f32 %v1977_v13, %v2648_v36  ;;  %v3372_v2 = vmax.f32 %v6813_v47, %v3045_v53  ;;  %v3059_v55 = vpop.f32.mrf.mxu1 }
 0x28d   : > { %v3373_v42 = vmax.f32 %v6814_v9, %v3059_v55 }
 0x28e   : > { %v3432_v40 = vadd.f32 %v6505_v23, %v3372_v2 }
 0x28f   : > { %v3433_v63 = vadd.f32 %v6505_v23, %v3373_v42 }
 0x290   : > { %v3480_v11 = vmax.f32 %v3432_v40, 0.0 }
 0x291   : > { %v3481_v25 = vmax.f32 %v3433_v63, 0.0 }
 0x292   : > { %v3073_v26 = vpop.f32.mrf.mxu2 }
 0x293   : > { %v3528_v60 = vpack.c.bf16 %v3481_v25, %v3480_v11  ;;  %v3374_v29 = vmax.f32 %v6288_v51, %v3073_v26  ;;  %v3087_v13 = vpop.f32.mrf.mxu3  ;;  %v3047_v10 = vpop.f32.mrf.mxu0 }
 0x294   : > { %v3375_v36 = vmax.f32 %v6290_v35, %v3087_v13  ;;  %v3396_v53 = vmax.f32 %v6292_v5, %v3047_v10  ;;  %v3061_v47 = vpop.f32.mrf.mxu1 }
 0x295   : > { %v3434_v2 = vadd.f32 %v6505_v23, %v3374_v29  ;;  %3552 = vst [vmem:[%s6527_s12] sm:$0xff] %v3528_v60  ;;  %v3397_v55 = vmax.f32 %v6294_v12, %v3061_v47 }
 0x296   : > { %v3435_v9 = vadd.f32 %v6505_v23, %v3375_v36  ;;  %v3456_v51 = vadd.f32 %v6521_v59, %v3396_v53 }
 0x297   : > { %v3482_v42 = vmax.f32 %v3434_v2, 0.0  ;;  %v3457_v35 = vadd.f32 %v6521_v59, %v3397_v55 }
 0x298   : > { %v3483_v40 = vmax.f32 %v3435_v9, 0.0  ;;  %v3504_v5 = vmax.f32 %v3456_v51, 0.0 }
 0x299   : > { %v3505_v63 = vmax.f32 %v3457_v35, 0.0 }
 0x29a   : > { %v3529_v11 = vpack.c.bf16 %v3483_v40, %v3482_v42  ;;  %v3075_v25 = vpop.f32.mrf.mxu2 }
 0x29b   : > { %v3540_v26 = vpack.c.bf16 %v3505_v63, %v3504_v5  ;;  %v3398_v29 = vmax.f32 %v6312_v52, %v3075_v25  ;;  %v3089_v13 = vpop.f32.mrf.mxu3  ;;  %v3101_v60 = vpop.f32.mrf.mxu0 }
 0x29c   : > { %3553 = vst [vmem:[%s6527_s12 + $0x8] sm:$0xff] %v3529_v11  ;;  %v3399_v12 = vmax.f32 %v6314_v31, %v3089_v13  ;;  %v3376_v10 = vmax.f32 %v6316_v20, %v3101_v60  ;;  %v3115_v36 = vpop.f32.mrf.mxu1 }
 0x29d   : > { %3564 = vst [vmem:[%s6527_s12 + $0x60] sm:$0xff] %v3540_v26  ;;  %v3458_v53 = vadd.f32 %v6521_v59, %v3398_v29  ;;  %v3377_v47 = vmax.f32 %v6319_v50, %v3115_v36 }
 0x29e   : > { %v3459_v2 = vadd.f32 %v6521_v59, %v3399_v12  ;;  %v3436_v55 = vadd.f32 %v6505_v23, %v3376_v10 }
 0x29f   : > { %v3506_v52 = vmax.f32 %v3458_v53, 0.0  ;;  %v3437_v9 = vadd.f32 %v6505_v23, %v3377_v47 }
 0x2a0   : > { %v3507_v51 = vmax.f32 %v3459_v2, 0.0  ;;  %v3484_v42 = vmax.f32 %v3436_v55, 0.0 }
 0x2a1   : > { %v3485_v31 = vmax.f32 %v3437_v9, 0.0 }
 0x2a2   : > { %v3541_v35 = vpack.c.bf16 %v3507_v51, %v3506_v52  ;;  %v3129_v20 = vpop.f32.mrf.mxu2 }
 0x2a3   : > { %v3530_v40 = vpack.c.bf16 %v3485_v31, %v3484_v42  ;;  %v3378_v5 = vmax.f32 %v6353_v15, %v3129_v20  ;;  %v3143_v63 = vpop.f32.mrf.mxu3  ;;  %v3103_v11 = vpop.f32.mrf.mxu0 }
 0x2a4   : > { %3565 = vst [vmem:[%s6527_s12 + $0x68] sm:$0xff] %v3541_v35  ;;  %v3379_v50 = vmax.f32 %v6355_v17, %v3143_v63  ;;  %v3400_v25 = vmax.f32 %v6357_v45, %v3103_v11  ;;  %v3117_v26 = vpop.f32.mrf.mxu1 }
 0x2a5   : > { %3554 = vst [vmem:[%s6527_s12 + $0x10] sm:$0xff] %v3530_v40  ;;  %v3438_v29 = vadd.f32 %v6505_v23, %v3378_v5  ;;  %v3401_v13 = vmax.f32 %v6359_v41, %v3117_v26 }
 0x2a6   : > { %v3439_v60 = vadd.f32 %v6505_v23, %v3379_v50  ;;  %v3460_v12 = vadd.f32 %v6521_v59, %v3400_v25 }
 0x2a7   : > { %v3486_v15 = vmax.f32 %v3438_v29, 0.0  ;;  %v3461_v10 = vadd.f32 %v6521_v59, %v3401_v13 }
 0x2a8   : > { %v3487_v36 = vmax.f32 %v3439_v60, 0.0  ;;  %v3508_v53 = vmax.f32 %v3460_v12, 0.0 }
 0x2a9   : > { %v3509_v17 = vmax.f32 %v3461_v10, 0.0 }
 0x2aa   : > { %v3531_v47 = vpack.c.bf16 %v3487_v36, %v3486_v15  ;;  %v3131_v45 = vpop.f32.mrf.mxu2 }
 0x2ab   : > { %v3542_v2 = vpack.c.bf16 %v3509_v17, %v3508_v53  ;;  %v3402_v55 = vmax.f32 %v6369_v18, %v3131_v45  ;;  %v3145_v52 = vpop.f32.mrf.mxu3  ;;  %v3157_v9 = vpop.f32.mrf.mxu0 }
 0x2ac   : > { %3555 = vst [vmem:[%s6527_s12 + $0x18] sm:$0xff] %v3531_v47  ;;  %v3403_v41 = vmax.f32 %v6371_v21, %v3145_v52  ;;  %v3380_v51 = vmax.f32 %v6373_v22, %v3157_v9  ;;  %v3171_v42 = vpop.f32.mrf.mxu1 }
 0x2ad   : > { %3566 = vst [vmem:[%s6527_s12 + $0x70] sm:$0xff] %v3542_v2  ;;  %v3462_v31 = vadd.f32 %v6521_v59, %v3402_v55  ;;  %v3381_v35 = vmax.f32 %v6375_v57, %v3171_v42 }
 0x2ae   : > { %v3463_v20 = vadd.f32 %v6521_v59, %v3403_v41  ;;  %v3440_v40 = vadd.f32 %v6505_v23, %v3380_v51 }
 0x2af   : > { %v3510_v18 = vmax.f32 %v3462_v31, 0.0  ;;  %v3441_v5 = vadd.f32 %v6505_v23, %v3381_v35 }
 0x2b0   : > { %v3511_v63 = vmax.f32 %v3463_v20, 0.0  ;;  %v3488_v11 = vmax.f32 %v3440_v40, 0.0 }
 0x2b1   : > { %v3489_v21 = vmax.f32 %v3441_v5, 0.0 }
 0x2b2   : > { %v3543_v50 = vpack.c.bf16 %v3511_v63, %v3510_v18  ;;  %v3185_v22 = vpop.f32.mrf.mxu2 }
 0x2b3   : > { %v3532_v25 = vpack.c.bf16 %v3489_v21, %v3488_v11  ;;  %v3382_v26 = vmax.f32 %v6393_v16, %v3185_v22  ;;  %v3199_v29 = vpop.f32.mrf.mxu3  ;;  %v3159_v13 = vpop.f32.mrf.mxu0 }
 0x2b4   : > { %3567 = vst [vmem:[%s6527_s12 + $0x78] sm:$0xff] %v3543_v50  ;;  %v3383_v57 = vmax.f32 %v6395_v4, %v3199_v29  ;;  %v3404_v60 = vmax.f32 %v6397_v58, %v3159_v13  ;;  %v3173_v12 = vpop.f32.mrf.mxu1 }
 0x2b5   : > { %3556 = vst [vmem:[%s6527_s12 + $0x20] sm:$0xff] %v3532_v25  ;;  %v3442_v15 = vadd.f32 %v6505_v23, %v3382_v26  ;;  %v3405_v10 = vmax.f32 %v6399_v19, %v3173_v12 }
 0x2b6   : > { %v3443_v36 = vadd.f32 %v6505_v23, %v3383_v57  ;;  %v3464_v53 = vadd.f32 %v6521_v59, %v3404_v60 }
 0x2b7   : > { %v3490_v16 = vmax.f32 %v3442_v15, 0.0  ;;  %v3465_v17 = vadd.f32 %v6521_v59, %v3405_v10 }
 0x2b8   : > { %v3491_v47 = vmax.f32 %v3443_v36, 0.0  ;;  %v3512_v45 = vmax.f32 %v3464_v53, 0.0 }
 0x2b9   : > { %v3513_v4 = vmax.f32 %v3465_v17, 0.0 }
 0x2ba   : > { %v3533_v2 = vpack.c.bf16 %v3491_v47, %v3490_v16  ;;  %v3187_v58 = vpop.f32.mrf.mxu2 }
 0x2bb   : > { %v3544_v55 = vpack.c.bf16 %v3513_v4, %v3512_v45  ;;  %v3406_v52 = vmax.f32 %v6409_v44, %v3187_v58  ;;  %v3201_v9 = vpop.f32.mrf.mxu3  ;;  %v3213_v41 = vpop.f32.mrf.mxu0 }
 0x2bc   : > { %3557 = vst [vmem:[%s6527_s12 + $0x28] sm:$0xff] %v3533_v2  ;;  %v3407_v19 = vmax.f32 %v6411_v3, %v3201_v9  ;;  %v3384_v51 = vmax.f32 %v6413_v8, %v3213_v41  ;;  %v3227_v42 = vpop.f32.mrf.mxu1 }
 0x2bd   : > { %3568 = vst [vmem:[%s6527_s12 + $0x80] sm:$0xff] %v3544_v55  ;;  %v3466_v31 = vadd.f32 %v6521_v59, %v3406_v52  ;;  %v3385_v35 = vmax.f32 %v6415_v62, %v3227_v42 }
 0x2be   : > { %v3467_v20 = vadd.f32 %v6521_v59, %v3407_v19  ;;  %v3444_v40 = vadd.f32 %v6505_v23, %v3384_v51 }
 0x2bf   : > { %v3514_v44 = vmax.f32 %v3466_v31, 0.0  ;;  %v3445_v18 = vadd.f32 %v6505_v23, %v3385_v35 }
 0x2c0   : > { %v3515_v5 = vmax.f32 %v3467_v20, 0.0  ;;  %v3492_v63 = vmax.f32 %v3444_v40, 0.0 }
 0x2c1   : > { %v3493_v3 = vmax.f32 %v3445_v18, 0.0 }
 0x2c2   : > { %v3545_v11 = vpack.c.bf16 %v3515_v5, %v3514_v44  ;;  %v3241_v8 = vpop.f32.mrf.mxu2 }
 0x2c3   : > { %v3534_v21 = vpack.c.bf16 %v3493_v3, %v3492_v63  ;;  %v3386_v50 = vmax.f32 %v6433_v37, %v3241_v8  ;;  %v3255_v22 = vpop.f32.mrf.mxu3  ;;  %v3215_v25 = vpop.f32.mrf.mxu0 }
 0x2c4   : > { %3569 = vst [vmem:[%s6527_s12 + $0x88] sm:$0xff] %v3545_v11  ;;  %v3387_v62 = vmax.f32 %v6435_v1, %v3255_v22  ;;  %v3408_v26 = vmax.f32 %v6437_v0, %v3215_v25  ;;  %v3229_v29 = vpop.f32.mrf.mxu1 }
 0x2c5   : > { %3558 = vst [vmem:[%s6527_s12 + $0x30] sm:$0xff] %v3534_v21  ;;  %v3446_v13 = vadd.f32 %v6505_v23, %v3386_v50  ;;  %v3409_v57 = vmax.f32 %v6439_v14, %v3229_v29 }
 0x2c6   : > { %v3447_v60 = vadd.f32 %v6505_v23, %v3387_v62  ;;  %v3468_v12 = vadd.f32 %v6521_v59, %v3408_v26 }
 0x2c7   : > { %v3494_v37 = vmax.f32 %v3446_v13, 0.0  ;;  %v3469_v15 = vadd.f32 %v6521_v59, %v3409_v57 }
 0x2c8   : > { %v3495_v10 = vmax.f32 %v3447_v60, 0.0  ;;  %v3516_v36 = vmax.f32 %v3468_v12, 0.0 }
 0x2c9   : > { %v3517_v1 = vmax.f32 %v3469_v15, 0.0 }
 0x2ca   : > { %v3535_v53 = vpack.c.bf16 %v3495_v10, %v3494_v37  ;;  %v3243_v0 = vpop.f32.mrf.mxu2 }
 0x2cb   : > { %v3546_v16 = vpack.c.bf16 %v3517_v1, %v3516_v36  ;;  %v3410_v17 = vmax.f32 %v6449_v38, %v3243_v0  ;;  %v3257_v47 = vpop.f32.mrf.mxu3  ;;  %v3269_v45 = vpop.f32.mrf.mxu0 }
 0x2cc   : > { %3559 = vst [vmem:[%s6527_s12 + $0x38] sm:$0xff] %v3535_v53  ;;  %v3411_v14 = vmax.f32 %v6451_v39, %v3257_v47  ;;  %v3388_v4 = vmax.f32 %v6453_v34, %v3269_v45  ;;  %v3283_v2 = vpop.f32.mrf.mxu1 }
 0x2cd   : > { %3570 = vst [vmem:[%s6527_s12 + $0x90] sm:$0xff] %v3546_v16  ;;  %v3470_v58 = vadd.f32 %v6521_v59, %v3410_v17  ;;  %v3389_v55 = vmax.f32 %v6455_v43, %v3283_v2 }
 0x2ce   : > { %v3471_v52 = vadd.f32 %v6521_v59, %v3411_v14  ;;  %v3448_v9 = vadd.f32 %v6505_v23, %v3388_v4 }
 0x2cf   : > { %v3518_v38 = vmax.f32 %v3470_v58, 0.0  ;;  %v3449_v41 = vadd.f32 %v6505_v23, %v3389_v55 }
 0x2d0   : > { %v3519_v19 = vmax.f32 %v3471_v52, 0.0  ;;  %v3496_v51 = vmax.f32 %v3448_v9, 0.0 }
 0x2d1   : > { %v3497_v39 = vmax.f32 %v3449_v41, 0.0 }
 0x2d2   : > { %v3547_v42 = vpack.c.bf16 %v3519_v19, %v3518_v38  ;;  %v3297_v34 = vpop.f32.mrf.mxu2 }
 0x2d3   : > { %v3536_v31 = vpack.c.bf16 %v3497_v39, %v3496_v51  ;;  %v3390_v35 = vmax.f32 %v6465_v24, %v3297_v34  ;;  %v3311_v20 = vpop.f32.mrf.mxu3  ;;  %v3271_v40 = vpop.f32.mrf.mxu0 }
 0x2d4   : > { %3571 = vst [vmem:[%s6527_s12 + $0x98] sm:$0xff] %v3547_v42  ;;  %v3391_v43 = vmax.f32 %v6467_v32, %v3311_v20  ;;  %v3412_v44 = vmax.f32 %v6469_v46, %v3271_v40  ;;  %v3285_v18 = vpop.f32.mrf.mxu1  ;;  %v3604_v20 = vld [vmem:[%s6527_s12 + $0x18] sm:$0xff] (%p5029_p5)  ;;  %v3606_v40 = vld [vmem:[%s6527_s12 + $0x20] sm:$0xff] (%p5029_p5) }
 0x2d5   : > { %3560 = vst [vmem:[%s6527_s12 + $0x40] sm:$0xff] %v3536_v31  ;;  %v3450_v5 = vadd.f32 %v6505_v23, %v3390_v35  ;;  %v3413_v63 = vmax.f32 %v6471_v7, %v3285_v18  ;;  %v3612_v18 = vld [vmem:[%s6527_s12 + $0x38] sm:$0xff] (%p5029_p5) }
 0x2d6   : > { %v3451_v3 = vadd.f32 %v6505_v23, %v3391_v43  ;;  %v3472_v11 = vadd.f32 %v6521_v59, %v3412_v44  ;;  %v3608_v43 = vld [vmem:[%s6527_s12 + $0x28] sm:$0xff] (%p5029_p5)  ;;  %3605 = vst [vmem:[%s6650_s20 + $0x18] sm:$0xff] (%p5029_p5), %v3604_v20  ;;  %v3610_v44 = vld [vmem:[%s6527_s12 + $0x30] sm:$0xff] (%p5029_p5) }
 0x2d7   : > { %v3498_v24 = vmax.f32 %v3450_v5, 0.0  ;;  %v3473_v8 = vadd.f32 %v6521_v59, %v3413_v63  ;;  %3607 = vst [vmem:[%s6650_s20 + $0x20] sm:$0xff] (%p5029_p5), %v3606_v40 }
 0x2d8   : > { %v3499_v21 = vmax.f32 %v3451_v3, 0.0  ;;  %v3520_v50 = vmax.f32 %v3472_v11, 0.0  ;;  %3609 = vst [vmem:[%s6650_s20 + $0x28] sm:$0xff] (%p5029_p5), %v3608_v43 }
 0x2d9   : > { %v3521_v32 = vmax.f32 %v3473_v8, 0.0  ;;  %3611 = vst [vmem:[%s6650_s20 + $0x30] sm:$0xff] (%p5029_p5), %v3610_v44  ;;  %v3624_v8 = vld [vmem:[%s6527_s12 + $0x68] sm:$0xff] (%p5029_p5) }
 0x2da   : > { %v3537_v22 = vpack.c.bf16 %v3499_v21, %v3498_v24  ;;  %v3299_v46 = vpop.f32.mrf.mxu2  ;;  %3613 = vst [vmem:[%s6650_s20 + $0x38] sm:$0xff] (%p5029_p5), %v3612_v18  ;;  %v3622_v24 = vld [vmem:[%s6527_s12 + $0x60] sm:$0xff] (%p5029_p5)  ;;  %v3626_v21 = vld [vmem:[%s6527_s12 + $0x70] sm:$0xff] (%p5029_p5) }
 0x2db   : > { %v3548_v25 = vpack.c.bf16 %v3521_v32, %v3520_v50  ;;  %v3414_v62 = vmax.f32 %v6481_v56, %v3299_v46  ;;  %v3313_v26 = vpop.f32.mrf.mxu3  ;;  %v3325_v29 = vpop.f32.mrf.mxu0  ;;  %3623 = vst [vmem:[%s6650_s20 + $0xc0] sm:$0xff] (%p5029_p5), %v3622_v24  ;;  %v3628_v50 = vld [vmem:[%s6527_s12 + $0x78] sm:$0xff] (%p5029_p5)  ;;  %v3630_v32 = vld [vmem:[%s6527_s12 + $0x80] sm:$0xff] (%p5029_p5)  ;;  %v3634_v46 = vld [vmem:[%s6527_s12 + $0x90] sm:$0xff] (%p5029_p5) }
 0x2dc   : > { %3561 = vst [vmem:[%s6527_s12 + $0x48] sm:$0xff] %v3537_v22  ;;  %v3415_v7 = vmax.f32 %v6483_v61, %v3313_v26  ;;  %v3392_v13 = vmax.f32 %v6485_v27, %v3325_v29  ;;  %v3339_v57 = vpop.f32.mrf.mxu1  ;;  %v3614_v5 = vld [vmem:[%s6527_s12 + $0x40] sm:$0xff] (%p5029_p5)  ;;  %v3632_v22 = vld [vmem:[%s6527_s12 + $0x88] sm:$0xff] (%p5029_p5) }
 0x2dd   : > { %3572 = vst [vmem:[%s6527_s12 + $0xa0] sm:$0xff] %v3548_v25  ;;  %v3474_v60 = vadd.f32 %v6521_v59, %v3414_v62  ;;  %v3393_v12 = vmax.f32 %v6487_v33, %v3339_v57  ;;  %v3636_v25 = vld [vmem:[%s6527_s12 + $0x98] sm:$0xff] (%p5029_p5) }
 0x2de   : > { %v3475_v37 = vadd.f32 %v6521_v59, %v3415_v7  ;;  %v3452_v15 = vadd.f32 %v6505_v23, %v3392_v13  ;;  %3615 = vst [vmem:[%s6650_s20 + $0x40] sm:$0xff] (%p5029_p5), %v3614_v5 }
 0x2df   : > { %v3522_v56 = vmax.f32 %v3474_v60, 0.0  ;;  %v3453_v10 = vadd.f32 %v6505_v23, %v3393_v12  ;;  %3625 = vst [vmem:[%s6650_s20 + $0xc8] sm:$0xff] (%p5029_p5), %v3624_v8 }
 0x2e0   : > { %v3523_v36 = vmax.f32 %v3475_v37, 0.0  ;;  %v3500_v1 = vmax.f32 %v3452_v15, 0.0  ;;  %3627 = vst [vmem:[%s6650_s20 + $0xd0] sm:$0xff] (%p5029_p5), %v3626_v21 }
 0x2e1   : > { %v3501_v61 = vmax.f32 %v3453_v10, 0.0  ;;  %3629 = vst [vmem:[%s6650_s20 + $0xd8] sm:$0xff] (%p5029_p5), %v3628_v50 }
 0x2e2   : > { %v3549_v53 = vpack.c.bf16 %v3523_v36, %v3522_v56  ;;  %v3353_v27 = vpop.f32.mrf.mxu2  ;;  %3631 = vst [vmem:[%s6650_s20 + $0xe0] sm:$0xff] (%p5029_p5), %v3630_v32 }
 0x2e3   : > { %v3538_v0 = vpack.c.bf16 %v3501_v61, %v3500_v1  ;;  %v3394_v16 = vmax.f32 %v6497_v48, %v3353_v27  ;;  %v3367_v17 = vpop.f32.mrf.mxu3  ;;  %v3327_v47 = vpop.f32.mrf.mxu0  ;;  %v3616_v63 = vld [vmem:[%s6527_s12 + $0x48] sm:$0xff] (%p5029_p5)  ;;  %3633 = vst [vmem:[%s6650_s20 + $0xe8] sm:$0xff] (%p5029_p5), %v3632_v22 }
 0x2e4   : > { %3573 = vst [vmem:[%s6527_s12 + $0xa8] sm:$0xff] %v3549_v53  ;;  %v3395_v33 = vmax.f32 %v6499_v54, %v3367_v17  ;;  %v3416_v45 = vmax.f32 %v6501_v28, %v3327_v47  ;;  %v3341_v14 = vpop.f32.mrf.mxu1  ;;  %v3638_v62 = vld [vmem:[%s6527_s12 + $0xa0] sm:$0xff] (%p5029_p5) }
 0x2e5   : > { %3562 = vst [vmem:[%s6527_s12 + $0x50] sm:$0xff] %v3538_v0  ;;  %v3454_v4 = vadd.f32 %v6505_v23, %v3394_v16  ;;  %v3417_v2 = vmax.f32 %v6503_v30, %v3341_v14 }
 0x2e6   : > { %v3455_v58 = vadd.f32 %v6505_v23, %v3395_v33  ;;  %v3476_v55 = vadd.f32 %v6521_v59, %v3416_v45  ;;  %3617 = vst [vmem:[%s6650_s20 + $0x48] sm:$0xff] (%p5029_p5), %v3616_v63 }
 0x2e7   : > { %v3502_v48 = vmax.f32 %v3454_v4, 0.0  ;;  %v3477_v52 = vadd.f32 %v6521_v59, %v3417_v2  ;;  %3635 = vst [vmem:[%s6650_s20 + $0xf0] sm:$0xff] (%p5029_p5), %v3634_v46 }
 0x2e8   : > { %v3503_v9 = vmax.f32 %v3455_v58, 0.0  ;;  %v3524_v54 = vmax.f32 %v3476_v55, 0.0  ;;  %3637 = vst [vmem:[%s6650_s20 + $0xf8] sm:$0xff] (%p5029_p5), %v3636_v25 }
 0x2e9   : > { %v3525_v38 = vmax.f32 %v3477_v52, 0.0  ;;  %3639 = vst [vmem:[%s6650_s20 + $0x100] sm:$0xff] (%p5029_p5), %v3638_v62 }
 0x2ea   : > { %v3539_v28 = vpack.c.bf16 %v3503_v9, %v3502_v48  ;;  %v3355_v41 = vpop.f32.mrf.mxu2 }
 0x2eb   : > { %v3550_v19 = vpack.c.bf16 %v3525_v38, %v3524_v54  ;;  %v3418_v51 = vmax.f32 %v6511_v6, %v3355_v41  ;;  %v3369_v39 = vpop.f32.mrf.mxu3  ;;  %v3598_v6 = vld [vmem:[%s6527_s12] sm:$0xff] (%p5029_p5)  ;;  %v3640_v26 = vld [vmem:[%s6527_s12 + $0xa8] sm:$0xff] (%p5029_p5) }
 0x2ec   : > { %3563 = vst [vmem:[%s6527_s12 + $0x58] sm:$0xff] %v3539_v28  ;;  %v3419_v30 = vmax.f32 %v6513_v49, %v3369_v39  ;;  %v3600_v49 = vld [vmem:[%s6527_s12 + $0x8] sm:$0xff] (%p5029_p5)  ;;  %v3618_v3 = vld [vmem:[%s6527_s12 + $0x50] sm:$0xff] (%p5029_p5) }
 0x2ed   : > { %3574 = vst [vmem:[%s6527_s12 + $0xb0] sm:$0xff] %v3550_v19  ;;  %v3478_v23 = vadd.f32 %v6521_v59, %v3418_v51 }
 0x2ee   : > { %v3479_v42 = vadd.f32 %v6521_v59, %v3419_v30  ;;  %v3602_v59 = vld [vmem:[%s6527_s12 + $0x10] sm:$0xff] (%p5029_p5)  ;;  %3599 = vst [vmem:[%s6650_s20] sm:$0xff] (%p5029_p5), %v3598_v6 }
 0x2ef   : > { %v3526_v34 = vmax.f32 %v3478_v23, 0.0  ;;  %3601 = vst [vmem:[%s6650_s20 + $0x8] sm:$0xff] (%p5029_p5), %v3600_v49 }
 0x2f0   : > { %v3527_v31 = vmax.f32 %v3479_v42, 0.0  ;;  %3582 = sbr.rel (!%p5029_p5) target bundleno = 765 (0x2fd), region = 59  ;;  %3603 = vst [vmem:[%s6650_s20 + $0x10] sm:$0xff] (%p5029_p5), %v3602_v59 }
 0x2f1   : > { %3619 = vst [vmem:[%s6650_s20 + $0x50] sm:$0xff] (%p5029_p5), %v3618_v3 }
 0x2f2   : > { %v3551_v35 = vpack.c.bf16 %v3527_v31, %v3526_v34  ;;  %3641 = vst [vmem:[%s6650_s20 + $0x108] sm:$0xff] (%p5029_p5), %v3640_v26 }
 0x2f3   : > { %v3620_v11 = vld [vmem:[%s6527_s12 + $0x58] sm:$0xff] (%p5029_p5) }
 0x2f4   : > { %3575 = vst [vmem:[%s6527_s12 + $0xb8] sm:$0xff] %v3551_v35  ;;  %v3642_v29 = vld [vmem:[%s6527_s12 + $0xb0] sm:$0xff] (%p5029_p5) }
 0x2f5   : > { %3621 = vst [vmem:[%s6650_s20 + $0x58] sm:$0xff] %v3620_v11 }
 0x2f6   : > { %3643 = vst [vmem:[%s6650_s20 + $0x110] sm:$0xff] %v3642_v29 }
 0x2fb   : > { %v3644_v7 = vld [vmem:[%s6527_s12 + $0xb8] sm:$0xff] }
 0x2fc   : > { %3645 = vst [vmem:[%s6650_s20 + $0x118] sm:$0xff] %v3644_v7 }
 0x2fd PF: > { %p10_p10 = scmp.ge.s32.totalorder %s5016_s16, 4   ;;  %s6815_s12 = smov %s4971_s13 }
 0x2fe   : > { %s6816_s13 = smov %s5027_s19  ;;  %s6817_s14 = smov %s5016_s16 }
 0x2ff   :  { %12 = sbr.rel (!%p10_p10) target bundleno = 2 (0x2), region = 116 }

// kernel: cnn_forward.4
= control target key start
LH: loop header
LB: loop body
LE: loop exit
PB: predicated region body
PF: predicated region fallthrough
CT: control target
= control target key end

     0   :  { %vm217_vm0 = vcmask 130048   ;;  %vm1316_vm1 = vcmask 666624   ;;  %s2950_s1 = inlined_call_operand.vmem [shape: bf16[4,144,338], index: 1, kind: input, shape index: {}]   ;;  %s2951_s0 = inlined_call_operand.vmem [shape: bf16[32,144], index: 0, kind: input, shape index: {}]   ;;  %s2952_s2 = inlined_call_operand.vmem [shape: f32[32,1], index: 2, kind: input, shape index: {}]   ;;  %s2953_s3 = inlined_call_operand.vmem [shape: bf16[32,338], index: 3, kind: output, shape index: {}]  }
   0x1   :  { %v1430_v0 = vld [vmem:[%s2950_s1 + $0xa8] sm:$0xf]  ;;  %v1934_v1 = vld [vmem:[%s2950_s1 + $0xb0] sm:$0xf0]  ;;  %v1442_v2 = vld [vmem:[%s2950_s1 + $0xc0] sm:$0xf] }
   0x2   :  { %v1431_v3 = vor.u32 %v1934_v1, %v1430_v0  ;;  %v1937_v4 = vld [vmem:[%s2950_s1 + $0xc8] sm:$0xf0]  ;;  %v1432_v6 = vld [vmem:[%s2950_s1 + $0xb4] sm:$0xf0]  ;;  %v1936_v9 = vld [vmem:[%s2950_s1 + $0xc4] sm:$0xf] }
   0x3   :  { %v1933_v5 = vld [vmem:[%s2950_s1 + $0xac] sm:$0xf]  ;;  %v1443_v7 = vor.u32 %v1937_v4, %v1442_v2  ;;  %v1444_v10 = vld [vmem:[%s2950_s1 + $0xcc] sm:$0xf0]  ;;  %v1908_v11 = vld [vmem:[%s2951_s0 + $0x4] sm:$0xf] }
   0x4   :  { %v1435_v8 = vor.u32 %v1933_v5, %v1432_v6  ;;  %224 = vmatpush.bf16.msra.mxu0 %v1431_v3  ;;  %v1447_v12 = vor.u32 %v1936_v9, %v1444_v10  ;;  %v1332_v13 = vld [vmem:[%s2951_s0 + $0x8] sm:$0xf0]  ;;  %v1450_v14 = vld [vmem:[%s2950_s1 + $0xc8] sm:$0xf]  ;;  %v1938_v15 = vld [vmem:[%s2950_s1 + $0xd0] sm:$0xf0] }
   0x5   :  { %250 = vmatpush.bf16.msra.mxu1 %v1443_v7  ;;  %v2089_v16 = vor.u32 %v1908_v11, %v1332_v13  ;;  %v1451_v17 = vor.u32 %v1938_v15, %v1450_v14  ;;  %v1418_v18 = vld [vmem:[%s2950_s1 + $0x90] sm:$0xf]  ;;  %v1931_v19 = vld [vmem:[%s2950_s1 + $0x98] sm:$0xf0]  ;;  %v1930_v20 = vld [vmem:[%s2950_s1 + $0x94] sm:$0xf] }
   0x6   :  { %262 = vmatpush.bf16.msra.mxu2 %v1435_v8  ;;  %288 = vmatpush.bf16.msra.mxu3 %v1447_v12  ;;  %v1419_v21 = vor.u32 %v1931_v19, %v1418_v18  ;;  %v1420_v22 = vld [vmem:[%s2950_s1 + $0x9c] sm:$0xf0]  ;;  %v1438_v23 = vld [vmem:[%s2950_s1 + $0xb0] sm:$0xf]  ;;  %v1935_v24 = vld [vmem:[%s2950_s1 + $0xb8] sm:$0xf0] }
   0x7   :  { %v1423_v25 = vor.u32 %v1930_v20, %v1420_v22  ;;  %v1439_v26 = vor.u32 %v1935_v24, %v1438_v23  ;;  %v1406_v27 = vld [vmem:[%s2950_s1 + $0x78] sm:$0xf]  ;;  %v1928_v28 = vld [vmem:[%s2950_s1 + $0x80] sm:$0xf0]  ;;  %v1927_v29 = vld [vmem:[%s2950_s1 + $0x7c] sm:$0xf] }
   0x8   :  { %1452 = vmatmul.msk.bf16.vlgmr.msra.gmra.mxu1 %vm217_vm0, %v2089_v16  ;;  %225 = vmatpush.bf16.msra.mxu0 %v1419_v21  ;;  %v1407_v30 = vor.u32 %v1928_v28, %v1406_v27  ;;  %v1408_v31 = vld [vmem:[%s2950_s1 + $0x84] sm:$0xf0]  ;;  %v1426_v32 = vld [vmem:[%s2950_s1 + $0x98] sm:$0xf]  ;;  %v1932_v33 = vld [vmem:[%s2950_s1 + $0xa0] sm:$0xf0] }
   0x9   :  { %1454 = vmatmul.msk.bf16.vlgmr.msra.gmra.mxu3 %vm217_vm0, %v2089_v16  ;;  %v1411_v34 = vor.u32 %v1927_v29, %v1408_v31  ;;  %v1394_v35 = vld [vmem:[%s2950_s1 + $0x60] sm:$0xf]  ;;  %v1925_v36 = vld [vmem:[%s2950_s1 + $0x68] sm:$0xf0]  ;;  %300 = vmatpush.bf16.msrb.mxu1 %v1439_v26  ;;  %v1427_v37 = vor.u32 %v1932_v33, %v1426_v32  ;;  %v1924_v38 = vld [vmem:[%s2950_s1 + $0x64] sm:$0xf] }
   0xa   :  { %326 = vmatpush.bf16.msrb.mxu3 %v1451_v17  ;;  %263 = vmatpush.bf16.msra.mxu2 %v1423_v25  ;;  %v1396_v39 = vld [vmem:[%s2950_s1 + $0x6c] sm:$0xf0]  ;;  %v1414_v40 = vld [vmem:[%s2950_s1 + $0x80] sm:$0xf]  ;;  %v1929_v41 = vld [vmem:[%s2950_s1 + $0x88] sm:$0xf0]  ;;  %v1395_v42 = vor.u32 %v1925_v36, %v1394_v35 }
   0xb   :  { %v1399_v43 = vor.u32 %v1924_v38, %v1396_v39  ;;  %v1382_v44 = vld [vmem:[%s2950_s1 + $0x48] sm:$0xf]  ;;  %v1922_v45 = vld [vmem:[%s2950_s1 + $0x50] sm:$0xf0]  ;;  %v1415_v46 = vor.u32 %v1929_v41, %v1414_v40  ;;  %v1921_v47 = vld [vmem:[%s2950_s1 + $0x4c] sm:$0xf] }
   0xc   :  { %226 = vmatpush.bf16.msra.mxu0 %v1407_v30  ;;  %v1384_v48 = vld [vmem:[%s2950_s1 + $0x54] sm:$0xf0]  ;;  %v1402_v49 = vld [vmem:[%s2950_s1 + $0x68] sm:$0xf]  ;;  %v1926_v50 = vld [vmem:[%s2950_s1 + $0x70] sm:$0xf0]  ;;  %v1383_v51 = vor.u32 %v1922_v45, %v1382_v44 }
   0xd   :  { %301 = vmatpush.bf16.msrb.mxu1 %v1427_v37  ;;  %v1910_v52 = vld [vmem:[%s2951_s0 + $0x14] sm:$0xf]  ;;  %v1387_v53 = vor.u32 %v1921_v47, %v1384_v48  ;;  %v1340_v54 = vld [vmem:[%s2951_s0 + $0x18] sm:$0xf0]  ;;  %v1370_v55 = vld [vmem:[%s2950_s1 + $0x30] sm:$0xf]  ;;  %v1403_v57 = vor.u32 %v1926_v50, %v1402_v49 }
   0xe   :  { %264 = vmatpush.bf16.msra.mxu2 %v1411_v34  ;;  %v1919_v56 = vld [vmem:[%s2950_s1 + $0x38] sm:$0xf0]  ;;  %v1918_v58 = vld [vmem:[%s2950_s1 + $0x34] sm:$0xf]  ;;  %v1372_v59 = vld [vmem:[%s2950_s1 + $0x3c] sm:$0xf0]  ;;  %v2191_v62 = vor.u32 %v1910_v52, %v1340_v54 }
   0xf   :  { %v1390_v60 = vld [vmem:[%s2950_s1 + $0x50] sm:$0xf]  ;;  %v1923_v61 = vld [vmem:[%s2950_s1 + $0x58] sm:$0xf0]  ;;  %v1371_v63 = vor.u32 %v1919_v56, %v1370_v55  ;;  %v1375_v0 = vor.u32 %v1918_v58, %v1372_v59  ;;  %v1358_v1 = vld [vmem:[%s2950_s1 + $0x18] sm:$0xf] }
  0x10   :  { %227 = vmatpush.bf16.msra.mxu0 %v1395_v42  ;;  %v1916_v2 = vld [vmem:[%s2950_s1 + $0x20] sm:$0xf0]  ;;  %v1592_v3 = vld [vmem:[%s2950_s1 + $0x198] sm:$0xf]  ;;  %v1391_v4 = vor.u32 %v1923_v61, %v1390_v60  ;;  %v1915_v5 = vld [vmem:[%s2950_s1 + $0x1c] sm:$0xf] }
  0x11   :  { %302 = vmatpush.bf16.msrb.mxu1 %v1415_v46  ;;  %v1360_v6 = vld [vmem:[%s2950_s1 + $0x24] sm:$0xf0]  ;;  %v1964_v7 = vld [vmem:[%s2950_s1 + $0x1a0] sm:$0xf0]  ;;  %v1378_v8 = vld [vmem:[%s2950_s1 + $0x38] sm:$0xf]  ;;  %v1359_v10 = vor.u32 %v1916_v2, %v1358_v1 }
  0x12   :  { %265 = vmatpush.bf16.msra.mxu2 %v1399_v43  ;;  %v1920_v9 = vld [vmem:[%s2950_s1 + $0x40] sm:$0xf0]  ;;  %v1593_v11 = vor.u32 %v1964_v7, %v1592_v3  ;;  %v1363_v12 = vor.u32 %v1915_v5, %v1360_v6  ;;  %v1346_v13 = vld [vmem:[%s2950_s1] sm:$0xf]  ;;  %v1913_v14 = vld [vmem:[%s2950_s1 + $0x8] sm:$0xf0] }
  0x13   :  { %v1912_v15 = vld [vmem:[%s2950_s1 + $0x4] sm:$0xf]  ;;  %v1379_v17 = vor.u32 %v1920_v9, %v1378_v8  ;;  %v1348_v18 = vld [vmem:[%s2950_s1 + $0xc] sm:$0xf0]  ;;  %v1580_v19 = vld [vmem:[%s2950_s1 + $0x180] sm:$0xf]  ;;  %v1347_v23 = vor.u32 %v1913_v14, %v1346_v13 }
  0x14   :  { %228 = vmatpush.bf16.msra.mxu0 %v1383_v51  ;;  %v1961_v20 = vld [vmem:[%s2950_s1 + $0x188] sm:$0xf0]  ;;  %2020 = vmatpush.bf16.msra.mxu3 %v1593_v11  ;;  %v1366_v21 = vld [vmem:[%s2950_s1 + $0x20] sm:$0xf]  ;;  %v1909_v25 = vld [vmem:[%s2951_s0 + $0x4] sm:$0xf0]  ;;  %v1351_v26 = vor.u32 %v1912_v15, %v1348_v18 }
  0x15   :  { %303 = vmatpush.bf16.msrb.mxu1 %v1403_v57  ;;  %v1917_v22 = vld [vmem:[%s2950_s1 + $0x28] sm:$0xf0]  ;;  %v1330_v24 = vld [vmem:[%s2951_s0] sm:$0xf]  ;;  %v1581_v27 = vor.u32 %v1961_v20, %v1580_v19  ;;  %v1568_v29 = vld [vmem:[%s2950_s1 + $0x168] sm:$0xf] }
  0x16   :  { %266 = vmatpush.bf16.msra.mxu2 %v1387_v53  ;;  %v1367_v28 = vor.u32 %v1917_v22, %v1366_v21  ;;  %v1958_v30 = vld [vmem:[%s2950_s1 + $0x170] sm:$0xf0]  ;;  %v2257_v31 = vor.u32 %v1909_v25, %v1330_v24  ;;  %v1354_v32 = vld [vmem:[%s2950_s1 + $0x8] sm:$0xf]  ;;  %v1960_v34 = vld [vmem:[%s2950_s1 + $0x184] sm:$0xf] }
  0x17   :  { %v1914_v33 = vld [vmem:[%s2950_s1 + $0x10] sm:$0xf0]  ;;  %v1582_v35 = vld [vmem:[%s2950_s1 + $0x18c] sm:$0xf0]  ;;  %v1569_v36 = vor.u32 %v1958_v30, %v1568_v29  ;;  %v1955_v40 = vld [vmem:[%s2950_s1 + $0x158] sm:$0xf0] }
  0x18   :  { %1453 = vmatmul.msk.bf16.gmra.mxu1 %vm217_vm0, %v2191_v62  ;;  %229 = vmatpush.bf16.msra.mxu0 %v1371_v63  ;;  %v1355_v37 = vor.u32 %v1914_v33, %v1354_v32  ;;  %v1585_v38 = vor.u32 %v1960_v34, %v1582_v35  ;;  %v1556_v39 = vld [vmem:[%s2950_s1 + $0x150] sm:$0xf]  ;;  %v1957_v41 = vld [vmem:[%s2950_s1 + $0x16c] sm:$0xf]  ;;  %v1570_v42 = vld [vmem:[%s2950_s1 + $0x174] sm:$0xf0] }
  0x19   :  { %1455 = vmatmul.msk.bf16.gmra.mxu3 %vm217_vm0, %v2191_v62  ;;  %304 = vmatpush.bf16.msrb.mxu1 %v1391_v4  ;;  %v1557_v43 = vor.u32 %v1955_v40, %v1556_v39  ;;  %v1573_v44 = vor.u32 %v1957_v41, %v1570_v42  ;;  %v1544_v45 = vld [vmem:[%s2950_s1 + $0x138] sm:$0xf]  ;;  %v1952_v46 = vld [vmem:[%s2950_s1 + $0x140] sm:$0xf0]  ;;  %v1954_v47 = vld [vmem:[%s2950_s1 + $0x154] sm:$0xf] }
  0x1a   :  { %267 = vmatpush.bf16.msra.mxu2 %v1375_v0  ;;  %v1558_v48 = vld [vmem:[%s2950_s1 + $0x15c] sm:$0xf0]  ;;  %v1963_v49 = vld [vmem:[%s2950_s1 + $0x19c] sm:$0xf]  ;;  %v1594_v50 = vld [vmem:[%s2950_s1 + $0x1a4] sm:$0xf0]  ;;  %v1545_v52 = vor.u32 %v1952_v46, %v1544_v45 }
  0x1b   :  { %v1600_v51 = vld [vmem:[%s2950_s1 + $0x1a0] sm:$0xf]  ;;  %v1597_v53 = vor.u32 %v1963_v49, %v1594_v50  ;;  %v1965_v54 = vld [vmem:[%s2950_s1 + $0x1a8] sm:$0xf0]  ;;  %v1561_v55 = vor.u32 %v1954_v47, %v1558_v48  ;;  %v1338_v56 = vld [vmem:[%s2951_s0 + $0x10] sm:$0xf] }
  0x1c   :  { %230 = vmatpush.bf16.msra.mxu0 %v1359_v10  ;;  %v1532_v57 = vld [vmem:[%s2950_s1 + $0x120] sm:$0xf]  ;;  %v1949_v58 = vld [vmem:[%s2950_s1 + $0x128] sm:$0xf0]  ;;  %v1601_v59 = vor.u32 %v1965_v54, %v1600_v51  ;;  %v1911_v60 = vld [vmem:[%s2951_s0 + $0x14] sm:$0xf0] }
  0x1d   :  { %305 = vmatpush.bf16.msrb.mxu1 %v1379_v17  ;;  %v1951_v61 = vld [vmem:[%s2950_s1 + $0x13c] sm:$0xf]  ;;  %v1546_v63 = vld [vmem:[%s2950_s1 + $0x144] sm:$0xf0]  ;;  %v1533_v0 = vor.u32 %v1949_v58, %v1532_v57  ;;  %v2330_v1 = vor.u32 %v1911_v60, %v1338_v56  ;;  %v1946_v4 = vld [vmem:[%s2950_s1 + $0x110] sm:$0xf0] }
  0x1e   :  { %268 = vmatpush.bf16.msra.mxu2 %v1363_v12  ;;  %v1549_v2 = vor.u32 %v1951_v61, %v1546_v63  ;;  %v1520_v3 = vld [vmem:[%s2950_s1 + $0x108] sm:$0xf]  ;;  %v1948_v5 = vld [vmem:[%s2950_s1 + $0x124] sm:$0xf]  ;;  %v1534_v6 = vld [vmem:[%s2950_s1 + $0x12c] sm:$0xf0] }
  0x1f   :  { %v1521_v7 = vor.u32 %v1946_v4, %v1520_v3  ;;  %v1537_v8 = vor.u32 %v1948_v5, %v1534_v6  ;;  %v1508_v9 = vld [vmem:[%s2950_s1 + $0xf0] sm:$0xf]  ;;  %v1943_v10 = vld [vmem:[%s2950_s1 + $0xf8] sm:$0xf0]  ;;  %v1522_v12 = vld [vmem:[%s2950_s1 + $0x114] sm:$0xf0] }
  0x20   :  { %231 = vmatpush.bf16.msra.mxu0 %v1347_v23  ;;  %v1509_v13 = vor.u32 %v1943_v10, %v1508_v9  ;;  %v1496_v15 = vld [vmem:[%s2950_s1 + $0xd8] sm:$0xf]  ;;  %v1940_v17 = vld [vmem:[%s2950_s1 + $0xe0] sm:$0xf0]  ;;  %v1942_v18 = vld [vmem:[%s2950_s1 + $0xf4] sm:$0xf] }
  0x21   :  { %306 = vmatpush.bf16.msrb.mxu1 %v1367_v28  ;;  %v1510_v19 = vld [vmem:[%s2950_s1 + $0xfc] sm:$0xf0]  ;;  %v1588_v20 = vld [vmem:[%s2950_s1 + $0x188] sm:$0xf]  ;;  %v1962_v21 = vld [vmem:[%s2950_s1 + $0x190] sm:$0xf0]  ;;  %v1497_v22 = vor.u32 %v1940_v17, %v1496_v15 }
  0x22   :  { %269 = vmatpush.bf16.msra.mxu2 %v1351_v26  ;;  %v1513_v23 = vor.u32 %v1942_v18, %v1510_v19  ;;  %v1589_v24 = vor.u32 %v1962_v21, %v1588_v20  ;;  %v1939_v25 = vld [vmem:[%s2950_s1 + $0xdc] sm:$0xf]  ;;  %v1498_v26 = vld [vmem:[%s2950_s1 + $0xe4] sm:$0xf0]  ;;  %v1730_v29 = vld [vmem:[%s2950_s1 + $0x258] sm:$0xf] }
  0x23   :  { %232 = vmatmul.bf16.vlgmr.msra.gmra.mxu0 %v2257_v31  ;;  %v1959_v28 = vld [vmem:[%s2950_s1 + $0x178] sm:$0xf0]  ;;  %v1988_v30 = vld [vmem:[%s2950_s1 + $0x260] sm:$0xf0]  ;;  %v1990_v32 = vld [vmem:[%s2950_s1 + $0x274] sm:$0xf]  ;;  %v1501_v34 = vor.u32 %v1939_v25, %v1498_v26 }
  0x24   :  { %519 = vmatpush.bf16.msrb.mxu0 %v1581_v27  ;;  %v1576_v27 = vld [vmem:[%s2950_s1 + $0x170] sm:$0xf]  ;;  %v1744_v33 = vld [vmem:[%s2950_s1 + $0x27c] sm:$0xf0]  ;;  %v1985_v41 = vld [vmem:[%s2950_s1 + $0x248] sm:$0xf0] }
  0x25   :  { %270 = vmatmul.bf16.vlgmr.msra.gmra.mxu2 %v2257_v31  ;;  %307 = vmatpush.bf16.msrb.mxu1 %v1355_v37  ;;  %v1577_v35 = vor.u32 %v1959_v28, %v1576_v27  ;;  %v1564_v37 = vld [vmem:[%s2950_s1 + $0x158] sm:$0xf]  ;;  %v1747_v39 = vor.u32 %v1990_v32, %v1744_v33  ;;  %v1718_v40 = vld [vmem:[%s2950_s1 + $0x240] sm:$0xf]  ;;  %v1742_v42 = vld [vmem:[%s2950_s1 + $0x270] sm:$0xf] }
  0x26   :  { %545 = vmatpush.bf16.msrb.mxu2 %v1593_v11  ;;  %v1945_v11 = vld [vmem:[%s2950_s1 + $0x10c] sm:$0xf]  ;;  %v1552_v45 = vld [vmem:[%s2950_s1 + $0x140] sm:$0xf]  ;;  %v1719_v47 = vor.u32 %v1985_v41, %v1718_v40  ;;  %v1706_v49 = vld [vmem:[%s2950_s1 + $0x228] sm:$0xf] }
  0x27   :  { %v1525_v14 = vor.u32 %v1945_v11, %v1522_v12  ;;  %v1953_v46 = vld [vmem:[%s2950_s1 + $0x148] sm:$0xf0]  ;;  %v1982_v50 = vld [vmem:[%s2950_s1 + $0x230] sm:$0xf0]  ;;  %v1979_v56 = vld [vmem:[%s2950_s1 + $0x218] sm:$0xf0] }
  0x28   :  { %520 = vmatpush.bf16.msrb.mxu0 %v1569_v36  ;;  %308 = vmatmul.bf16.vlgmr.msrb.gmra.mxu1 %v2257_v31  ;;  %v1731_v36 = vor.u32 %v1988_v30, %v1730_v29  ;;  %v1553_v51 = vor.u32 %v1953_v46, %v1552_v45  ;;  %v1707_v54 = vor.u32 %v1982_v50, %v1706_v49  ;;  %v1528_v58 = vld [vmem:[%s2950_s1 + $0x110] sm:$0xf]  ;;  %v1682_v61 = vld [vmem:[%s2950_s1 + $0x1f8] sm:$0xf]  ;;  %v1976_v63 = vld [vmem:[%s2950_s1 + $0x200] sm:$0xf0] }
  0x29   :  { %557 = vmatpush.bf16.msra.mxu1 %v1585_v38  ;;  %1456 = vmatmul.msk.bf16.vlgmr.msrb.gmra.mxu3 %vm217_vm0, %v2089_v16  ;;  %v1956_v38 = vld [vmem:[%s2950_s1 + $0x160] sm:$0xf0]  ;;  %v1683_v4 = vor.u32 %v1976_v63, %v1682_v61  ;;  %v1670_v5 = vld [vmem:[%s2950_s1 + $0x1e0] sm:$0xf]  ;;  %v1973_v6 = vld [vmem:[%s2950_s1 + $0x1e8] sm:$0xf0] }
  0x2a   :  { %583 = vmatpush.bf16.msrb.mxu3 %v1597_v53  ;;  %621 = vmatpush.bf16.msra.mxu2 %v1601_v59  ;;  %v1950_v53 = vld [vmem:[%s2950_s1 + $0x130] sm:$0xf0]  ;;  %v1947_v59 = vld [vmem:[%s2950_s1 + $0x118] sm:$0xf0]  ;;  %v1944_v3 = vld [vmem:[%s2950_s1 + $0x100] sm:$0xf0]  ;;  %v1671_v10 = vor.u32 %v1973_v6, %v1670_v5 }
  0x2b   :  { %v1941_v9 = vld [vmem:[%s2950_s1 + $0xe8] sm:$0xf0]  ;;  %v1987_v11 = vld [vmem:[%s2950_s1 + $0x25c] sm:$0xf]  ;;  %v1732_v12 = vld [vmem:[%s2950_s1 + $0x264] sm:$0xf0] }
  0x2c   :  { %521 = vmatpush.bf16.msrb.mxu0 %v1557_v43  ;;  %v1991_v43 = vld [vmem:[%s2950_s1 + $0x278] sm:$0xf0]  ;;  %v1735_v17 = vor.u32 %v1987_v11, %v1732_v12  ;;  %v1750_v18 = vld [vmem:[%s2950_s1 + $0x278] sm:$0xf]  ;;  %v1992_v19 = vld [vmem:[%s2950_s1 + $0x280] sm:$0xf0] }
  0x2d   :  { %558 = vmatpush.bf16.msra.mxu1 %v1573_v44  ;;  %v1565_v44 = vor.u32 %v1956_v38, %v1564_v37  ;;  %v1743_v48 = vor.u32 %v1991_v43, %v1742_v42  ;;  %v1892_v20 = vld [vmem:[%s2950_s1 + $0x348] sm:$0xf]  ;;  %v2018_v25 = vld [vmem:[%s2950_s1 + $0x350] sm:$0xf0]  ;;  %v1646_v26 = vld [vmem:[%s2950_s1 + $0x1b0] sm:$0xf] }
  0x2e   :  { %v1967_v27 = vld [vmem:[%s2950_s1 + $0x1b8] sm:$0xf0]  ;;  %v1893_v28 = vor.u32 %v2018_v25, %v1892_v20  ;;  %v1738_v29 = vld [vmem:[%s2950_s1 + $0x260] sm:$0xf]  ;;  %v1989_v30 = vld [vmem:[%s2950_s1 + $0x268] sm:$0xf0] }
  0x2f   :  { %v1647_v33 = vor.u32 %v1967_v27, %v1646_v26  ;;  %v1726_v37 = vld [vmem:[%s2950_s1 + $0x248] sm:$0xf]  ;;  %v1986_v38 = vld [vmem:[%s2950_s1 + $0x250] sm:$0xf0]  ;;  %v1696_v42 = vld [vmem:[%s2950_s1 + $0x21c] sm:$0xf0] }
  0x30   :  { %522 = vmatpush.bf16.msrb.mxu0 %v1545_v52  ;;  %v1540_v52 = vld [vmem:[%s2950_s1 + $0x128] sm:$0xf]  ;;  %v1727_v40 = vor.u32 %v1986_v38, %v1726_v37  ;;  %v1978_v41 = vld [vmem:[%s2950_s1 + $0x214] sm:$0xf]  ;;  %v1714_v43 = vld [vmem:[%s2950_s1 + $0x230] sm:$0xf] }
  0x31   :  { %559 = vmatpush.bf16.msra.mxu1 %v1561_v55  ;;  %v1694_v55 = vld [vmem:[%s2950_s1 + $0x210] sm:$0xf]  ;;  %v1541_v57 = vor.u32 %v1950_v53, %v1540_v52  ;;  %v1699_v45 = vor.u32 %v1978_v41, %v1696_v42  ;;  %v1702_v49 = vld [vmem:[%s2950_s1 + $0x218] sm:$0xf]  ;;  %v1980_v50 = vld [vmem:[%s2950_s1 + $0x220] sm:$0xf0] }
  0x32   :  { %v1695_v60 = vor.u32 %v1979_v56, %v1694_v55  ;;  %v1703_v52 = vor.u32 %v1980_v50, %v1702_v49  ;;  %v1972_v53 = vld [vmem:[%s2950_s1 + $0x1e4] sm:$0xf]  ;;  %v1690_v55 = vld [vmem:[%s2950_s1 + $0x200] sm:$0xf]  ;;  %v1977_v56 = vld [vmem:[%s2950_s1 + $0x208] sm:$0xf0] }
  0x33   :  { %237 = vmatmul.bf16.gmra.mxu0 %v2330_v1  ;;  %v1678_v61 = vld [vmem:[%s2950_s1 + $0x1e8] sm:$0xf]  ;;  %v1974_v63 = vld [vmem:[%s2950_s1 + $0x1f0] sm:$0xf0]  ;;  %v1666_v5 = vld [vmem:[%s2950_s1 + $0x1d0] sm:$0xf] }
  0x34   :  { %523 = vmatpush.bf16.msrb.mxu0 %v1533_v0  ;;  %v1529_v0 = vor.u32 %v1947_v59, %v1528_v58  ;;  %v1691_v58 = vor.u32 %v1977_v56, %v1690_v55  ;;  %v1969_v59 = vld [vmem:[%s2950_s1 + $0x1cc] sm:$0xf]  ;;  %v1971_v6 = vld [vmem:[%s2950_s1 + $0x1d8] sm:$0xf0]  ;;  %v1654_v11 = vld [vmem:[%s2950_s1 + $0x1b8] sm:$0xf] }
  0x35   :  { %560 = vmatpush.bf16.msra.mxu1 %v1549_v2  ;;  %275 = vmatmul.bf16.gmra.mxu2 %v2330_v1  ;;  %v1516_v2 = vld [vmem:[%s2950_s1 + $0xf8] sm:$0xf]  ;;  %v1968_v12 = vld [vmem:[%s2950_s1 + $0x1c0] sm:$0xf0]  ;;  %v1858_v38 = vld [vmem:[%s2950_s1 + $0x30c] sm:$0xf0] }
  0x36   :  { %v1894_v20 = vld [vmem:[%s2950_s1 + $0x354] sm:$0xf0]  ;;  %v2008_v37 = vld [vmem:[%s2950_s1 + $0x304] sm:$0xf]  ;;  %v1832_v41 = vld [vmem:[%s2950_s1 + $0x2d0] sm:$0xf] }
  0x37   :  { %v2003_v42 = vld [vmem:[%s2950_s1 + $0x2d8] sm:$0xf0]  ;;  %v2002_v50 = vld [vmem:[%s2950_s1 + $0x2d4] sm:$0xf]  ;;  %v1808_v55 = vld [vmem:[%s2950_s1 + $0x2a0] sm:$0xf] }
  0x38   :  { %524 = vmatpush.bf16.msrb.mxu0 %v1521_v7  ;;  %313 = vmatmul.bf16.gmra.mxu1 %v2330_v1  ;;  %v1517_v7 = vor.u32 %v1944_v3, %v1516_v2  ;;  %v1679_v2 = vor.u32 %v1974_v63, %v1678_v61  ;;  %v1966_v3 = vld [vmem:[%s2950_s1 + $0x1b4] sm:$0xf]  ;;  %v1997_v56 = vld [vmem:[%s2950_s1 + $0x2a8] sm:$0xf0]  ;;  %v1796_v61 = vld [vmem:[%s2950_s1 + $0x288] sm:$0xf] }
  0x39   :  { %561 = vmatpush.bf16.msra.mxu1 %v1537_v8  ;;  %1457 = vmatmul.msk.bf16.gmra.mxu3 %vm217_vm0, %v2191_v62  ;;  %v1504_v8 = vld [vmem:[%s2950_s1 + $0xe0] sm:$0xf]  ;;  %v1994_v63 = vld [vmem:[%s2950_s1 + $0x290] sm:$0xf0] }
  0x3a   :  { %v1505_v15 = vor.u32 %v1941_v9, %v1504_v8  ;;  %v2015_v8 = vld [vmem:[%s2950_s1 + $0x338] sm:$0xf0] }
  0x3c   :  { %525 = vmatpush.bf16.msrb.mxu0 %v1509_v13  ;;  %v1658_v13 = vld [vmem:[%s2950_s1 + $0x1c8] sm:$0xf] }
  0x3d   :  { %562 = vmatpush.bf16.msra.mxu1 %v1525_v14  ;;  %v1970_v14 = vld [vmem:[%s2950_s1 + $0x1d0] sm:$0xf0] }
  0x3e   :  { %v1659_v21 = vor.u32 %v1970_v14, %v1658_v13  ;;  %v1868_v14 = vld [vmem:[%s2950_s1 + $0x318] sm:$0xf] }
  0x40   :  { %526 = vmatpush.bf16.msrb.mxu0 %v1497_v22  ;;  %v1984_v22 = vld [vmem:[%s2950_s1 + $0x244] sm:$0xf] }
  0x41   :  { %563 = vmatpush.bf16.msra.mxu1 %v1513_v23  ;;  %v1720_v23 = vld [vmem:[%s2950_s1 + $0x24c] sm:$0xf0] }
  0x42   :  { %v1723_v32 = vor.u32 %v1984_v22, %v1720_v23  ;;  %v2019_v23 = vld [vmem:[%s2950_s1 + $0x358] sm:$0xf0] }
  0x43   :  { %527 = vmatmul.bf16.vlgmr.msrb.gmra.mxu0 %v2257_v31 }
  0x44   :  { %595 = vmatpush.bf16.msra.mxu0 %v1589_v24  ;;  %v1751_v24 = vor.u32 %v1992_v19, %v1750_v18  ;;  %v1882_v18 = vld [vmem:[%s2950_s1 + $0x33c] sm:$0xf0]  ;;  %v2017_v19 = vld [vmem:[%s2950_s1 + $0x34c] sm:$0xf] }
  0x45   :  { %564 = vmatpush.bf16.msra.mxu1 %v1501_v34  ;;  %1602 = vmatmul.msk.bf16.vlgmr.msrb.gmra.mxu2 %vm217_vm0, %v2089_v16  ;;  %v1981_v34 = vld [vmem:[%s2950_s1 + $0x22c] sm:$0xf]  ;;  %v1897_v22 = vor.u32 %v2017_v19, %v1894_v20 }
  0x46   :  { %890 = vmatpush.bf16.msrb.mxu2 %v1747_v39 }
  0x48   :  { %596 = vmatpush.bf16.msra.mxu0 %v1577_v35  ;;  %565 = vmatmul.bf16.vlgmr.msra.gmra.mxu1 %v2257_v31  ;;  %v1708_v35 = vld [vmem:[%s2950_s1 + $0x234] sm:$0xf0] }
  0x49   :  { %826 = vmatpush.bf16.msrb.mxu1 %v1731_v36  ;;  %1603 = vmatmul.msk.bf16.vlgmr.msra.gmra.mxu3 %vm217_vm0, %v2191_v62  ;;  %v1739_v36 = vor.u32 %v1989_v30, %v1738_v29  ;;  %v1711_v39 = vor.u32 %v1981_v34, %v1708_v35  ;;  %v2009_v29 = vld [vmem:[%s2950_s1 + $0x308] sm:$0xf0]  ;;  %v2011_v30 = vld [vmem:[%s2950_s1 + $0x31c] sm:$0xf]  ;;  %v1844_v35 = vld [vmem:[%s2950_s1 + $0x2e8] sm:$0xf] }
  0x4a   :  { %852 = vmatpush.bf16.msra.mxu3 %v1743_v48  ;;  %v1684_v48 = vld [vmem:[%s2950_s1 + $0x204] sm:$0xf0] }
  0x4c   :  { %597 = vmatpush.bf16.msra.mxu0 %v1565_v44  ;;  %v1983_v44 = vld [vmem:[%s2950_s1 + $0x238] sm:$0xf0] }
  0x4d   :  { %827 = vmatpush.bf16.msrb.mxu1 %v1719_v47  ;;  %v1715_v46 = vor.u32 %v1983_v44, %v1714_v43  ;;  %v1975_v47 = vld [vmem:[%s2950_s1 + $0x1fc] sm:$0xf]  ;;  %v1861_v43 = vor.u32 %v2008_v37, %v1858_v38  ;;  %v2005_v44 = vld [vmem:[%s2950_s1 + $0x2ec] sm:$0xf] }
  0x50   :  { %598 = vmatpush.bf16.msra.mxu0 %v1553_v51  ;;  %v1687_v51 = vor.u32 %v1975_v47, %v1684_v48  ;;  %v1820_v47 = vld [vmem:[%s2950_s1 + $0x2b8] sm:$0xf]  ;;  %v2000_v48 = vld [vmem:[%s2950_s1 + $0x2c0] sm:$0xf0] }
  0x51   :  { %828 = vmatpush.bf16.msrb.mxu1 %v1707_v54  ;;  %v1672_v54 = vld [vmem:[%s2950_s1 + $0x1ec] sm:$0xf0] }
  0x53   :  { %532 = vmatmul.bf16.gmra.mxu0 %v2330_v1 }
  0x54   :  { %599 = vmatpush.bf16.msra.mxu0 %v1541_v57  ;;  %v1675_v57 = vor.u32 %v1972_v53, %v1672_v54  ;;  %v1821_v53 = vor.u32 %v2000_v48, %v1820_v47  ;;  %v1998_v47 = vld [vmem:[%s2950_s1 + $0x2b0] sm:$0xf0] }
  0x55   :  { %829 = vmatpush.bf16.msrb.mxu1 %v1695_v60  ;;  %1606 = vmatmul.msk.bf16.vlgmr.msra.gmra.mxu2 %vm217_vm0, %v2089_v16  ;;  %v1660_v60 = vld [vmem:[%s2950_s1 + $0x1d4] sm:$0xf0] }
  0x56   :  { %1159 = vmatpush.bf16.msra.mxu2 %v1893_v28  ;;  %v1856_v28 = vld [vmem:[%s2950_s1 + $0x300] sm:$0xf] }
  0x58   :  { %600 = vmatpush.bf16.msra.mxu0 %v1529_v0  ;;  %570 = vmatmul.bf16.gmra.mxu1 %v2330_v1  ;;  %v1663_v0 = vor.u32 %v1969_v59, %v1660_v60  ;;  %v1822_v59 = vld [vmem:[%s2950_s1 + $0x2c4] sm:$0xf0]  ;;  %v1809_v60 = vor.u32 %v1997_v56, %v1808_v55 }
  0x59   :  { %830 = vmatpush.bf16.msrb.mxu1 %v1683_v4  ;;  %1604 = vmatmul.msk.bf16.vlgmr.msrb.gmra.mxu3 %vm217_vm0, %v2089_v16  ;;  %v1648_v4 = vld [vmem:[%s2950_s1 + $0x1bc] sm:$0xf0] }
  0x5a   :  { %928 = vmatpush.bf16.msrb.mxu3 %v1751_v24  ;;  %v1651_v9 = vor.u32 %v1966_v3, %v1648_v4  ;;  %v1655_v24 = vor.u32 %v1968_v12, %v1654_v11  ;;  %v1996_v3 = vld [vmem:[%s2950_s1 + $0x2a4] sm:$0xf]  ;;  %v2032_v4 = vmov 0   ;;  %v1993_v12 = vld [vmem:[%s2950_s1 + $0x28c] sm:$0xf] }
  0x5b   :  { %2030 = vset.pattern.permute.xlu0 %v2032_v4  ;;  %2031 = vset.pattern.permute.xlu1 %v2032_v4 }
  0x5c   :  { %601 = vmatpush.bf16.msra.mxu0 %v1517_v7  ;;  %v1880_v7 = vld [vmem:[%s2950_s1 + $0x330] sm:$0xf] }
  0x5d   :  { %831 = vmatpush.bf16.msrb.mxu1 %v1671_v10  ;;  %v1667_v10 = vor.u32 %v1971_v6, %v1666_v5  ;;  %v1881_v13 = vor.u32 %v2015_v8, %v1880_v7  ;;  %v1810_v5 = vld [vmem:[%s2950_s1 + $0x2ac] sm:$0xf0]  ;;  %v1888_v6 = vld [vmem:[%s2950_s1 + $0x338] sm:$0xf]  ;;  %v2016_v7 = vld [vmem:[%s2950_s1 + $0x340] sm:$0xf0] }
  0x5e   :  { %v1813_v11 = vor.u32 %v1996_v3, %v1810_v5 }
  0x60   :  { %602 = vmatpush.bf16.msra.mxu0 %v1505_v15  ;;  %v2012_v15 = vld [vmem:[%s2950_s1 + $0x320] sm:$0xf0] }
  0x61   :  { %832 = vmatpush.bf16.msrb.mxu1 %v1659_v21  ;;  %v1900_v21 = vld [vmem:[%s2950_s1 + $0x350] sm:$0xf]  ;;  %v1869_v25 = vor.u32 %v2012_v15, %v1868_v14  ;;  %v1798_v14 = vld [vmem:[%s2950_s1 + $0x294] sm:$0xf0]  ;;  %v1876_v15 = vld [vmem:[%s2950_s1 + $0x320] sm:$0xf] }
  0x62   :  { %v1901_v26 = vor.u32 %v2019_v23, %v1900_v21  ;;  %v1801_v19 = vor.u32 %v1993_v12, %v1798_v14  ;;  %v1864_v21 = vld [vmem:[%s2950_s1 + $0x308] sm:$0xf] }
  0x63   :  { %603 = vmatmul.bf16.vlgmr.msra.gmra.mxu0 %v2257_v31 }
  0x64   :  { %864 = vmatpush.bf16.msrb.mxu0 %v1735_v17  ;;  %v2014_v17 = vld [vmem:[%s2950_s1 + $0x334] sm:$0xf] }
  0x65   :  { %833 = vmatpush.bf16.msrb.mxu1 %v1647_v33  ;;  %1607 = vmatmul.msk.bf16.gmra.mxu2 %vm217_vm0, %v2191_v62  ;;  %v1885_v27 = vor.u32 %v2014_v17, %v1882_v18  ;;  %v1857_v33 = vor.u32 %v2009_v29, %v1856_v28  ;;  %v2013_v17 = vld [vmem:[%s2950_s1 + $0x328] sm:$0xf0]  ;;  %v1261_v29 = vld [vmem:[%s2952_s2 + $0x10] sm:$0xff] }
  0x66   :  { %v1260_v18 = vld [vmem:[%s2952_s2 + $0x8] sm:$0xff]  ;;  %v1877_v20 = vor.u32 %v2013_v17, %v1876_v15  ;;  %1275 = vperm.xlu1 %2031, %v1261_v29  }
  0x68   :  { %865 = vmatpush.bf16.msrb.mxu0 %v1723_v32  ;;  %834 = vmatmul.bf16.vlgmr.msrb.gmra.mxu1 %v2257_v31  ;;  %v1870_v32 = vld [vmem:[%s2950_s1 + $0x324] sm:$0xf0] }
  0x69   :  { %902 = vmatpush.bf16.msra.mxu1 %v1739_v36  ;;  %1605 = vmatmul.msk.bf16.gmra.mxu3 %vm217_vm0, %v2191_v62  ;;  %v1873_v34 = vor.u32 %v2011_v30, %v1870_v32  ;;  %v2006_v36 = vld [vmem:[%s2950_s1 + $0x2f0] sm:$0xf0] }
  0x6c   :  { %866 = vmatpush.bf16.msrb.mxu0 %v1711_v39  ;;  %v1845_v39 = vor.u32 %v2006_v36, %v1844_v35 }
  0x6d   :  { %903 = vmatpush.bf16.msra.mxu1 %v1727_v40 }
  0x70   :  { %867 = vmatpush.bf16.msrb.mxu0 %v1699_v45  ;;  %v1846_v45 = vld [vmem:[%s2950_s1 + $0x2f4] sm:$0xf0] }
  0x71   :  { %904 = vmatpush.bf16.msra.mxu1 %v1715_v46  ;;  %v1833_v46 = vor.u32 %v2003_v42, %v1832_v41  ;;  %v1849_v49 = vor.u32 %v2005_v44, %v1846_v45  ;;  %v1262_v45 = vld [vmem:[%s2952_s2 + $0x18] sm:$0xff] }
  0x72   :  { %1280 = vperm.xlu1 %2031, %v1262_v45  }
  0x73   :  { %608 = vmatmul.bf16.gmra.mxu0 %v2330_v1 }
  0x74   :  { %868 = vmatpush.bf16.msrb.mxu0 %v1687_v51  ;;  %v1834_v51 = vld [vmem:[%s2950_s1 + $0x2dc] sm:$0xf0] }
  0x75   :  { %905 = vmatpush.bf16.msra.mxu1 %v1703_v52  ;;  %1754 = vmatmul.msk.bf16.vlgmr.msrb.gmra.mxu2 %vm217_vm0, %v2089_v16 }
  0x76   :  { %1235 = vmatpush.bf16.msrb.mxu2 %v1901_v26  ;;  %v1852_v26 = vld [vmem:[%s2950_s1 + $0x2f0] sm:$0xf] }
  0x78   :  { %869 = vmatpush.bf16.msrb.mxu0 %v1675_v57  ;;  %839 = vmatmul.bf16.gmra.mxu1 %v2330_v1  ;;  %v1837_v57 = vor.u32 %v2002_v50, %v1834_v51 }
  0x79   :  { %906 = vmatpush.bf16.msra.mxu1 %v1691_v58  ;;  %1752 = vmatmul.msk.bf16.vlgmr.msra.gmra.mxu3 %vm217_vm0, %v2089_v16  ;;  %v1999_v58 = vld [vmem:[%s2950_s1 + $0x2bc] sm:$0xf] }
  0x7a   :  { %1197 = vmatpush.bf16.msra.mxu3 %v1897_v22  ;;  %v2010_v22 = vld [vmem:[%s2950_s1 + $0x310] sm:$0xf0] }
  0x7c   :  { %870 = vmatpush.bf16.msrb.mxu0 %v1663_v0  ;;  %v1259_v0 = vld [vmem:[%s2952_s2] sm:$0xff] }
  0x7d   :  { %907 = vmatpush.bf16.msra.mxu1 %v1679_v2  ;;  %v1825_v2 = vor.u32 %v1999_v58, %v1822_v59  ;;  %1265 = vperm.xlu0 %2030, %v1259_v0  }
  0x80   :  { %871 = vmatpush.bf16.msrb.mxu0 %v1651_v9  ;;  %v1797_v9 = vor.u32 %v1994_v63, %v1796_v61 }
  0x81   :  { %908 = vmatpush.bf16.msra.mxu1 %v1667_v10 }
  0x83   :  { %872 = vmatmul.bf16.vlgmr.msrb.gmra.mxu0 %v2257_v31 }
  0x84   :  { %1133 = vmatpush.bf16.msra.mxu0 %v1881_v13  ;;  %v1889_v13 = vor.u32 %v2016_v7, %v1888_v6 }
  0x85   :  { %909 = vmatpush.bf16.msra.mxu1 %v1655_v24  ;;  %1755 = vmatmul.msk.bf16.gmra.mxu2 %vm217_vm0, %v2191_v62  ;;  %v2676_v40 = vpop.f32.mrf.mxu1 }
  0x86   :  { %1270 = vperm.xlu0 %2030, %v1260_v18  }
  0x88   :  { %1134 = vmatpush.bf16.msra.mxu0 %v1869_v25  ;;  %910 = vmatmul.bf16.vlgmr.msra.gmra.mxu1 %v2257_v31  ;;  %v1865_v25 = vor.u32 %v2010_v22, %v1864_v21 }
  0x89   :  { %1171 = vmatpush.bf16.msrb.mxu1 %v1885_v27  ;;  %1753 = vmatmul.msk.bf16.gmra.mxu3 %vm217_vm0, %v2191_v62  ;;  %v2007_v27 = vld [vmem:[%s2950_s1 + $0x2f8] sm:$0xf0] }
  0x8a   :  { %v1853_v32 = vor.u32 %v2007_v27, %v1852_v26 }
  0x8c   :  { %1135 = vmatpush.bf16.msra.mxu0 %v1857_v33  ;;  %v2705_v52 = vpop.f32.mrf.mxu3  ;;  %v1840_v33 = vld [vmem:[%s2950_s1 + $0x2d8] sm:$0xf] }
  0x8d   :  { %1172 = vmatpush.bf16.msrb.mxu1 %v1873_v34  ;;  %v2707_v54 = vpop.f32.mrf.mxu1  ;;  %v2004_v34 = vld [vmem:[%s2950_s1 + $0x2e0] sm:$0xf0] }
  0x8e   :  { %v1841_v37 = vor.u32 %v2004_v34, %v1840_v33 }
  0x90   :  { %1136 = vmatpush.bf16.msra.mxu0 %v1845_v39  ;;  %v1828_v39 = vld [vmem:[%s2950_s1 + $0x2c0] sm:$0xf] }
  0x91   :  { %1173 = vmatpush.bf16.msrb.mxu1 %v1861_v43 }
  0x93   :  { %877 = vmatmul.bf16.gmra.mxu0 %v2330_v1 }
  0x94   :  { %1137 = vmatpush.bf16.msra.mxu0 %v1833_v46  ;;  %v2743_v8 = vpop.f32.mrf.mxu3  ;;  %v1816_v46 = vld [vmem:[%s2950_s1 + $0x2a8] sm:$0xf] }
  0x95   :  { %1174 = vmatpush.bf16.msrb.mxu1 %v1849_v49  ;;  %1902 = vmatmul.msk.bf16.vlgmr.msra.gmra.mxu2 %vm217_vm0, %v2089_v16  ;;  %v2747_v10 = vpop.f32.mrf.mxu1  ;;  %v1817_v51 = vor.u32 %v1998_v47, %v1816_v46 }
  0x98   :  { %1138 = vmatpush.bf16.msra.mxu0 %v1821_v53  ;;  %915 = vmatmul.bf16.gmra.mxu1 %v2330_v1  ;;  %v1804_v53 = vld [vmem:[%s2950_s1 + $0x290] sm:$0xf] }
  0x99   :  { %1175 = vmatpush.bf16.msrb.mxu1 %v1837_v57  ;;  %1756 = vmatmul.msk.bf16.vlgmr.msrb.gmra.mxu3 %vm217_vm0, %v2089_v16 }
  0x9c   :  { %1139 = vmatpush.bf16.msra.mxu0 %v1809_v60  ;;  %v295_v23 = vpop.f32.mrf.mxu3 }
  0x9d   :  { %1176 = vmatpush.bf16.msrb.mxu1 %v1825_v2  ;;  %v2773_v24 = vpop.f32.mrf.mxu1 }
  0xa0   :  { %1140 = vmatpush.bf16.msra.mxu0 %v1797_v9  ;;  %v233_v28 = vpop.f32.mrf.mxu0 }
  0xa1   :  { %1177 = vmatpush.bf16.msrb.mxu1 %v1813_v11  ;;  %v2785_v30 = vadd.f32 %v2676_v40, %v233_v28  ;;  %v2001_v40 = vld [vmem:[%s2950_s1 + $0x2c8] sm:$0xf0] }
  0xa2   :  { %v1829_v44 = vor.u32 %v2001_v40, %v1828_v39 }
  0xa3   :  { %1141 = vmatmul.bf16.vlgmr.msra.gmra.mxu0 %v2257_v31 }
  0xa4   :  { %1209 = vmatpush.bf16.msrb.mxu0 %v1889_v13  ;;  %v297_v35 = vpop.f32.mrf.mxu3 }
  0xa5   :  { %1178 = vmatpush.bf16.msrb.mxu1 %v1801_v19  ;;  %1903 = vmatmul.msk.bf16.gmra.mxu2 %vm217_vm0, %v2191_v62  ;;  %v309_v36 = vpop.f32.mrf.mxu1 }
  0xa8   :  { %1210 = vmatpush.bf16.msrb.mxu0 %v1877_v20  ;;  %v271_v38 = vpop.f32.mrf.mxu2  ;;  %v235_v42 = vpop.f32.mrf.mxu0  ;;  %1179 = vmatmul.bf16.vlgmr.msrb.gmra.mxu1 %v2257_v31 }
  0xa9   :  { %2021 = vmatpush.bf16.msra.mxu1 %v1889_v13  ;;  %v2803_v41 = vadd.f32 %v2705_v52, %v271_v38  ;;  %1757 = vmatmul.msk.bf16.gmra.mxu3 %vm217_vm0, %v2191_v62  ;;  %v2809_v43 = vadd.f32 %v2707_v54, %v235_v42  ;;  %v1995_v54 = vld [vmem:[%s2950_s1 + $0x298] sm:$0xf0] }
  0xaa   :  { %v1805_v58 = vor.u32 %v1995_v54, %v1804_v53 }
  0xac   :  { %1211 = vmatpush.bf16.msrb.mxu0 %v1865_v25  ;;  %v328_v48 = vpop.f32.mrf.mxu3 }
  0xad   :  { %2022 = vmatpush.bf16.msra.mxu1 %v1877_v20  ;;  %v2820_v49 = vadd.f32 %v328_v48, %v309_v36  ;;  %v311_v50 = vpop.f32.mrf.mxu1 }
  0xb0   :  { %1212 = vmatpush.bf16.msrb.mxu0 %v1853_v32  ;;  %v273_v52 = vpop.f32.mrf.mxu2  ;;  %v238_v56 = vpop.f32.mrf.mxu0 }
  0xb1   :  { %2023 = vmatpush.bf16.msra.mxu1 %v1865_v25  ;;  %v2829_v55 = vadd.f32 %v2743_v8, %v273_v52  ;;  %v2832_v57 = vadd.f32 %v2747_v10, %v238_v56 }
  0xb3   :  { %1146 = vmatmul.bf16.gmra.mxu0 %v2330_v1 }
  0xb4   :  { %1213 = vmatpush.bf16.msrb.mxu0 %v1841_v37  ;;  %v330_v59 = vpop.f32.mrf.mxu3 }
  0xb5   :  { %2024 = vmatpush.bf16.msra.mxu1 %v1853_v32  ;;  %1906 = vmatmul.msk.bf16.vlgmr.msrb.gmra.mxu2 %vm217_vm0, %v2089_v16  ;;  %v2837_v60 = vadd.f32 %v330_v59, %v311_v50  ;;  %v314_v61 = vpop.f32.mrf.mxu1 }
  0xb8   :  { %1214 = vmatpush.bf16.msrb.mxu0 %v1829_v44  ;;  %v276_v63 = vpop.f32.mrf.mxu2  ;;  %v240_v2 = vpop.f32.mrf.mxu0  ;;  %1184 = vmatmul.bf16.gmra.mxu1 %v2330_v1 }
  0xb9   :  { %2025 = vmatpush.bf16.msra.mxu1 %v1841_v37  ;;  %v2839_v0 = vadd.f32 %v295_v23, %v276_v63  ;;  %1904 = vmatmul.msk.bf16.vlgmr.msra.gmra.mxu3 %vm217_vm0, %v2089_v16  ;;  %v2845_v3 = vadd.f32 %v2773_v24, %v240_v2 }
  0xbc   :  { %1215 = vmatpush.bf16.msrb.mxu0 %v1817_v51  ;;  %v333_v4 = vpop.f32.mrf.mxu3 }
  0xbd   :  { %2026 = vmatpush.bf16.msra.mxu1 %v1829_v44  ;;  %v2847_v5 = vadd.f32 %v333_v4, %v314_v61  ;;  %v316_v6 = vpop.f32.mrf.mxu1 }
  0xc0   :  { %1216 = vmatpush.bf16.msrb.mxu0 %v1805_v58  ;;  %v278_v7 = vpop.f32.mrf.mxu2  ;;  %v528_v9 = vpop.f32.mrf.mxu0 }
  0xc1   :  { %2027 = vmatpush.bf16.msra.mxu1 %v1817_v51  ;;  %v2849_v8 = vadd.f32 %v297_v35, %v278_v7 }
  0xc3   :  { %1217 = vmatmul.bf16.vlgmr.msrb.gmra.mxu0 %v2257_v31 }
  0xc4   :  { %v335_v10 = vpop.f32.mrf.mxu3 }
  0xc5   :  { %2028 = vmatpush.bf16.msra.mxu1 %v1805_v58  ;;  %1907 = vmatmul.msk.bf16.gmra.mxu2 %vm217_vm0, %v2191_v62  ;;  %v2854_v11 = vadd.f32 %v335_v10, %v316_v6  ;;  %v566_v16 = vpop.f32.mrf.mxu1 }
  0xc8   :  { %v547_v12 = vpop.f32.mrf.mxu2  ;;  %v530_v14 = vpop.f32.mrf.mxu0  ;;  %1222 = vmatmul.bf16.vlgmr.msra.gmra.mxu1 %v2330_v1 }
  0xc9   :  { %v548_v13 = vadd.f32 %v547_v12, %v528_v9  ;;  %1905 = vmatmul.msk.bf16.gmra.mxu3 %vm217_vm0, %v2191_v62 }
  0xcb   :  { %v633_v15 = vmax.f32 %v2785_v30, %v548_v13 }
  0xcc   :  { %v552_v17 = vpop.f32.mrf.mxu3 }
  0xcd   :  { %v568_v18 = vpop.f32.mrf.mxu1 }
  0xd0   :  { %v549_v31 = vpop.f32.mrf.mxu2  ;;  %v533_v20 = vpop.f32.mrf.mxu0 }
  0xd1   :  { %v550_v19 = vadd.f32 %v549_v31, %v530_v14  ;;  %v553_v21 = vadd.f32 %v552_v17, %v533_v20 }
  0xd3   :  { %v636_v22 = vmax.f32 %v2809_v43, %v550_v19  ;;  %v639_v23 = vmax.f32 %v2832_v57, %v553_v21 }
  0xd4   :  { %v554_v24 = vpop.f32.mrf.mxu3 }
  0xd5   :  { %v571_v25 = vpop.f32.mrf.mxu1 }
  0xd8   :  { %v623_v26 = vpop.f32.mrf.mxu2  ;;  %v535_v27 = vpop.f32.mrf.mxu0 }
  0xd9   :  { %v555_v28 = vadd.f32 %v554_v24, %v535_v27 }
  0xdb   :  { %v642_v62 = vmax.f32 %v2845_v3, %v555_v28 }
  0xdc   :  { %v585_v1 = vpop.f32.mrf.mxu3 }
  0xdd   :  { %v586_v29 = vadd.f32 %v585_v1, %v566_v16  ;;  %v573_v30 = vpop.f32.mrf.mxu1 }
  0xdf   :  { %v634_v32 = vmax.f32 %v2803_v41, %v586_v29 }
  0xe0   :  { %v625_v33 = vpop.f32.mrf.mxu2  ;;  %v604_v34 = vpop.f32.mrf.mxu0 }
  0xe1   :  { %v2864_v35 = vadd.f32 %v623_v26, %v604_v34 }
  0xe3   :  { %v635_v36 = vmax.f32 %v2820_v49, %v2864_v35 }
  0xe4   :  { %v587_v37 = vpop.f32.mrf.mxu3 }
  0xe5   :  { %v588_v38 = vadd.f32 %v587_v37, %v568_v18  ;;  %v835_v39 = vpop.f32.mrf.mxu1 }
  0xe7   :  { %v637_v40 = vmax.f32 %v2829_v55, %v588_v38 }
  0xe8   :  { %v628_v42 = vpop.f32.mrf.mxu2  ;;  %v606_v43 = vpop.f32.mrf.mxu0 }
  0xe9   :  { %v2869_v44 = vadd.f32 %v625_v33, %v606_v43 }
  0xeb   :  { %v638_v45 = vmax.f32 %v2837_v60, %v2869_v44 }
  0xec   :  { %v590_v41 = vpop.f32.mrf.mxu3 }
  0xed   :  { %v591_v46 = vadd.f32 %v590_v41, %v571_v25  ;;  %v837_v47 = vpop.f32.mrf.mxu1 }
  0xef   :  { %v640_v48 = vmax.f32 %v2839_v0, %v591_v46 }
  0xf0   :  { %v630_v50 = vpop.f32.mrf.mxu2  ;;  %v609_v51 = vpop.f32.mrf.mxu0 }
  0xf1   :  { %v2874_v52 = vadd.f32 %v628_v42, %v609_v51 }
  0xf3   :  { %v641_v53 = vmax.f32 %v2847_v5, %v2874_v52 }
  0xf4   :  { %v592_v54 = vpop.f32.mrf.mxu3 }
  0xf5   :  { %v593_v55 = vadd.f32 %v592_v54, %v573_v30  ;;  %v840_v56 = vpop.f32.mrf.mxu1 }
  0xf7   :  { %v643_v57 = vmax.f32 %v2849_v8, %v593_v55 }
  0xf8   :  { %v892_v58 = vpop.f32.mrf.mxu2  ;;  %v611_v59 = vpop.f32.mrf.mxu0 }
  0xf9   :  { %v2879_v61 = vadd.f32 %v630_v50, %v611_v59 }
  0xfb   :  { %v644_v63 = vmax.f32 %v2854_v11, %v2879_v61 }
  0xfc   :  { %v854_v0 = vpop.f32.mrf.mxu3 }
  0xfd   :  { %v855_v2 = vadd.f32 %v854_v0, %v835_v39  ;;  %v842_v3 = vpop.f32.mrf.mxu1 }
  0xff   :  { %v940_v4 = vmax.f32 %v633_v15, %v855_v2 }
 0x100   :  { %v894_v6 = vpop.f32.mrf.mxu2  ;;  %v873_v7 = vpop.f32.mrf.mxu0 }
 0x101   :  { %v893_v9 = vadd.f32 %v892_v58, %v873_v7 }
 0x103   :  { %v941_v10 = vmax.f32 %v634_v32, %v893_v9 }
 0x104   :  { %v856_v16 = vpop.f32.mrf.mxu3 }
 0x105   :  { %v857_v12 = vadd.f32 %v856_v16, %v837_v47  ;;  %v911_v13 = vpop.f32.mrf.mxu1 }
 0x107   :  { %v2883_v14 = vmax.f32 %v636_v22, %v857_v12 }
 0x108   :  { %v897_v8 = vpop.f32.mrf.mxu2  ;;  %v875_v17 = vpop.f32.mrf.mxu0 }
 0x109   :  { %v895_v18 = vadd.f32 %v894_v6, %v875_v17 }
 0x10b   :  { %v2885_v31 = vmax.f32 %v637_v40, %v895_v18 }
 0x10c   :  { %v859_v19 = vpop.f32.mrf.mxu3 }
 0x10d   :  { %v860_v20 = vadd.f32 %v859_v19, %v840_v56  ;;  %v913_v21 = vpop.f32.mrf.mxu1 }
 0x10f   :  { %v2887_v24 = vmax.f32 %v639_v23, %v860_v20 }
 0x110   :  { %v899_v15 = vpop.f32.mrf.mxu2  ;;  %v878_v25 = vpop.f32.mrf.mxu0 }
 0x111   :  { %v898_v26 = vadd.f32 %v897_v8, %v878_v25 }
 0x113   :  { %v2889_v27 = vmax.f32 %v640_v48, %v898_v26 }
 0x114   :  { %v861_v28 = vpop.f32.mrf.mxu3 }
 0x115   :  { %v862_v1 = vadd.f32 %v861_v28, %v842_v3  ;;  %v916_v29 = vpop.f32.mrf.mxu1 }
 0x117   :  { %v2891_v22 = vmax.f32 %v642_v62, %v862_v1 }
 0x118   :  { %v1161_v30 = vpop.f32.mrf.mxu2  ;;  %v880_v32 = vpop.f32.mrf.mxu0 }
 0x119   :  { %v900_v33 = vadd.f32 %v899_v15, %v880_v32 }
 0x11b   :  { %v2893_v34 = vmax.f32 %v643_v57, %v900_v33  ;;  %v1266_v57 = vpop.permute.xlu0 %1265 }
 0x11c   :  { %v930_v37 = vpop.f32.mrf.mxu3 }
 0x11d   :  { %v2895_v38 = vpop.f32.mrf.mxu1  ;;  %v931_v0 = vadd.f32 %v930_v37, %v911_v13 }
 0x11f   :  { %v942_v8 = vmax.f32 %v635_v36, %v931_v0 }
 0x120   :  { %v1163_v23 = vpop.f32.mrf.mxu2  ;;  %v1142_v39 = vpop.f32.mrf.mxu0 }
 0x121   :  { %v1162_v54 = vadd.f32 %v1161_v30, %v1142_v39  ;;  %v1276_v39 = vpop.permute.xlu1 %1275 }
 0x123   :  { %v1247_v58 = vmax.f32 %v940_v4, %v1162_v54  ;;  %v1271_v25 = vpop.permute.xlu0 %1270 }
 0x124   :  { %v932_v40 = vpop.f32.mrf.mxu3 }
 0x125   :  { %v1180_v42 = vpop.f32.mrf.mxu1  ;;  %v1283_v6 = vadd.f32 %v1266_v57, %v1247_v58  ;;  %v933_v28 = vadd.f32 %v932_v40, %v913_v21 }
 0x127   :  { %v1295_v19 = vmax.f32 %v1283_v6, 0.0 }
 0x128   :  { %v1166_v43 = vpop.f32.mrf.mxu2  ;;  %v1144_v41 = vpop.f32.mrf.mxu0 }
 0x129   :  { %v1164_v7 = vadd.f32 %v1163_v23, %v1144_v41  ;;  %v945_v23 = vmax.f32 %v638_v45, %v933_v28 }
 0x12b   :  { %v1250_v20 = vmax.f32 %v2883_v14, %v1164_v7 }
 0x12c   :  { %v935_v46 = vpop.f32.mrf.mxu3 }
 0x12d   :  { %v1182_v47 = vpop.f32.mrf.mxu1  ;;  %v936_v13 = vadd.f32 %v935_v46, %v916_v29  ;;  %v1286_v33 = vadd.f32 %v1271_v25, %v1250_v20 }
 0x12f   :  { %v948_v14 = vmax.f32 %v641_v53, %v936_v13  ;;  %v1298_v46 = vmax.f32 %v1286_v33, 0.0 }
 0x130   :  { %v2897_v48 = vpop.f32.mrf.mxu2  ;;  %v1147_v62 = vpop.f32.mrf.mxu0 }
 0x131   :  { %v1167_v37 = vadd.f32 %v1166_v43, %v1147_v62 }
 0x134   :  { %v937_v50 = vpop.f32.mrf.mxu3 }
 0x135   :  { %v1185_v51 = vpop.f32.mrf.mxu1  ;;  %v938_v53 = vadd.f32 %v937_v50, %v2895_v38 }
 0x137   :  { %v951_v38 = vmax.f32 %v644_v63, %v938_v53 }
 0x138   :  { %v1237_v55 = vpop.f32.mrf.mxu2  ;;  %v1149_v56 = vpop.f32.mrf.mxu0 }
 0x13c   :  { %v1199_v59 = vpop.f32.mrf.mxu3 }
 0x13d   :  { %v1200_v2 = vadd.f32 %v1199_v59, %v1180_v42  ;;  %v2899_v3 = vpop.f32.mrf.mxu1 }
 0x13f   :  { %v1248_v9 = vmax.f32 %v941_v10, %v1200_v2 }
 0x140   :  { %v1239_v16 = vpop.f32.mrf.mxu2  ;;  %v1218_v12 = vpop.f32.mrf.mxu0 }
 0x141   :  { %v1284_v17 = vadd.f32 %v1266_v57, %v1248_v9  ;;  %v1238_v18 = vadd.f32 %v1237_v55, %v1218_v12 }
 0x143   :  { %v1296_v4 = vmax.f32 %v1284_v17, 0.0  ;;  %v1249_v15 = vmax.f32 %v942_v8, %v1238_v18 }
 0x144   :  { %v1201_v26 = vpop.f32.mrf.mxu3 }
 0x145   :  { %v1307_v1 = vpack.c.bf16 %v1296_v4, %v1295_v19  ;;  %v1285_v30 = vadd.f32 %v1266_v57, %v1249_v15  ;;  %v1202_v10 = vadd.f32 %v1201_v26, %v1182_v47  ;;  %v1223_v32 = vpop.f32.mrf.mxu1  ;;  %v1169_v57 = vadd.f32 %v2897_v48, %v1149_v56 }
 0x147   :  { %1315 = vst [vmem:[%s2953_s3] sm:$0xff] %v1307_v1  ;;  %v1297_v49 = vmax.f32 %v1285_v30, 0.0  ;;  %v1251_v35 = vmax.f32 %v2885_v31, %v1202_v10  ;;  %v1253_v31 = vmax.f32 %v2887_v24, %v1167_v37  ;;  %v1256_v7 = vmax.f32 %v2891_v22, %v1169_v57 }
 0x148   :  { %v1242_v36 = vpop.f32.mrf.mxu2  ;;  %v1220_v29 = vpop.f32.mrf.mxu0 }
 0x149   :  { %v1243_v21 = vadd.f32 %v1242_v36, %v1223_v32  ;;  %v1308_v40 = vpack.c.bf16 %v1297_v49, %v1297_v49  ;;  %v1287_v42 = vadd.f32 %v1271_v25, %v1251_v35  ;;  %v1240_v43 = vadd.f32 %v1239_v16, %v1220_v29 }
 0x14a   :  { %v1289_v55 = vadd.f32 %v1276_v39, %v1253_v31 }
 0x14b   :  { %v1255_v41 = vmax.f32 %v948_v14, %v1243_v21  ;;  %1317 = vst.msk [vmem:[%s2953_s3 + $0x8] sm:$0xf] %vm1316_vm1, %v1308_v40  ;;  %v1299_v5 = vmax.f32 %v1287_v42, 0.0  ;;  %v1252_v52 = vmax.f32 %v945_v23, %v1240_v43 }
 0x14c   :  { %v1204_v60 = vpop.f32.mrf.mxu3  ;;  %v1301_v56 = vmax.f32 %v1289_v55, 0.0 }
 0x14d   :  { %v1291_v47 = vadd.f32 %v1276_v39, %v1255_v41  ;;  %v1309_v44 = vpack.c.bf16 %v1299_v5, %v1298_v46  ;;  %v1288_v45 = vadd.f32 %v1271_v25, %v1252_v52  ;;  %v1205_v62 = vadd.f32 %v1204_v60, %v1185_v51  ;;  %v1225_v59 = vpop.f32.mrf.mxu1 }
 0x14f   :  { %v1303_v54 = vmax.f32 %v1291_v47, 0.0  ;;  %1318 = vst [vmem:[%s2953_s3 + $0xc] sm:$0xff] %v1309_v44  ;;  %v1300_v24 = vmax.f32 %v1288_v45, 0.0  ;;  %v1254_v58 = vmax.f32 %v2889_v27, %v1205_v62  ;;  %v1281_v27 = vpop.permute.xlu1 %1280 }
 0x150   :  { %v1244_v0 = vpop.f32.mrf.mxu2  ;;  %v1292_v8 = vadd.f32 %v1281_v27, %v1256_v7 }
 0x151   :  { %v1312_v50 = vpack.c.bf16 %v1303_v54, %v1303_v54  ;;  %v1245_v2 = vadd.f32 %v1244_v0, %v1225_v59  ;;  %v1310_v51 = vpack.c.bf16 %v1300_v24, %v1300_v24  ;;  %v1290_v6 = vadd.f32 %v1276_v39, %v1254_v58 }
 0x152   :  { %v1304_v19 = vmax.f32 %v1292_v8, 0.0 }
 0x153   :  { %1321 = vst.msk [vmem:[%s2953_s3 + $0x20] sm:$0xf] %vm1316_vm1, %v1312_v50  ;;  %v1258_v48 = vmax.f32 %v951_v38, %v1245_v2  ;;  %v1302_v11 = vmax.f32 %v1290_v6, 0.0 }
 0x154   :  { %1319 = vst.msk [vmem:[%s2953_s3 + $0x14] sm:$0xf] %vm1316_vm1, %v1310_v51  ;;  %v1206_v63 = vpop.f32.mrf.mxu3 }
 0x155   :  { %v1294_v61 = vadd.f32 %v1281_v27, %v1258_v48  ;;  %v1311_v9 = vpack.c.bf16 %v1302_v11, %v1301_v56  ;;  %v1207_v16 = vadd.f32 %v1206_v63, %v2899_v3 }
 0x157   :  { %v1306_v12 = vmax.f32 %v1294_v61, 0.0  ;;  %1320 = vst [vmem:[%s2953_s3 + $0x18] sm:$0xff] %v1311_v9  ;;  %v1257_v22 = vmax.f32 %v2893_v34, %v1207_v16 }
 0x159   :  { %v1314_v17 = vpack.c.bf16 %v1306_v12, %v1306_v12  ;;  %v1293_v18 = vadd.f32 %v1281_v27, %v1257_v22 }
 0x15b   :  { %1323 = vst.msk [vmem:[%s2953_s3 + $0x2c] sm:$0xf] %vm1316_vm1, %v1314_v17  ;;  %v1305_v20 = vmax.f32 %v1293_v18, 0.0 }
 0x15d   :  { %v1313_v4 = vpack.c.bf16 %v1305_v20, %v1304_v19 }
 0x15f   :  { %1322 = vst [vmem:[%s2953_s3 + $0x24] sm:$0xff] %v1313_v4 }

// kernel: cnn_forward.5
= control target key start
LH: loop header
LB: loop body
LE: loop exit
PB: predicated region body
PF: predicated region fallthrough
CT: control target
= control target key end

     0   :  { %s4115_s0 = inlined_call_operand.vmem [shape: bf16[9,4,2,288], index: 0, kind: input, shape index: {}]   ;;  %s4116_s1 = inlined_call_operand.vmem [shape: bf16[288,64], index: 1, kind: input, shape index: {}]   ;;  %s4117_s2 = inlined_call_operand.vmem [shape: f32[1,64], index: 2, kind: input, shape index: {}]   ;;  %s4118_s3 = inlined_call_operand.vmem [shape: f32[9,64,64], index: 3, kind: input, shape index: {}]   ;;  %s4119_s4 = inlined_call_operand.vmem [shape: f32[1,64], index: 4, kind: input, shape index: {}]   ;;  %s4120_s5 = inlined_call_operand.vmem [shape: f32[64,32], index: 5, kind: input, shape index: {}]   ;;  %s4121_s6 = inlined_call_operand.vmem [shape: f32[1,32], index: 6, kind: input, shape index: {}]   ;;  %s4122_s7 = inlined_call_operand.hbm [shape: f32[2,32], index: 7, kind: output, shape index: {}]  }
   0x1   :  { %v2740_v0 = vld [vmem:[%s4116_s1 + $0x38] sm:$0xff]  ;;  %v2750_v2 = vld [vmem:[%s4116_s1 + $0x88] sm:$0xff]  ;;  %v2757_v3 = vld [vmem:[%s4116_s1 + $0x30] sm:$0xff] }
   0x2   :  { %v2745_v1 = vld [vmem:[%s4116_s1 + $0x78] sm:$0xff]  ;;  %184 = vmatpush.bf16.msra.mxu0 %v2740_v0  ;;  %v2762_v4 = vld [vmem:[%s4116_s1 + $0x70] sm:$0xff]  ;;  %216 = vmatpush.bf16.msra.mxu2 %v2750_v2  ;;  %v2769_v5 = vld [vmem:[%s4116_s1 + $0x80] sm:$0xff] }
   0x3   :  { %197 = vmatpush.bf16.msra.mxu1 %v2745_v1  ;;  %234 = vmatpush.bf16.msra.mxu3 %v2740_v0  ;;  %v65_v6 = vld [vmem:[%s4115_s0] sm:$0x7]  ;;  %v2779_v7 = vld [vmem:[%s4116_s1 + $0x28] sm:$0xff] }
   0x4   :  { %67 = vst [vmem:[#allocation1] ss:$9 sm:$0xff] %v65_v6  ;;  %v2784_v8 = vld [vmem:[%s4116_s1 + $0x68] sm:$0xff] }
   0x6   :  { %185 = vmatpush.bf16.msra.mxu0 %v2757_v3  ;;  %217 = vmatpush.bf16.msra.mxu2 %v2769_v5 }
   0x7   :  { %198 = vmatpush.bf16.msra.mxu1 %v2762_v4  ;;  %235 = vmatpush.bf16.msra.mxu3 %v2757_v3 }
   0x8   :  { %12 = vsyncpa [#allocation3], 0  ;;  %v2462_v9 = vld [vmem:[%s4115_s0 + $0x3] sm:$0x7]  ;;  %vm181_vm0 = vcmask 261120   ;;  %v2812_v15 = vld [vmem:[%s4116_s1 + $0x18] sm:$0xff] }
   0x9   :  { %v2797_v10 = vld [vmem:[%s4116_s1 + $0x20] sm:$0xff]  ;;  %v2817_v16 = vld [vmem:[%s4116_s1 + $0x58] sm:$0xff]  ;;  %v2829_v18 = vld [vmem:[%s4116_s1 + $0x10] sm:$0xff]  ;;  %vm603_vm1 = vcmask 523264   ;;  %vm2358_vm2 = vcmask 254976   ;;  %s2380_s22 = sshll.u32 %s4122_s7, 4  ;;  %s2381_s22 = int_to_ptr.hbm [resolvable:$true] %s2380_s22 }
   0xa   :  { %247 = vmatpush.bf16.msrb.mxu2 %v2745_v1  ;;  %186 = vmatpush.bf16.msra.mxu0 %v2779_v7  ;;  %v2802_v11 = vld [vmem:[%s4116_s1 + $0x60] sm:$0xff]  ;;  %v2834_v19 = vld [vmem:[%s4116_s1 + $0x50] sm:$0xff]  ;;  %v2843_v23 = vld [vmem:[%s4116_s1 + $0x8] sm:$0xff] }
   0xb   :  { %199 = vmatpush.bf16.msra.mxu1 %v2784_v8  ;;  %236 = vmatpush.bf16.msra.mxu3 %v2779_v7  ;;  %v70_v12 = vld [vmem:[#allocation1 + $0x12] sm:$0xff]  ;;  %v68_v13 = vld [vmem:[#allocation1] sm:$0xff]  ;;  %v69_v14 = vld [vmem:[#allocation1 + $0x9] sm:$0xff] }
   0xc   :  { %226 = vst [vmem:[#allocation1] ss:$9 sm:$0xff] %v2462_v9  ;;  %2461 = vmatmul.msk.bf16.vlgmr.msra.gmra.mxu2 %vm181_vm0, %v70_v12  ;;  %v2464_v17 = vld [vmem:[%s4115_s0 + $0x6] sm:$0x7]  ;;  %v2466_v30 = vld [vmem:[%s4115_s0 + $0x9] sm:$0x7] }
   0xd   :  { %v2848_v24 = vld [vmem:[%s4116_s1 + $0x48] sm:$0xff]  ;;  %v2857_v25 = vld [vmem:[%s4116_s1] sm:$0xff]  ;;  %v2472_v42 = vld [vmem:[%s4115_s0 + $0x12] sm:$0x7] }
   0xe   :  { %248 = vmatpush.bf16.msrb.mxu2 %v2762_v4  ;;  %187 = vmatpush.bf16.msra.mxu0 %v2797_v10  ;;  %v2862_v26 = vld [vmem:[%s4116_s1 + $0x40] sm:$0xff]  ;;  %v2468_v34 = vld [vmem:[%s4115_s0 + $0xc] sm:$0x7]  ;;  %v2470_v38 = vld [vmem:[%s4115_s0 + $0xf] sm:$0x7] }
   0xf   :  { %200 = vmatpush.bf16.msra.mxu1 %v2802_v11  ;;  %237 = vmatpush.bf16.msra.mxu3 %v2797_v10  ;;  %v2474_v46 = vld [vmem:[%s4115_s0 + $0x15] sm:$0x7]  ;;  %v388_v56 = vld [vmem:[%s4118_s3 + $0x38] sm:$0xff]  ;;  %v386_v62 = vld [vmem:[%s4118_s3 + $0x28] sm:$0xff] }
  0x10   :  { %v387_v57 = vld [vmem:[%s4118_s3 + $0x30] sm:$0xff]  ;;  %v385_v63 = vld [vmem:[%s4118_s3 + $0x20] sm:$0xff]  ;;  %v384_v9 = vld [vmem:[%s4118_s3 + $0x18] sm:$0xff] }
  0x11   :  { %v383_v12 = vld [vmem:[%s4118_s3 + $0x10] sm:$0xff] }
  0x12   :  { %249 = vmatpush.bf16.msrb.mxu2 %v2784_v8  ;;  %188 = vmatpush.bf16.msra.mxu0 %v2812_v15 }
  0x13   :  { %201 = vmatpush.bf16.msra.mxu1 %v2817_v16  ;;  %238 = vmatpush.bf16.msra.mxu3 %v2812_v15  ;;  %v228_v20 = vld [vmem:[#allocation1 + $0x9] sm:$0xff]  ;;  %v227_v21 = vld [vmem:[#allocation1] sm:$0xff]  ;;  %v229_v22 = vld [vmem:[#allocation1 + $0x12] sm:$0xff] }
  0x14   :  { %277 = vst [vmem:[#allocation1] ss:$9 sm:$0xff] %v2464_v17  ;;  %v381_v17 = vld [vmem:[%s4118_s3] sm:$0xff] }
  0x16   :  { %250 = vmatpush.bf16.msrb.mxu2 %v2802_v11  ;;  %189 = vmatpush.bf16.msra.mxu0 %v2829_v18 }
  0x17   :  { %202 = vmatpush.bf16.msra.mxu1 %v2834_v19  ;;  %239 = vmatpush.bf16.msra.mxu3 %v2829_v18 }
  0x1a   :  { %251 = vmatpush.bf16.msrb.mxu2 %v2817_v16  ;;  %190 = vmatpush.bf16.msra.mxu0 %v2843_v23 }
  0x1b   :  { %203 = vmatpush.bf16.msra.mxu1 %v2848_v24  ;;  %240 = vmatpush.bf16.msra.mxu3 %v2843_v23  ;;  %v280_v27 = vld [vmem:[#allocation1 + $0x12] sm:$0xff]  ;;  %v278_v28 = vld [vmem:[#allocation1] sm:$0xff]  ;;  %v279_v29 = vld [vmem:[#allocation1 + $0x9] sm:$0xff] }
  0x1c   :  { %328 = vst [vmem:[#allocation1] ss:$9 sm:$0xff] %v2466_v30 }
  0x1e   :  { %252 = vmatpush.bf16.msrb.mxu2 %v2834_v19  ;;  %191 = vmatpush.bf16.msra.mxu0 %v2857_v25 }
  0x1f   :  { %204 = vmatpush.bf16.msra.mxu1 %v2862_v26  ;;  %241 = vmatpush.bf16.msra.mxu3 %v2857_v25 }
  0x21   :  { %192 = vmatmul.bf16.vlgmr.msra.gmra.mxu0 %v68_v13 }
  0x22   :  { %266 = vmatpush.bf16.msrb.mxu0 %v2750_v2  ;;  %253 = vmatpush.bf16.msrb.mxu2 %v2848_v24 }
  0x23   :  { %285 = vmatpush.bf16.msrb.mxu1 %v2740_v0  ;;  %298 = vmatpush.bf16.msrb.mxu3 %v2745_v1  ;;  %v330_v31 = vld [vmem:[#allocation1 + $0x9] sm:$0xff]  ;;  %v329_v32 = vld [vmem:[#allocation1] sm:$0xff]  ;;  %v331_v33 = vld [vmem:[#allocation1 + $0x12] sm:$0xff] }
  0x24   :  { %205 = vmatmul.bf16.vlgmr.msra.gmra.mxu1 %v69_v14  ;;  %242 = vmatmul.bf16.vlgmr.msra.gmra.mxu3 %v227_v21  ;;  %392 = vst [vmem:[#allocation1] ss:$9 sm:$0xff] %v2468_v34  ;;  %v382_v14 = vld [vmem:[%s4118_s3 + $0x8] sm:$0xff] }
  0x26   :  { %267 = vmatpush.bf16.msrb.mxu0 %v2769_v5  ;;  %254 = vmatpush.bf16.msrb.mxu2 %v2862_v26 }
  0x27   :  { %286 = vmatpush.bf16.msrb.mxu1 %v2757_v3  ;;  %299 = vmatpush.bf16.msrb.mxu3 %v2762_v4 }
  0x29   :  { %255 = vmatmul.bf16.vlgmr.msrb.gmra.mxu2 %v228_v20 }
  0x2a   :  { %317 = vmatpush.bf16.msra.mxu2 %v2750_v2  ;;  %336 = vmatpush.bf16.msra.mxu0 %v2740_v0 }
  0x2b   :  { %287 = vmatpush.bf16.msrb.mxu1 %v2779_v7  ;;  %300 = vmatpush.bf16.msrb.mxu3 %v2784_v8  ;;  %v394_v35 = vld [vmem:[#allocation1 + $0x9] sm:$0xff]  ;;  %v395_v36 = vld [vmem:[#allocation1 + $0x12] sm:$0xff]  ;;  %v393_v37 = vld [vmem:[#allocation1] sm:$0xff] }
  0x2c   :  { %442 = vst [vmem:[#allocation1] ss:$9 sm:$0xff] %v2470_v38 }
  0x2e   :  { %318 = vmatpush.bf16.msra.mxu2 %v2769_v5  ;;  %337 = vmatpush.bf16.msra.mxu0 %v2757_v3 }
  0x2f   :  { %288 = vmatpush.bf16.msrb.mxu1 %v2797_v10  ;;  %301 = vmatpush.bf16.msrb.mxu3 %v2802_v11 }
  0x31   :  { %2463 = vmatmul.msk.bf16.vlgmr.msrb.gmra.mxu0 %vm181_vm0, %v229_v22 }
  0x32   :  { %349 = vmatpush.bf16.msrb.mxu2 %v2745_v1  ;;  %338 = vmatpush.bf16.msra.mxu0 %v2779_v7 }
  0x33   :  { %289 = vmatpush.bf16.msrb.mxu1 %v2812_v15  ;;  %302 = vmatpush.bf16.msrb.mxu3 %v2817_v16  ;;  %v444_v39 = vld [vmem:[#allocation1 + $0x9] sm:$0xff]  ;;  %v443_v40 = vld [vmem:[#allocation1] sm:$0xff]  ;;  %v445_v41 = vld [vmem:[#allocation1 + $0x12] sm:$0xff] }
  0x34   :  { %493 = vst [vmem:[#allocation1] ss:$9 sm:$0xff] %v2472_v42 }
  0x36   :  { %350 = vmatpush.bf16.msrb.mxu2 %v2762_v4  ;;  %339 = vmatpush.bf16.msra.mxu0 %v2797_v10 }
  0x37   :  { %290 = vmatpush.bf16.msrb.mxu1 %v2829_v18  ;;  %303 = vmatpush.bf16.msrb.mxu3 %v2834_v19 }
  0x39   :  { %2465 = vmatmul.msk.bf16.vlgmr.msra.gmra.mxu2 %vm181_vm0, %v280_v27 }
  0x3a   :  { %351 = vmatpush.bf16.msrb.mxu2 %v2784_v8  ;;  %340 = vmatpush.bf16.msra.mxu0 %v2812_v15 }
  0x3b   :  { %291 = vmatpush.bf16.msrb.mxu1 %v2843_v23  ;;  %304 = vmatpush.bf16.msrb.mxu3 %v2848_v24  ;;  %v496_v43 = vld [vmem:[#allocation1 + $0x12] sm:$0xff]  ;;  %v494_v44 = vld [vmem:[#allocation1] sm:$0xff]  ;;  %v495_v45 = vld [vmem:[#allocation1 + $0x9] sm:$0xff] }
  0x3c   :  { %544 = vst [vmem:[#allocation1] ss:$9 sm:$0xff] %v2474_v46 }
  0x3e   :  { %352 = vmatpush.bf16.msrb.mxu2 %v2802_v11  ;;  %341 = vmatpush.bf16.msra.mxu0 %v2829_v18 }
  0x3f   :  { %292 = vmatpush.bf16.msrb.mxu1 %v2857_v25  ;;  %305 = vmatpush.bf16.msrb.mxu3 %v2862_v26 }
  0x42   :  { %353 = vmatpush.bf16.msrb.mxu2 %v2817_v16  ;;  %342 = vmatpush.bf16.msra.mxu0 %v2843_v23 }
  0x43   :  { %368 = vmatpush.bf16.msra.mxu1 %v2750_v2  ;;  %400 = vmatpush.bf16.msra.mxu3 %v2740_v0  ;;  %v546_v47 = vld [vmem:[#allocation1 + $0x9] sm:$0xff]  ;;  %v545_v48 = vld [vmem:[#allocation1] sm:$0xff]  ;;  %v547_v49 = vld [vmem:[#allocation1 + $0x12] sm:$0xff] }
  0x44   :  { %293 = vmatmul.bf16.vlgmr.msrb.gmra.mxu1 %v278_v28  ;;  %306 = vmatmul.bf16.vlgmr.msrb.gmra.mxu3 %v279_v29 }
  0x46   :  { %354 = vmatpush.bf16.msrb.mxu2 %v2834_v19  ;;  %343 = vmatpush.bf16.msra.mxu0 %v2857_v25 }
  0x47   :  { %369 = vmatpush.bf16.msra.mxu1 %v2769_v5  ;;  %401 = vmatpush.bf16.msra.mxu3 %v2757_v3 }
  0x49   :  { %344 = vmatmul.bf16.vlgmr.msra.gmra.mxu0 %v329_v32 }
  0x4a   :  { %355 = vmatpush.bf16.msrb.mxu2 %v2848_v24  ;;  %413 = vmatpush.bf16.msrb.mxu0 %v2745_v1 }
  0x4b   :  { %432 = vmatpush.bf16.msrb.mxu1 %v2750_v2  ;;  %402 = vmatpush.bf16.msra.mxu3 %v2779_v7 }
  0x4e   :  { %356 = vmatpush.bf16.msrb.mxu2 %v2862_v26  ;;  %414 = vmatpush.bf16.msrb.mxu0 %v2762_v4 }
  0x4f   :  { %433 = vmatpush.bf16.msrb.mxu1 %v2769_v5  ;;  %403 = vmatpush.bf16.msra.mxu3 %v2797_v10 }
  0x51   :  { %357 = vmatmul.bf16.vlgmr.msrb.gmra.mxu2 %v330_v31 }
  0x52   :  { %450 = vmatpush.bf16.msra.mxu2 %v2740_v0  ;;  %415 = vmatpush.bf16.msrb.mxu0 %v2784_v8 }
  0x53   :  { %404 = vmatpush.bf16.msra.mxu3 %v2812_v15 }
  0x54   :  { %2467 = vmatmul.msk.bf16.vlgmr.msra.gmra.mxu1 %vm181_vm0, %v331_v33 }
  0x55   :  { %463 = vmatpush.bf16.msra.mxu1 %v2745_v1 }
  0x56   :  { %451 = vmatpush.bf16.msra.mxu2 %v2757_v3  ;;  %416 = vmatpush.bf16.msrb.mxu0 %v2802_v11 }
  0x57   :  { %405 = vmatpush.bf16.msra.mxu3 %v2829_v18 }
  0x59   :  { %464 = vmatpush.bf16.msra.mxu1 %v2762_v4 }
  0x5a   :  { %452 = vmatpush.bf16.msra.mxu2 %v2779_v7  ;;  %417 = vmatpush.bf16.msrb.mxu0 %v2817_v16 }
  0x5b   :  { %406 = vmatpush.bf16.msra.mxu3 %v2843_v23 }
  0x5d   :  { %465 = vmatpush.bf16.msra.mxu1 %v2784_v8 }
  0x5e   :  { %453 = vmatpush.bf16.msra.mxu2 %v2797_v10  ;;  %418 = vmatpush.bf16.msrb.mxu0 %v2834_v19 }
  0x5f   :  { %407 = vmatpush.bf16.msra.mxu3 %v2857_v25 }
  0x61   :  { %466 = vmatpush.bf16.msra.mxu1 %v2802_v11 }
  0x62   :  { %454 = vmatpush.bf16.msra.mxu2 %v2812_v15  ;;  %419 = vmatpush.bf16.msrb.mxu0 %v2848_v24 }
  0x63   :  { %482 = vmatpush.bf16.msrb.mxu3 %v2750_v2 }
  0x64   :  { %408 = vmatmul.bf16.vlgmr.msra.gmra.mxu3 %v393_v37  ;;  %2469 = vmatmul.msk.bf16.vlgmr.msrb.gmra.mxu1 %vm181_vm0, %v395_v36 }
  0x65   :  { %467 = vmatpush.bf16.msra.mxu1 %v2817_v16 }
  0x66   :  { %455 = vmatpush.bf16.msra.mxu2 %v2829_v18  ;;  %420 = vmatpush.bf16.msrb.mxu0 %v2862_v26 }
  0x67   :  { %483 = vmatpush.bf16.msrb.mxu3 %v2769_v5 }
  0x69   :  { %421 = vmatmul.bf16.vlgmr.msrb.gmra.mxu0 %v394_v35  ;;  %468 = vmatpush.bf16.msra.mxu1 %v2834_v19  ;;  %v2483_v35 = vld [vmem:[%s4118_s3 + $0x78] sm:$0xff] }
  0x6a   :  { %456 = vmatpush.bf16.msra.mxu2 %v2843_v23  ;;  %501 = vmatpush.bf16.msra.mxu0 %v2740_v0 }
  0x6b   :  { %514 = vmatpush.bf16.msra.mxu3 %v2745_v1 }
  0x6d   :  { %469 = vmatpush.bf16.msra.mxu1 %v2848_v24 }
  0x6e   :  { %457 = vmatpush.bf16.msra.mxu2 %v2857_v25  ;;  %502 = vmatpush.bf16.msra.mxu0 %v2757_v3 }
  0x6f   :  { %515 = vmatpush.bf16.msra.mxu3 %v2762_v4 }
  0x71   :  { %458 = vmatmul.bf16.vlgmr.msra.gmra.mxu2 %v443_v40  ;;  %470 = vmatpush.bf16.msra.mxu1 %v2862_v26 }
  0x72   :  { %533 = vmatpush.bf16.msrb.mxu2 %v2750_v2  ;;  %503 = vmatpush.bf16.msra.mxu0 %v2779_v7 }
  0x73   :  { %516 = vmatpush.bf16.msra.mxu3 %v2784_v8 }
  0x74   :  { %2471 = vmatmul.msk.bf16.vlgmr.msrb.gmra.mxu3 %vm181_vm0, %v445_v41  ;;  %471 = vmatmul.bf16.vlgmr.msra.gmra.mxu1 %v444_v39 }
  0x75   :  { %552 = vmatpush.bf16.msrb.mxu1 %v2740_v0 }
  0x76   :  { %534 = vmatpush.bf16.msrb.mxu2 %v2769_v5  ;;  %504 = vmatpush.bf16.msra.mxu0 %v2797_v10 }
  0x77   :  { %517 = vmatpush.bf16.msra.mxu3 %v2802_v11 }
  0x79   :  { %553 = vmatpush.bf16.msrb.mxu1 %v2757_v3 }
  0x7a   :  { %565 = vmatpush.bf16.msra.mxu2 %v2745_v1  ;;  %505 = vmatpush.bf16.msra.mxu0 %v2812_v15 }
  0x7b   :  { %518 = vmatpush.bf16.msra.mxu3 %v2817_v16 }
  0x7d   :  { %554 = vmatpush.bf16.msrb.mxu1 %v2779_v7 }
  0x7e   :  { %566 = vmatpush.bf16.msra.mxu2 %v2762_v4  ;;  %506 = vmatpush.bf16.msra.mxu0 %v2829_v18 }
  0x7f   :  { %519 = vmatpush.bf16.msra.mxu3 %v2834_v19 }
  0x81   :  { %2473 = vmatmul.msk.bf16.vlgmr.msrb.gmra.mxu2 %vm181_vm0, %v496_v43  ;;  %555 = vmatpush.bf16.msrb.mxu1 %v2797_v10  ;;  %v2482_v43 = vld [vmem:[%s4118_s3 + $0x70] sm:$0xff] }
  0x82   :  { %567 = vmatpush.bf16.msra.mxu2 %v2784_v8  ;;  %507 = vmatpush.bf16.msra.mxu0 %v2843_v23 }
  0x83   :  { %520 = vmatpush.bf16.msra.mxu3 %v2848_v24 }
  0x85   :  { %556 = vmatpush.bf16.msrb.mxu1 %v2812_v15 }
  0x86   :  { %568 = vmatpush.bf16.msra.mxu2 %v2802_v11  ;;  %508 = vmatpush.bf16.msra.mxu0 %v2857_v25 }
  0x87   :  { %521 = vmatpush.bf16.msra.mxu3 %v2862_v26 }
  0x89   :  { %509 = vmatmul.bf16.vlgmr.msra.gmra.mxu0 %v494_v44  ;;  %557 = vmatpush.bf16.msrb.mxu1 %v2829_v18  ;;  %v2481_v44 = vld [vmem:[%s4118_s3 + $0x68] sm:$0xff] }
  0x8a   :  { %569 = vmatpush.bf16.msra.mxu2 %v2817_v16  ;;  %584 = vmatpush.bf16.msrb.mxu0 %v2750_v2 }
  0x8b   :  { %522 = vmatmul.bf16.vlgmr.msra.gmra.mxu3 %v495_v45 }
  0x8c   :  { %615 = vmatpush.msrb.mxu3 %v2483_v35 }
  0x8d   :  { %558 = vmatpush.bf16.msrb.mxu1 %v2843_v23 }
  0x8e   :  { %570 = vmatpush.bf16.msra.mxu2 %v2834_v19  ;;  %585 = vmatpush.bf16.msrb.mxu0 %v2769_v5 }
  0x8f   :  { %v3007_v50 = vpop.f32.mrf.mxu2  ;;  %616 = vmatpush.msrb.mxu3 %v2482_v43 }
  0x91   :  { %559 = vmatpush.bf16.msrb.mxu1 %v2857_v25  ;;  %617 = vmatpush.msrb.mxu3 %v2481_v44 }
  0x92   :  { %571 = vmatpush.bf16.msra.mxu2 %v2848_v24  ;;  %638 = vmatpush.msra.mxu0 %v388_v56  ;;  %v2477_v56 = vld [vmem:[%s4118_s3 + $0x48] sm:$0xff] }
  0x94   :  { %560 = vmatmul.bf16.vlgmr.msrb.gmra.mxu1 %v545_v48  ;;  %639 = vmatpush.msra.mxu0 %v387_v57  ;;  %v2476_v57 = vld [vmem:[%s4118_s3 + $0x40] sm:$0xff] }
  0x95   :  { %661 = vmatpush.bf16.msra.mxu1 %v2740_v0 }
  0x96   :  { %572 = vmatpush.bf16.msra.mxu2 %v2862_v26  ;;  %640 = vmatpush.msra.mxu0 %v386_v62 }
  0x97   :  { %v221_v51 = vpop.f32.mrf.mxu2 }
  0x98   :  { %641 = vmatpush.msra.mxu0 %v385_v63 }
  0x99   :  { %573 = vmatmul.bf16.vlgmr.msra.gmra.mxu2 %v546_v47  ;;  %662 = vmatpush.bf16.msra.mxu1 %v2757_v3  ;;  %v3070_v47 = vld [vmem:[%s4117_s2] ss:$0 sm:$0xff] }
  0x9a   :  { %711 = vmatpush.bf16.msrb.mxu2 %v2740_v0  ;;  %2475 = vmatmul.msk.bf16.vlgmr.msrb.gmra.mxu0 %vm181_vm0, %v547_v49  ;;  %v2480_v49 = vld [vmem:[%s4118_s3 + $0x60] sm:$0xff] }
  0x9b   :  { %642 = vmatpush.msra.mxu0 %v384_v9  ;;  %618 = vmatpush.msrb.mxu3 %v2480_v49  ;;  %v2486_v9 = vld [vmem:[%s4115_s0 + $0x18] sm:$0x7] }
  0x9c   :  { %653 = vst [vmem:[#allocation1] ss:$9 sm:$0xff] %v2486_v9 }
  0x9d   :  { %663 = vmatpush.bf16.msra.mxu1 %v2779_v7  ;;  %643 = vmatpush.msra.mxu0 %v383_v12 }
  0x9e   :  { %712 = vmatpush.bf16.msrb.mxu2 %v2757_v3  ;;  %v193_v52 = vpop.f32.mrf.mxu0 }
  0x9f   :  { %644 = vmatpush.msra.mxu0 %v382_v14 }
  0xa1   :  { %664 = vmatpush.bf16.msra.mxu1 %v2797_v10  ;;  %v206_v53 = vpop.f32.mrf.mxu1  ;;  %645 = vmatpush.msra.mxu0 %v381_v17 }
  0xa2   :  { %713 = vmatpush.bf16.msrb.mxu2 %v2779_v7  ;;  %v207_v31 = vadd.f32 %v206_v53, %v193_v52  ;;  %v2479_v52 = vld [vmem:[%s4118_s3 + $0x58] sm:$0xff] }
  0xa3   :  { %693 = vmatpush.bf16.msrb.mxu0 %v2750_v2  ;;  %619 = vmatpush.msrb.mxu3 %v2479_v52  ;;  %v654_v17 = vld [vmem:[#allocation1] sm:$0xff] }
  0xa4   :  { %v220_v37 = vadd.f32 %v3007_v50, %v207_v31 }
  0xa5   :  { %665 = vmatpush.bf16.msra.mxu1 %v2812_v15 }
  0xa6   :  { %714 = vmatpush.bf16.msrb.mxu2 %v2797_v10  ;;  %v195_v55 = vpop.f32.mrf.mxu0 }
  0xa7   :  { %v243_v54 = vpop.f32.mrf.mxu3  ;;  %694 = vmatpush.bf16.msrb.mxu0 %v2769_v5 }
  0xa9   :  { %666 = vmatpush.bf16.msra.mxu1 %v2829_v18  ;;  %v208_v58 = vpop.f32.mrf.mxu1 }
  0xaa   :  { %715 = vmatpush.bf16.msrb.mxu2 %v2812_v15 }
  0xac   :  { %v256_v59 = vpop.f32.mrf.mxu2 }
  0xad   :  { %667 = vmatpush.bf16.msra.mxu1 %v2843_v23  ;;  %v257_v30 = vadd.f32 %v256_v59, %v243_v54  ;;  %v2478_v54 = vld [vmem:[%s4118_s3 + $0x50] sm:$0xff] }
  0xae   :  { %716 = vmatpush.bf16.msrb.mxu2 %v2829_v18  ;;  %v269_v61 = vpop.f32.mrf.mxu0  ;;  %620 = vmatpush.msrb.mxu3 %v2478_v54 }
  0xaf   :  { %v245_v60 = vpop.f32.mrf.mxu3  ;;  %v270_v33 = vadd.f32 %v269_v61, %v257_v30 }
  0xb0   :  { %621 = vmatpush.msrb.mxu3 %v2477_v56 }
  0xb1   :  { %668 = vmatpush.bf16.msra.mxu1 %v2857_v25  ;;  %v273_v41 = vmax.f32 %v220_v37, %v270_v33 }
  0xb2   :  { %717 = vmatpush.bf16.msrb.mxu2 %v2843_v23  ;;  %622 = vmatpush.msrb.mxu3 %v2476_v57 }
  0xb4   :  { %v258_v6 = vpop.f32.mrf.mxu2  ;;  %674 = vmatpush.bf16.msra.mxu3 %v2745_v1  ;;  %669 = vmatmul.bf16.vlgmr.msra.gmra.mxu1 %v654_v17  ;;  %v2499_v17 = vld [vmem:[%s4118_s3 + $0xa8] sm:$0xff] }
  0xb5   :  { %743 = vmatpush.bf16.msrb.mxu1 %v2750_v2 }
  0xb6   :  { %718 = vmatpush.bf16.msrb.mxu2 %v2857_v25  ;;  %v271_v13 = vpop.f32.mrf.mxu0 }
  0xb8   :  { %675 = vmatpush.bf16.msra.mxu3 %v2762_v4 }
  0xb9   :  { %744 = vmatpush.bf16.msrb.mxu1 %v2769_v5 }
  0xba   :  { %775 = vmatpush.bf16.msra.mxu2 %v2745_v1 }
  0xbc   :  { %v320_v20 = vpop.f32.mrf.mxu2  ;;  %676 = vmatpush.bf16.msra.mxu3 %v2784_v8 }
  0xbd   :  { %794 = vmatpush.bf16.msra.mxu1 %v2750_v2 }
  0xbe   :  { %776 = vmatpush.bf16.msra.mxu2 %v2762_v4 }
  0xc0   :  { %677 = vmatpush.bf16.msra.mxu3 %v2802_v11 }
  0xc1   :  { %v294_v21 = vpop.f32.mrf.mxu1  ;;  %795 = vmatpush.bf16.msra.mxu1 %v2769_v5 }
  0xc2   :  { %777 = vmatpush.bf16.msra.mxu2 %v2784_v8 }
  0xc4   :  { %v322_v22 = vpop.f32.mrf.mxu2  ;;  %678 = vmatpush.bf16.msra.mxu3 %v2817_v16 }
  0xc5   :  { %v3110_v22 = vld [vmem:[#allocation1 + $0x9] sm:$0xff] }
  0xc6   :  { %778 = vmatpush.bf16.msra.mxu2 %v2802_v11  ;;  %v345_v27 = vpop.f32.mrf.mxu0 }
  0xc7   :  { %v307_v28 = vpop.f32.mrf.mxu3 }
  0xc8   :  { %v308_v32 = vadd.f32 %v307_v28, %v294_v21  ;;  %679 = vmatpush.bf16.msra.mxu3 %v2834_v19  ;;  %v656_v21 = vld [vmem:[#allocation1 + $0x12] sm:$0xff] }
  0xc9   :  { %v296_v29 = vpop.f32.mrf.mxu1 }
  0xca   :  { %779 = vmatpush.bf16.msra.mxu2 %v2817_v16  ;;  %v321_v38 = vadd.f32 %v320_v20, %v308_v32 }
  0xcc   :  { %v324_v45 = vmax.f32 %v273_v41, %v321_v38  ;;  %680 = vmatpush.bf16.msra.mxu3 %v2848_v24 }
  0xce   :  { %780 = vmatpush.bf16.msra.mxu2 %v2834_v19  ;;  %v347_v34 = vpop.f32.mrf.mxu0 }
  0xcf   :  { %v309_v36 = vpop.f32.mrf.mxu3 }
  0xd0   :  { %681 = vmatpush.bf16.msra.mxu3 %v2862_v26 }
  0xd1   :  { %v371_v39 = vpop.f32.mrf.mxu1 }
  0xd2   :  { %781 = vmatpush.bf16.msra.mxu2 %v2848_v24 }
  0xd4   :  { %v358_v40 = vpop.f32.mrf.mxu2 }
  0xd5   :  { %v359_v42 = vadd.f32 %v358_v40, %v345_v27  ;;  %v2488_v27 = vld [vmem:[%s4115_s0 + $0x1b] sm:$0x7] }
  0xd6   :  { %782 = vmatpush.bf16.msra.mxu2 %v2862_v26  ;;  %703 = vst [vmem:[#allocation1] ss:$9 sm:$0xff] %v2488_v27 }
  0xd7   :  { %v372_v46 = vadd.f32 %v371_v39, %v359_v42  ;;  %v2490_v42 = vld [vmem:[%s4115_s0 + $0x1e] sm:$0x7] }
  0xd9   :  { %v375_v48 = vmax.f32 %v324_v45, %v372_v46  ;;  %v373_v51 = vpop.f32.mrf.mxu1 }
  0xdb   :  { %v379_v50 = vadd.f32 %v3070_v47, %v375_v48 }
  0xdc   :  { %v360_v53 = vpop.f32.mrf.mxu2 }
  0xdd   :  { %v380_v55 = vmax.f32 %v379_v50, 0.0  ;;  %v704_v31 = vld [vmem:[#allocation1] sm:$0xff]  ;;  %v706_v32 = vld [vmem:[#allocation1 + $0x12] sm:$0xff]  ;;  %v705_v36 = vld [vmem:[#allocation1 + $0x9] sm:$0xff] }
  0xde   :  { %719 = vmatmul.bf16.vlgmr.msrb.gmra.mxu2 %v704_v31  ;;  %2489 = vmatmul.msk.bf16.vlgmr.msrb.gmra.mxu1 %vm181_vm0, %v706_v32  ;;  %754 = vst [vmem:[#allocation1] ss:$9 sm:$0xff] %v2490_v42 }
  0xdf   :  { %2485 = vmatmul.msk.f32.vlgmr.msra.gmra.mxu0 %vm603_vm1, %v380_v55  ;;  %826 = vmatpush.bf16.msrb.mxu1 %v2745_v1 }
  0xe0   :  { %724 = vmatpush.bf16.msra.mxu0 %v2745_v1 }
  0xe1   :  { %v435_v58 = vpop.f32.mrf.mxu1 }
  0xe3   :  { %827 = vmatpush.bf16.msrb.mxu1 %v2762_v4 }
  0xe4   :  { %725 = vmatpush.bf16.msra.mxu0 %v2762_v4 }
  0xe5   :  { %v757_v55 = vld [vmem:[#allocation1 + $0x12] sm:$0xff] }
  0xe6   :  { %v422_v59 = vpop.f32.mrf.mxu0 }
  0xe7   :  { %v409_v60 = vpop.f32.mrf.mxu3  ;;  %2487 = vmatmul.msk.bf16.vlgmr.msrb.gmra.mxu0 %vm181_vm0, %v656_v21  ;;  %828 = vmatpush.bf16.msrb.mxu1 %v2784_v8 }
  0xe8   :  { %726 = vmatpush.bf16.msra.mxu0 %v2784_v8  ;;  %v423_v38 = vadd.f32 %v422_v59, %v409_v60  ;;  %v756_v60 = vld [vmem:[#allocation1 + $0x9] sm:$0xff] }
  0xe9   :  { %v437_v61 = vpop.f32.mrf.mxu1 }
  0xea   :  { %v436_v43 = vadd.f32 %v435_v58, %v423_v38  ;;  %v755_v61 = vld [vmem:[#allocation1] sm:$0xff] }
  0xeb   :  { %829 = vmatpush.bf16.msrb.mxu1 %v2802_v11  ;;  %v3233_v38 = vld [vmem:[%s4116_s1 + $0x80] sm:$0xff] }
  0xec   :  { %727 = vmatpush.bf16.msra.mxu0 %v2802_v11 }
  0xee   :  { %v424_v62 = vpop.f32.mrf.mxu0  ;;  %2491 = vmatmul.msk.bf16.vlgmr.msra.gmra.mxu1 %vm181_vm0, %v757_v55  ;;  %783 = vmatmul.bf16.vlgmr.msra.gmra.mxu2 %v756_v60 }
  0xef   :  { %v411_v63 = vpop.f32.mrf.mxu3  ;;  %830 = vmatpush.bf16.msrb.mxu1 %v2817_v16  ;;  %v2492_v62 = vld [vmem:[%s4115_s0 + $0x21] sm:$0x7] }
  0xf0   :  { %728 = vmatpush.bf16.msra.mxu0 %v2817_v16  ;;  %805 = vst [vmem:[#allocation1] ss:$9 sm:$0xff] %v2492_v62 }
  0xf1   :  { %v472_v12 = vpop.f32.mrf.mxu1 }
  0xf3   :  { %831 = vmatpush.bf16.msrb.mxu1 %v2834_v19 }
  0xf4   :  { %v459_v6 = vpop.f32.mrf.mxu2  ;;  %729 = vmatpush.bf16.msra.mxu0 %v2834_v19 }
  0xf5   :  { %v473_v37 = vadd.f32 %v472_v12, %v459_v6  ;;  %v2500_v12 = vld [vmem:[%s4118_s3 + $0xb0] sm:$0xff] }
  0xf7   :  { %v485_v13 = vpop.f32.mrf.mxu3  ;;  %832 = vmatpush.bf16.msrb.mxu1 %v2848_v24  ;;  %v806_v63 = vld [vmem:[#allocation1] sm:$0xff]  ;;  %v807_v6 = vld [vmem:[#allocation1 + $0x9] sm:$0xff]  ;;  %v808_v9 = vld [vmem:[#allocation1 + $0x12] sm:$0xff] }
  0xf8   :  { %730 = vmatpush.bf16.msra.mxu0 %v2848_v24  ;;  %v486_v40 = vadd.f32 %v485_v13, %v473_v37  ;;  %v3227_v37 = vld [vmem:[%s4116_s1 + $0x88] sm:$0xff] }
  0xf9   :  { %v474_v20 = vpop.f32.mrf.mxu1 }
  0xfa   :  { %v489_v49 = vmax.f32 %v436_v43, %v486_v40  ;;  %v2498_v20 = vld [vmem:[%s4118_s3 + $0xa0] sm:$0xff]  ;;  %v3242_v43 = vld [vmem:[%s4116_s1 + $0x38] sm:$0xff] }
  0xfb   :  { %833 = vmatpush.bf16.msrb.mxu1 %v2862_v26 }
  0xfc   :  { %v461_v14 = vpop.f32.mrf.mxu2  ;;  %731 = vmatpush.bf16.msra.mxu0 %v2862_v26 }
  0xfe   :  { %834 = vmatmul.bf16.vlgmr.msrb.gmra.mxu1 %v807_v6 }
  0xff   :  { %v487_v28 = vpop.f32.mrf.mxu3  ;;  %732 = vmatmul.bf16.vlgmr.msra.gmra.mxu0 %v705_v36  ;;  %949 = vmatpush.bf16.msra.mxu1 %v2740_v0  ;;  %v2494_v36 = vld [vmem:[%s4118_s3 + $0x80] sm:$0xff] }
 0x100   :  { %813 = vmatpush.bf16.msrb.mxu0 %v2740_v0  ;;  %v2497_v28 = vld [vmem:[%s4118_s3 + $0x98] sm:$0xff] }
 0x103   :  { %950 = vmatpush.bf16.msra.mxu1 %v2757_v3 }
 0x104   :  { %v536_v29 = vpop.f32.mrf.mxu2  ;;  %814 = vmatpush.bf16.msrb.mxu0 %v2757_v3 }
 0x106   :  { %v510_v30 = vpop.f32.mrf.mxu0 }
 0x107   :  { %951 = vmatpush.bf16.msra.mxu1 %v2779_v7 }
 0x108   :  { %815 = vmatpush.bf16.msrb.mxu0 %v2779_v7 }
 0x10b   :  { %952 = vmatpush.bf16.msra.mxu1 %v2797_v10 }
 0x10c   :  { %v538_v33 = vpop.f32.mrf.mxu2  ;;  %816 = vmatpush.bf16.msrb.mxu0 %v2797_v10 }
 0x10e   :  { %v523_v34 = vpop.f32.mrf.mxu3  ;;  %v512_v35 = vpop.f32.mrf.mxu0 }
 0x10f   :  { %v524_v39 = vadd.f32 %v523_v34, %v510_v30  ;;  %953 = vmatpush.bf16.msra.mxu1 %v2812_v15  ;;  %v2496_v30 = vld [vmem:[%s4118_s3 + $0x90] sm:$0xff]  ;;  %v2495_v35 = vld [vmem:[%s4118_s3 + $0x88] sm:$0xff] }
 0x110   :  { %817 = vmatpush.bf16.msrb.mxu0 %v2812_v15 }
 0x111   :  { %v561_v41 = vpop.f32.mrf.mxu1  ;;  %v537_v44 = vadd.f32 %v536_v29, %v524_v39  ;;  %v2503_v39 = vld [vmem:[%s4115_s0 + $0x24] sm:$0x7] }
 0x112   :  { %891 = vst [vmem:[#allocation1] ss:$9 sm:$0xff] %v2503_v39  ;;  %v2518_v39 = vld [vmem:[%s4118_s3 + $0xf8] sm:$0xff] }
 0x113   :  { %v540_v51 = vmax.f32 %v489_v49, %v537_v44  ;;  %954 = vmatpush.bf16.msra.mxu1 %v2829_v18 }
 0x114   :  { %818 = vmatpush.bf16.msrb.mxu0 %v2829_v18 }
 0x116   :  { %v525_v45 = vpop.f32.mrf.mxu3 }
 0x117   :  { %v587_v48 = vpop.f32.mrf.mxu0  ;;  %955 = vmatpush.bf16.msra.mxu1 %v2843_v23  ;;  %v3248_v45 = vld [vmem:[%s4116_s1 + $0x30] sm:$0xff] }
 0x118   :  { %819 = vmatpush.bf16.msrb.mxu0 %v2843_v23 }
 0x119   :  { %v563_v54 = vpop.f32.mrf.mxu1  ;;  %v893_v49 = vld [vmem:[#allocation1 + $0x9] sm:$0xff] }
 0x11b   :  { %956 = vmatpush.bf16.msra.mxu1 %v2857_v25 }
 0x11c   :  { %v574_v46 = vpop.f32.mrf.mxu2  ;;  %820 = vmatpush.bf16.msrb.mxu0 %v2857_v25 }
 0x11d   :  { %v575_v50 = vadd.f32 %v574_v46, %v561_v41  ;;  %v892_v41 = vld [vmem:[#allocation1] sm:$0xff] }
 0x11f   :  { %v588_v52 = vadd.f32 %v587_v48, %v575_v50  ;;  %v589_v58 = vpop.f32.mrf.mxu0  ;;  %821 = vmatmul.bf16.vlgmr.msrb.gmra.mxu0 %v806_v63  ;;  %1013 = vmatpush.bf16.msrb.mxu1 %v2745_v1  ;;  %v3279_v63 = vld [vmem:[%s4116_s1 + $0x78] sm:$0xff] }
 0x120   :  { %912 = vmatpush.bf16.msra.mxu0 %v2745_v1 }
 0x121   :  { %v591_v53 = vmax.f32 %v540_v51, %v588_v52  ;;  %v894_v51 = vld [vmem:[#allocation1 + $0x12] sm:$0xff]  ;;  %v2505_v52 = vld [vmem:[%s4115_s0 + $0x27] sm:$0x7] }
 0x122   :  { %941 = vst [vmem:[#allocation1] ss:$9 sm:$0xff] %v2505_v52  ;;  %v2513_v52 = vld [vmem:[%s4118_s3 + $0xd0] sm:$0xff] }
 0x123   :  { %v592_v56 = vadd.f32 %v3070_v47, %v591_v53  ;;  %1014 = vmatpush.bf16.msrb.mxu1 %v2762_v4  ;;  %v3257_v53 = vld [vmem:[%s4116_s1 + $0x28] sm:$0xff] }
 0x124   :  { %v576_v57 = vpop.f32.mrf.mxu2  ;;  %913 = vmatpush.bf16.msra.mxu0 %v2762_v4 }
 0x125   :  { %v593_v59 = vmax.f32 %v592_v56, 0.0  ;;  %v3264_v57 = vld [vmem:[%s4116_s1 + $0x20] sm:$0xff] }
 0x127   :  { %2484 = vmatmul.msk.f32.vlgmr.msrb.gmra.mxu3 %vm603_vm1, %v593_v59  ;;  %1015 = vmatpush.bf16.msrb.mxu1 %v2784_v8 }
 0x128   :  { %762 = vmatpush.bf16.msrb.mxu3 %v2740_v0  ;;  %914 = vmatpush.bf16.msra.mxu0 %v2784_v8 }
 0x129   :  { %v944_v62 = vld [vmem:[#allocation1 + $0x12] sm:$0xff]  ;;  %v942_v6 = vld [vmem:[#allocation1] sm:$0xff] }
 0x12a   :  { %957 = vmatmul.bf16.vlgmr.msra.gmra.mxu1 %v942_v6 }
 0x12b   :  { %1016 = vmatpush.bf16.msrb.mxu1 %v2802_v11 }
 0x12c   :  { %763 = vmatpush.bf16.msrb.mxu3 %v2757_v3  ;;  %915 = vmatpush.bf16.msra.mxu0 %v2802_v11 }
 0x12f   :  { %682 = vmatmul.bf16.vlgmr.msra.gmra.mxu3 %v3110_v22  ;;  %1017 = vmatpush.bf16.msrb.mxu1 %v2817_v16 }
 0x130   :  { %764 = vmatpush.bf16.msrb.mxu3 %v2779_v7  ;;  %916 = vmatpush.bf16.msra.mxu0 %v2817_v16 }
 0x131   :  { %v670_v1 = vpop.f32.mrf.mxu1 }
 0x133   :  { %1018 = vmatpush.bf16.msrb.mxu1 %v2834_v19 }
 0x134   :  { %765 = vmatpush.bf16.msrb.mxu3 %v2797_v10  ;;  %917 = vmatpush.bf16.msra.mxu0 %v2834_v19 }
 0x137   :  { %1019 = vmatpush.bf16.msrb.mxu1 %v2848_v24 }
 0x138   :  { %766 = vmatpush.bf16.msrb.mxu3 %v2812_v15  ;;  %918 = vmatpush.bf16.msra.mxu0 %v2848_v24 }
 0x139   :  { %v672_v4 = vpop.f32.mrf.mxu1 }
 0x13a   :  { %v2507_v4 = vld [vmem:[%s4115_s0 + $0x2a] sm:$0x7] }
 0x13b   :  { %1020 = vmatpush.bf16.msrb.mxu1 %v2862_v26 }
 0x13c   :  { %767 = vmatpush.bf16.msrb.mxu3 %v2829_v18  ;;  %919 = vmatpush.bf16.msra.mxu0 %v2862_v26 }
 0x13f   :  { %920 = vmatmul.bf16.vlgmr.msra.gmra.mxu0 %v893_v49  ;;  %1113 = vmatpush.msra.mxu1 %v2518_v39 }
 0x140   :  { %768 = vmatpush.bf16.msrb.mxu3 %v2843_v23  ;;  %1000 = vmatpush.bf16.msrb.mxu0 %v2740_v0 }
 0x144   :  { %769 = vmatpush.bf16.msrb.mxu3 %v2857_v25  ;;  %1001 = vmatpush.bf16.msrb.mxu0 %v2757_v3 }
 0x147   :  { %770 = vmatmul.bf16.vlgmr.msrb.gmra.mxu3 %v755_v61  ;;  %v3272_v61 = vld [vmem:[%s4116_s1 + $0x18] sm:$0xff] }
 0x148   :  { %845 = vmatpush.bf16.msra.mxu3 %v2750_v2  ;;  %1002 = vmatpush.bf16.msrb.mxu0 %v2779_v7 }
 0x14c   :  { %846 = vmatpush.bf16.msra.mxu3 %v2769_v5  ;;  %1003 = vmatpush.bf16.msrb.mxu0 %v2797_v10 }
 0x150   :  { %899 = vmatpush.bf16.msrb.mxu3 %v2740_v0  ;;  %1004 = vmatpush.bf16.msrb.mxu0 %v2812_v15 }
 0x154   :  { %900 = vmatpush.bf16.msrb.mxu3 %v2757_v3  ;;  %1005 = vmatpush.bf16.msrb.mxu0 %v2829_v18 }
 0x157   :  { %2493 = vmatmul.msk.bf16.vlgmr.msra.gmra.mxu3 %vm181_vm0, %v808_v9  ;;  %v3286_v9 = vld [vmem:[%s4116_s1 + $0x10] sm:$0xff] }
 0x158   :  { %901 = vmatpush.bf16.msrb.mxu3 %v2779_v7  ;;  %1006 = vmatpush.bf16.msrb.mxu0 %v2843_v23 }
 0x15b   :  { %v746_v8 = vpop.f32.mrf.mxu1 }
 0x15c   :  { %902 = vmatpush.bf16.msrb.mxu3 %v2797_v10  ;;  %1007 = vmatpush.bf16.msrb.mxu0 %v2857_v25  ;;  %v3196_v0 = vpop.f32.mrf.mxu0 }
 0x160   :  { %903 = vmatpush.bf16.msrb.mxu3 %v2812_v15  ;;  %1083 = vmatpush.bf16.msra.mxu0 %v3227_v37 }
 0x161   :  { %v720_v10 = vpop.f32.mrf.mxu2 }
 0x163   :  { %v748_v16 = vpop.f32.mrf.mxu1 }
 0x164   :  { %904 = vmatpush.bf16.msrb.mxu3 %v2829_v18  ;;  %v696_v3 = vpop.f32.mrf.mxu0  ;;  %1084 = vmatpush.bf16.msra.mxu0 %v3233_v38  ;;  %v3328_v16 = vld [vmem:[%s4116_s1 + $0x58] sm:$0xff] }
 0x168   :  { %905 = vmatpush.bf16.msrb.mxu3 %v2843_v23 }
 0x169   :  { %v722_v18 = vpop.f32.mrf.mxu2 }
 0x16b   :  { %v797_v23 = vpop.f32.mrf.mxu1 }
 0x16c   :  { %906 = vmatpush.bf16.msrb.mxu3 %v2857_v25  ;;  %v698_v7 = vpop.f32.mrf.mxu0 }
 0x16d   :  { %v3301_v7 = vld [vmem:[%s4116_s1 + $0x8] sm:$0xff] }
 0x16f   :  { %907 = vmatmul.bf16.vlgmr.msrb.gmra.mxu3 %v892_v41 }
 0x170   :  { %981 = vmatpush.bf16.msra.mxu3 %v2750_v2 }
 0x171   :  { %v784_v25 = vpop.f32.mrf.mxu2 }
 0x173   :  { %v799_v24 = vpop.f32.mrf.mxu1 }
 0x174   :  { %982 = vmatpush.bf16.msra.mxu3 %v2769_v5  ;;  %v2501_v5 = vld [vmem:[%s4118_s3 + $0xb8] sm:$0xff]  ;;  %v3339_v24 = vld [vmem:[%s4116_s1 + $0x50] sm:$0xff] }
 0x175   :  { %875 = vmatpush.msrb.mxu2 %v2501_v5 }
 0x177   :  { %876 = vmatpush.msrb.mxu2 %v2500_v12 }
 0x178   :  { %1051 = vmatpush.bf16.msrb.mxu3 %v3242_v43 }
 0x179   :  { %v786_v21 = vpop.f32.mrf.mxu2  ;;  %877 = vmatpush.msrb.mxu2 %v2499_v17 }
 0x17b   :  { %v835_v13 = vpop.f32.mrf.mxu1  ;;  %878 = vmatpush.msrb.mxu2 %v2498_v20 }
 0x17c   :  { %v733_v11 = vpop.f32.mrf.mxu0  ;;  %1052 = vmatpush.bf16.msrb.mxu3 %v3248_v45 }
 0x17d   :  { %v734_v15 = vadd.f32 %v733_v11, %v720_v10  ;;  %879 = vmatpush.msrb.mxu2 %v2497_v28  ;;  %v3314_v10 = vld [vmem:[%s4116_s1] sm:$0xff] }
 0x17e   :  { %v3321_v11 = vld [vmem:[%s4116_s1 + $0x60] sm:$0xff] }
 0x17f   :  { %v747_v27 = vadd.f32 %v746_v8, %v734_v15  ;;  %880 = vmatpush.msrb.mxu2 %v2496_v30  ;;  %2506 = vmatmul.msk.bf16.vlgmr.msra.gmra.mxu3 %vm181_vm0, %v944_v62  ;;  %v3308_v8 = vld [vmem:[%s4116_s1 + $0x68] sm:$0xff] }
 0x180   :  { %1053 = vmatpush.bf16.msrb.mxu3 %v3257_v53 }
 0x181   :  { %881 = vmatpush.msrb.mxu2 %v2495_v35 }
 0x183   :  { %v837_v33 = vpop.f32.mrf.mxu1  ;;  %882 = vmatpush.msrb.mxu2 %v2494_v36 }
 0x184   :  { %v735_v19 = vpop.f32.mrf.mxu0  ;;  %1054 = vmatpush.bf16.msrb.mxu3 %v3264_v57 }
 0x185   :  { %931 = vmatpush.bf16.msra.mxu2 %v3227_v37 }
 0x188   :  { %1055 = vmatpush.bf16.msrb.mxu3 %v3272_v61 }
 0x189   :  { %932 = vmatpush.bf16.msra.mxu2 %v3233_v38 }
 0x18c   :  { %1056 = vmatpush.bf16.msrb.mxu3 %v3286_v9 }
 0x190   :  { %1057 = vmatpush.bf16.msrb.mxu3 %v3301_v7 }
 0x194   :  { %1058 = vmatpush.bf16.msrb.mxu3 %v3314_v10 }
 0x198   :  { %1137 = vmatpush.bf16.msra.mxu3 %v3242_v43 }
 0x19c   :  { %v822_v26 = vpop.f32.mrf.mxu0  ;;  %1138 = vmatpush.bf16.msra.mxu3 %v3248_v45 }
 0x19d   :  { %v836_v48 = vadd.f32 %v835_v13, %v822_v26  ;;  %v3355_v26 = vld [vmem:[%s4116_s1 + $0x40] sm:$0xff] }
 0x1a0   :  { %1139 = vmatpush.bf16.msra.mxu3 %v3257_v53 }
 0x1a4   :  { %v824_v32 = vpop.f32.mrf.mxu0  ;;  %1140 = vmatpush.bf16.msra.mxu3 %v3264_v57 }
 0x1a8   :  { %1141 = vmatpush.bf16.msra.mxu3 %v3272_v61 }
 0x1aa   :  { %v3198_v2 = vpop.f32.mrf.mxu3 }
 0x1ac   :  { %1142 = vmatpush.bf16.msra.mxu3 %v3286_v9 }
 0x1b0   :  { %1143 = vmatpush.bf16.msra.mxu3 %v3301_v7 }
 0x1b2   :  { %v683_v14 = vpop.f32.mrf.mxu3 }
 0x1b3   :  { %v684_v22 = vadd.f32 %v683_v14, %v670_v1  ;;  %v3292_v1 = vld [vmem:[%s4116_s1 + $0x70] sm:$0xff] }
 0x1b4   :  { %1144 = vmatpush.bf16.msra.mxu3 %v3314_v10 }
 0x1b5   :  { %v697_v29 = vadd.f32 %v696_v3, %v684_v22  ;;  %v943_v3 = vld [vmem:[#allocation1 + $0x9] sm:$0xff]  ;;  %v958_v22 = vpop.f32.mrf.mxu1 }
 0x1b6   :  { %992 = vst [vmem:[#allocation1] ss:$9 sm:$0xff] %v2507_v4 }
 0x1b7   :  { %v750_v31 = vmax.f32 %v697_v29, %v747_v27 }
 0x1ba   :  { %v685_v34 = vpop.f32.mrf.mxu3 }
 0x1bc   :  { %v921_v17 = vpop.f32.mrf.mxu0 }
 0x1bd   :  { %v993_v15 = vld [vmem:[#allocation1] sm:$0xff]  ;;  %v995_v18 = vld [vmem:[#allocation1 + $0x12] sm:$0xff]  ;;  %v994_v19 = vld [vmem:[#allocation1 + $0x9] sm:$0xff]  ;;  %v960_v29 = vpop.f32.mrf.mxu1 }
 0x1be   :  { %1008 = vmatmul.bf16.vlgmr.msrb.gmra.mxu0 %v993_v15  ;;  %1021 = vmatmul.bf16.vlgmr.msrb.gmra.mxu1 %v994_v19 }
 0x1bf   :  { %1150 = vmatpush.bf16.msrb.mxu0 %v3279_v63 }
 0x1c3   :  { %1151 = vmatpush.bf16.msrb.mxu0 %v3292_v1 }
 0x1c4   :  { %v923_v21 = vpop.f32.mrf.mxu0 }
 0x1c7   :  { %1152 = vmatpush.bf16.msrb.mxu0 %v3308_v8 }
 0x1ca   :  { %v771_v40 = vpop.f32.mrf.mxu3 }
 0x1cb   :  { %v785_v44 = vadd.f32 %v784_v25, %v771_v40  ;;  %v3347_v25 = vld [vmem:[%s4116_s1 + $0x48] sm:$0xff]  ;;  %1153 = vmatpush.bf16.msrb.mxu0 %v3321_v11  ;;  %v2517_v40 = vld [vmem:[%s4118_s3 + $0xf0] sm:$0xff] }
 0x1cc   :  { %1114 = vmatpush.msra.mxu1 %v2517_v40 }
 0x1cd   :  { %v798_v46 = vadd.f32 %v797_v23, %v785_v44  ;;  %v2509_v23 = vld [vmem:[%s4115_s0 + $0x2d] sm:$0x7] }
 0x1ce   :  { %1043 = vst [vmem:[#allocation1] ss:$9 sm:$0xff] %v2509_v23 }
 0x1cf   :  { %v801_v54 = vmax.f32 %v750_v31, %v798_v46  ;;  %1154 = vmatpush.bf16.msrb.mxu0 %v3328_v16  ;;  %v2515_v46 = vld [vmem:[%s4118_s3 + $0xe0] sm:$0xff] }
 0x1d2   :  { %v773_v42 = vpop.f32.mrf.mxu3 }
 0x1d3   :  { %1155 = vmatpush.bf16.msrb.mxu0 %v3339_v24  ;;  %v2516_v42 = vld [vmem:[%s4118_s3 + $0xe8] sm:$0xff] }
 0x1d4   :  { %1115 = vmatpush.msra.mxu1 %v2516_v42 }
 0x1d5   :  { %v1044_v5 = vld [vmem:[#allocation1] sm:$0xff]  ;;  %v1046_v12 = vld [vmem:[#allocation1 + $0x12] sm:$0xff]  ;;  %v1045_v13 = vld [vmem:[#allocation1 + $0x9] sm:$0xff] }
 0x1d6   :  { %1059 = vmatmul.bf16.vlgmr.msrb.gmra.mxu3 %v1044_v5  ;;  %2510 = vmatmul.msk.bf16.vlgmr.msra.gmra.mxu0 %vm181_vm0, %v1046_v12 }
 0x1d7   :  { %1219 = vmatpush.bf16.msrb.mxu3 %v3227_v37  ;;  %1156 = vmatpush.bf16.msrb.mxu0 %v3347_v25 }
 0x1d8   :  { %1116 = vmatpush.msra.mxu1 %v2515_v46 }
 0x1da   :  { %v848_v50 = vpop.f32.mrf.mxu3 }
 0x1db   :  { %v849_v55 = vadd.f32 %v848_v50, %v836_v48  ;;  %1220 = vmatpush.bf16.msrb.mxu3 %v3233_v38  ;;  %1157 = vmatpush.bf16.msrb.mxu0 %v3355_v26  ;;  %v2514_v48 = vld [vmem:[%s4118_s3 + $0xd8] sm:$0xff]  ;;  %v2520_v50 = vld [vmem:[%s4115_s0 + $0x30] sm:$0x7] }
 0x1dc   :  { %1117 = vmatpush.msra.mxu1 %v2514_v48  ;;  %1129 = vst [vmem:[#allocation1] ss:$9 sm:$0xff] %v2520_v50 }
 0x1dd   :  { %v852_v56 = vmax.f32 %v801_v54, %v849_v55  ;;  %v2512_v55 = vld [vmem:[%s4118_s3 + $0xc8] sm:$0xff] }
 0x1de   :  { %1118 = vmatpush.msra.mxu1 %v2513_v52 }
 0x1df   :  { %v853_v58 = vadd.f32 %v3070_v47, %v852_v56  ;;  %1238 = vmatpush.bf16.msra.mxu0 %v3242_v43  ;;  %v2511_v56 = vld [vmem:[%s4118_s3 + $0xc0] sm:$0xff] }
 0x1e0   :  { %1119 = vmatpush.msra.mxu1 %v2512_v55 }
 0x1e1   :  { %v854_v59 = vmax.f32 %v853_v58, 0.0 }
 0x1e2   :  { %v850_v60 = vpop.f32.mrf.mxu3  ;;  %1120 = vmatpush.msra.mxu1 %v2511_v56 }
 0x1e3   :  { %2502 = vmatmul.msk.f32.vlgmr.msrb.gmra.mxu2 %vm603_vm1, %v854_v59  ;;  %1239 = vmatpush.bf16.msra.mxu0 %v3248_v45  ;;  %v1130_v59 = vld [vmem:[#allocation1] sm:$0xff]  ;;  %v1131_v60 = vld [vmem:[#allocation1 + $0x9] sm:$0xff]  ;;  %v1132_v62 = vld [vmem:[#allocation1 + $0x12] sm:$0xff] }
 0x1e4   :  { %962 = vmatpush.bf16.msrb.mxu2 %v3279_v63  ;;  %1169 = vmatpush.bf16.msrb.mxu1 %v3227_v37 }
 0x1e6   :  { %1145 = vmatmul.bf16.vlgmr.msra.gmra.mxu3 %v1130_v59  ;;  %1158 = vmatmul.bf16.vlgmr.msrb.gmra.mxu0 %v1131_v60 }
 0x1e7   :  { %1240 = vmatpush.bf16.msra.mxu0 %v3257_v53  ;;  %1270 = vmatpush.bf16.msra.mxu3 %v3227_v37 }
 0x1e8   :  { %963 = vmatpush.bf16.msrb.mxu2 %v3292_v1  ;;  %1170 = vmatpush.bf16.msrb.mxu1 %v3233_v38 }
 0x1eb   :  { %2504 = vmatmul.msk.bf16.vlgmr.msra.gmra.mxu2 %vm181_vm0, %v894_v51  ;;  %1241 = vmatpush.bf16.msra.mxu0 %v3264_v57 }
 0x1ec   :  { %964 = vmatpush.bf16.msrb.mxu2 %v3308_v8  ;;  %1271 = vmatpush.bf16.msra.mxu3 %v3233_v38 }
 0x1ef   :  { %1242 = vmatpush.bf16.msra.mxu0 %v3272_v61 }
 0x1f0   :  { %965 = vmatpush.bf16.msrb.mxu2 %v3321_v11 }
 0x1f2   :  { %v3401_v14 = vpop.f32.mrf.mxu3 }
 0x1f3   :  { %1243 = vmatpush.bf16.msra.mxu0 %v3286_v9  ;;  %v922_v23 = vadd.f32 %v921_v17, %v3401_v14 }
 0x1f4   :  { %966 = vmatpush.bf16.msrb.mxu2 %v3328_v16 }
 0x1f7   :  { %1244 = vmatpush.bf16.msra.mxu0 %v3301_v7 }
 0x1f8   :  { %967 = vmatpush.bf16.msrb.mxu2 %v3339_v24 }
 0x1fa   :  { %v910_v20 = vpop.f32.mrf.mxu3 }
 0x1fb   :  { %1245 = vmatpush.bf16.msra.mxu0 %v3314_v10  ;;  %v2524_v20 = vld [vmem:[%s4115_s0 + $0x36] sm:$0x7] }
 0x1fc   :  { %968 = vmatpush.bf16.msrb.mxu2 %v3347_v25 }
 0x1ff   :  { %1321 = vmatpush.bf16.msrb.mxu0 %v3227_v37 }
 0x200   :  { %969 = vmatpush.bf16.msrb.mxu2 %v3355_v26 }
 0x202   :  { %v984_v28 = vpop.f32.mrf.mxu3 }
 0x203   :  { %970 = vmatmul.bf16.vlgmr.msrb.gmra.mxu2 %v943_v3  ;;  %v2522_v3 = vld [vmem:[%s4115_s0 + $0x33] sm:$0x7]  ;;  %1322 = vmatpush.bf16.msrb.mxu0 %v3233_v38 }
 0x204   :  { %1032 = vmatpush.bf16.msra.mxu2 %v3227_v37  ;;  %1179 = vst [vmem:[#allocation1] ss:$9 sm:$0xff] %v2522_v3 }
 0x208   :  { %1033 = vmatpush.bf16.msra.mxu2 %v3233_v38 }
 0x20a   :  { %v986_v31 = vpop.f32.mrf.mxu3 }
 0x20b   :  { %v1180_v15 = vld [vmem:[#allocation1] sm:$0xff]  ;;  %v1181_v12 = vld [vmem:[#allocation1 + $0x9] sm:$0xff] }
 0x20c   :  { %1064 = vmatpush.bf16.msrb.mxu2 %v3279_v63 }
 0x210   :  { %1065 = vmatpush.bf16.msrb.mxu2 %v3292_v1 }
 0x213   :  { %2508 = vmatmul.msk.bf16.vlgmr.msra.gmra.mxu2 %vm181_vm0, %v995_v18  ;;  %v1182_v18 = vld [vmem:[#allocation1 + $0x12] sm:$0xff] }
 0x214   :  { %1066 = vmatpush.bf16.msrb.mxu2 %v3308_v8  ;;  %2523 = vmatmul.msk.bf16.vlgmr.msrb.gmra.mxu3 %vm181_vm0, %v1182_v18  ;;  %1230 = vst [vmem:[#allocation1] ss:$9 sm:$0xff] %v2524_v20 }
 0x215   :  { %1302 = vmatpush.bf16.msrb.mxu3 %v3279_v63 }
 0x218   :  { %1067 = vmatpush.bf16.msrb.mxu2 %v3321_v11 }
 0x219   :  { %1303 = vmatpush.bf16.msrb.mxu3 %v3292_v1 }
 0x21b   :  { %v1232_v17 = vld [vmem:[#allocation1 + $0x9] sm:$0xff] }
 0x21c   :  { %1068 = vmatpush.bf16.msrb.mxu2 %v3328_v16 }
 0x21d   :  { %1304 = vmatpush.bf16.msrb.mxu3 %v3308_v8 }
 0x220   :  { %1069 = vmatpush.bf16.msrb.mxu2 %v3339_v24 }
 0x221   :  { %1305 = vmatpush.bf16.msrb.mxu3 %v3321_v11 }
 0x224   :  { %1070 = vmatpush.bf16.msrb.mxu2 %v3347_v25 }
 0x225   :  { %1306 = vmatpush.bf16.msrb.mxu3 %v3328_v16 }
 0x228   :  { %1071 = vmatpush.bf16.msrb.mxu2 %v3355_v26 }
 0x229   :  { %1307 = vmatpush.bf16.msrb.mxu3 %v3339_v24 }
 0x22b   :  { %1072 = vmatmul.bf16.vlgmr.msrb.gmra.mxu2 %v1045_v13 }
 0x22c   :  { %1187 = vmatpush.bf16.msra.mxu2 %v3242_v43 }
 0x22d   :  { %1308 = vmatpush.bf16.msrb.mxu3 %v3347_v25 }
 0x230   :  { %1188 = vmatpush.bf16.msra.mxu2 %v3248_v45 }
 0x231   :  { %1309 = vmatpush.bf16.msrb.mxu3 %v3355_v26 }
 0x234   :  { %1189 = vmatpush.bf16.msra.mxu2 %v3257_v53 }
 0x238   :  { %1190 = vmatpush.bf16.msra.mxu2 %v3264_v57 }
 0x23b   :  { %v1009_v32 = vpop.f32.mrf.mxu0  ;;  %v1022_v33 = vpop.f32.mrf.mxu1 }
 0x23c   :  { %1191 = vmatpush.bf16.msra.mxu2 %v3272_v61  ;;  %v1023_v5 = vadd.f32 %v1022_v33, %v1009_v32  ;;  %v1233_v33 = vld [vmem:[#allocation1 + $0x12] sm:$0xff] }
 0x23d   :  { %2525 = vmatmul.msk.bf16.vlgmr.msra.gmra.mxu3 %vm181_vm0, %v1233_v33 }
 0x23e   :  { %1425 = vmatpush.bf16.msra.mxu3 %v3242_v43 }
 0x240   :  { %1192 = vmatpush.bf16.msra.mxu2 %v3286_v9 }
 0x242   :  { %1426 = vmatpush.bf16.msra.mxu3 %v3248_v45 }
 0x243   :  { %v1011_v35 = vpop.f32.mrf.mxu0  ;;  %v1024_v36 = vpop.f32.mrf.mxu1 }
 0x244   :  { %1193 = vmatpush.bf16.msra.mxu2 %v3301_v7 }
 0x246   :  { %1427 = vmatpush.bf16.msra.mxu3 %v3257_v53 }
 0x248   :  { %1194 = vmatpush.bf16.msra.mxu2 %v3314_v10 }
 0x24a   :  { %1428 = vmatpush.bf16.msra.mxu3 %v3264_v57 }
 0x24b   :  { %1195 = vmatmul.bf16.vlgmr.msra.gmra.mxu2 %v1180_v15 }
 0x24c   :  { %1251 = vmatpush.bf16.msrb.mxu2 %v3279_v63 }
 0x24e   :  { %1429 = vmatpush.bf16.msra.mxu3 %v3272_v61 }
 0x250   :  { %1252 = vmatpush.bf16.msrb.mxu2 %v3292_v1 }
 0x252   :  { %1430 = vmatpush.bf16.msra.mxu3 %v3286_v9 }
 0x253   :  { %v1086_v44 = vpop.f32.mrf.mxu0 }
 0x254   :  { %1253 = vmatpush.bf16.msrb.mxu2 %v3308_v8 }
 0x256   :  { %1431 = vmatpush.bf16.msra.mxu3 %v3301_v7 }
 0x258   :  { %1254 = vmatpush.bf16.msrb.mxu2 %v3321_v11 }
 0x259   :  { %v1060_v41 = vpop.f32.mrf.mxu3 }
 0x25a   :  { %1432 = vmatpush.bf16.msra.mxu3 %v3314_v10 }
 0x25b   :  { %v1088_v54 = vpop.f32.mrf.mxu0 }
 0x25c   :  { %1255 = vmatpush.bf16.msrb.mxu2 %v3328_v16 }
 0x260   :  { %1256 = vmatpush.bf16.msrb.mxu2 %v3339_v24 }
 0x261   :  { %v1062_v51 = vpop.f32.mrf.mxu3 }
 0x264   :  { %1257 = vmatpush.bf16.msrb.mxu2 %v3347_v25 }
 0x266   :  { %v3406_v27 = vpop.f32.mrf.mxu2 }
 0x268   :  { %1258 = vmatpush.bf16.msrb.mxu2 %v3355_v26 }
 0x269   :  { %v1146_v46 = vpop.f32.mrf.mxu3 }
 0x26b   :  { %1259 = vmatmul.bf16.vlgmr.msrb.gmra.mxu2 %v1232_v17 }
 0x26e   :  { %v934_v30 = vpop.f32.mrf.mxu2 }
 0x26f   :  { %v935_v21 = vadd.f32 %v934_v30, %v922_v23  ;;  %v1231_v30 = vld [vmem:[#allocation1] sm:$0xff]  ;;  %v2531_v23 = vld [vmem:[%s4118_s3 + $0x118] sm:$0xff] }
 0x270   :  { %1246 = vmatmul.bf16.vlgmr.msra.gmra.mxu0 %v1231_v30 }
 0x271   :  { %1375 = vmatpush.bf16.msra.mxu0 %v3242_v43 }
 0x275   :  { %1376 = vmatpush.bf16.msra.mxu0 %v3248_v45 }
 0x276   :  { %v936_v34 = vpop.f32.mrf.mxu2 }
 0x279   :  { %1377 = vmatpush.bf16.msra.mxu0 %v3257_v53 }
 0x27d   :  { %1378 = vmatpush.bf16.msra.mxu0 %v3264_v57 }
 0x281   :  { %1379 = vmatpush.bf16.msra.mxu0 %v3272_v61 }
 0x285   :  { %1380 = vmatpush.bf16.msra.mxu0 %v3286_v9 }
 0x286   :  { %v971_v49 = vpop.f32.mrf.mxu2 }
 0x287   :  { %v972_v19 = vadd.f32 %v971_v49, %v958_v22  ;;  %v1148_v49 = vpop.f32.mrf.mxu3 }
 0x289   :  { %v985_v13 = vadd.f32 %v984_v28, %v972_v19  ;;  %1381 = vmatpush.bf16.msra.mxu0 %v3301_v7  ;;  %v2532_v19 = vld [vmem:[%s4118_s3 + $0x120] sm:$0xff] }
 0x28b   :  { %v988_v22 = vmax.f32 %v935_v21, %v985_v13  ;;  %v2530_v21 = vld [vmem:[%s4118_s3 + $0x110] sm:$0xff] }
 0x28d   :  { %1382 = vmatpush.bf16.msra.mxu0 %v3314_v10 }
 0x28e   :  { %v973_v58 = vpop.f32.mrf.mxu2 }
 0x296   :  { %v1035_v6 = vpop.f32.mrf.mxu2 }
 0x297   :  { %v1036_v29 = vadd.f32 %v1035_v6, %v1023_v5  ;;  %v1222_v51 = vpop.f32.mrf.mxu3  ;;  %v2534_v6 = vld [vmem:[%s4118_s3 + $0x130] sm:$0xff] }
 0x299   :  { %v1039_v35 = vmax.f32 %v988_v22, %v1036_v29 }
 0x29e   :  { %v1037_v4 = vpop.f32.mrf.mxu2 }
 0x29f   :  { %v1224_v54 = vpop.f32.mrf.mxu3  ;;  %v2533_v4 = vld [vmem:[%s4118_s3 + $0x128] sm:$0xff] }
 0x2ae   :  { %v1073_v31 = vpop.f32.mrf.mxu2 }
 0x2af   :  { %v1074_v34 = vadd.f32 %v1073_v31, %v1060_v41  ;;  %v2529_v31 = vld [vmem:[%s4118_s3 + $0x108] sm:$0xff] }
 0x2b1   :  { %v1087_v36 = vadd.f32 %v1086_v44, %v1074_v34  ;;  %v1159_v44 = vpop.f32.mrf.mxu0  ;;  %v2528_v34 = vld [vmem:[%s4118_s3 + $0x100] sm:$0xff] }
 0x2b3   :  { %v1090_v14 = vmax.f32 %v1039_v35, %v1087_v36  ;;  %v2537_v36 = vld [vmem:[%s4115_s0 + $0x3c] sm:$0x7] }
 0x2b5   :  { %v1091_v28 = vadd.f32 %v3070_v47, %v1090_v14  ;;  %v2526_v47 = vld [vmem:[%s4115_s0 + $0x39] sm:$0x7] }
 0x2b6   :  { %v1075_v32 = vpop.f32.mrf.mxu2  ;;  %1281 = vst [vmem:[#allocation1] ss:$9 sm:$0xff] %v2526_v47 }
 0x2b7   :  { %v1092_v39 = vmax.f32 %v1091_v28, 0.0  ;;  %v2539_v32 = vld [vmem:[%s4115_s0 + $0x3f] sm:$0x7] }
 0x2b9   :  { %2519 = vmatmul.msk.f32.vlgmr.msra.gmra.mxu1 %vm603_vm1, %v1092_v39  ;;  %v1161_v48 = vpop.f32.mrf.mxu0  ;;  %v1160_v39 = vadd.f32 %v1159_v44, %v1146_v46  ;;  %v2541_v44 = vld [vmem:[%s4115_s0 + $0x42] sm:$0x7] }
 0x2ba   :  { %1200 = vmatpush.bf16.msra.mxu1 %v3279_v63 }
 0x2bd   :  { %v1283_v40 = vld [vmem:[#allocation1 + $0x9] sm:$0xff]  ;;  %v1284_v41 = vld [vmem:[#allocation1 + $0x12] sm:$0xff]  ;;  %v1282_v42 = vld [vmem:[#allocation1] sm:$0xff] }
 0x2be   :  { %1201 = vmatpush.bf16.msra.mxu1 %v3292_v1  ;;  %1310 = vmatmul.bf16.vlgmr.msrb.gmra.mxu3 %v1283_v40  ;;  %1367 = vst [vmem:[#allocation1] ss:$9 sm:$0xff] %v2537_v36 }
 0x2bf   :  { %2527 = vmatmul.msk.bf16.vlgmr.msrb.gmra.mxu0 %vm181_vm0, %v1284_v41  ;;  %1489 = vmatpush.bf16.msrb.mxu3 %v3279_v63 }
 0x2c0   :  { %1457 = vmatpush.bf16.msrb.mxu0 %v3227_v37  ;;  %v1273_v59 = vpop.f32.mrf.mxu3 }
 0x2c1   :  { %2521 = vmatmul.msk.bf16.vlgmr.msrb.gmra.mxu1 %vm181_vm0, %v1132_v62  ;;  %v2535_v62 = vld [vmem:[%s4118_s3 + $0x138] sm:$0xff] }
 0x2c2   :  { %1202 = vmatpush.bf16.msra.mxu1 %v3308_v8  ;;  %1351 = vmatpush.msra.mxu2 %v2535_v62 }
 0x2c3   :  { %1490 = vmatpush.bf16.msrb.mxu3 %v3292_v1 }
 0x2c4   :  { %1458 = vmatpush.bf16.msrb.mxu0 %v3233_v38  ;;  %1352 = vmatpush.msra.mxu2 %v2534_v6 }
 0x2c5   :  { %v1368_v14 = vld [vmem:[#allocation1] sm:$0xff]  ;;  %v1369_v17 = vld [vmem:[#allocation1 + $0x9] sm:$0xff]  ;;  %v1370_v28 = vld [vmem:[#allocation1 + $0x12] sm:$0xff] }
 0x2c6   :  { %1203 = vmatpush.bf16.msra.mxu1 %v3321_v11  ;;  %1353 = vmatpush.msra.mxu2 %v2533_v4  ;;  %1417 = vst [vmem:[#allocation1] ss:$9 sm:$0xff] %v2539_v32 }
 0x2c7   :  { %1491 = vmatpush.bf16.msrb.mxu3 %v3308_v8 }
 0x2c8   :  { %v1275_v18 = vpop.f32.mrf.mxu3  ;;  %1354 = vmatpush.msra.mxu2 %v2532_v19 }
 0x2ca   :  { %1204 = vmatpush.bf16.msra.mxu1 %v3328_v16  ;;  %1355 = vmatpush.msra.mxu2 %v2531_v23 }
 0x2cb   :  { %1492 = vmatpush.bf16.msrb.mxu3 %v3321_v11 }
 0x2cc   :  { %1356 = vmatpush.msra.mxu2 %v2530_v21 }
 0x2cd   :  { %v1418_v41 = vld [vmem:[#allocation1] sm:$0xff]  ;;  %v1420_v6 = vld [vmem:[#allocation1 + $0x12] sm:$0xff] }
 0x2ce   :  { %1205 = vmatpush.bf16.msra.mxu1 %v3339_v24  ;;  %v1196_v50 = vpop.f32.mrf.mxu2  ;;  %1357 = vmatpush.msra.mxu2 %v2529_v31 }
 0x2cf   :  { %1493 = vmatpush.bf16.msrb.mxu3 %v3328_v16  ;;  %1383 = vmatmul.bf16.vlgmr.msra.gmra.mxu0 %v1368_v14 }
 0x2d0   :  { %1358 = vmatpush.msra.mxu2 %v2528_v34  ;;  %1508 = vmatpush.bf16.msra.mxu0 %v3227_v37 }
 0x2d1   :  { %1433 = vmatmul.bf16.vlgmr.msra.gmra.mxu3 %v1418_v41 }
 0x2d2   :  { %1206 = vmatpush.bf16.msra.mxu1 %v3347_v25  ;;  %1407 = vmatpush.bf16.msrb.mxu2 %v3227_v37 }
 0x2d3   :  { %1494 = vmatpush.bf16.msrb.mxu3 %v3339_v24 }
 0x2d4   :  { %1509 = vmatpush.bf16.msra.mxu0 %v3233_v38 }
 0x2d6   :  { %1207 = vmatpush.bf16.msra.mxu1 %v3355_v26  ;;  %v1198_v52 = vpop.f32.mrf.mxu2  ;;  %1408 = vmatpush.bf16.msrb.mxu2 %v3233_v38 }
 0x2d7   :  { %1495 = vmatpush.bf16.msrb.mxu3 %v3347_v25 }
 0x2d9   :  { %1208 = vmatmul.bf16.vlgmr.msra.gmra.mxu1 %v1181_v12 }
 0x2da   :  { %1289 = vmatpush.bf16.msrb.mxu1 %v3242_v43 }
 0x2db   :  { %1496 = vmatpush.bf16.msrb.mxu3 %v3355_v26 }
 0x2de   :  { %1290 = vmatpush.bf16.msrb.mxu1 %v3248_v45 }
 0x2df   :  { %2540 = vmatmul.msk.bf16.vlgmr.msrb.gmra.mxu0 %vm181_vm0, %v1420_v6 }
 0x2e0   :  { %1540 = vmatpush.bf16.msrb.mxu0 %v3279_v63 }
 0x2e2   :  { %1291 = vmatpush.bf16.msrb.mxu1 %v3257_v53 }
 0x2e4   :  { %1541 = vmatpush.bf16.msrb.mxu0 %v3292_v1 }
 0x2e6   :  { %1292 = vmatpush.bf16.msrb.mxu1 %v3264_v57 }
 0x2e8   :  { %1542 = vmatpush.bf16.msrb.mxu0 %v3308_v8 }
 0x2ea   :  { %1293 = vmatpush.bf16.msrb.mxu1 %v3272_v61 }
 0x2ec   :  { %1543 = vmatpush.bf16.msrb.mxu0 %v3321_v11 }
 0x2ed   :  { %v1247_v56 = vpop.f32.mrf.mxu0 }
 0x2ee   :  { %1294 = vmatpush.bf16.msrb.mxu1 %v3286_v9  ;;  %v1260_v58 = vpop.f32.mrf.mxu2 }
 0x2ef   :  { %v1261_v47 = vadd.f32 %v1260_v58, %v1247_v56 }
 0x2f0   :  { %1544 = vmatpush.bf16.msrb.mxu0 %v3328_v16 }
 0x2f1   :  { %v1274_v48 = vadd.f32 %v1273_v59, %v1261_v47  ;;  %v2549_v47 = vld [vmem:[%s4118_s3 + $0x160] sm:$0xff] }
 0x2f2   :  { %1295 = vmatpush.bf16.msrb.mxu1 %v3301_v7 }
 0x2f4   :  { %1545 = vmatpush.bf16.msrb.mxu0 %v3339_v24 }
 0x2f5   :  { %v1249_v3 = vpop.f32.mrf.mxu0 }
 0x2f6   :  { %1296 = vmatpush.bf16.msrb.mxu1 %v3314_v10  ;;  %v1262_v15 = vpop.f32.mrf.mxu2  ;;  %v1419_v3 = vld [vmem:[#allocation1 + $0x9] sm:$0xff] }
 0x2f7   :  { %1468 = vst [vmem:[#allocation1] ss:$9 sm:$0xff] %v2541_v44  ;;  %v2543_v15 = vld [vmem:[%s4115_s0 + $0x45] sm:$0x7] }
 0x2f8   :  { %1546 = vmatpush.bf16.msrb.mxu0 %v3347_v25 }
 0x2f9   :  { %1297 = vmatmul.bf16.vlgmr.msrb.gmra.mxu1 %v1282_v42 }
 0x2fa   :  { %1388 = vmatpush.bf16.msra.mxu1 %v3279_v63 }
 0x2fc   :  { %1547 = vmatpush.bf16.msrb.mxu0 %v3355_v26 }
 0x2fe   :  { %1389 = vmatpush.bf16.msra.mxu1 %v3292_v1  ;;  %v1470_v59 = vld [vmem:[#allocation1 + $0x9] sm:$0xff]  ;;  %v1471_v4 = vld [vmem:[#allocation1 + $0x12] sm:$0xff] }
 0x2ff   :  { %1497 = vmatmul.bf16.vlgmr.msrb.gmra.mxu3 %v1470_v59  ;;  %2542 = vmatmul.msk.bf16.vlgmr.msra.gmra.mxu0 %vm181_vm0, %v1471_v4  ;;  %v2556_v4 = vld [vmem:[%s4115_s0 + $0x4b] sm:$0x7] }
 0x300   :  { %1663 = vmatpush.bf16.msra.mxu0 %v3242_v43 }
 0x302   :  { %1390 = vmatpush.bf16.msra.mxu1 %v3308_v8 }
 0x304   :  { %1664 = vmatpush.bf16.msra.mxu0 %v3248_v45 }
 0x306   :  { %1391 = vmatpush.bf16.msra.mxu1 %v3321_v11 }
 0x308   :  { %1665 = vmatpush.bf16.msra.mxu0 %v3257_v53 }
 0x30a   :  { %1392 = vmatpush.bf16.msra.mxu1 %v3328_v16 }
 0x30c   :  { %1666 = vmatpush.bf16.msra.mxu0 %v3264_v57 }
 0x30e   :  { %1393 = vmatpush.bf16.msra.mxu1 %v3339_v24 }
 0x310   :  { %1667 = vmatpush.bf16.msra.mxu0 %v3272_v61 }
 0x312   :  { %1394 = vmatpush.bf16.msra.mxu1 %v3347_v25 }
 0x314   :  { %1668 = vmatpush.bf16.msra.mxu0 %v3286_v9 }
 0x316   :  { %1395 = vmatpush.bf16.msra.mxu1 %v3355_v26 }
 0x318   :  { %1669 = vmatpush.bf16.msra.mxu0 %v3301_v7 }
 0x319   :  { %1396 = vmatmul.bf16.vlgmr.msra.gmra.mxu1 %v1369_v17  ;;  %v2552_v17 = vld [vmem:[%s4118_s3 + $0x178] sm:$0xff] }
 0x31a   :  { %1476 = vmatpush.bf16.msrb.mxu1 %v3242_v43  ;;  %1589 = vmatpush.msra.mxu3 %v2552_v17  ;;  %v2558_v17 = vld [vmem:[%s4115_s0 + $0x4e] sm:$0x7] }
 0x31c   :  { %1670 = vmatpush.bf16.msra.mxu0 %v3314_v10 }
 0x31e   :  { %1477 = vmatpush.bf16.msrb.mxu1 %v3248_v45 }
 0x322   :  { %1478 = vmatpush.bf16.msrb.mxu1 %v3257_v53 }
 0x326   :  { %1479 = vmatpush.bf16.msrb.mxu1 %v3264_v57 }
 0x32a   :  { %1480 = vmatpush.bf16.msrb.mxu1 %v3272_v61 }
 0x32e   :  { %1481 = vmatpush.bf16.msrb.mxu1 %v3286_v9 }
 0x332   :  { %1482 = vmatpush.bf16.msrb.mxu1 %v3301_v7 }
 0x336   :  { %1483 = vmatpush.bf16.msrb.mxu1 %v3314_v10  ;;  %v3523_v55 = vpop.f32.mrf.mxu1 }
 0x33a   :  { %1559 = vmatpush.bf16.msra.mxu1 %v3227_v37 }
 0x33c   :  { %v1324_v13 = vpop.f32.mrf.mxu0 }
 0x33e   :  { %v1172_v60 = vpop.f32.mrf.mxu1  ;;  %1560 = vmatpush.bf16.msra.mxu1 %v3233_v38 }
 0x33f   :  { %v1173_v40 = vadd.f32 %v1172_v60, %v1160_v39  ;;  %v1469_v60 = vld [vmem:[#allocation1] sm:$0xff] }
 0x340   :  { %1484 = vmatmul.bf16.vlgmr.msrb.gmra.mxu1 %v1469_v60  ;;  %1519 = vst [vmem:[#allocation1] ss:$9 sm:$0xff] %v2543_v15 }
 0x341   :  { %v1311_v12 = vpop.f32.mrf.mxu3 }
 0x342   :  { %1613 = vmatpush.bf16.msrb.mxu1 %v3242_v43 }
 0x344   :  { %v1326_v29 = vpop.f32.mrf.mxu0 }
 0x346   :  { %v1174_v5 = vpop.f32.mrf.mxu1  ;;  %1614 = vmatpush.bf16.msrb.mxu1 %v3248_v45 }
 0x347   :  { %v1521_v18 = vld [vmem:[#allocation1 + $0x9] sm:$0xff]  ;;  %v1522_v19 = vld [vmem:[#allocation1 + $0x12] sm:$0xff]  ;;  %v1520_v23 = vld [vmem:[#allocation1] sm:$0xff] }
 0x348   :  { %1548 = vmatmul.bf16.vlgmr.msrb.gmra.mxu0 %v1521_v18 }
 0x349   :  { %v1313_v20 = vpop.f32.mrf.mxu3  ;;  %1727 = vmatpush.bf16.msrb.mxu0 %v3279_v63 }
 0x34a   :  { %1615 = vmatpush.bf16.msrb.mxu1 %v3257_v53 }
 0x34c   :  { %v1384_v5 = vpop.f32.mrf.mxu0 }
 0x34d   :  { %1728 = vmatpush.bf16.msrb.mxu0 %v3292_v1 }
 0x34e   :  { %1616 = vmatpush.bf16.msrb.mxu1 %v3264_v57 }
 0x350   :  { %2544 = vmatmul.msk.bf16.vlgmr.msra.gmra.mxu1 %vm181_vm0, %v1522_v19 }
 0x351   :  { %1729 = vmatpush.bf16.msrb.mxu0 %v3308_v8 }
 0x352   :  { %1617 = vmatpush.bf16.msrb.mxu1 %v3272_v61 }
 0x354   :  { %v1434_v21 = vpop.f32.mrf.mxu3 }
 0x355   :  { %1730 = vmatpush.bf16.msrb.mxu0 %v3321_v11 }
 0x356   :  { %v1209_v22 = vpop.f32.mrf.mxu1  ;;  %1618 = vmatpush.bf16.msrb.mxu1 %v3286_v9 }
 0x357   :  { %v1210_v33 = vadd.f32 %v1209_v22, %v1196_v50  ;;  %v3569_v50 = vld [vmem:[%s4117_s2] ss:$0 sm:$0xff] }
 0x359   :  { %v1223_v30 = vadd.f32 %v1222_v51, %v1210_v33  ;;  %1731 = vmatpush.bf16.msrb.mxu0 %v3328_v16  ;;  %v2550_v33 = vld [vmem:[%s4118_s3 + $0x168] sm:$0xff] }
 0x35a   :  { %1619 = vmatpush.bf16.msrb.mxu1 %v3301_v7 }
 0x35b   :  { %v1226_v42 = vmax.f32 %v1173_v40, %v1223_v30  ;;  %v2548_v40 = vld [vmem:[%s4118_s3 + $0x158] sm:$0xff] }
 0x35c   :  { %v1436_v31 = vpop.f32.mrf.mxu3 }
 0x35d   :  { %v1277_v54 = vmax.f32 %v1226_v42, %v1274_v48  ;;  %1732 = vmatpush.bf16.msrb.mxu0 %v3339_v24 }
 0x35e   :  { %v1211_v35 = vpop.f32.mrf.mxu1  ;;  %1620 = vmatpush.bf16.msrb.mxu1 %v3314_v10 }
 0x361   :  { %1733 = vmatpush.bf16.msrb.mxu0 %v3347_v25 }
 0x362   :  { %1695 = vmatpush.bf16.msra.mxu1 %v3227_v37 }
 0x365   :  { %1734 = vmatpush.bf16.msrb.mxu0 %v3355_v26 }
 0x366   :  { %1696 = vmatpush.bf16.msra.mxu1 %v3233_v38 }
 0x376   :  { %v1298_v49 = vpop.f32.mrf.mxu1 }
 0x377   :  { %v1312_v52 = vadd.f32 %v1311_v12, %v1298_v49 }
 0x379   :  { %v1325_v62 = vadd.f32 %v1324_v13, %v1312_v52  ;;  %v1386_v13 = vpop.f32.mrf.mxu0  ;;  %v2547_v52 = vld [vmem:[%s4118_s3 + $0x150] sm:$0xff] }
 0x37b   :  { %v1328_v46 = vmax.f32 %v1277_v54, %v1325_v62  ;;  %v2546_v62 = vld [vmem:[%s4118_s3 + $0x148] sm:$0xff] }
 0x37d   :  { %v1329_v51 = vadd.f32 %v3569_v50, %v1328_v46  ;;  %v2554_v46 = vld [vmem:[%s4115_s0 + $0x48] sm:$0x7] }
 0x37e   :  { %v1300_v56 = vpop.f32.mrf.mxu1  ;;  %1605 = vst [vmem:[#allocation1] ss:$9 sm:$0xff] %v2554_v46 }
 0x37f   :  { %v1330_v58 = vmax.f32 %v1329_v51, 0.0 }
 0x381   :  { %2536 = vmatmul.msk.f32.vlgmr.msra.gmra.mxu2 %vm603_vm1, %v1330_v58  ;;  %v1460_v29 = vpop.f32.mrf.mxu0 }
 0x382   :  { %1438 = vmatpush.bf16.msra.mxu2 %v3279_v63  ;;  %v1498_v35 = vpop.f32.mrf.mxu3 }
 0x385   :  { %v1606_v51 = vld [vmem:[#allocation1] sm:$0xff]  ;;  %v1607_v56 = vld [vmem:[#allocation1 + $0x9] sm:$0xff]  ;;  %v1608_v59 = vld [vmem:[#allocation1 + $0x12] sm:$0xff] }
 0x386   :  { %1439 = vmatpush.bf16.msra.mxu2 %v3292_v1  ;;  %1621 = vmatmul.bf16.vlgmr.msrb.gmra.mxu1 %v1606_v51  ;;  %1655 = vst [vmem:[#allocation1] ss:$9 sm:$0xff] %v2556_v4 }
 0x387   :  { %1746 = vmatpush.bf16.msrb.mxu1 %v3227_v37 }
 0x389   :  { %2538 = vmatmul.msk.bf16.vlgmr.msrb.gmra.mxu2 %vm181_vm0, %v1370_v28  ;;  %v2551_v28 = vld [vmem:[%s4118_s3 + $0x170] sm:$0xff] }
 0x38a   :  { %1440 = vmatpush.bf16.msra.mxu2 %v3308_v8  ;;  %1590 = vmatpush.msra.mxu3 %v2551_v28  ;;  %v1500_v39 = vpop.f32.mrf.mxu3 }
 0x38b   :  { %1747 = vmatpush.bf16.msrb.mxu1 %v3233_v38  ;;  %v3809_v39 = vld [vmem:[%s4116_s1 + $0x60] sm:$0xff] }
 0x38c   :  { %1591 = vmatpush.msra.mxu3 %v2550_v33  ;;  %v3802_v33 = vld [vmem:[%s4116_s1 + $0x68] sm:$0xff] }
 0x38e   :  { %1441 = vmatpush.bf16.msra.mxu2 %v3321_v11  ;;  %1592 = vmatpush.msra.mxu3 %v2549_v47  ;;  %v3823_v47 = vld [vmem:[%s4116_s1 + $0x50] sm:$0xff] }
 0x390   :  { %1593 = vmatpush.msra.mxu3 %v2548_v40  ;;  %v3830_v40 = vld [vmem:[%s4116_s1 + $0x48] sm:$0xff] }
 0x392   :  { %1442 = vmatpush.bf16.msra.mxu2 %v3328_v16  ;;  %1594 = vmatpush.msra.mxu3 %v2547_v52 }
 0x394   :  { %1595 = vmatpush.msra.mxu3 %v2546_v62 }
 0x396   :  { %1443 = vmatpush.bf16.msra.mxu2 %v3339_v24  ;;  %v1397_v12 = vpop.f32.mrf.mxu1 }
 0x397   :  { %v1398_v60 = vadd.f32 %v1397_v12, %v1384_v5  ;;  %v1658_v5 = vld [vmem:[#allocation1 + $0x12] sm:$0xff]  ;;  %v1657_v12 = vld [vmem:[#allocation1 + $0x9] sm:$0xff] }
 0x398   :  { %2557 = vmatmul.msk.bf16.vlgmr.msra.gmra.mxu1 %vm181_vm0, %v1658_v5 }
 0x399   :  { %1778 = vmatpush.bf16.msra.mxu1 %v3279_v63 }
 0x39a   :  { %1444 = vmatpush.bf16.msra.mxu2 %v3347_v25 }
 0x39d   :  { %1779 = vmatpush.bf16.msra.mxu1 %v3292_v1 }
 0x39e   :  { %1445 = vmatpush.bf16.msra.mxu2 %v3355_v26  ;;  %v1399_v20 = vpop.f32.mrf.mxu1 }
 0x3a1   :  { %1446 = vmatmul.bf16.vlgmr.msra.gmra.mxu2 %v1419_v3  ;;  %v2545_v3 = vld [vmem:[%s4118_s3 + $0x140] sm:$0xff]  ;;  %1780 = vmatpush.bf16.msra.mxu1 %v3308_v8 }
 0x3a2   :  { %1527 = vmatpush.bf16.msrb.mxu2 %v3242_v43  ;;  %1596 = vmatpush.msra.mxu3 %v2545_v3  ;;  %v648_v3 = vadd.f32 %v3196_v0, %v3198_v2  ;;  %v2568_v0 = vld [vmem:[%s4118_s3 + $0x1b0] sm:$0xff] }
 0x3a4   :  { %1645 = vmatpush.bf16.msrb.mxu3 %v3227_v37  ;;  %v887_v46 = vadd.f32 %v3406_v27, %v648_v3  ;;  %v2567_v27 = vld [vmem:[%s4118_s3 + $0x1a8] sm:$0xff] }
 0x3a5   :  { %1781 = vmatpush.bf16.msra.mxu1 %v3321_v11 }
 0x3a6   :  { %1528 = vmatpush.bf16.msrb.mxu2 %v3248_v45 }
 0x3a8   :  { %1646 = vmatpush.bf16.msrb.mxu3 %v3233_v38 }
 0x3a9   :  { %1782 = vmatpush.bf16.msra.mxu1 %v3328_v16 }
 0x3aa   :  { %1529 = vmatpush.bf16.msrb.mxu2 %v3257_v53 }
 0x3ad   :  { %1783 = vmatpush.bf16.msra.mxu1 %v3339_v24 }
 0x3ae   :  { %1530 = vmatpush.bf16.msrb.mxu2 %v3264_v57 }
 0x3b1   :  { %1784 = vmatpush.bf16.msra.mxu1 %v3347_v25 }
 0x3b2   :  { %1531 = vmatpush.bf16.msrb.mxu2 %v3272_v61 }
 0x3b5   :  { %1785 = vmatpush.bf16.msra.mxu1 %v3355_v26 }
 0x3b6   :  { %1532 = vmatpush.bf16.msrb.mxu2 %v3286_v9 }
 0x3ba   :  { %1533 = vmatpush.bf16.msrb.mxu2 %v3301_v7 }
 0x3bd   :  { %v1485_v34 = vpop.f32.mrf.mxu1 }
 0x3be   :  { %1534 = vmatpush.bf16.msrb.mxu2 %v3314_v10  ;;  %v1499_v18 = vadd.f32 %v1498_v35, %v1485_v34 }
 0x3c1   :  { %1535 = vmatmul.bf16.vlgmr.msrb.gmra.mxu2 %v1520_v23 }
 0x3c2   :  { %1626 = vmatpush.bf16.msra.mxu2 %v3279_v63 }
 0x3c5   :  { %v1487_v32 = vpop.f32.mrf.mxu1 }
 0x3c6   :  { %1627 = vmatpush.bf16.msra.mxu2 %v3292_v1  ;;  %v3698_v32 = vld [vmem:[%s4116_s1 + $0x30] sm:$0xff] }
 0x3ca   :  { %1628 = vmatpush.bf16.msra.mxu2 %v3308_v8 }
 0x3cd   :  { %v1562_v48 = vpop.f32.mrf.mxu1 }
 0x3ce   :  { %1629 = vmatpush.bf16.msra.mxu2 %v3321_v11 }
 0x3d2   :  { %1630 = vmatpush.bf16.msra.mxu2 %v3328_v16 }
 0x3d5   :  { %v1564_v54 = vpop.f32.mrf.mxu1 }
 0x3d6   :  { %1631 = vmatpush.bf16.msra.mxu2 %v3339_v24 }
 0x3da   :  { %1632 = vmatpush.bf16.msra.mxu2 %v3347_v25 }
 0x3de   :  { %1633 = vmatpush.bf16.msra.mxu2 %v3355_v26 }
 0x3e1   :  { %1634 = vmatmul.bf16.vlgmr.msra.gmra.mxu2 %v1607_v56  ;;  %v1125_v56 = vadd.f32 %v3523_v55, %v887_v46 }
 0x3e2   :  { %1714 = vmatpush.bf16.msrb.mxu2 %v3242_v43 }
 0x3e6   :  { %1715 = vmatpush.bf16.msrb.mxu2 %v3248_v45  ;;  %v1462_v45 = vpop.f32.mrf.mxu0 }
 0x3ea   :  { %1716 = vmatpush.bf16.msrb.mxu2 %v3257_v53 }
 0x3ee   :  { %1717 = vmatpush.bf16.msrb.mxu2 %v3264_v57  ;;  %v1511_v36 = vpop.f32.mrf.mxu0 }
 0x3ef   :  { %v1512_v13 = vadd.f32 %v1511_v36, %v1499_v18 }
 0x3f2   :  { %1718 = vmatpush.bf16.msrb.mxu2 %v3272_v61 }
 0x3f6   :  { %1719 = vmatpush.bf16.msrb.mxu2 %v3286_v9  ;;  %v1513_v30 = vpop.f32.mrf.mxu0 }
 0x3f7   :  { %v3816_v30 = vld [vmem:[%s4116_s1 + $0x58] sm:$0xff] }
 0x3fa   :  { %1720 = vmatpush.bf16.msrb.mxu2 %v3301_v7 }
 0x3fe   :  { %1721 = vmatpush.bf16.msrb.mxu2 %v3314_v10  ;;  %v1549_v42 = vpop.f32.mrf.mxu0 }
 0x402   :  { %1797 = vmatpush.bf16.msra.mxu2 %v3227_v37  ;;  %v1656_v37 = vld [vmem:[#allocation1] sm:$0xff] }
 0x403   :  { %1671 = vmatmul.bf16.vlgmr.msra.gmra.mxu0 %v1656_v37  ;;  %1706 = vst [vmem:[#allocation1] ss:$9 sm:$0xff] %v2558_v17 }
 0x404   :  { %v3644_v22 = vpop.f32.mrf.mxu2 }
 0x406   :  { %v1551_v49 = vpop.f32.mrf.mxu0  ;;  %1798 = vmatpush.bf16.msra.mxu2 %v3233_v38 }
 0x40a   :  { %v1707_v35 = vld [vmem:[#allocation1] sm:$0xff]  ;;  %v1708_v36 = vld [vmem:[#allocation1 + $0x9] sm:$0xff] }
 0x40b   :  { %1722 = vmatmul.bf16.vlgmr.msrb.gmra.mxu2 %v1707_v35 }
 0x40c   :  { %v1410_v14 = vpop.f32.mrf.mxu2  ;;  %1851 = vmatpush.bf16.msrb.mxu2 %v3242_v43  ;;  %v2560_v43 = vld [vmem:[%s4115_s0 + $0x51] sm:$0x7] }
 0x40d   :  { %v1411_v19 = vadd.f32 %v1410_v14, %v1398_v60  ;;  %v1709_v14 = vld [vmem:[#allocation1 + $0x12] sm:$0xff] }
 0x40e   :  { %2559 = vmatmul.msk.bf16.vlgmr.msrb.gmra.mxu1 %vm181_vm0, %v1709_v14  ;;  %1757 = vst [vmem:[#allocation1] ss:$9 sm:$0xff] %v2560_v43 }
 0x410   :  { %1852 = vmatpush.bf16.msrb.mxu2 %v3698_v32 }
 0x413   :  { %1735 = vmatmul.bf16.vlgmr.msrb.gmra.mxu0 %v1708_v36 }
 0x414   :  { %v1412_v41 = vpop.f32.mrf.mxu2  ;;  %1853 = vmatpush.bf16.msrb.mxu2 %v3257_v53 }
 0x415   :  { %v1760_v53 = vld [vmem:[#allocation1 + $0x12] sm:$0xff]  ;;  %v3837_v41 = vld [vmem:[%s4116_s1 + $0x40] sm:$0xff] }
 0x418   :  { %1854 = vmatpush.bf16.msrb.mxu2 %v3264_v57  ;;  %v1759_v57 = vld [vmem:[#allocation1 + $0x9] sm:$0xff] }
 0x41b   :  { %2561 = vmatmul.msk.bf16.vlgmr.msra.gmra.mxu2 %vm181_vm0, %v1760_v53 }
 0x41c   :  { %1855 = vmatpush.bf16.msrb.mxu2 %v3272_v61  ;;  %v3733_v61 = vld [vmem:[%s4116_s1 + $0x28] sm:$0xff] }
 0x41e   :  { %1786 = vmatmul.bf16.vlgmr.msra.gmra.mxu1 %v1759_v57 }
 0x420   :  { %1856 = vmatpush.bf16.msrb.mxu2 %v3286_v9  ;;  %v3741_v9 = vld [vmem:[%s4116_s1 + $0x88] sm:$0xff] }
 0x424   :  { %v1447_v6 = vpop.f32.mrf.mxu2  ;;  %1857 = vmatpush.bf16.msrb.mxu2 %v3301_v7  ;;  %v3754_v7 = vld [vmem:[%s4116_s1 + $0x80] sm:$0xff] }
 0x425   :  { %v1448_v58 = vadd.f32 %v1447_v6, %v1434_v21 }
 0x427   :  { %v1461_v15 = vadd.f32 %v1460_v29, %v1448_v58  ;;  %v1363_v58 = vadd.f32 %v3644_v22, %v1125_v56 }
 0x428   :  { %1858 = vmatpush.bf16.msrb.mxu2 %v3314_v10  ;;  %v3767_v10 = vld [vmem:[%s4116_s1 + $0x10] sm:$0xff] }
 0x429   :  { %v1464_v23 = vmax.f32 %v1411_v19, %v1461_v15 }
 0x42b   :  { %v1515_v21 = vmax.f32 %v1464_v23, %v1512_v13  ;;  %v2569_v23 = vld [vmem:[%s4118_s3 + $0x1b8] sm:$0xff]  ;;  %v2566_v13 = vld [vmem:[%s4118_s3 + $0x1a0] sm:$0xff] }
 0x42c   :  { %v1449_v44 = vpop.f32.mrf.mxu2  ;;  %1933 = vmatpush.bf16.msra.mxu2 %v3741_v9  ;;  %1827 = vmatpush.msra.mxu0 %v2569_v23  ;;  %v2577_v23 = vld [vmem:[%s4115_s0 + $0x5d] sm:$0x7] }
 0x42e   :  { %1828 = vmatpush.msra.mxu0 %v2568_v0 }
 0x430   :  { %1934 = vmatpush.bf16.msra.mxu2 %v3754_v7  ;;  %1829 = vmatpush.msra.mxu0 %v2567_v27 }
 0x432   :  { %1830 = vmatpush.msra.mxu0 %v2566_v13 }
 0x444   :  { %v1536_v20 = vpop.f32.mrf.mxu2 }
 0x445   :  { %v1550_v31 = vadd.f32 %v1549_v42, %v1536_v20  ;;  %v1622_v42 = vpop.f32.mrf.mxu1  ;;  %v2565_v20 = vld [vmem:[%s4118_s3 + $0x198] sm:$0xff] }
 0x446   :  { %1831 = vmatpush.msra.mxu0 %v2565_v20 }
 0x447   :  { %v1563_v45 = vadd.f32 %v1562_v48, %v1550_v31 }
 0x449   :  { %v1566_v28 = vmax.f32 %v1515_v21, %v1563_v45  ;;  %v2571_v45 = vld [vmem:[%s4115_s0 + $0x54] sm:$0x7] }
 0x44b   :  { %v1567_v38 = vadd.f32 %v3569_v50, %v1566_v28  ;;  %v2563_v28 = vld [vmem:[%s4118_s3 + $0x188] sm:$0xff] }
 0x44c   :  { %v1538_v29 = vpop.f32.mrf.mxu2 }
 0x44d   :  { %v1568_v34 = vmax.f32 %v1567_v38, 0.0  ;;  %v1624_v52 = vpop.f32.mrf.mxu1 }
 0x44f   :  { %2553 = vmatmul.msk.f32.vlgmr.msra.gmra.mxu3 %vm603_vm1, %v1568_v34  ;;  %v2562_v34 = vld [vmem:[%s4118_s3 + $0x180] sm:$0xff] }
 0x450   :  { %1676 = vmatpush.bf16.msra.mxu3 %v3279_v63  ;;  %v3721_v63 = vld [vmem:[%s4116_s1 + $0x38] sm:$0xff] }
 0x451   :  { %1901 = vmatpush.bf16.msrb.mxu1 %v3721_v63 }
 0x454   :  { %1677 = vmatpush.bf16.msra.mxu3 %v3292_v1  ;;  %v3747_v1 = vld [vmem:[%s4116_s1 + $0x20] sm:$0xff] }
 0x455   :  { %1902 = vmatpush.bf16.msrb.mxu1 %v3698_v32  ;;  %v1698_v6 = vpop.f32.mrf.mxu1 }
 0x457   :  { %2555 = vmatmul.msk.bf16.vlgmr.msrb.gmra.mxu3 %vm181_vm0, %v1608_v59 }
 0x458   :  { %1678 = vmatpush.bf16.msra.mxu3 %v3308_v8  ;;  %v3760_v8 = vld [vmem:[%s4116_s1 + $0x18] sm:$0xff] }
 0x459   :  { %1903 = vmatpush.bf16.msrb.mxu1 %v3733_v61 }
 0x45c   :  { %1679 = vmatpush.bf16.msra.mxu3 %v3321_v11  ;;  %v3774_v11 = vld [vmem:[%s4116_s1 + $0x8] sm:$0xff] }
 0x45d   :  { %1904 = vmatpush.bf16.msrb.mxu1 %v3747_v1  ;;  %v1700_v51 = vpop.f32.mrf.mxu1 }
 0x460   :  { %1680 = vmatpush.bf16.msra.mxu3 %v3328_v16  ;;  %v3781_v16 = vld [vmem:[%s4116_s1] sm:$0xff] }
 0x461   :  { %1905 = vmatpush.bf16.msrb.mxu1 %v3760_v8 }
 0x464   :  { %1681 = vmatpush.bf16.msra.mxu3 %v3339_v24  ;;  %v3787_v24 = vld [vmem:[%s4116_s1 + $0x78] sm:$0xff]  ;;  %v1635_v48 = vpop.f32.mrf.mxu2 }
 0x465   :  { %1906 = vmatpush.bf16.msrb.mxu1 %v3767_v10  ;;  %v1636_v49 = vadd.f32 %v1635_v48, %v1622_v42  ;;  %v2573_v42 = vld [vmem:[%s4115_s0 + $0x57] sm:$0x7] }
 0x468   :  { %1682 = vmatpush.bf16.msra.mxu3 %v3347_v25  ;;  %v3794_v25 = vld [vmem:[%s4116_s1 + $0x70] sm:$0xff] }
 0x469   :  { %1907 = vmatpush.bf16.msrb.mxu1 %v3774_v11 }
 0x46c   :  { %1683 = vmatpush.bf16.msra.mxu3 %v3355_v26  ;;  %v1758_v26 = vld [vmem:[#allocation1] sm:$0xff]  ;;  %v1637_v62 = vpop.f32.mrf.mxu2 }
 0x46d   :  { %1908 = vmatpush.bf16.msrb.mxu1 %v3781_v16  ;;  %1843 = vst [vmem:[#allocation1] ss:$9 sm:$0xff] %v2571_v45  ;;  %v2575_v62 = vld [vmem:[%s4115_s0 + $0x5a] sm:$0x7] }
 0x46f   :  { %1684 = vmatmul.bf16.vlgmr.msra.gmra.mxu3 %v1657_v12  ;;  %v2564_v12 = vld [vmem:[%s4118_s3 + $0x190] sm:$0xff] }
 0x470   :  { %1765 = vmatpush.bf16.msrb.mxu3 %v3721_v63  ;;  %1832 = vmatpush.msra.mxu0 %v2564_v12 }
 0x471   :  { %1965 = vmatpush.bf16.msra.mxu1 %v3787_v24 }
 0x472   :  { %1833 = vmatpush.msra.mxu0 %v2563_v28 }
 0x474   :  { %1766 = vmatpush.bf16.msrb.mxu3 %v3698_v32  ;;  %1834 = vmatpush.msra.mxu0 %v2562_v34  ;;  %v1844_v14 = vld [vmem:[#allocation1] sm:$0xff]  ;;  %v1846_v57 = vld [vmem:[#allocation1 + $0x12] sm:$0xff] }
 0x475   :  { %1966 = vmatpush.bf16.msra.mxu1 %v3794_v25  ;;  %1859 = vmatmul.bf16.vlgmr.msrb.gmra.mxu2 %v1844_v14  ;;  %v2586_v14 = vld [vmem:[%s4118_s3 + $0x1f8] sm:$0xff] }
 0x476   :  { %1883 = vmatpush.bf16.msrb.mxu0 %v3741_v9  ;;  %1984 = vmatpush.bf16.msrb.mxu2 %v3741_v9 }
 0x478   :  { %1767 = vmatpush.bf16.msrb.mxu3 %v3733_v61 }
 0x479   :  { %1967 = vmatpush.bf16.msra.mxu1 %v3802_v33 }
 0x47a   :  { %1884 = vmatpush.bf16.msrb.mxu0 %v3754_v7  ;;  %1985 = vmatpush.bf16.msrb.mxu2 %v3754_v7 }
 0x47c   :  { %1768 = vmatpush.bf16.msrb.mxu3 %v3747_v1 }
 0x47d   :  { %1968 = vmatpush.bf16.msra.mxu1 %v3809_v39 }
 0x480   :  { %1769 = vmatpush.bf16.msrb.mxu3 %v3760_v8  ;;  %v1672_v54 = vpop.f32.mrf.mxu0 }
 0x481   :  { %1969 = vmatpush.bf16.msra.mxu1 %v3816_v30 }
 0x484   :  { %1770 = vmatpush.bf16.msrb.mxu3 %v3767_v10 }
 0x485   :  { %1970 = vmatpush.bf16.msra.mxu1 %v3823_v47 }
 0x488   :  { %1771 = vmatpush.bf16.msrb.mxu3 %v3774_v11  ;;  %v1674_v44 = vpop.f32.mrf.mxu0 }
 0x489   :  { %1971 = vmatpush.bf16.msra.mxu1 %v3830_v40 }
 0x48b   :  { %v1749_v18 = vpop.f32.mrf.mxu1 }
 0x48c   :  { %1772 = vmatpush.bf16.msrb.mxu3 %v3781_v16 }
 0x48d   :  { %1972 = vmatpush.bf16.msra.mxu1 %v3837_v41 }
 0x48e   :  { %v1723_v4 = vpop.f32.mrf.mxu2 }
 0x48f   :  { %1773 = vmatmul.bf16.vlgmr.msrb.gmra.mxu3 %v1758_v26  ;;  %v1845_v26 = vld [vmem:[#allocation1 + $0x9] sm:$0xff] }
 0x490   :  { %1864 = vmatpush.bf16.msra.mxu3 %v3787_v24  ;;  %v1736_v15 = vpop.f32.mrf.mxu0  ;;  %1893 = vst [vmem:[#allocation1] ss:$9 sm:$0xff] %v2573_v42  ;;  %v2583_v42 = vld [vmem:[%s4118_s3 + $0x1e0] sm:$0xff] }
 0x493   :  { %v1751_v22 = vpop.f32.mrf.mxu1 }
 0x494   :  { %1865 = vmatpush.bf16.msra.mxu3 %v3794_v25 }
 0x496   :  { %v1725_v2 = vpop.f32.mrf.mxu2 }
 0x497   :  { %v1896_v48 = vld [vmem:[#allocation1 + $0x12] sm:$0xff]  ;;  %v1895_v52 = vld [vmem:[#allocation1 + $0x9] sm:$0xff] }
 0x498   :  { %1866 = vmatpush.bf16.msra.mxu3 %v3802_v33  ;;  %v1738_v55 = vpop.f32.mrf.mxu0  ;;  %2574 = vmatmul.msk.bf16.vlgmr.msra.gmra.mxu2 %vm181_vm0, %v1896_v48  ;;  %v2582_v48 = vld [vmem:[%s4118_s3 + $0x1d8] sm:$0xff] }
 0x499   :  { %2016 = vmatpush.bf16.msra.mxu2 %v3787_v24  ;;  %v2588_v55 = vld [vmem:[%s4115_s0 + $0x60] sm:$0x7] }
 0x49b   :  { %v1787_v37 = vpop.f32.mrf.mxu1 }
 0x49c   :  { %1867 = vmatpush.bf16.msra.mxu3 %v3809_v39 }
 0x49d   :  { %2017 = vmatpush.bf16.msra.mxu2 %v3794_v25 }
 0x49e   :  { %v1800_v21 = vpop.f32.mrf.mxu2 }
 0x4a0   :  { %1868 = vmatpush.bf16.msra.mxu3 %v3816_v30 }
 0x4a1   :  { %2018 = vmatpush.bf16.msra.mxu2 %v3802_v33 }
 0x4a3   :  { %v1789_v5 = vpop.f32.mrf.mxu1 }
 0x4a4   :  { %1869 = vmatpush.bf16.msra.mxu3 %v3823_v47 }
 0x4a5   :  { %2019 = vmatpush.bf16.msra.mxu2 %v3809_v39 }
 0x4a6   :  { %v1802_v17 = vpop.f32.mrf.mxu2 }
 0x4a8   :  { %1870 = vmatpush.bf16.msra.mxu3 %v3830_v40 }
 0x4a9   :  { %2020 = vmatpush.bf16.msra.mxu2 %v3816_v30 }
 0x4ac   :  { %1871 = vmatpush.bf16.msra.mxu3 %v3837_v41 }
 0x4ad   :  { %2021 = vmatpush.bf16.msra.mxu2 %v3823_v47 }
 0x4af   :  { %1872 = vmatmul.bf16.vlgmr.msra.gmra.mxu3 %v1845_v26 }
 0x4b0   :  { %1952 = vmatpush.bf16.msrb.mxu3 %v3721_v63 }
 0x4b1   :  { %2022 = vmatpush.bf16.msra.mxu2 %v3830_v40 }
 0x4b4   :  { %1953 = vmatpush.bf16.msrb.mxu3 %v3698_v32 }
 0x4b5   :  { %2023 = vmatpush.bf16.msra.mxu2 %v3837_v41 }
 0x4b8   :  { %1954 = vmatpush.bf16.msrb.mxu3 %v3733_v61 }
 0x4bc   :  { %1955 = vmatpush.bf16.msrb.mxu3 %v3747_v1 }
 0x4c0   :  { %1956 = vmatpush.bf16.msrb.mxu3 %v3760_v8 }
 0x4c4   :  { %1957 = vmatpush.bf16.msrb.mxu3 %v3767_v10 }
 0x4c8   :  { %1958 = vmatpush.bf16.msrb.mxu3 %v3774_v11 }
 0x4cc   :  { %1959 = vmatpush.bf16.msrb.mxu3 %v3781_v16 }
 0x4d0   :  { %2035 = vmatpush.bf16.msra.mxu3 %v3741_v9 }
 0x4d2   :  { %v1598_v59 = vpop.f32.mrf.mxu3 }
 0x4d3   :  { %v3855_v60 = vadd.f32 %v1598_v59, %v1363_v58 }
 0x4d4   :  { %2036 = vmatpush.bf16.msra.mxu3 %v3754_v7 }
 0x4da   :  { %v1648_v19 = vpop.f32.mrf.mxu3 }
 0x4db   :  { %v1649_v35 = vadd.f32 %v1648_v19, %v1636_v49  ;;  %v1737_v49 = vadd.f32 %v1736_v15, %v1723_v4 }
 0x4e2   :  { %v1650_v31 = vpop.f32.mrf.mxu3 }
 0x4f2   :  { %v1685_v38 = vpop.f32.mrf.mxu3 }
 0x4f3   :  { %v1686_v29 = vadd.f32 %v1685_v38, %v1672_v54  ;;  %v1894_v54 = vld [vmem:[#allocation1] sm:$0xff] }
 0x4f4   :  { %1909 = vmatmul.bf16.vlgmr.msrb.gmra.mxu1 %v1894_v54  ;;  %1944 = vst [vmem:[#allocation1] ss:$9 sm:$0xff] %v2575_v62 }
 0x4f5   :  { %v1699_v36 = vadd.f32 %v1698_v6, %v1686_v29  ;;  %v1750_v6 = vadd.f32 %v1749_v18, %v1737_v49  ;;  %2065 = vmatpush.msrb.mxu1 %v2586_v14 }
 0x4f7   :  { %v1702_v43 = vmax.f32 %v1649_v35, %v1699_v36 }
 0x4f8   :  { %v1860_v13 = vpop.f32.mrf.mxu2 }
 0x4f9   :  { %v1753_v46 = vmax.f32 %v1702_v43, %v1750_v6  ;;  %v2585_v43 = vld [vmem:[%s4118_s3 + $0x1f0] sm:$0xff] }
 0x4fa   :  { %v1687_v53 = vpop.f32.mrf.mxu3  ;;  %2066 = vmatpush.msrb.mxu1 %v2585_v43  ;;  %v2581_v6 = vld [vmem:[%s4118_s3 + $0x1d0] sm:$0xff] }
 0x4fb   :  { %v1945_v58 = vld [vmem:[#allocation1] sm:$0xff]  ;;  %v1947_v15 = vld [vmem:[#allocation1 + $0x12] sm:$0xff]  ;;  %v1946_v18 = vld [vmem:[#allocation1 + $0x9] sm:$0xff] }
 0x4fc   :  { %1960 = vmatmul.bf16.vlgmr.msrb.gmra.mxu3 %v1945_v58  ;;  %2576 = vmatmul.msk.bf16.vlgmr.msrb.gmra.mxu2 %vm181_vm0, %v1947_v15  ;;  %1995 = vst [vmem:[#allocation1] ss:$9 sm:$0xff] %v2577_v23 }
 0x4fd   :  { %2089 = vmatpush.bf16.msrb.mxu3 %v3721_v63  ;;  %2139 = vmatpush.bf16.msrb.mxu2 %v3721_v63 }
 0x500   :  { %v1862_v20 = vpop.f32.mrf.mxu2 }
 0x501   :  { %2090 = vmatpush.bf16.msrb.mxu3 %v3698_v32  ;;  %2140 = vmatpush.bf16.msrb.mxu2 %v3698_v32 }
 0x503   :  { %v1997_v0 = vld [vmem:[#allocation1 + $0x9] sm:$0xff]  ;;  %v1998_v2 = vld [vmem:[#allocation1 + $0x12] sm:$0xff]  ;;  %v1996_v27 = vld [vmem:[#allocation1] sm:$0xff] }
 0x504   :  { %1973 = vmatmul.bf16.vlgmr.msra.gmra.mxu1 %v1946_v18  ;;  %2081 = vst [vmem:[#allocation1] ss:$9 sm:$0xff] %v2588_v55  ;;  %v2590_v18 = vld [vmem:[%s4115_s0 + $0x63] sm:$0x7] }
 0x505   :  { %2091 = vmatpush.bf16.msrb.mxu3 %v3733_v61  ;;  %2141 = vmatpush.bf16.msrb.mxu2 %v3733_v61 }
 0x509   :  { %2092 = vmatpush.bf16.msrb.mxu3 %v3747_v1  ;;  %2142 = vmatpush.bf16.msrb.mxu2 %v3747_v1 }
 0x50b   :  { %v2083_v22 = vld [vmem:[#allocation1 + $0x9] sm:$0xff]  ;;  %v2082_v15 = vld [vmem:[#allocation1] sm:$0xff] }
 0x50c   :  { %2024 = vmatmul.bf16.vlgmr.msra.gmra.mxu2 %v1997_v0  ;;  %2578 = vmatmul.msk.bf16.vlgmr.msra.gmra.mxu3 %vm181_vm0, %v1998_v2 }
 0x50d   :  { %2093 = vmatpush.bf16.msrb.mxu3 %v3760_v8  ;;  %2143 = vmatpush.bf16.msrb.mxu2 %v3760_v8 }
 0x511   :  { %2094 = vmatpush.bf16.msrb.mxu3 %v3767_v10  ;;  %2144 = vmatpush.bf16.msrb.mxu2 %v3767_v10 }
 0x512   :  { %v1774_v3 = vpop.f32.mrf.mxu3 }
 0x513   :  { %v1788_v44 = vadd.f32 %v1787_v37, %v1774_v3 }
 0x515   :  { %v1801_v51 = vadd.f32 %v1800_v21, %v1788_v44  ;;  %2095 = vmatpush.bf16.msrb.mxu3 %v3774_v11  ;;  %2145 = vmatpush.bf16.msrb.mxu2 %v3774_v11  ;;  %v2580_v44 = vld [vmem:[%s4118_s3 + $0x1c8] sm:$0xff] }
 0x517   :  { %v1804_v56 = vmax.f32 %v1753_v46, %v1801_v51 }
 0x519   :  { %v1805_v59 = vadd.f32 %v3569_v50, %v1804_v56  ;;  %2096 = vmatpush.bf16.msrb.mxu3 %v3781_v16  ;;  %2146 = vmatpush.bf16.msrb.mxu2 %v3781_v16  ;;  %v2579_v56 = vld [vmem:[%s4118_s3 + $0x1c0] sm:$0xff] }
 0x51a   :  { %v1776_v4 = vpop.f32.mrf.mxu3 }
 0x51b   :  { %v1806_v19 = vmax.f32 %v1805_v59, 0.0  ;;  %v1936_v45 = vpop.f32.mrf.mxu2  ;;  %v2084_v4 = vld [vmem:[#allocation1 + $0x12] sm:$0xff] }
 0x51c   :  { %2097 = vmatmul.bf16.vlgmr.msrb.gmra.mxu3 %v2082_v15  ;;  %2131 = vst [vmem:[#allocation1] ss:$9 sm:$0xff] %v2590_v18  ;;  %v2327_v15 = vld [vmem:[%s4120_s5 + $0x28] sm:$0xff]  ;;  %v2325_v18 = vld [vmem:[%s4120_s5 + $0x18] sm:$0xff] }
 0x51d   :  { %2570 = vmatmul.msk.f32.vlgmr.msra.gmra.mxu0 %vm603_vm1, %v1806_v19  ;;  %2171 = vmatpush.bf16.msra.mxu3 %v3741_v9 }
 0x51e   :  { %1914 = vmatpush.bf16.msra.mxu0 %v3787_v24  ;;  %2203 = vmatpush.bf16.msra.mxu2 %v3787_v24 }
 0x521   :  { %2172 = vmatpush.bf16.msra.mxu3 %v3754_v7 }
 0x522   :  { %1915 = vmatpush.bf16.msra.mxu0 %v3794_v25  ;;  %2204 = vmatpush.bf16.msra.mxu2 %v3794_v25 }
 0x523   :  { %v1938_v17 = vpop.f32.mrf.mxu2  ;;  %v2132_v0 = vld [vmem:[#allocation1] sm:$0xff]  ;;  %v2134_v2 = vld [vmem:[#allocation1 + $0x12] sm:$0xff]  ;;  %v2133_v55 = vld [vmem:[#allocation1 + $0x9] sm:$0xff] }
 0x524   :  { %2147 = vmatmul.bf16.vlgmr.msrb.gmra.mxu2 %v2132_v0 }
 0x525   :  { %2572 = vmatmul.msk.bf16.vlgmr.msrb.gmra.mxu0 %vm181_vm0, %v1846_v57  ;;  %v2584_v57 = vld [vmem:[%s4118_s3 + $0x1e8] sm:$0xff]  ;;  %2222 = vmatpush.bf16.msrb.mxu3 %v3741_v9 }
 0x526   :  { %1916 = vmatpush.bf16.msra.mxu0 %v3802_v33  ;;  %2205 = vmatpush.bf16.msra.mxu2 %v3802_v33 }
 0x527   :  { %2067 = vmatpush.msrb.mxu1 %v2584_v57 }
 0x529   :  { %2068 = vmatpush.msrb.mxu1 %v2583_v42  ;;  %2223 = vmatpush.bf16.msrb.mxu3 %v3754_v7 }
 0x52a   :  { %1917 = vmatpush.bf16.msra.mxu0 %v3809_v39  ;;  %2206 = vmatpush.bf16.msra.mxu2 %v3809_v39 }
 0x52b   :  { %2069 = vmatpush.msrb.mxu1 %v2582_v48  ;;  %v2600_v48 = vld [vmem:[%s4118_s3 + $0x220] sm:$0xff] }
 0x52c   :  { %2591 = vmatmul.msk.bf16.vlgmr.msra.gmra.mxu3 %vm181_vm0, %v2134_v2 }
 0x52d   :  { %2070 = vmatpush.msrb.mxu1 %v2581_v6  ;;  %2254 = vmatpush.bf16.msra.mxu3 %v3787_v24  ;;  %v2598_v6 = vld [vmem:[%s4118_s3 + $0x210] sm:$0xff] }
 0x52e   :  { %1918 = vmatpush.bf16.msra.mxu0 %v3816_v30  ;;  %2207 = vmatpush.bf16.msra.mxu2 %v3816_v30 }
 0x52f   :  { %2071 = vmatpush.msrb.mxu1 %v2580_v44 }
 0x531   :  { %2072 = vmatpush.msrb.mxu1 %v2579_v56  ;;  %2255 = vmatpush.bf16.msra.mxu3 %v3794_v25  ;;  %v2596_v56 = vld [vmem:[%s4118_s3 + $0x200] sm:$0xff] }
 0x532   :  { %1919 = vmatpush.bf16.msra.mxu0 %v3823_v47  ;;  %2208 = vmatpush.bf16.msra.mxu2 %v3823_v47  ;;  %v1873_v31 = vpop.f32.mrf.mxu3 }
 0x533   :  { %v1874_v37 = vadd.f32 %v1873_v31, %v1860_v13  ;;  %2121 = vmatpush.bf16.msra.mxu1 %v3741_v9 }
 0x535   :  { %2256 = vmatpush.bf16.msra.mxu3 %v3802_v33 }
 0x536   :  { %1920 = vmatpush.bf16.msra.mxu0 %v3830_v40  ;;  %2209 = vmatpush.bf16.msra.mxu2 %v3830_v40 }
 0x537   :  { %2122 = vmatpush.bf16.msra.mxu1 %v3754_v7 }
 0x539   :  { %2257 = vmatpush.bf16.msra.mxu3 %v3809_v39 }
 0x53a   :  { %1921 = vmatpush.bf16.msra.mxu0 %v3837_v41  ;;  %2210 = vmatpush.bf16.msra.mxu2 %v3837_v41  ;;  %v1875_v5 = vpop.f32.mrf.mxu3 }
 0x53d   :  { %1922 = vmatmul.bf16.vlgmr.msra.gmra.mxu0 %v1895_v52  ;;  %2258 = vmatpush.bf16.msra.mxu3 %v3816_v30 }
 0x53e   :  { %2003 = vmatpush.bf16.msrb.mxu0 %v3721_v63 }
 0x541   :  { %2259 = vmatpush.bf16.msra.mxu3 %v3823_v47 }
 0x542   :  { %2004 = vmatpush.bf16.msrb.mxu0 %v3698_v32 }
 0x545   :  { %2260 = vmatpush.bf16.msra.mxu3 %v3830_v40 }
 0x546   :  { %2005 = vmatpush.bf16.msrb.mxu0 %v3733_v61 }
 0x549   :  { %2261 = vmatpush.bf16.msra.mxu3 %v3837_v41 }
 0x54a   :  { %2006 = vmatpush.bf16.msrb.mxu0 %v3747_v1 }
 0x54e   :  { %2007 = vmatpush.bf16.msrb.mxu0 %v3760_v8 }
 0x552   :  { %2008 = vmatpush.bf16.msrb.mxu0 %v3767_v10 }
 0x556   :  { %2009 = vmatpush.bf16.msrb.mxu0 %v3774_v11 }
 0x55a   :  { %2010 = vmatpush.bf16.msrb.mxu0 %v3781_v16 }
 0x55d   :  { %2011 = vmatmul.bf16.vlgmr.msrb.gmra.mxu0 %v1996_v27 }
 0x55e   :  { %2102 = vmatpush.bf16.msra.mxu0 %v3787_v24 }
 0x562   :  { %2103 = vmatpush.bf16.msra.mxu0 %v3794_v25 }
 0x566   :  { %2104 = vmatpush.bf16.msra.mxu0 %v3802_v33 }
 0x56a   :  { %2105 = vmatpush.bf16.msra.mxu0 %v3809_v39 }
 0x56e   :  { %2106 = vmatpush.bf16.msra.mxu0 %v3816_v30 }
 0x571   :  { %v1910_v21 = vpop.f32.mrf.mxu1 }
 0x572   :  { %2107 = vmatpush.bf16.msra.mxu0 %v3823_v47 }
 0x576   :  { %2108 = vmatpush.bf16.msra.mxu0 %v3830_v40 }
 0x579   :  { %v1912_v12 = vpop.f32.mrf.mxu1 }
 0x57a   :  { %2109 = vmatpush.bf16.msra.mxu0 %v3837_v41 }
 0x57d   :  { %2110 = vmatmul.bf16.vlgmr.msra.gmra.mxu0 %v2083_v22 }
 0x57e   :  { %2190 = vmatpush.bf16.msrb.mxu0 %v3721_v63 }
 0x57f   :  { %v1961_v29 = vpop.f32.mrf.mxu3  ;;  %v1987_v35 = vpop.f32.mrf.mxu2 }
 0x581   :  { %v1974_v34 = vpop.f32.mrf.mxu1 }
 0x582   :  { %2191 = vmatpush.bf16.msrb.mxu0 %v3698_v32  ;;  %v1975_v27 = vadd.f32 %v1974_v34, %v1961_v29 }
 0x584   :  { %v1988_v22 = vadd.f32 %v1987_v35, %v1975_v27 }
 0x586   :  { %2192 = vmatpush.bf16.msrb.mxu0 %v3733_v61 }
 0x587   :  { %v1963_v53 = vpop.f32.mrf.mxu3  ;;  %v1989_v26 = vpop.f32.mrf.mxu2 }
 0x58a   :  { %2193 = vmatpush.bf16.msrb.mxu0 %v3747_v1 }
 0x58e   :  { %2194 = vmatpush.bf16.msrb.mxu0 %v3760_v8 }
 0x58f   :  { %v2025_v52 = vpop.f32.mrf.mxu2  ;;  %v2038_v54 = vpop.f32.mrf.mxu3 }
 0x592   :  { %2195 = vmatpush.bf16.msrb.mxu0 %v3767_v10 }
 0x596   :  { %2196 = vmatpush.bf16.msrb.mxu0 %v3774_v11 }
 0x597   :  { %v2027_v62 = vpop.f32.mrf.mxu2  ;;  %v2040_v3 = vpop.f32.mrf.mxu3 }
 0x59a   :  { %2197 = vmatpush.bf16.msrb.mxu0 %v3781_v16  ;;  %v1836_v28 = vpop.f32.mrf.mxu0 }
 0x59b   :  { %v3977_v38 = vadd.f32 %v1836_v28, %v3855_v60  ;;  %v1976_v60 = vpop.f32.mrf.mxu1 }
 0x59e   :  { %2273 = vmatpush.bf16.msra.mxu0 %v3741_v9  ;;  %v2592_v9 = vld [vmem:[%s4115_s0 + $0x66] sm:$0x7] }
 0x59f   :  { %2182 = vst [vmem:[#allocation1] ss:$9 sm:$0xff] %v2592_v9 }
 0x5a2   :  { %2274 = vmatpush.bf16.msra.mxu0 %v3754_v7  ;;  %v1886_v36 = vpop.f32.mrf.mxu0 }
 0x5a3   :  { %v1887_v58 = vadd.f32 %v1886_v36, %v1874_v37  ;;  %v2602_v36 = vld [vmem:[%s4118_s3 + $0x230] sm:$0xff] }
 0x5a6   :  { %v2185_v12 = vld [vmem:[#allocation1 + $0x12] sm:$0xff]  ;;  %v2183_v28 = vld [vmem:[#allocation1] sm:$0xff] }
 0x5a7   :  { %2593 = vmatmul.msk.bf16.vlgmr.msrb.gmra.mxu3 %vm181_vm0, %v2185_v12  ;;  %2198 = vmatmul.bf16.vlgmr.msrb.gmra.mxu0 %v2183_v28 }
 0x5aa   :  { %v1888_v49 = vpop.f32.mrf.mxu0 }
 0x5ba   :  { %v1923_v46 = vpop.f32.mrf.mxu0 }
 0x5bb   :  { %v1924_v51 = vadd.f32 %v1923_v46, %v1910_v21  ;;  %v2184_v21 = vld [vmem:[#allocation1 + $0x9] sm:$0xff] }
 0x5bc   :  { %2211 = vmatmul.bf16.vlgmr.msra.gmra.mxu2 %v2184_v21  ;;  %v2597_v46 = vld [vmem:[%s4118_s3 + $0x208] sm:$0xff] }
 0x5bd   :  { %v1937_v59 = vadd.f32 %v1936_v45, %v1924_v51  ;;  %v2323_v21 = vld [vmem:[%s4120_s5 + $0x8] sm:$0xff] }
 0x5bf   :  { %v1940_v19 = vmax.f32 %v1887_v58, %v1937_v59  ;;  %v2329_v59 = vld [vmem:[%s4120_s5 + $0x38] sm:$0xff] }
 0x5c0   :  { %2345 = vmatpush.msrb.mxu0 %v2329_v59 }
 0x5c1   :  { %v1991_v7 = vmax.f32 %v1940_v19, %v1988_v22  ;;  %v2326_v19 = vld [vmem:[%s4120_s5 + $0x20] sm:$0xff] }
 0x5c2   :  { %v1925_v23 = vpop.f32.mrf.mxu0 }
 0x5da   :  { %v2012_v13 = vpop.f32.mrf.mxu0 }
 0x5db   :  { %v2026_v20 = vadd.f32 %v2025_v52, %v2012_v13  ;;  %v2669_v13 = vld [vmem:[%s4117_s2] ss:$0 sm:$0xff] }
 0x5dd   :  { %v2039_v31 = vadd.f32 %v2038_v54, %v2026_v20  ;;  %v2599_v54 = vld [vmem:[%s4118_s3 + $0x218] sm:$0xff] }
 0x5df   :  { %v2042_v37 = vmax.f32 %v1991_v7, %v2039_v31 }
 0x5e1   :  { %v2043_v45 = vadd.f32 %v3569_v50, %v2042_v37  ;;  %v2594_v50 = vld [vmem:[%s4115_s0 + $0x69] sm:$0x7]  ;;  %v2324_v37 = vld [vmem:[%s4120_s5 + $0x10] sm:$0xff] }
 0x5e2   :  { %v2014_v5 = vpop.f32.mrf.mxu0  ;;  %2233 = vst [vmem:[#allocation1] ss:$9 sm:$0xff] %v2594_v50 }
 0x5e3   :  { %v2044_v17 = vmax.f32 %v2043_v45, 0.0  ;;  %v2322_v45 = vld [vmem:[%s4120_s5] sm:$0xff] }
 0x5e4   :  { %v2626_v5 = vld [vmem:[%s4119_s4] ss:$0 sm:$0xff]  ;;  %s2696_s4 = smov [#allocation2]  }
 0x5e5   :  { %2587 = vmatmul.msk.f32.vlgmr.msrb.gmra.mxu1 %vm603_vm1, %v2044_v17 }
 0x5e6   :  { %2152 = vmatpush.bf16.msrb.mxu1 %v3787_v24 }
 0x5e9   :  { %v2235_v24 = vld [vmem:[#allocation1 + $0x9] sm:$0xff] }
 0x5ea   :  { %2153 = vmatpush.bf16.msrb.mxu1 %v3794_v25  ;;  %2262 = vmatmul.bf16.vlgmr.msra.gmra.mxu3 %v2235_v24  ;;  %v2236_v25 = vld [vmem:[#allocation1 + $0x12] sm:$0xff]  ;;  %v2627_v24 = vld [vmem:[%s4121_s6] ss:$0 sm:$0xff] }
 0x5eb   :  { %2595 = vmatmul.msk.bf16.vlgmr.msra.gmra.mxu0 %vm181_vm0, %v2236_v25 }
 0x5ed   :  { %2589 = vmatmul.msk.bf16.vlgmr.msra.gmra.mxu1 %vm181_vm0, %v2084_v4  ;;  %v2328_v4 = vld [vmem:[%s4120_s5 + $0x30] sm:$0xff]  ;;  %s2378_s5 = sshll.u32 %s2696_s4, 4  ;;  %s2379_s5 = int_to_ptr.vmem [resolvable:$true] %s2378_s5 }
 0x5ee   :  { %2154 = vmatpush.bf16.msrb.mxu1 %v3802_v33  ;;  %v2234_v33 = vld [vmem:[#allocation1] sm:$0xff]  ;;  %2346 = vmatpush.msrb.mxu0 %v2328_v4 }
 0x5f0   :  { %2347 = vmatpush.msrb.mxu0 %v2327_v15 }
 0x5f2   :  { %2155 = vmatpush.bf16.msrb.mxu1 %v3809_v39  ;;  %2348 = vmatpush.msrb.mxu0 %v2326_v19 }
 0x5f4   :  { %2349 = vmatpush.msrb.mxu0 %v2325_v18 }
 0x5f6   :  { %2156 = vmatpush.bf16.msrb.mxu1 %v3816_v30  ;;  %v2098_v30 = vpop.f32.mrf.mxu3  ;;  %2350 = vmatpush.msrb.mxu0 %v2324_v37 }
 0x5f8   :  { %2351 = vmatpush.msrb.mxu0 %v2323_v21 }
 0x5fa   :  { %2157 = vmatpush.bf16.msrb.mxu1 %v3823_v47  ;;  %v2111_v39 = vpop.f32.mrf.mxu0  ;;  %2352 = vmatpush.msrb.mxu0 %v2322_v45 }
 0x5fe   :  { %2158 = vmatpush.bf16.msrb.mxu1 %v3830_v40  ;;  %v2100_v40 = vpop.f32.mrf.mxu3 }
 0x602   :  { %2159 = vmatpush.bf16.msrb.mxu1 %v3837_v41  ;;  %v2113_v47 = vpop.f32.mrf.mxu0 }
 0x605   :  { %2160 = vmatmul.bf16.vlgmr.msrb.gmra.mxu1 %v2133_v55 }
 0x606   :  { %2241 = vmatpush.bf16.msra.mxu1 %v3721_v63  ;;  %v2112_v63 = vadd.f32 %v2111_v39, %v2098_v30  ;;  %v2174_v41 = vpop.f32.mrf.mxu3 }
 0x60a   :  { %2242 = vmatpush.bf16.msra.mxu1 %v3698_v32  ;;  %v2148_v32 = vpop.f32.mrf.mxu2 }
 0x60e   :  { %2243 = vmatpush.bf16.msra.mxu1 %v3733_v61  ;;  %v2176_v29 = vpop.f32.mrf.mxu3 }
 0x612   :  { %2244 = vmatpush.bf16.msra.mxu1 %v3747_v1  ;;  %v2150_v61 = vpop.f32.mrf.mxu2 }
 0x616   :  { %2245 = vmatpush.bf16.msra.mxu1 %v3760_v8 }
 0x61a   :  { %2246 = vmatpush.bf16.msra.mxu1 %v3767_v10 }
 0x61e   :  { %2247 = vmatpush.bf16.msra.mxu1 %v3774_v11 }
 0x622   :  { %2248 = vmatpush.bf16.msra.mxu1 %v3781_v16  ;;  %v2603_v16 = vld [vmem:[%s4118_s3 + $0x238] sm:$0xff] }
 0x623   :  { %2303 = vmatpush.msrb.mxu2 %v2603_v16 }
 0x624   :  { %v2199_v10 = vpop.f32.mrf.mxu0 }
 0x625   :  { %2249 = vmatmul.bf16.vlgmr.msra.gmra.mxu1 %v2234_v33  ;;  %2304 = vmatpush.msrb.mxu2 %v2602_v36 }
 0x62a   :  { %v2225_v11 = vpop.f32.mrf.mxu3 }
 0x62c   :  { %v2201_v14 = vpop.f32.mrf.mxu0 }
 0x632   :  { %v2227_v53 = vpop.f32.mrf.mxu3 }
 0x63f   :  { %v2212_v34 = vpop.f32.mrf.mxu2 }
 0x640   :  { %v2213_v23 = vadd.f32 %v2212_v34, %v2199_v10 }
 0x642   :  { %v2226_v0 = vadd.f32 %v2225_v11, %v2213_v23 }
 0x647   :  { %v2214_v43 = vpop.f32.mrf.mxu2 }
 0x662   :  { %v2074_v1 = vpop.f32.mrf.mxu1 }
 0x663   :  { %v4047_v8 = vadd.f32 %v2074_v1, %v3977_v38  ;;  %v2601_v38 = vld [vmem:[%s4118_s3 + $0x228] sm:$0xff] }
 0x664   :  { %2305 = vmatpush.msrb.mxu2 %v2601_v38 }
 0x666   :  { %2306 = vmatpush.msrb.mxu2 %v2600_v48 }
 0x668   :  { %v2276_v26 = vpop.f32.mrf.mxu0  ;;  %2307 = vmatpush.msrb.mxu2 %v2599_v54 }
 0x66a   :  { %v2124_v35 = vpop.f32.mrf.mxu1  ;;  %2308 = vmatpush.msrb.mxu2 %v2598_v6 }
 0x66b   :  { %v2125_v3 = vadd.f32 %v2124_v35, %v2112_v63 }
 0x66c   :  { %2309 = vmatpush.msrb.mxu2 %v2597_v46 }
 0x66d   :  { %v2263_v60 = vpop.f32.mrf.mxu3 }
 0x66e   :  { %2310 = vmatpush.msrb.mxu2 %v2596_v56 }
 0x670   :  { %v2278_v49 = vpop.f32.mrf.mxu0 }
 0x672   :  { %v2126_v57 = vpop.f32.mrf.mxu1 }
 0x675   :  { %v2265_v42 = vpop.f32.mrf.mxu3 }
 0x682   :  { %v2161_v52 = vpop.f32.mrf.mxu1 }
 0x683   :  { %v2162_v62 = vadd.f32 %v2161_v52, %v2148_v32 }
 0x685   :  { %v2175_v44 = vadd.f32 %v2174_v41, %v2162_v62 }
 0x687   :  { %v2178_v51 = vmax.f32 %v2125_v3, %v2175_v44 }
 0x689   :  { %v2229_v55 = vmax.f32 %v2178_v51, %v2226_v0 }
 0x68a   :  { %v2163_v58 = vpop.f32.mrf.mxu1 }
 0x6a2   :  { %v2250_v2 = vpop.f32.mrf.mxu1 }
 0x6a3   :  { %v2264_v27 = vadd.f32 %v2263_v60, %v2250_v2 }
 0x6a5   :  { %v2277_v9 = vadd.f32 %v2276_v26, %v2264_v27 }
 0x6a7   :  { %v2280_v22 = vmax.f32 %v2229_v55, %v2277_v9 }
 0x6a9   :  { %v2281_v20 = vadd.f32 %v2669_v13, %v2280_v22 }
 0x6aa   :  { %v2252_v7 = vpop.f32.mrf.mxu1 }
 0x6ab   :  { %v2282_v31 = vmax.f32 %v2281_v20, 0.0 }
 0x6ad   :  { %2604 = vmatmul.msk.f32.vlgmr.msrb.gmra.mxu2 %vm603_vm1, %v2282_v31 }
 0x730   :  { %v2312_v12 = vpop.f32.mrf.mxu2 }
 0x731   :  { %v2315_v17 = vadd.f32 %v2312_v12, %v4047_v8 }
 0x733   :  { %v2320_v28 = vadd.f32 %v2626_v5, %v2315_v17 }
 0x735   :  { %v2321_v50 = vmax.f32 %v2320_v28, 0.0 }
 0x737   :  { %2605 = vmatmul.msk.f32.vlgmr.msrb.gmra.mxu0 %vm603_vm1, %v2321_v50 }
 0x7b4   :  { %v2354_v25 = vpop.f32.mrf.mxu0 }
 0x7b5   :  { %v2355_v33 = vadd.f32 %v2627_v24, %v2354_v25 }
 0x7b7   :  { %v2357_v39 = vmax.f32 %v2355_v33, 0.0 }
 0x7b9   :  { %v2359_v30 = vsel %vm2358_vm2, %v2357_v39, -inf }
 0x7ba   :  { %2360 = vmax.xlane.f32.xlu0 %v2359_v30 }
 0x82d   :  { %v2361_v63 = vpop.xlane.xlu0 %2360 }
 0x82e   :  { %v2362_v47 = vsub.f32 %v2357_v39, %v2361_v63 }
 0x830   :  { %v2363_v40 = vmul.f32 1.442695, %v2362_v47 }
 0x832   :  { %2628 = vpow2.f32 %v2363_v40 }
 0x838   :  { %v2629_v32 = vpop.eup %2628 }
 0x839   :  { %v2365_v41 = vsel %vm2358_vm2, %v2629_v32, 0.0 }
 0x83a   :  { %2366 = vadd.xlane.f32.xlu0 %v2365_v41 }
 0x8ad   :  { %v2367_v61 = vpop.xlane.xlu0 %2366 }
 0x8ae   :  { %2630 = vlog2.f32 %v2367_v61 }
 0x8b4   :  { %v2631_v29 = vpop.eup %2630 }
 0x8b5   :  { %v2369_v1 = vmul.f32 0.6931472, %v2631_v29 }
 0x8b7   :  { %v2370_v8 = vadd.f32 %v2369_v1, %v2361_v63 }
 0x8b9   :  { %v2371_v10 = vsub.f32 %v2357_v39, %v2370_v8 }
 0x8bb   :  { %2372 = vst.msk [vmem:[#allocation2] sm:$0x3] %vm2358_vm2, %v2371_v10 }
 0x8bc   :  { %2383 = dma.vmem_to_hbm [thread:$0]  %s2379_s5, 32, %s2381_s22, [#allocation3]  }
 0x8bd   :  { %2694 = dma.done.wait [#allocation3], 32  }
 0x8be   :  { %2695 = vsyncadd [#allocation3], 4294967264 }
 0x8bf   :  { %2388 = vsyncpa [#allocation3], 1 }

</bundles_post_ra>
